<compile_context>
chip_gen: v7x
topology: tpu7x:2x2x1
jax: 0.10.0
libtpu: 0.0.40
codegen_flags: <defaults>
</compile_context>

<pallas_src>
import jax
import jax.numpy as jnp
from jax import lax
from jax.experimental import pallas as pl
from jax.experimental.pallas import tpu as pltpu

LEAKY_SLOPE = 0.01   # nn.LeakyReLU default
BN_EPS = 1e-5        # nn.BatchNorm1d default

# ---------------------------------------------------------------------------
# Fixed problem geometry (the torch module requires batch 16; L=990 is the
# smallest input giving the canonical 128*12 flatten).
# ---------------------------------------------------------------------------
N_BATCH = 16
L_IN = 990

# Conv stage configs: (C_in, C_out, K, pool, g)   [g = pooled outputs per row]
_CONV_CFG = [
    (1, 32, 300, 6, 4),     # s = g*pool = 24, Q = 14, frame feat 336 -> pad 384, cols 768
    (32, 64, 60, 2, 2),     # s = 4,  Q = 16, frame feat 2048,            cols 256
    (64, 128, 5, 2, 1),     # s = 2,  Q = 3,  frame feat 384,             cols 256
]
_CONV_ROWPAD = [384, 2048, 384]   # K-dim padding of the Toeplitz weights

S1, Q1, LB1, T1, F1 = 24, 14, 42, 29, 384    # conv1: 42 input blocks of 24, 29 output rows/batch
Q2, T2 = 16, 14                              # conv2: 16 frame taps, 14 output rows/batch
Q3, T3 = 3, 12                               # conv3: 3 frame taps, 12 output rows/batch


def _leaky_relu(y):
    return jnp.where(y >= 0, y, LEAKY_SLOPE * y)


# ---------------------------------------------------------------------------
# The single fused kernel.
# Row layout of every activation scratch: row = t * N_BATCH + n (t-major),
# lanes = (local pooled offset) * C_out + channel  -> always exactly 128 lanes.
# ---------------------------------------------------------------------------
def _fused_kernel(f1_ref, w1_ref, b1_ref, w2_ref, b2_ref, w3_ref, b3_ref,
                  wf1_ref, bf1_ref, wf2_ref, bf2_ref, wo_ref, bo_ref,
                  out_ref, h1_ref, f2_ref, h2_ref, h3_ref):
    n = N_BATCH

    # ---- stage 1: conv1 + BN + LeakyReLU + AvgPool(6) (one (464,384)x(384,768) matmul)
    y = jnp.dot(f1_ref[...], w1_ref[...], preferred_element_type=jnp.float32)
    y = _leaky_relu(y + b1_ref[...])                       # (464, 768)
    acc = y[:, 0:128]
    for p in range(1, 6):                                  # pool partners 128 lanes apart
        acc = acc + y[:, p * 128:(p + 1) * 128]
    h1_ref[...] = acc.astype(jnp.bfloat16)                 # (T1*N, 128)

    # ---- stage 2: build frames in VMEM (128-lane aligned copies), one matmul
    r2 = T2 * n
    for q in range(Q2):
        f2_ref[:, q * 128:(q + 1) * 128] = h1_ref[q * n:q * n + r2, :]
    y = jnp.dot(f2_ref[...], w2_ref[...], preferred_element_type=jnp.float32)
    y = _leaky_relu(y + b2_ref[...])                       # (224, 256)
    h2_ref[...] = (y[:, 0:128] + y[:, 128:256]).astype(jnp.bfloat16)   # (T2*N, 128)

    # ---- stage 3: only 3 taps -> accumulate 3 dots directly (no frame scratch)
    r3 = T3 * n
    y = jnp.dot(h2_ref[0:r3, :], w3_ref[0:128, :], preferred_element_type=jnp.float32)
    y = y + jnp.dot(h2_ref[n:n + r3, :], w3_ref[128:256, :],
                    preferred_element_type=jnp.float32)
    y = y + jnp.dot(h2_ref[2 * n:2 * n + r3, :], w3_ref[256:384, :],
                    preferred_element_type=jnp.float32)
    y = _leaky_relu(y + b3_ref[...])                       # (192, 256)
    h3_ref[...] = (y[:, 0:128] + y[:, 128:256]).astype(jnp.bfloat16)   # (T3*N, 128)

    # ---- FC head: fc1 (torch channel-major flatten folded into the weight),
    #      fc2, out -- all bf16 weights, f32 accumulation, 128-lane final store.
    acc = jnp.dot(h3_ref[0:n, :], wf1_ref[0:128, :], preferred_element_type=jnp.float32)
    for t in range(1, T3):
        acc = acc + jnp.dot(h3_ref[t * n:(t + 1) * n, :],
                            wf1_ref[t * 128:(t + 1) * 128, :],
                            preferred_element_type=jnp.float32)
    h = _leaky_relu(acc + bf1_ref[...]).astype(jnp.bfloat16)           # (16, 128)
    h = _leaky_relu(jnp.dot(h, wf2_ref[...], preferred_element_type=jnp.float32)
                    + bf2_ref[...]).astype(jnp.bfloat16)               # (16, 64)
    out_ref[...] = (jnp.dot(h, wo_ref[...], preferred_element_type=jnp.float32)
                    + bo_ref[...])                                     # (16, 128)


def _vspec(shape):
    return pl.BlockSpec(shape, lambda i: (0, 0))


# ---------------------------------------------------------------------------
# Parameter folding.
# Block-Toeplitz weight:  row = m*C_in + c   (m = frame time offset, < Q*s)
#                         col = p*(g*C_out) + gg*C_out + co   (u = gg*pool + p)
#   W[row, col] = w[co, c, m-u] * (gamma/sqrt(rv+eps)) / pool    if 0 <= m-u < K
# Folding the positive BN scale and 1/pool *before* LeakyReLU is exact because
# LeakyReLU(a*x) = a*LeakyReLU(x) for a > 0 (gamma is initialised > 0 here).
# ---------------------------------------------------------------------------
def _conv_stage_params(w, b, gamma, beta, rmean, rvar, pool, g, rows_pad):
    c_out, c_in, k = w.shape
    scale = gamma / jnp.sqrt(rvar + BN_EPS)
    shift = (b - rmean) * scale + beta
    s = g * pool
    q_cnt = (k + s - 2) // s + 1
    f_len = q_cnt * s
    m = jnp.arange(f_len)
    u = (jnp.arange(g) * pool)[:, None] + jnp.arange(pool)[None, :]        # (g, pool)
    kk = m[:, None, None] - u[None, :, :]                                  # (F, g, pool)
    valid = (kk >= 0) & (kk < k)
    wt = jnp.transpose(w, (2, 1, 0))                                       # (k, c_in, c_out)
    vals = wt[jnp.clip(kk, 0, k - 1)]                                      # (F, g, pool, c_in, c_out)
    vals = jnp.where(valid[..., None, None], vals, 0.0)
    vals = vals * (scale / pool)[None, None, None, None, :]
    wtp = jnp.transpose(vals, (0, 3, 2, 1, 4)).reshape(f_len * c_in, s * c_out)
    if rows_pad > f_len * c_in:
        wtp = jnp.pad(wtp, ((0, rows_pad - f_len * c_in), (0, 0)))
    bias = jnp.tile(shift / pool, s).reshape(1, s * c_out)
    return wtp.astype(jnp.bfloat16), bias.astype(jnp.float32)


def init_params(key):
    ks = iter(jax.random.split(key, 40))
    raw, p = {}, {}

    for si, (c_in, c_out, k, pool, g) in enumerate(_CONV_CFG, start=1):
        w = jax.random.normal(next(ks), (c_out, c_in, k), jnp.float32) * 0.02
        b = jax.random.normal(next(ks), (c_out,), jnp.float32) * 0.01
        gm = jax.random.uniform(next(ks), (c_out,), jnp.float32, minval=0.5, maxval=1.5)
        bt = jax.random.normal(next(ks), (c_out,), jnp.float32) * 0.1
        rm = jax.random.normal(next(ks), (c_out,), jnp.float32) * 0.1
        rv = jax.random.uniform(next(ks), (c_out,), jnp.float32, minval=0.5, maxval=1.5)
        raw[f"conv{si}"] = (w, b, gm, bt, rm, rv, pool)
        p[f"c{si}_w"], p[f"c{si}_b"] = _conv_stage_params(
            w, b, gm, bt, rm, rv, pool, g, _CONV_ROWPAD[si - 1])

    def fc_raw(d_out, d_in, with_bn):
        w = jax.random.normal(next(ks), (d_out, d_in), jnp.float32) / jnp.sqrt(d_in)
        b = jax.random.normal(next(ks), (d_out,), jnp.float32) * 0.01
        bn = None
        if with_bn:  # nn.BatchNorm1d(1): scalar stats / affine (eval mode)
            g_ = jax.random.uniform(next(ks), (), jnp.float32, minval=0.5, maxval=1.5)
            bt_ = jax.random.normal(next(ks), ()) * 0.1
            rm_ = jax.random.normal(next(ks), ()) * 0.1
            rv_ = jax.random.uniform(next(ks), (), jnp.float32, minval=0.5, maxval=1.5)
            bn = (g_, bt_, rm_, rv_)
        return w, b, bn

    def fold_fc(w, b, bn):
        if bn is None:
            s, t = jnp.float32(1.0), b
        else:
            g_, bt_, rm_, rv_ = bn
            s = g_ / jnp.sqrt(rv_ + BN_EPS)
            t = (b - rm_) * s + bt_
        return w.T * s, t

    raw["fc1"] = fc_raw(128, 128 * 12, True)
    raw["fc2"] = fc_raw(64, 128, True)
    raw["out"] = fc_raw(1, 64, False)

    w1f, b1f = fold_fc(*raw["fc1"])                         # (1536, 128), row = c*12 + t
    # Fold the torch channel-major flatten: reorder rows to  t*128 + c.
    w1f = w1f.reshape(128, 12, 128).transpose(1, 0, 2).reshape(12 * 128, 128)
    p["f1_w"] = w1f.astype(jnp.bfloat16)
    p["f1_b"] = b1f.reshape(1, 128).astype(jnp.float32)

    w2f, b2f = fold_fc(*raw["fc2"])
    p["f2_w"] = w2f.astype(jnp.bfloat16)                    # (128, 64)
    p["f2_b"] = b2f.reshape(1, 64).astype(jnp.float32)

    wof, bof = fold_fc(*raw["out"])
    p["o_w"] = jnp.pad(wof, ((0, 0), (0, 127))).astype(jnp.bfloat16)      # lane-dense final store
    p["o_b"] = jnp.pad(bof.reshape(1, 1), ((0, 0), (0, 127))).astype(jnp.float32)
    return p, raw


# ---------------------------------------------------------------------------
# Forward: one tiny wrapper reshape/slice/concat (NO gather) + one pallas_call.
# ---------------------------------------------------------------------------
@jax.jit
def cnn_forward(x_ncl, params):
    n, c, l = x_ncl.shape
    assert n == N_BATCH and c == 1 and l == L_IN, (n, c, l)

    # conv1 frames, t-major rows (t, n): frame element m of row t = x[n, 24t + m].
    x = x_ncl.reshape(n, l).astype(jnp.float32)
    xp = jnp.pad(x, ((0, 0), (0, LB1 * S1 - l)))                    # (16, 1008)
    xb = xp.reshape(n, LB1, S1).transpose(1, 0, 2)                  # (42, 16, 24)
    fr = jnp.concatenate([xb[q:q + T1] for q in range(Q1)], axis=-1)  # (29, 16, 336)
    fr = jnp.pad(fr, ((0, 0), (0, 0), (0, F1 - Q1 * S1)))
    frames1 = fr.reshape(T1 * n, F1).astype(jnp.bfloat16)           # (464, 384)

    out = pl.pallas_call(
        _fused_kernel,
        out_shape=jax.ShapeDtypeStruct((n, 128), jnp.float32),
        grid=(1,),
        in_specs=[
            _vspec((T1 * N_BATCH, F1)),
            _vspec((F1, 768)), _vspec((1, 768)),
            _vspec((Q2 * 128, 256)), _vspec((1, 256)),
            _vspec((384, 256)), _vspec((1, 256)),
            _vspec((12 * 128, 128)), _vspec((1, 128)),
            _vspec((128, 64)), _vspec((1, 64)),
            _vspec((64, 128)), _vspec((1, 128)),
        ],
        out_specs=_vspec((N_BATCH, 128)),
        scratch_shapes=[
            pltpu.VMEM((T1 * N_BATCH, 128), jnp.bfloat16),            # h1
            pltpu.VMEM((T2 * N_BATCH, Q2 * 128), jnp.bfloat16),       # conv2 frames
            pltpu.VMEM((T2 * N_BATCH, 128), jnp.bfloat16),            # h2
            pltpu.VMEM((T3 * N_BATCH, 128), jnp.bfloat16),            # h3
        ],
        compiler_params=pltpu.CompilerParams(
            dimension_semantics=("arbitrary",),
            vmem_limit_bytes=40 * 1024 * 1024),
    )(frames1, params["c1_w"], params["c1_b"], params["c2_w"], params["c2_b"],
      params["c3_w"], params["c3_b"], params["f1_w"], params["f1_b"],
      params["f2_w"], params["f2_b"], params["o_w"], params["o_b"])

    return out[:, :1].reshape(16, n // 16, 1)


# ---------------------------------------------------------------------------
# Pure-JAX f32 reference (straight conv/BN/pool/linear) for correctness check.
# ---------------------------------------------------------------------------
def reference_forward(x_ncl, raw):
    x = x_ncl.astype(jnp.float32)                                   # (N, C, L)
    for i in (1, 2, 3):
        w, b, g, bt, rm, rv, pool = raw[f"conv{i}"]
        y = lax.conv_general_dilated(x, w, (1,), "VALID",
                                     dimension_numbers=("NCH", "OIH", "NCH"))
        y = y + b[None, :, None]
        y = (y - rm[None, :, None]) / jnp.sqrt(rv[None, :, None] + BN_EPS) \
            * g[None, :, None] + bt[None, :, None]
        y = _leaky_relu(y)
        n_, c_, l_ = y.shape
        lp = l_ // pool
        x = y[:, :, :lp * pool].reshape(n_, c_, lp, pool).mean(-1)

    n_ = x.shape[0]
    h = x.reshape(n_, 128 * 12)                                     # channel-major flatten

    def fc(hh, key, act):
        w, b, bn = raw[key]
        y = hh @ w.T + b
        if bn is not None:
            g, bt, rm, rv = bn
            y = (y - rm) / jnp.sqrt(rv + BN_EPS) * g + bt
        return _leaky_relu(y) if act else y

    h = fc(h, "fc1", True)
    h = fc(h, "fc2", True)
    out = fc(h, "out", False)
    return out.reshape(16, n_ // 16, 1)


if __name__ == "__main__":
    key = jax.random.PRNGKey(0)
    k_x, k_p = jax.random.split(key)
    # Smallest shapes consistent with the module: BatchNorm1d(1) after
    # view(16, -1, 128*12) forces batch == 16; L = 990 gives the final conv
    # length of 12 assumed by the flatten.
    x = jax.random.normal(k_x, (N_BATCH, 1, L_IN), jnp.float32)
    params, raw = init_params(k_p)

    out = cnn_forward(x, params)
    jax.block_until_ready(out)

    assert out.shape == (16, 1, 1), out.shape
    assert bool(jnp.all(jnp.isfinite(out)))
    ref = reference_forward(x, raw)
    err = float(jnp.max(jnp.abs(out - ref)))
    assert bool(jnp.allclose(out, ref, rtol=6e-2, atol=6e-2)), err
    print("KERNEL_OK")
</pallas_src>

<mosaic_0001>
module attributes {stable_mosaic.version = 11 : i64} {
  func.func @_fused_kernel(%arg0: i32, %arg1: memref<464x384xbf16, #tpu.memory_space<vmem>>, %arg2: memref<384x768xbf16, #tpu.memory_space<vmem>>, %arg3: memref<1x768xf32, #tpu.memory_space<vmem>>, %arg4: memref<2048x256xbf16, #tpu.memory_space<vmem>>, %arg5: memref<1x256xf32, #tpu.memory_space<vmem>>, %arg6: memref<384x256xbf16, #tpu.memory_space<vmem>>, %arg7: memref<1x256xf32, #tpu.memory_space<vmem>>, %arg8: memref<1536x128xbf16, #tpu.memory_space<vmem>>, %arg9: memref<1x128xf32, #tpu.memory_space<vmem>>, %arg10: memref<128x64xbf16, #tpu.memory_space<vmem>>, %arg11: memref<1x64xf32, #tpu.memory_space<vmem>>, %arg12: memref<64x128xbf16, #tpu.memory_space<vmem>>, %arg13: memref<1x128xf32, #tpu.memory_space<vmem>>, %arg14: memref<16x128xf32, #tpu.memory_space<vmem>>, %arg15: memref<464x128xbf16, #tpu.memory_space<vmem>>, %arg16: memref<224x2048xbf16, #tpu.memory_space<vmem>>, %arg17: memref<224x128xbf16, #tpu.memory_space<vmem>>, %arg18: memref<192x128xbf16, #tpu.memory_space<vmem>>) attributes {dimension_semantics = [#tpu.dimension_semantics<arbitrary>], iteration_bounds = array<i64: 1>, scalar_prefetch = 0 : i64, scratch_operands = 4 : i64, tpu.core_type = #tpu.core_type<tc>, window_params = [{pipeline_mode = #tpu.pipeline_mode<synchronous>, transform_indices = @transform_0, window_bounds = array<i64: 464, 384>}, {pipeline_mode = #tpu.pipeline_mode<synchronous>, transform_indices = @transform_1, window_bounds = array<i64: 384, 768>}, {pipeline_mode = #tpu.pipeline_mode<synchronous>, transform_indices = @transform_2, window_bounds = array<i64: 1, 768>}, {pipeline_mode = #tpu.pipeline_mode<synchronous>, transform_indices = @transform_3, window_bounds = array<i64: 2048, 256>}, {pipeline_mode = #tpu.pipeline_mode<synchronous>, transform_indices = @transform_4, window_bounds = array<i64: 1, 256>}, {pipeline_mode = #tpu.pipeline_mode<synchronous>, transform_indices = @transform_5, window_bounds = array<i64: 384, 256>}, {pipeline_mode = #tpu.pipeline_mode<synchronous>, transform_indices = @transform_6, window_bounds = array<i64: 1, 256>}, {pipeline_mode = #tpu.pipeline_mode<synchronous>, transform_indices = @transform_7, window_bounds = array<i64: 1536, 128>}, {pipeline_mode = #tpu.pipeline_mode<synchronous>, transform_indices = @transform_8, window_bounds = array<i64: 1, 128>}, {pipeline_mode = #tpu.pipeline_mode<synchronous>, transform_indices = @transform_9, window_bounds = array<i64: 128, 64>}, {pipeline_mode = #tpu.pipeline_mode<synchronous>, transform_indices = @transform_10, window_bounds = array<i64: 1, 64>}, {pipeline_mode = #tpu.pipeline_mode<synchronous>, transform_indices = @transform_11, window_bounds = array<i64: 64, 128>}, {pipeline_mode = #tpu.pipeline_mode<synchronous>, transform_indices = @transform_12, window_bounds = array<i64: 1, 128>}, {pipeline_mode = #tpu.pipeline_mode<synchronous>, transform_indices = @transform_13, window_bounds = array<i64: 16, 128>}]} {
    %c0 = arith.constant 0 : index
    %c0_0 = arith.constant 0 : index
    %0 = vector.load %arg1[%c0, %c0_0] : memref<464x384xbf16, #tpu.memory_space<vmem>>, vector<464x384xbf16>
    %c0_1 = arith.constant 0 : index
    %c0_2 = arith.constant 0 : index
    %1 = vector.load %arg2[%c0_1, %c0_2] : memref<384x768xbf16, #tpu.memory_space<vmem>>, vector<384x768xbf16>
    %cst = arith.constant dense<0.000000e+00> : vector<464x768xf32>
    %2 = tpu.matmul %0, %1, %cst {dimension_numbers = #tpu.dot_dimension_numbers<[1], [0], [0], [1], [0, 0, 1, 1], [], []>} : vector<464x384xbf16>, vector<384x768xbf16>, vector<464x768xf32> -> vector<464x768xf32>
    %c0_3 = arith.constant 0 : index
    %c0_4 = arith.constant 0 : index
    %3 = vector.load %arg3[%c0_3, %c0_4] : memref<1x768xf32, #tpu.memory_space<vmem>>, vector<1x768xf32>
    %4 = vector.broadcast %3 : vector<1x768xf32> to vector<464x768xf32>
    %5 = arith.addf %2, %4 : vector<464x768xf32>
    %cst_5 = arith.constant 0.000000e+00 : f32
    %6 = vector.broadcast %cst_5 : f32 to vector<464x768xf32>
    %7 = arith.cmpf oge, %5, %6 : vector<464x768xf32>
    %cst_6 = arith.constant 0.00999999977 : f32
    %8 = vector.broadcast %cst_6 : f32 to vector<464x768xf32>
    %9 = arith.mulf %8, %5 : vector<464x768xf32>
    %10 = arith.select %7, %5, %9 : vector<464x768xi1>, vector<464x768xf32>
    %11 = vector.extract_strided_slice %10 {offsets = [0, 0], sizes = [464, 128], strides = [1, 1]} : vector<464x768xf32> to vector<464x128xf32>
    %12 = vector.extract_strided_slice %10 {offsets = [0, 128], sizes = [464, 128], strides = [1, 1]} : vector<464x768xf32> to vector<464x128xf32>
    %13 = arith.addf %11, %12 : vector<464x128xf32>
    %14 = vector.extract_strided_slice %10 {offsets = [0, 256], sizes = [464, 128], strides = [1, 1]} : vector<464x768xf32> to vector<464x128xf32>
    %15 = arith.addf %13, %14 : vector<464x128xf32>
    %16 = vector.extract_strided_slice %10 {offsets = [0, 384], sizes = [464, 128], strides = [1, 1]} : vector<464x768xf32> to vector<464x128xf32>
    %17 = arith.addf %15, %16 : vector<464x128xf32>
    %18 = vector.extract_strided_slice %10 {offsets = [0, 512], sizes = [464, 128], strides = [1, 1]} : vector<464x768xf32> to vector<464x128xf32>
    %19 = arith.addf %17, %18 : vector<464x128xf32>
    %20 = vector.extract_strided_slice %10 {offsets = [0, 640], sizes = [464, 128], strides = [1, 1]} : vector<464x768xf32> to vector<464x128xf32>
    %21 = arith.addf %19, %20 : vector<464x128xf32>
    %22 = arith.truncf %21 : vector<464x128xf32> to vector<464x128xbf16>
    %c0_7 = arith.constant 0 : index
    %c0_8 = arith.constant 0 : index
    %23 = vector.load %arg15[%c0_7, %c0_8] : memref<464x128xbf16, #tpu.memory_space<vmem>>, vector<464x128xbf16>
    tpu.vector_store %arg15[%c0_7, %c0_8], %22 {strides = array<i32>} : memref<464x128xbf16, #tpu.memory_space<vmem>>, vector<464x128xbf16>,
    %c0_9 = arith.constant 0 : index
    %c0_10 = arith.constant 0 : index
    %24 = vector.load %arg15[%c0_9, %c0_10] : memref<464x128xbf16, #tpu.memory_space<vmem>>, vector<224x128xbf16>
    %c0_11 = arith.constant 0 : index
    %c0_12 = arith.constant 0 : index
    %25 = vector.load %arg16[%c0_11, %c0_12] : memref<224x2048xbf16, #tpu.memory_space<vmem>>, vector<224x128xbf16>
    tpu.vector_store %arg16[%c0_11, %c0_12], %24 {strides = array<i32>} : memref<224x2048xbf16, #tpu.memory_space<vmem>>, vector<224x128xbf16>,
    %c16 = arith.constant 16 : index
    %c0_13 = arith.constant 0 : index
    %26 = vector.load %arg15[%c16, %c0_13] : memref<464x128xbf16, #tpu.memory_space<vmem>>, vector<224x128xbf16>
    %c0_14 = arith.constant 0 : index
    %c128 = arith.constant 128 : index
    %27 = vector.load %arg16[%c0_14, %c128] : memref<224x2048xbf16, #tpu.memory_space<vmem>>, vector<224x128xbf16>
    tpu.vector_store %arg16[%c0_14, %c128], %26 {strides = array<i32>} : memref<224x2048xbf16, #tpu.memory_space<vmem>>, vector<224x128xbf16>,
    %c32 = arith.constant 32 : index
    %c0_15 = arith.constant 0 : index
    %28 = vector.load %arg15[%c32, %c0_15] : memref<464x128xbf16, #tpu.memory_space<vmem>>, vector<224x128xbf16>
    %c0_16 = arith.constant 0 : index
    %c256 = arith.constant 256 : index
    %29 = vector.load %arg16[%c0_16, %c256] : memref<224x2048xbf16, #tpu.memory_space<vmem>>, vector<224x128xbf16>
    tpu.vector_store %arg16[%c0_16, %c256], %28 {strides = array<i32>} : memref<224x2048xbf16, #tpu.memory_space<vmem>>, vector<224x128xbf16>,
    %c48 = arith.constant 48 : index
    %c0_17 = arith.constant 0 : index
    %30 = vector.load %arg15[%c48, %c0_17] : memref<464x128xbf16, #tpu.memory_space<vmem>>, vector<224x128xbf16>
    %c0_18 = arith.constant 0 : index
    %c384 = arith.constant 384 : index
    %31 = vector.load %arg16[%c0_18, %c384] : memref<224x2048xbf16, #tpu.memory_space<vmem>>, vector<224x128xbf16>
    tpu.vector_store %arg16[%c0_18, %c384], %30 {strides = array<i32>} : memref<224x2048xbf16, #tpu.memory_space<vmem>>, vector<224x128xbf16>,
    %c64 = arith.constant 64 : index
    %c0_19 = arith.constant 0 : index
    %32 = vector.load %arg15[%c64, %c0_19] : memref<464x128xbf16, #tpu.memory_space<vmem>>, vector<224x128xbf16>
    %c0_20 = arith.constant 0 : index
    %c512 = arith.constant 512 : index
    %33 = vector.load %arg16[%c0_20, %c512] : memref<224x2048xbf16, #tpu.memory_space<vmem>>, vector<224x128xbf16>
    tpu.vector_store %arg16[%c0_20, %c512], %32 {strides = array<i32>} : memref<224x2048xbf16, #tpu.memory_space<vmem>>, vector<224x128xbf16>,
    %c80 = arith.constant 80 : index
    %c0_21 = arith.constant 0 : index
    %34 = vector.load %arg15[%c80, %c0_21] : memref<464x128xbf16, #tpu.memory_space<vmem>>, vector<224x128xbf16>
    %c0_22 = arith.constant 0 : index
    %c640 = arith.constant 640 : index
    %35 = vector.load %arg16[%c0_22, %c640] : memref<224x2048xbf16, #tpu.memory_space<vmem>>, vector<224x128xbf16>
    tpu.vector_store %arg16[%c0_22, %c640], %34 {strides = array<i32>} : memref<224x2048xbf16, #tpu.memory_space<vmem>>, vector<224x128xbf16>,
    %c96 = arith.constant 96 : index
    %c0_23 = arith.constant 0 : index
    %36 = vector.load %arg15[%c96, %c0_23] : memref<464x128xbf16, #tpu.memory_space<vmem>>, vector<224x128xbf16>
    %c0_24 = arith.constant 0 : index
    %c768 = arith.constant 768 : index
    %37 = vector.load %arg16[%c0_24, %c768] : memref<224x2048xbf16, #tpu.memory_space<vmem>>, vector<224x128xbf16>
    tpu.vector_store %arg16[%c0_24, %c768], %36 {strides = array<i32>} : memref<224x2048xbf16, #tpu.memory_space<vmem>>, vector<224x128xbf16>,
    %c112 = arith.constant 112 : index
    %c0_25 = arith.constant 0 : index
    %38 = vector.load %arg15[%c112, %c0_25] : memref<464x128xbf16, #tpu.memory_space<vmem>>, vector<224x128xbf16>
    %c0_26 = arith.constant 0 : index
    %c896 = arith.constant 896 : index
    %39 = vector.load %arg16[%c0_26, %c896] : memref<224x2048xbf16, #tpu.memory_space<vmem>>, vector<224x128xbf16>
    tpu.vector_store %arg16[%c0_26, %c896], %38 {strides = array<i32>} : memref<224x2048xbf16, #tpu.memory_space<vmem>>, vector<224x128xbf16>,
    %c128_27 = arith.constant 128 : index
    %c0_28 = arith.constant 0 : index
    %40 = vector.load %arg15[%c128_27, %c0_28] : memref<464x128xbf16, #tpu.memory_space<vmem>>, vector<224x128xbf16>
    %c0_29 = arith.constant 0 : index
    %c1024 = arith.constant 1024 : index
    %41 = vector.load %arg16[%c0_29, %c1024] : memref<224x2048xbf16, #tpu.memory_space<vmem>>, vector<224x128xbf16>
    tpu.vector_store %arg16[%c0_29, %c1024], %40 {strides = array<i32>} : memref<224x2048xbf16, #tpu.memory_space<vmem>>, vector<224x128xbf16>,
    %c144 = arith.constant 144 : index
    %c0_30 = arith.constant 0 : index
    %42 = vector.load %arg15[%c144, %c0_30] : memref<464x128xbf16, #tpu.memory_space<vmem>>, vector<224x128xbf16>
    %c0_31 = arith.constant 0 : index
    %c1152 = arith.constant 1152 : index
    %43 = vector.load %arg16[%c0_31, %c1152] : memref<224x2048xbf16, #tpu.memory_space<vmem>>, vector<224x128xbf16>
    tpu.vector_store %arg16[%c0_31, %c1152], %42 {strides = array<i32>} : memref<224x2048xbf16, #tpu.memory_space<vmem>>, vector<224x128xbf16>,
    %c160 = arith.constant 160 : index
    %c0_32 = arith.constant 0 : index
    %44 = vector.load %arg15[%c160, %c0_32] : memref<464x128xbf16, #tpu.memory_space<vmem>>, vector<224x128xbf16>
    %c0_33 = arith.constant 0 : index
    %c1280 = arith.constant 1280 : index
    %45 = vector.load %arg16[%c0_33, %c1280] : memref<224x2048xbf16, #tpu.memory_space<vmem>>, vector<224x128xbf16>
    tpu.vector_store %arg16[%c0_33, %c1280], %44 {strides = array<i32>} : memref<224x2048xbf16, #tpu.memory_space<vmem>>, vector<224x128xbf16>,
    %c176 = arith.constant 176 : index
    %c0_34 = arith.constant 0 : index
    %46 = vector.load %arg15[%c176, %c0_34] : memref<464x128xbf16, #tpu.memory_space<vmem>>, vector<224x128xbf16>
    %c0_35 = arith.constant 0 : index
    %c1408 = arith.constant 1408 : index
    %47 = vector.load %arg16[%c0_35, %c1408] : memref<224x2048xbf16, #tpu.memory_space<vmem>>, vector<224x128xbf16>
    tpu.vector_store %arg16[%c0_35, %c1408], %46 {strides = array<i32>} : memref<224x2048xbf16, #tpu.memory_space<vmem>>, vector<224x128xbf16>,
    %c192 = arith.constant 192 : index
    %c0_36 = arith.constant 0 : index
    %48 = vector.load %arg15[%c192, %c0_36] : memref<464x128xbf16, #tpu.memory_space<vmem>>, vector<224x128xbf16>
    %c0_37 = arith.constant 0 : index
    %c1536 = arith.constant 1536 : index
    %49 = vector.load %arg16[%c0_37, %c1536] : memref<224x2048xbf16, #tpu.memory_space<vmem>>, vector<224x128xbf16>
    tpu.vector_store %arg16[%c0_37, %c1536], %48 {strides = array<i32>} : memref<224x2048xbf16, #tpu.memory_space<vmem>>, vector<224x128xbf16>,
    %c208 = arith.constant 208 : index
    %c0_38 = arith.constant 0 : index
    %50 = vector.load %arg15[%c208, %c0_38] : memref<464x128xbf16, #tpu.memory_space<vmem>>, vector<224x128xbf16>
    %c0_39 = arith.constant 0 : index
    %c1664 = arith.constant 1664 : index
    %51 = vector.load %arg16[%c0_39, %c1664] : memref<224x2048xbf16, #tpu.memory_space<vmem>>, vector<224x128xbf16>
    tpu.vector_store %arg16[%c0_39, %c1664], %50 {strides = array<i32>} : memref<224x2048xbf16, #tpu.memory_space<vmem>>, vector<224x128xbf16>,
    %c224 = arith.constant 224 : index
    %c0_40 = arith.constant 0 : index
    %52 = vector.load %arg15[%c224, %c0_40] : memref<464x128xbf16, #tpu.memory_space<vmem>>, vector<224x128xbf16>
    %c0_41 = arith.constant 0 : index
    %c1792 = arith.constant 1792 : index
    %53 = vector.load %arg16[%c0_41, %c1792] : memref<224x2048xbf16, #tpu.memory_space<vmem>>, vector<224x128xbf16>
    tpu.vector_store %arg16[%c0_41, %c1792], %52 {strides = array<i32>} : memref<224x2048xbf16, #tpu.memory_space<vmem>>, vector<224x128xbf16>,
    %c240 = arith.constant 240 : index
    %c0_42 = arith.constant 0 : index
    %54 = vector.load %arg15[%c240, %c0_42] : memref<464x128xbf16, #tpu.memory_space<vmem>>, vector<224x128xbf16>
    %c0_43 = arith.constant 0 : index
    %c1920 = arith.constant 1920 : index
    %55 = vector.load %arg16[%c0_43, %c1920] : memref<224x2048xbf16, #tpu.memory_space<vmem>>, vector<224x128xbf16>
    tpu.vector_store %arg16[%c0_43, %c1920], %54 {strides = array<i32>} : memref<224x2048xbf16, #tpu.memory_space<vmem>>, vector<224x128xbf16>,
    %c0_44 = arith.constant 0 : index
    %c0_45 = arith.constant 0 : index
    %56 = vector.load %arg16[%c0_44, %c0_45] : memref<224x2048xbf16, #tpu.memory_space<vmem>>, vector<224x2048xbf16>
    %c0_46 = arith.constant 0 : index
    %c0_47 = arith.constant 0 : index
    %57 = vector.load %arg4[%c0_46, %c0_47] : memref<2048x256xbf16, #tpu.memory_space<vmem>>, vector<2048x256xbf16>
    %cst_48 = arith.constant dense<0.000000e+00> : vector<224x256xf32>
    %58 = tpu.matmul %56, %57, %cst_48 {dimension_numbers = #tpu.dot_dimension_numbers<[1], [0], [0], [1], [0, 0, 1, 1], [], []>} : vector<224x2048xbf16>, vector<2048x256xbf16>, vector<224x256xf32> -> vector<224x256xf32>
    %c0_49 = arith.constant 0 : index
    %c0_50 = arith.constant 0 : index
    %59 = vector.load %arg5[%c0_49, %c0_50] : memref<1x256xf32, #tpu.memory_space<vmem>>, vector<1x256xf32>
    %60 = vector.broadcast %59 : vector<1x256xf32> to vector<224x256xf32>
    %61 = arith.addf %58, %60 : vector<224x256xf32>
    %cst_51 = arith.constant 0.000000e+00 : f32
    %62 = vector.broadcast %cst_51 : f32 to vector<224x256xf32>
    %63 = arith.cmpf oge, %61, %62 : vector<224x256xf32>
    %cst_52 = arith.constant 0.00999999977 : f32
    %64 = vector.broadcast %cst_52 : f32 to vector<224x256xf32>
    %65 = arith.mulf %64, %61 : vector<224x256xf32>
    %66 = arith.select %63, %61, %65 : vector<224x256xi1>, vector<224x256xf32>
    %67 = vector.extract_strided_slice %66 {offsets = [0, 0], sizes = [224, 128], strides = [1, 1]} : vector<224x256xf32> to vector<224x128xf32>
    %68 = vector.extract_strided_slice %66 {offsets = [0, 128], sizes = [224, 128], strides = [1, 1]} : vector<224x256xf32> to vector<224x128xf32>
    %69 = arith.addf %67, %68 : vector<224x128xf32>
    %70 = arith.truncf %69 : vector<224x128xf32> to vector<224x128xbf16>
    %c0_53 = arith.constant 0 : index
    %c0_54 = arith.constant 0 : index
    %71 = vector.load %arg17[%c0_53, %c0_54] : memref<224x128xbf16, #tpu.memory_space<vmem>>, vector<224x128xbf16>
    tpu.vector_store %arg17[%c0_53, %c0_54], %70 {strides = array<i32>} : memref<224x128xbf16, #tpu.memory_space<vmem>>, vector<224x128xbf16>,
    %c0_55 = arith.constant 0 : index
    %c0_56 = arith.constant 0 : index
    %72 = vector.load %arg17[%c0_55, %c0_56] : memref<224x128xbf16, #tpu.memory_space<vmem>>, vector<192x128xbf16>
    %c0_57 = arith.constant 0 : index
    %c0_58 = arith.constant 0 : index
    %73 = vector.load %arg6[%c0_57, %c0_58] : memref<384x256xbf16, #tpu.memory_space<vmem>>, vector<128x256xbf16>
    %cst_59 = arith.constant dense<0.000000e+00> : vector<192x256xf32>
    %74 = tpu.matmul %72, %73, %cst_59 {dimension_numbers = #tpu.dot_dimension_numbers<[1], [0], [0], [1], [0, 0, 1, 1], [], []>} : vector<192x128xbf16>, vector<128x256xbf16>, vector<192x256xf32> -> vector<192x256xf32>
    %c16_60 = arith.constant 16 : index
    %c0_61 = arith.constant 0 : index
    %75 = vector.load %arg17[%c16_60, %c0_61] : memref<224x128xbf16, #tpu.memory_space<vmem>>, vector<192x128xbf16>
    %c128_62 = arith.constant 128 : index
    %c0_63 = arith.constant 0 : index
    %76 = vector.load %arg6[%c128_62, %c0_63] : memref<384x256xbf16, #tpu.memory_space<vmem>>, vector<128x256xbf16>
    %cst_64 = arith.constant dense<0.000000e+00> : vector<192x256xf32>
    %77 = tpu.matmul %75, %76, %cst_64 {dimension_numbers = #tpu.dot_dimension_numbers<[1], [0], [0], [1], [0, 0, 1, 1], [], []>} : vector<192x128xbf16>, vector<128x256xbf16>, vector<192x256xf32> -> vector<192x256xf32>
    %78 = arith.addf %74, %77 : vector<192x256xf32>
    %c32_65 = arith.constant 32 : index
    %c0_66 = arith.constant 0 : index
    %79 = vector.load %arg17[%c32_65, %c0_66] : memref<224x128xbf16, #tpu.memory_space<vmem>>, vector<192x128xbf16>
    %c256_67 = arith.constant 256 : index
    %c0_68 = arith.constant 0 : index
    %80 = vector.load %arg6[%c256_67, %c0_68] : memref<384x256xbf16, #tpu.memory_space<vmem>>, vector<128x256xbf16>
    %cst_69 = arith.constant dense<0.000000e+00> : vector<192x256xf32>
    %81 = tpu.matmul %79, %80, %cst_69 {dimension_numbers = #tpu.dot_dimension_numbers<[1], [0], [0], [1], [0, 0, 1, 1], [], []>} : vector<192x128xbf16>, vector<128x256xbf16>, vector<192x256xf32> -> vector<192x256xf32>
    %82 = arith.addf %78, %81 : vector<192x256xf32>
    %c0_70 = arith.constant 0 : index
    %c0_71 = arith.constant 0 : index
    %83 = vector.load %arg7[%c0_70, %c0_71] : memref<1x256xf32, #tpu.memory_space<vmem>>, vector<1x256xf32>
    %84 = vector.broadcast %83 : vector<1x256xf32> to vector<192x256xf32>
    %85 = arith.addf %82, %84 : vector<192x256xf32>
    %cst_72 = arith.constant 0.000000e+00 : f32
    %86 = vector.broadcast %cst_72 : f32 to vector<192x256xf32>
    %87 = arith.cmpf oge, %85, %86 : vector<192x256xf32>
    %cst_73 = arith.constant 0.00999999977 : f32
    %88 = vector.broadcast %cst_73 : f32 to vector<192x256xf32>
    %89 = arith.mulf %88, %85 : vector<192x256xf32>
    %90 = arith.select %87, %85, %89 : vector<192x256xi1>, vector<192x256xf32>
    %91 = vector.extract_strided_slice %90 {offsets = [0, 0], sizes = [192, 128], strides = [1, 1]} : vector<192x256xf32> to vector<192x128xf32>
    %92 = vector.extract_strided_slice %90 {offsets = [0, 128], sizes = [192, 128], strides = [1, 1]} : vector<192x256xf32> to vector<192x128xf32>
    %93 = arith.addf %91, %92 : vector<192x128xf32>
    %94 = arith.truncf %93 : vector<192x128xf32> to vector<192x128xbf16>
    %c0_74 = arith.constant 0 : index
    %c0_75 = arith.constant 0 : index
    %95 = vector.load %arg18[%c0_74, %c0_75] : memref<192x128xbf16, #tpu.memory_space<vmem>>, vector<192x128xbf16>
    tpu.vector_store %arg18[%c0_74, %c0_75], %94 {strides = array<i32>} : memref<192x128xbf16, #tpu.memory_space<vmem>>, vector<192x128xbf16>,
    %c0_76 = arith.constant 0 : index
    %c0_77 = arith.constant 0 : index
    %96 = vector.load %arg18[%c0_76, %c0_77] : memref<192x128xbf16, #tpu.memory_space<vmem>>, vector<16x128xbf16>
    %c0_78 = arith.constant 0 : index
    %c0_79 = arith.constant 0 : index
    %97 = vector.load %arg8[%c0_78, %c0_79] : memref<1536x128xbf16, #tpu.memory_space<vmem>>, vector<128x128xbf16>
    %cst_80 = arith.constant dense<0.000000e+00> : vector<16x128xf32>
    %98 = tpu.matmul %96, %97, %cst_80 {dimension_numbers = #tpu.dot_dimension_numbers<[1], [0], [0], [1], [0, 0, 1, 1], [], []>} : vector<16x128xbf16>, vector<128x128xbf16>, vector<16x128xf32> -> vector<16x128xf32>
    %c16_81 = arith.constant 16 : index
    %c0_82 = arith.constant 0 : index
    %99 = vector.load %arg18[%c16_81, %c0_82] : memref<192x128xbf16, #tpu.memory_space<vmem>>, vector<16x128xbf16>
    %c128_83 = arith.constant 128 : index
    %c0_84 = arith.constant 0 : index
    %100 = vector.load %arg8[%c128_83, %c0_84] : memref<1536x128xbf16, #tpu.memory_space<vmem>>, vector<128x128xbf16>
    %cst_85 = arith.constant dense<0.000000e+00> : vector<16x128xf32>
    %101 = tpu.matmul %99, %100, %cst_85 {dimension_numbers = #tpu.dot_dimension_numbers<[1], [0], [0], [1], [0, 0, 1, 1], [], []>} : vector<16x128xbf16>, vector<128x128xbf16>, vector<16x128xf32> -> vector<16x128xf32>
    %102 = arith.addf %98, %101 : vector<16x128xf32>
    %c32_86 = arith.constant 32 : index
    %c0_87 = arith.constant 0 : index
    %103 = vector.load %arg18[%c32_86, %c0_87] : memref<192x128xbf16, #tpu.memory_space<vmem>>, vector<16x128xbf16>
    %c256_88 = arith.constant 256 : index
    %c0_89 = arith.constant 0 : index
    %104 = vector.load %arg8[%c256_88, %c0_89] : memref<1536x128xbf16, #tpu.memory_space<vmem>>, vector<128x128xbf16>
    %cst_90 = arith.constant dense<0.000000e+00> : vector<16x128xf32>
    %105 = tpu.matmul %103, %104, %cst_90 {dimension_numbers = #tpu.dot_dimension_numbers<[1], [0], [0], [1], [0, 0, 1, 1], [], []>} : vector<16x128xbf16>, vector<128x128xbf16>, vector<16x128xf32> -> vector<16x128xf32>
    %106 = arith.addf %102, %105 : vector<16x128xf32>
    %c48_91 = arith.constant 48 : index
    %c0_92 = arith.constant 0 : index
    %107 = vector.load %arg18[%c48_91, %c0_92] : memref<192x128xbf16, #tpu.memory_space<vmem>>, vector<16x128xbf16>
    %c384_93 = arith.constant 384 : index
    %c0_94 = arith.constant 0 : index
    %108 = vector.load %arg8[%c384_93, %c0_94] : memref<1536x128xbf16, #tpu.memory_space<vmem>>, vector<128x128xbf16>
    %cst_95 = arith.constant dense<0.000000e+00> : vector<16x128xf32>
    %109 = tpu.matmul %107, %108, %cst_95 {dimension_numbers = #tpu.dot_dimension_numbers<[1], [0], [0], [1], [0, 0, 1, 1], [], []>} : vector<16x128xbf16>, vector<128x128xbf16>, vector<16x128xf32> -> vector<16x128xf32>
    %110 = arith.addf %106, %109 : vector<16x128xf32>
    %c64_96 = arith.constant 64 : index
    %c0_97 = arith.constant 0 : index
    %111 = vector.load %arg18[%c64_96, %c0_97] : memref<192x128xbf16, #tpu.memory_space<vmem>>, vector<16x128xbf16>
    %c512_98 = arith.constant 512 : index
    %c0_99 = arith.constant 0 : index
    %112 = vector.load %arg8[%c512_98, %c0_99] : memref<1536x128xbf16, #tpu.memory_space<vmem>>, vector<128x128xbf16>
    %cst_100 = arith.constant dense<0.000000e+00> : vector<16x128xf32>
    %113 = tpu.matmul %111, %112, %cst_100 {dimension_numbers = #tpu.dot_dimension_numbers<[1], [0], [0], [1], [0, 0, 1, 1], [], []>} : vector<16x128xbf16>, vector<128x128xbf16>, vector<16x128xf32> -> vector<16x128xf32>
    %114 = arith.addf %110, %113 : vector<16x128xf32>
    %c80_101 = arith.constant 80 : index
    %c0_102 = arith.constant 0 : index
    %115 = vector.load %arg18[%c80_101, %c0_102] : memref<192x128xbf16, #tpu.memory_space<vmem>>, vector<16x128xbf16>
    %c640_103 = arith.constant 640 : index
    %c0_104 = arith.constant 0 : index
    %116 = vector.load %arg8[%c640_103, %c0_104] : memref<1536x128xbf16, #tpu.memory_space<vmem>>, vector<128x128xbf16>
    %cst_105 = arith.constant dense<0.000000e+00> : vector<16x128xf32>
    %117 = tpu.matmul %115, %116, %cst_105 {dimension_numbers = #tpu.dot_dimension_numbers<[1], [0], [0], [1], [0, 0, 1, 1], [], []>} : vector<16x128xbf16>, vector<128x128xbf16>, vector<16x128xf32> -> vector<16x128xf32>
    %118 = arith.addf %114, %117 : vector<16x128xf32>
    %c96_106 = arith.constant 96 : index
    %c0_107 = arith.constant 0 : index
    %119 = vector.load %arg18[%c96_106, %c0_107] : memref<192x128xbf16, #tpu.memory_space<vmem>>, vector<16x128xbf16>
    %c768_108 = arith.constant 768 : index
    %c0_109 = arith.constant 0 : index
    %120 = vector.load %arg8[%c768_108, %c0_109] : memref<1536x128xbf16, #tpu.memory_space<vmem>>, vector<128x128xbf16>
    %cst_110 = arith.constant dense<0.000000e+00> : vector<16x128xf32>
    %121 = tpu.matmul %119, %120, %cst_110 {dimension_numbers = #tpu.dot_dimension_numbers<[1], [0], [0], [1], [0, 0, 1, 1], [], []>} : vector<16x128xbf16>, vector<128x128xbf16>, vector<16x128xf32> -> vector<16x128xf32>
    %122 = arith.addf %118, %121 : vector<16x128xf32>
    %c112_111 = arith.constant 112 : index
    %c0_112 = arith.constant 0 : index
    %123 = vector.load %arg18[%c112_111, %c0_112] : memref<192x128xbf16, #tpu.memory_space<vmem>>, vector<16x128xbf16>
    %c896_113 = arith.constant 896 : index
    %c0_114 = arith.constant 0 : index
    %124 = vector.load %arg8[%c896_113, %c0_114] : memref<1536x128xbf16, #tpu.memory_space<vmem>>, vector<128x128xbf16>
    %cst_115 = arith.constant dense<0.000000e+00> : vector<16x128xf32>
    %125 = tpu.matmul %123, %124, %cst_115 {dimension_numbers = #tpu.dot_dimension_numbers<[1], [0], [0], [1], [0, 0, 1, 1], [], []>} : vector<16x128xbf16>, vector<128x128xbf16>, vector<16x128xf32> -> vector<16x128xf32>
    %126 = arith.addf %122, %125 : vector<16x128xf32>
    %c128_116 = arith.constant 128 : index
    %c0_117 = arith.constant 0 : index
    %127 = vector.load %arg18[%c128_116, %c0_117] : memref<192x128xbf16, #tpu.memory_space<vmem>>, vector<16x128xbf16>
    %c1024_118 = arith.constant 1024 : index
    %c0_119 = arith.constant 0 : index
    %128 = vector.load %arg8[%c1024_118, %c0_119] : memref<1536x128xbf16, #tpu.memory_space<vmem>>, vector<128x128xbf16>
    %cst_120 = arith.constant dense<0.000000e+00> : vector<16x128xf32>
    %129 = tpu.matmul %127, %128, %cst_120 {dimension_numbers = #tpu.dot_dimension_numbers<[1], [0], [0], [1], [0, 0, 1, 1], [], []>} : vector<16x128xbf16>, vector<128x128xbf16>, vector<16x128xf32> -> vector<16x128xf32>
    %130 = arith.addf %126, %129 : vector<16x128xf32>
    %c144_121 = arith.constant 144 : index
    %c0_122 = arith.constant 0 : index
    %131 = vector.load %arg18[%c144_121, %c0_122] : memref<192x128xbf16, #tpu.memory_space<vmem>>, vector<16x128xbf16>
    %c1152_123 = arith.constant 1152 : index
    %c0_124 = arith.constant 0 : index
    %132 = vector.load %arg8[%c1152_123, %c0_124] : memref<1536x128xbf16, #tpu.memory_space<vmem>>, vector<128x128xbf16>
    %cst_125 = arith.constant dense<0.000000e+00> : vector<16x128xf32>
    %133 = tpu.matmul %131, %132, %cst_125 {dimension_numbers = #tpu.dot_dimension_numbers<[1], [0], [0], [1], [0, 0, 1, 1], [], []>} : vector<16x128xbf16>, vector<128x128xbf16>, vector<16x128xf32> -> vector<16x128xf32>
    %134 = arith.addf %130, %133 : vector<16x128xf32>
    %c160_126 = arith.constant 160 : index
    %c0_127 = arith.constant 0 : index
    %135 = vector.load %arg18[%c160_126, %c0_127] : memref<192x128xbf16, #tpu.memory_space<vmem>>, vector<16x128xbf16>
    %c1280_128 = arith.constant 1280 : index
    %c0_129 = arith.constant 0 : index
    %136 = vector.load %arg8[%c1280_128, %c0_129] : memref<1536x128xbf16, #tpu.memory_space<vmem>>, vector<128x128xbf16>
    %cst_130 = arith.constant dense<0.000000e+00> : vector<16x128xf32>
    %137 = tpu.matmul %135, %136, %cst_130 {dimension_numbers = #tpu.dot_dimension_numbers<[1], [0], [0], [1], [0, 0, 1, 1], [], []>} : vector<16x128xbf16>, vector<128x128xbf16>, vector<16x128xf32> -> vector<16x128xf32>
    %138 = arith.addf %134, %137 : vector<16x128xf32>
    %c176_131 = arith.constant 176 : index
    %c0_132 = arith.constant 0 : index
    %139 = vector.load %arg18[%c176_131, %c0_132] : memref<192x128xbf16, #tpu.memory_space<vmem>>, vector<16x128xbf16>
    %c1408_133 = arith.constant 1408 : index
    %c0_134 = arith.constant 0 : index
    %140 = vector.load %arg8[%c1408_133, %c0_134] : memref<1536x128xbf16, #tpu.memory_space<vmem>>, vector<128x128xbf16>
    %cst_135 = arith.constant dense<0.000000e+00> : vector<16x128xf32>
    %141 = tpu.matmul %139, %140, %cst_135 {dimension_numbers = #tpu.dot_dimension_numbers<[1], [0], [0], [1], [0, 0, 1, 1], [], []>} : vector<16x128xbf16>, vector<128x128xbf16>, vector<16x128xf32> -> vector<16x128xf32>
    %142 = arith.addf %138, %141 : vector<16x128xf32>
    %c0_136 = arith.constant 0 : index
    %c0_137 = arith.constant 0 : index
    %143 = vector.load %arg9[%c0_136, %c0_137] : memref<1x128xf32, #tpu.memory_space<vmem>>, vector<1x128xf32>
    %144 = vector.broadcast %143 : vector<1x128xf32> to vector<16x128xf32>
    %145 = arith.addf %142, %144 : vector<16x128xf32>
    %cst_138 = arith.constant 0.000000e+00 : f32
    %146 = vector.broadcast %cst_138 : f32 to vector<16x128xf32>
    %147 = arith.cmpf oge, %145, %146 : vector<16x128xf32>
    %cst_139 = arith.constant 0.00999999977 : f32
    %148 = vector.broadcast %cst_139 : f32 to vector<16x128xf32>
    %149 = arith.mulf %148, %145 : vector<16x128xf32>
    %150 = arith.select %147, %145, %149 : vector<16x128xi1>, vector<16x128xf32>
    %151 = arith.truncf %150 : vector<16x128xf32> to vector<16x128xbf16>
    %c0_140 = arith.constant 0 : index
    %c0_141 = arith.constant 0 : index
    %152 = vector.load %arg10[%c0_140, %c0_141] : memref<128x64xbf16, #tpu.memory_space<vmem>>, vector<128x64xbf16>
    %cst_142 = arith.constant dense<0.000000e+00> : vector<16x64xf32>
    %153 = tpu.matmul %151, %152, %cst_142 {dimension_numbers = #tpu.dot_dimension_numbers<[1], [0], [0], [1], [0, 0, 1, 1], [], []>} : vector<16x128xbf16>, vector<128x64xbf16>, vector<16x64xf32> -> vector<16x64xf32>
    %c0_143 = arith.constant 0 : index
    %c0_144 = arith.constant 0 : index
    %154 = vector.load %arg11[%c0_143, %c0_144] : memref<1x64xf32, #tpu.memory_space<vmem>>, vector<1x64xf32>
    %155 = vector.broadcast %154 : vector<1x64xf32> to vector<16x64xf32>
    %156 = arith.addf %153, %155 : vector<16x64xf32>
    %cst_145 = arith.constant 0.000000e+00 : f32
    %157 = vector.broadcast %cst_145 : f32 to vector<16x64xf32>
    %158 = arith.cmpf oge, %156, %157 : vector<16x64xf32>
    %cst_146 = arith.constant 0.00999999977 : f32
    %159 = vector.broadcast %cst_146 : f32 to vector<16x64xf32>
    %160 = arith.mulf %159, %156 : vector<16x64xf32>
    %161 = arith.select %158, %156, %160 : vector<16x64xi1>, vector<16x64xf32>
    %162 = arith.truncf %161 : vector<16x64xf32> to vector<16x64xbf16>
    %c0_147 = arith.constant 0 : index
    %c0_148 = arith.constant 0 : index
    %163 = vector.load %arg12[%c0_147, %c0_148] : memref<64x128xbf16, #tpu.memory_space<vmem>>, vector<64x128xbf16>
    %cst_149 = arith.constant dense<0.000000e+00> : vector<16x128xf32>
    %164 = tpu.matmul %162, %163, %cst_149 {dimension_numbers = #tpu.dot_dimension_numbers<[1], [0], [0], [1], [0, 0, 1, 1], [], []>} : vector<16x64xbf16>, vector<64x128xbf16>, vector<16x128xf32> -> vector<16x128xf32>
    %c0_150 = arith.constant 0 : index
    %c0_151 = arith.constant 0 : index
    %165 = vector.load %arg13[%c0_150, %c0_151] : memref<1x128xf32, #tpu.memory_space<vmem>>, vector<1x128xf32>
    %166 = vector.broadcast %165 : vector<1x128xf32> to vector<16x128xf32>
    %167 = arith.addf %164, %166 : vector<16x128xf32>
    %c0_152 = arith.constant 0 : index
    %c0_153 = arith.constant 0 : index
    %168 = vector.load %arg14[%c0_152, %c0_153] : memref<16x128xf32, #tpu.memory_space<vmem>>, vector<16x128xf32>
    tpu.vector_store %arg14[%c0_152, %c0_153], %167 {strides = array<i32>} : memref<16x128xf32, #tpu.memory_space<vmem>>, vector<16x128xf32>,
    return
  }
  func.func @transform_0(%arg0: i32) -> (i32, i32) {
    %c0_i32 = arith.constant 0 : i32
    %c0_i32_0 = arith.constant 0 : i32
    %c0_i32_1 = arith.constant 0 : i32
    return %c0_i32, %c0_i32_0 : i32, i32
  }
  func.func @transform_1(%arg0: i32) -> (i32, i32) {
    %c0_i32 = arith.constant 0 : i32
    %c0_i32_0 = arith.constant 0 : i32
    %c0_i32_1 = arith.constant 0 : i32
    return %c0_i32, %c0_i32_0 : i32, i32
  }
  func.func @transform_2(%arg0: i32) -> (i32, i32) {
    %c0_i32 = arith.constant 0 : i32
    %c0_i32_0 = arith.constant 0 : i32
    %c0_i32_1 = arith.constant 0 : i32
    return %c0_i32, %c0_i32_0 : i32, i32
  }
  func.func @transform_3(%arg0: i32) -> (i32, i32) {
    %c0_i32 = arith.constant 0 : i32
    %c0_i32_0 = arith.constant 0 : i32
    %c0_i32_1 = arith.constant 0 : i32
    return %c0_i32, %c0_i32_0 : i32, i32
  }
  func.func @transform_4(%arg0: i32) -> (i32, i32) {
    %c0_i32 = arith.constant 0 : i32
    %c0_i32_0 = arith.constant 0 : i32
    %c0_i32_1 = arith.constant 0 : i32
    return %c0_i32, %c0_i32_0 : i32, i32
  }
  func.func @transform_5(%arg0: i32) -> (i32, i32) {
    %c0_i32 = arith.constant 0 : i32
    %c0_i32_0 = arith.constant 0 : i32
    %c0_i32_1 = arith.constant 0 : i32
    return %c0_i32, %c0_i32_0 : i32, i32
  }
  func.func @transform_6(%arg0: i32) -> (i32, i32) {
    %c0_i32 = arith.constant 0 : i32
    %c0_i32_0 = arith.constant 0 : i32
    %c0_i32_1 = arith.constant 0 : i32
    return %c0_i32, %c0_i32_0 : i32, i32
  }
  func.func @transform_7(%arg0: i32) -> (i32, i32) {
    %c0_i32 = arith.constant 0 : i32
    %c0_i32_0 = arith.constant 0 : i32
    %c0_i32_1 = arith.constant 0 : i32
    return %c0_i32, %c0_i32_0 : i32, i32
  }
  func.func @transform_8(%arg0: i32) -> (i32, i32) {
    %c0_i32 = arith.constant 0 : i32
    %c0_i32_0 = arith.constant 0 : i32
    %c0_i32_1 = arith.constant 0 : i32
    return %c0_i32, %c0_i32_0 : i32, i32
  }
  func.func @transform_9(%arg0: i32) -> (i32, i32) {
    %c0_i32 = arith.constant 0 : i32
    %c0_i32_0 = arith.constant 0 : i32
    %c0_i32_1 = arith.constant 0 : i32
    return %c0_i32, %c0_i32_0 : i32, i32
  }
  func.func @transform_10(%arg0: i32) -> (i32, i32) {
    %c0_i32 = arith.constant 0 : i32
    %c0_i32_0 = arith.constant 0 : i32
    %c0_i32_1 = arith.constant 0 : i32
    return %c0_i32, %c0_i32_0 : i32, i32
  }
  func.func @transform_11(%arg0: i32) -> (i32, i32) {
    %c0_i32 = arith.constant 0 : i32
    %c0_i32_0 = arith.constant 0 : i32
    %c0_i32_1 = arith.constant 0 : i32
    return %c0_i32, %c0_i32_0 : i32, i32
  }
  func.func @transform_12(%arg0: i32) -> (i32, i32) {
    %c0_i32 = arith.constant 0 : i32
    %c0_i32_0 = arith.constant 0 : i32
    %c0_i32_1 = arith.constant 0 : i32
    return %c0_i32, %c0_i32_0 : i32, i32
  }
  func.func @transform_13(%arg0: i32) -> (i32, i32) {
    %c0_i32 = arith.constant 0 : i32
    %c0_i32_0 = arith.constant 0 : i32
    %c0_i32_1 = arith.constant 0 : i32
    return %c0_i32, %c0_i32_0 : i32, i32
  }
}

</mosaic_0001>

<bundles_post_ra>
// kernel: cnn_forward.1
= control target key start
LH: loop header
LB: loop body
LE: loop exit
PB: predicated region body
PF: predicated region fallthrough
CT: control target
= control target key end

     0   :  { %s18736_s1 = inlined_call_operand.vmem [shape: bf16[384,768], index: 1, kind: input, shape index: {}]   ;;  %s18737_s0 = inlined_call_operand.vmem [shape: bf16[464,384], index: 0, kind: input, shape index: {}]   ;;  %s18738_s2 = inlined_call_operand.vmem [shape: f32[1,768], index: 2, kind: input, shape index: {}]   ;;  %s18739_s3 = inlined_call_operand.vmem [shape: bf16[2048,256], index: 3, kind: input, shape index: {}]   ;;  %s18740_s5 = inlined_call_operand.vmem [shape: bf16[384,256], index: 5, kind: input, shape index: {}]   ;;  %s18741_s4 = inlined_call_operand.vmem [shape: f32[1,256], index: 4, kind: input, shape index: {}]   ;;  %s18742_s7 = inlined_call_operand.vmem [shape: bf16[1536,128], index: 7, kind: input, shape index: {}]   ;;  %s18743_s6 = inlined_call_operand.vmem [shape: f32[1,256], index: 6, kind: input, shape index: {}]   ;;  %s18744_s9 = inlined_call_operand.vmem [shape: bf16[128,64], index: 9, kind: input, shape index: {}]   ;;  %s18745_s11 = inlined_call_operand.vmem [shape: bf16[64,128], index: 11, kind: input, shape index: {}]   ;;  %s18746_s8 = inlined_call_operand.vmem [shape: f32[1,128], index: 8, kind: input, shape index: {}]   ;;  %s18747_s10 = inlined_call_operand.vmem [shape: f32[1,64], index: 10, kind: input, shape index: {}]   ;;  %s18748_s12 = inlined_call_operand.vmem [shape: f32[1,128], index: 12, kind: input, shape index: {}]   ;;  %s18749_s13 = inlined_call_operand.vmem [shape: f32[16,128], index: 13, kind: output, shape index: {}]  }
   0x1   :  { %v13552_v0 = vld [vmem:[%s18736_s1 + $0x4] ss:$24 sps:$4 sm:$0xff]   ;;  %v13554_v1 = vld [vmem:[%s18736_s1] ss:$24 sps:$4 sm:$0xff]   ;;  %v13557_v3 = vld [vmem:[%s18736_s1 + $0x34] ss:$24 sps:$4 sm:$0xff]  }
   0x2   :  { %1521 = vmatprep.subr.bf16.mxu0 %v13552_v0  ;;  %v13555_v2 = vld [vmem:[%s18736_s1 + $0xc] ss:$24 sps:$4 sm:$0xff]   ;;  %v13559_v4 = vld [vmem:[%s18736_s1 + $0x8] ss:$24 sps:$4 sm:$0xff]   ;;  %v13561_v6 = vld [vmem:[%s18736_s1 + $0x3c] ss:$24 sps:$4 sm:$0xff]  }
   0x3   :  { %1522 = vmatpush1.bf16.msra.mxu0 %v13554_v1  ;;  %v13560_v5 = vld [vmem:[%s18736_s1 + $0x30] ss:$24 sps:$4 sm:$0xff]   ;;  %2167 = vmatprep.subr.bf16.mxu1 %v13555_v2  ;;  %v13563_v7 = vld [vmem:[%s18736_s1 + $0x64] ss:$24 sps:$4 sm:$0xff]   ;;  %v13566_v9 = vld [vmem:[%s18736_s1 + $0x60] ss:$24 sps:$4 sm:$0xff]  }
   0x4   :  { %1523 = vmatprep.subr.bf16.mxu0 %v13557_v3  ;;  %2168 = vmatpush1.bf16.msra.mxu1 %v13559_v4  ;;  %v13565_v8 = vld [vmem:[%s18736_s1 + $0x38] ss:$24 sps:$4 sm:$0xff]   ;;  %v13567_v10 = vld [vmem:[%s18736_s1 + $0x6c] ss:$24 sps:$4 sm:$0xff]   ;;  %v13571_v12 = vld [vmem:[%s18736_s1 + $0x68] ss:$24 sps:$4 sm:$0xff]  }
   0x5   :  { %2169 = vmatprep.subr.bf16.mxu1 %v13561_v6  ;;  %v13569_v11 = vld [vmem:[%s18736_s1 + $0x94] ss:$24 sps:$4 sm:$0xff]   ;;  %v13572_v14 = vld [vmem:[%s18736_s1 + $0x90] ss:$24 sps:$4 sm:$0xff]   ;;  %v13575_v15 = vld [vmem:[%s18736_s1 + $0xc4] ss:$24 sps:$4 sm:$0xff]  }
   0x6   :  { %v13573_v13 = vld [vmem:[%s18736_s1 + $0x9c] ss:$24 sps:$4 sm:$0xff]   ;;  %v13577_v16 = vld [vmem:[%s18736_s1 + $0x98] ss:$24 sps:$4 sm:$0xff]   ;;  %v13579_v17 = vld [vmem:[%s18736_s1 + $0xcc] ss:$24 sps:$4 sm:$0xff]  }
   0x7   :  { %1524 = vmatpush1.bf16.msra.mxu0 %v13560_v5  ;;  %v13578_v18 = vld [vmem:[%s18736_s1 + $0xc0] ss:$24 sps:$4 sm:$0xff]   ;;  %v13581_v19 = vld [vmem:[%s18736_s1 + $0xf4] ss:$24 sps:$4 sm:$0xff]   ;;  %v13584_v22 = vld [vmem:[%s18736_s1 + $0xf0] ss:$24 sps:$4 sm:$0xff]  }
   0x8   :  { %1525 = vmatprep.subr.bf16.mxu0 %v13563_v7  ;;  %2170 = vmatpush1.bf16.msra.mxu1 %v13565_v8  ;;  %v13583_v20 = vld [vmem:[%s18736_s1 + $0xc8] ss:$24 sps:$4 sm:$0xff]   ;;  %v13585_v21 = vld [vmem:[%s18736_s1 + $0xfc] ss:$24 sps:$4 sm:$0xff]   ;;  %v13589_v24 = vld [vmem:[%s18736_s1 + $0xf8] ss:$24 sps:$4 sm:$0xff]  }
   0x9   :  { %2171 = vmatprep.subr.bf16.mxu1 %v13567_v10  ;;  %v13587_v23 = vld [vmem:[%s18736_s1 + $0x124] ss:$24 sps:$4 sm:$0xff]   ;;  %v13590_v26 = vld [vmem:[%s18736_s1 + $0x120] ss:$24 sps:$4 sm:$0xff]   ;;  %v13593_v27 = vld [vmem:[%s18736_s1 + $0x154] ss:$24 sps:$4 sm:$0xff]  }
   0xa   :  { %v13591_v25 = vld [vmem:[%s18736_s1 + $0x12c] ss:$24 sps:$4 sm:$0xff]   ;;  %v13595_v28 = vld [vmem:[%s18736_s1 + $0x128] ss:$24 sps:$4 sm:$0xff]   ;;  %v13597_v29 = vld [vmem:[%s18736_s1 + $0x15c] ss:$24 sps:$4 sm:$0xff]  }
   0xb   :  { %1526 = vmatpush1.bf16.msra.mxu0 %v13566_v9  ;;  %v13596_v30 = vld [vmem:[%s18736_s1 + $0x150] ss:$24 sps:$4 sm:$0xff]   ;;  %v13599_v31 = vld [vmem:[%s18736_s1 + $0x184] ss:$24 sps:$4 sm:$0xff]   ;;  %v13602_v34 = vld [vmem:[%s18736_s1 + $0x180] ss:$24 sps:$4 sm:$0xff]  }
   0xc   :  { %1527 = vmatprep.subr.bf16.mxu0 %v13569_v11  ;;  %2172 = vmatpush1.bf16.msra.mxu1 %v13571_v12  ;;  %v13601_v32 = vld [vmem:[%s18736_s1 + $0x158] ss:$24 sps:$4 sm:$0xff]   ;;  %v13603_v33 = vld [vmem:[%s18736_s1 + $0x18c] ss:$24 sps:$4 sm:$0xff]   ;;  %v13607_v36 = vld [vmem:[%s18736_s1 + $0x188] ss:$24 sps:$4 sm:$0xff]  }
   0xd   :  { %2173 = vmatprep.subr.bf16.mxu1 %v13573_v13  ;;  %v13605_v35 = vld [vmem:[%s18736_s1 + $0x1b4] ss:$24 sps:$4 sm:$0xff]   ;;  %v13608_v38 = vld [vmem:[%s18736_s1 + $0x1b0] ss:$24 sps:$4 sm:$0xff]   ;;  %v13611_v39 = vld [vmem:[%s18736_s1 + $0x1e4] ss:$24 sps:$4 sm:$0xff]  }
   0xe   :  { %v13609_v37 = vld [vmem:[%s18736_s1 + $0x1bc] ss:$24 sps:$4 sm:$0xff]   ;;  %v13613_v40 = vld [vmem:[%s18736_s1 + $0x1b8] ss:$24 sps:$4 sm:$0xff]   ;;  %v13615_v41 = vld [vmem:[%s18736_s1 + $0x1ec] ss:$24 sps:$4 sm:$0xff]  }
   0xf   :  { %1528 = vmatpush1.bf16.msra.mxu0 %v13572_v14  ;;  %v13614_v42 = vld [vmem:[%s18736_s1 + $0x1e0] ss:$24 sps:$4 sm:$0xff]   ;;  %v13617_v43 = vld [vmem:[%s18736_s1 + $0x214] ss:$24 sps:$4 sm:$0xff]   ;;  %v13645_v46 = vld [vmem:[%s18737_s0 + $0x4] ss:$12 sps:$4 sm:$0xff]  }
  0x10   :  { %1529 = vmatprep.subr.bf16.mxu0 %v13575_v15  ;;  %2174 = vmatpush1.bf16.msra.mxu1 %v13577_v16  ;;  %v13619_v44 = vld [vmem:[%s18736_s1 + $0x1e8] ss:$24 sps:$4 sm:$0xff]   ;;  %v13621_v45 = vld [vmem:[%s18736_s1 + $0x21c] ss:$24 sps:$4 sm:$0xff]   ;;  %v13625_v49 = vld [vmem:[%s18736_s1 + $0x218] ss:$24 sps:$4 sm:$0xff]  }
  0x11   :  { %2175 = vmatprep.subr.bf16.mxu1 %v13579_v17  ;;  %v13620_v47 = vld [vmem:[%s18736_s1 + $0x210] ss:$24 sps:$4 sm:$0xff]   ;;  %v13623_v48 = vld [vmem:[%s18736_s1 + $0x244] ss:$24 sps:$4 sm:$0xff]   ;;  %1553 = vmatprep.mubr.bf16.mxu0 %v13645_v46  ;;  %v13626_v51 = vld [vmem:[%s18736_s1 + $0x240] ss:$24 sps:$4 sm:$0xff]  }
  0x12   :  { %2199 = vmatprep.mubr.bf16.mxu1 %v13645_v46  ;;  %v13627_v50 = vld [vmem:[%s18736_s1 + $0x24c] ss:$24 sps:$4 sm:$0xff]   ;;  %v13631_v53 = vld [vmem:[%s18736_s1 + $0x248] ss:$24 sps:$4 sm:$0xff]   ;;  %v13633_v54 = vld [vmem:[%s18736_s1 + $0x27c] ss:$24 sps:$4 sm:$0xff]  }
  0x13   :  { %1530 = vmatpush1.bf16.msra.mxu0 %v13578_v18  ;;  %v13629_v52 = vld [vmem:[%s18736_s1 + $0x274] ss:$24 sps:$4 sm:$0xff]   ;;  %v13632_v55 = vld [vmem:[%s18736_s1 + $0x270] ss:$24 sps:$4 sm:$0xff]   ;;  %v13635_v56 = vld [vmem:[%s18736_s1 + $0x2a4] ss:$24 sps:$4 sm:$0xff]  }
  0x14   :  { %1531 = vmatprep.subr.bf16.mxu0 %v13581_v19  ;;  %2176 = vmatpush1.bf16.msra.mxu1 %v13583_v20  ;;  %v13637_v57 = vld [vmem:[%s18736_s1 + $0x278] ss:$24 sps:$4 sm:$0xff]   ;;  %v13639_v58 = vld [vmem:[%s18736_s1 + $0x2ac] ss:$24 sps:$4 sm:$0xff]   ;;  %v13643_v61 = vld [vmem:[%s18736_s1 + $0x2a8] ss:$24 sps:$4 sm:$0xff]  }
  0x15   :  { %2177 = vmatprep.subr.bf16.mxu1 %v13585_v21  ;;  %v13638_v59 = vld [vmem:[%s18736_s1 + $0x2a0] ss:$24 sps:$4 sm:$0xff]   ;;  %v13641_v60 = vld [vmem:[%s18736_s1 + $0x2d4] ss:$24 sps:$4 sm:$0xff]   ;;  %v13644_v63 = vld [vmem:[%s18736_s1 + $0x2d0] ss:$24 sps:$4 sm:$0xff]  }
  0x16   :  { %v13647_v62 = vld [vmem:[%s18736_s1 + $0x2dc] ss:$24 sps:$4 sm:$0xff]   ;;  %v13653_v1 = vld [vmem:[%s18736_s1 + $0x2d8] ss:$24 sps:$4 sm:$0xff]   ;;  %v13649_v2 = vld [vmem:[%s18737_s0] ss:$12 sps:$4 sm:$0xff]  }
  0x17   :  { %1532 = vmatpush1.bf16.msra.mxu0 %v13584_v22  ;;  %v13652_v0 = vld [vmem:[%s18736_s1 + $0x304] ss:$24 sps:$4 sm:$0xff]   ;;  %v13650_v3 = vld [vmem:[%s18736_s1 + $0x300] ss:$24 sps:$4 sm:$0xff]   ;;  %v13665_v5 = vld [vmem:[%s18736_s1 + $0x334] ss:$24 sps:$4 sm:$0xff]  }
  0x18   :  { %1533 = vmatprep.subr.bf16.mxu0 %v13587_v23  ;;  %2178 = vmatpush1.bf16.msra.mxu1 %v13589_v24  ;;  %v13654_v4 = vld [vmem:[%s18737_s0 + $0x1c] ss:$12 sps:$4 sm:$0xff]   ;;  %v13656_v8 = vld [vmem:[%s18737_s0 + $0x18] ss:$12 sps:$4 sm:$0xff]   ;;  %v13657_v9 = vld [vmem:[%s18737_s0 + $0x34] ss:$12 sps:$4 sm:$0xff]  }
  0x19   :  { %2179 = vmatprep.subr.bf16.mxu1 %v13591_v25  ;;  %v13663_v6 = vld [vmem:[%s18736_s1 + $0x330] ss:$24 sps:$4 sm:$0xff]   ;;  %v13680_v7 = vld [vmem:[%s18736_s1 + $0x364] ss:$24 sps:$4 sm:$0xff]   ;;  %v13678_v10 = vld [vmem:[%s18736_s1 + $0x360] ss:$24 sps:$4 sm:$0xff]  }
  0x1a   :  { %v13694_v11 = vld [vmem:[%s18736_s1 + $0x394] ss:$24 sps:$4 sm:$0xff]   ;;  %v13692_v12 = vld [vmem:[%s18736_s1 + $0x390] ss:$24 sps:$4 sm:$0xff]   ;;  %v13707_v14 = vld [vmem:[%s18736_s1 + $0x3c4] ss:$24 sps:$4 sm:$0xff]  }
  0x1b   :  { %1534 = vmatpush1.bf16.msra.mxu0 %v13590_v26  ;;  %v13659_v13 = vld [vmem:[%s18737_s0 + $0x30] ss:$12 sps:$4 sm:$0xff]   ;;  %v13660_v15 = vld [vmem:[%s18737_s0 + $0x4c] ss:$12 sps:$4 sm:$0xff]   ;;  %v13662_v19 = vld [vmem:[%s18737_s0 + $0x48] ss:$12 sps:$4 sm:$0xff]  }
  0x1c   :  { %1535 = vmatprep.subr.bf16.mxu0 %v13593_v27  ;;  %2180 = vmatpush1.bf16.msra.mxu1 %v13595_v28  ;;  %v13705_v16 = vld [vmem:[%s18736_s1 + $0x3c0] ss:$24 sps:$4 sm:$0xff]   ;;  %v13720_v17 = vld [vmem:[%s18736_s1 + $0x3f0] ss:$24 sps:$4 sm:$0xff]   ;;  %v13722_v18 = vld [vmem:[%s18736_s1 + $0x3f4] ss:$24 sps:$4 sm:$0xff]  }
  0x1d   :  { %2181 = vmatprep.subr.bf16.mxu1 %v13597_v29  ;;  %v13666_v20 = vld [vmem:[%s18737_s0 + $0x64] ss:$12 sps:$4 sm:$0xff]   ;;  %v13668_v21 = vld [vmem:[%s18737_s0 + $0x60] ss:$12 sps:$4 sm:$0xff]   ;;  %v13669_v22 = vld [vmem:[%s18737_s0 + $0x7c] ss:$12 sps:$4 sm:$0xff]  }
  0x1e   :  { %v13671_v23 = vld [vmem:[%s18737_s0 + $0x78] ss:$12 sps:$4 sm:$0xff]   ;;  %v13672_v24 = vld [vmem:[%s18737_s0 + $0x94] ss:$12 sps:$4 sm:$0xff]   ;;  %v13674_v25 = vld [vmem:[%s18737_s0 + $0x90] ss:$12 sps:$4 sm:$0xff]  }
  0x1f   :  { %1536 = vmatpush1.bf16.msra.mxu0 %v13596_v30  ;;  %v13732_v26 = vld [vmem:[%s18736_s1 + $0x420] ss:$24 sps:$4 sm:$0xff]   ;;  %v13734_v27 = vld [vmem:[%s18736_s1 + $0x424] ss:$24 sps:$4 sm:$0xff]   ;;  %v13677_v29 = vld [vmem:[%s18737_s0 + $0xa8] ss:$12 sps:$4 sm:$0xff]  }
  0x20   :  { %1537 = vmatprep.subr.bf16.mxu0 %v13599_v31  ;;  %2182 = vmatpush1.bf16.msra.mxu1 %v13601_v32  ;;  %v13675_v28 = vld [vmem:[%s18737_s0 + $0xac] ss:$12 sps:$4 sm:$0xff]   ;;  %v13681_v30 = vld [vmem:[%s18737_s0 + $0xc4] ss:$12 sps:$4 sm:$0xff]   ;;  %v13684_v32 = vld [vmem:[%s18737_s0 + $0xdc] ss:$12 sps:$4 sm:$0xff]  }
  0x21   :  { %2183 = vmatprep.subr.bf16.mxu1 %v13603_v33  ;;  %v13683_v31 = vld [vmem:[%s18737_s0 + $0xc0] ss:$12 sps:$4 sm:$0xff]   ;;  %v13686_v33 = vld [vmem:[%s18737_s0 + $0xd8] ss:$12 sps:$4 sm:$0xff]   ;;  %v13695_v46 = vld [vmem:[%s18737_s0 + $0x108] ss:$12 sps:$4 sm:$0xff]  }
  0x23   :  { %1538 = vmatpush1.bf16.msra.mxu0 %v13602_v34  ;;  %v13687_v34 = vld [vmem:[%s18737_s0 + $0xf4] ss:$12 sps:$4 sm:$0xff]  }
  0x24   :  { %1539 = vmatprep.subr.bf16.mxu0 %v13605_v35  ;;  %2184 = vmatpush1.bf16.msra.mxu1 %v13607_v36  ;;  %v13747_v35 = vld [vmem:[%s18736_s1 + $0x450] ss:$24 sps:$4 sm:$0xff]   ;;  %v13749_v36 = vld [vmem:[%s18736_s1 + $0x454] ss:$24 sps:$4 sm:$0xff]  }
  0x25   :  { %2185 = vmatprep.subr.bf16.mxu1 %v13609_v37  ;;  %v13752_v37 = vld [vmem:[%s18736_s1 + $0x30c] ss:$24 sps:$4 sm:$0xff]  }
  0x27   :  { %1540 = vmatpush1.bf16.msra.mxu0 %v13608_v38  ;;  %v13750_v38 = vld [vmem:[%s18736_s1 + $0x308] ss:$24 sps:$4 sm:$0xff]  }
  0x28   :  { %1541 = vmatprep.subr.bf16.mxu0 %v13611_v39  ;;  %2186 = vmatpush1.bf16.msra.mxu1 %v13613_v40  ;;  %v13757_v39 = vld [vmem:[%s18736_s1 + $0x33c] ss:$24 sps:$4 sm:$0xff]  }
  0x29   :  { %2187 = vmatprep.subr.bf16.mxu1 %v13615_v41  ;;  %v13689_v40 = vld [vmem:[%s18737_s0 + $0xf0] ss:$12 sps:$4 sm:$0xff]  }
  0x2a   :  { %v13755_v41 = vld [vmem:[%s18736_s1 + $0x338] ss:$24 sps:$4 sm:$0xff]  }
  0x2b   :  { %1542 = vmatpush1.bf16.msra.mxu0 %v13614_v42  ;;  %v13690_v42 = vld [vmem:[%s18737_s0 + $0x10c] ss:$12 sps:$4 sm:$0xff]  }
  0x2c   :  { %1543 = vmatprep.subr.bf16.mxu0 %v13617_v43  ;;  %2188 = vmatpush1.bf16.msra.mxu1 %v13619_v44  ;;  %v13761_v43 = vld [vmem:[%s18736_s1 + $0x36c] ss:$24 sps:$4 sm:$0xff]   ;;  %v13759_v44 = vld [vmem:[%s18736_s1 + $0x368] ss:$24 sps:$4 sm:$0xff]  }
  0x2d   :  { %2189 = vmatprep.subr.bf16.mxu1 %v13621_v45  ;;  %v13766_v45 = vld [vmem:[%s18736_s1 + $0x39c] ss:$24 sps:$4 sm:$0xff]  }
  0x2f   :  { %1544 = vmatpush1.bf16.msra.mxu0 %v13620_v47  ;;  %v13764_v47 = vld [vmem:[%s18736_s1 + $0x398] ss:$24 sps:$4 sm:$0xff]  }
  0x30   :  { %1545 = vmatprep.subr.bf16.mxu0 %v13623_v48  ;;  %2190 = vmatpush1.bf16.msra.mxu1 %v13625_v49  ;;  %v13696_v48 = vld [vmem:[%s18737_s0 + $0x124] ss:$12 sps:$4 sm:$0xff]  }
  0x31   :  { %2191 = vmatprep.subr.bf16.mxu1 %v13627_v50  ;;  %v13770_v49 = vld [vmem:[%s18736_s1 + $0x3cc] ss:$24 sps:$4 sm:$0xff]   ;;  %v13768_v50 = vld [vmem:[%s18736_s1 + $0x3c8] ss:$24 sps:$4 sm:$0xff]  }
  0x33   :  { %1546 = vmatpush1.bf16.msra.mxu0 %v13626_v51  ;;  %v13775_v51 = vld [vmem:[%s18736_s1 + $0x3fc] ss:$24 sps:$4 sm:$0xff]  }
  0x34   :  { %1547 = vmatprep.subr.bf16.mxu0 %v13629_v52  ;;  %2192 = vmatpush1.bf16.msra.mxu1 %v13631_v53  ;;  %v13698_v52 = vld [vmem:[%s18737_s0 + $0x120] ss:$12 sps:$4 sm:$0xff]   ;;  %v13773_v53 = vld [vmem:[%s18736_s1 + $0x3f8] ss:$24 sps:$4 sm:$0xff]  }
  0x35   :  { %2193 = vmatprep.subr.bf16.mxu1 %v13633_v54  ;;  %v13699_v54 = vld [vmem:[%s18737_s0 + $0x13c] ss:$12 sps:$4 sm:$0xff]  }
  0x37   :  { %1548 = vmatpush1.bf16.msra.mxu0 %v13632_v55  ;;  %v13779_v55 = vld [vmem:[%s18736_s1 + $0x42c] ss:$24 sps:$4 sm:$0xff]  }
  0x38   :  { %1549 = vmatprep.subr.bf16.mxu0 %v13635_v56  ;;  %2194 = vmatpush1.bf16.msra.mxu1 %v13637_v57  ;;  %v13777_v56 = vld [vmem:[%s18736_s1 + $0x428] ss:$24 sps:$4 sm:$0xff]   ;;  %v13782_v57 = vld [vmem:[%s18736_s1 + $0x45c] ss:$24 sps:$4 sm:$0xff]  }
  0x39   :  { %2195 = vmatprep.subr.bf16.mxu1 %v13639_v58  ;;  %v13701_v58 = vld [vmem:[%s18737_s0 + $0x138] ss:$12 sps:$4 sm:$0xff]  }
  0x3b   :  { %1550 = vmatpush1.bf16.msra.mxu0 %v13638_v59  ;;  %v13780_v59 = vld [vmem:[%s18736_s1 + $0x458] ss:$24 sps:$4 sm:$0xff]  }
  0x3c   :  { %1551 = vmatprep.subr.bf16.mxu0 %v13641_v60  ;;  %2196 = vmatpush1.bf16.msra.mxu1 %v13643_v61  ;;  %v13702_v60 = vld [vmem:[%s18737_s0 + $0x154] ss:$12 sps:$4 sm:$0xff]  }
  0x3d   :  { %2197 = vmatprep.subr.bf16.mxu1 %v13647_v62  ;;  %v13786_v61 = vld [vmem:[%s18736_s1 + $0x14] ss:$24 sps:$4 sm:$0xff]   ;;  %v13704_v62 = vld [vmem:[%s18737_s0 + $0x150] ss:$12 sps:$4 sm:$0xff]  }
  0x3f   :  { %1552 = vmatpush1.bf16.msra.mxu0 %v13644_v63  ;;  %v13708_v63 = vld [vmem:[%s18737_s0 + $0x16c] ss:$12 sps:$4 sm:$0xff]  }
  0x40   :  { %1844 = vmatprep.subr.bf16.mxu0 %v13652_v0  ;;  %2198 = vmatpush1.bf16.msra.mxu1 %v13653_v1  ;;  %v13710_v0 = vld [vmem:[%s18737_s0 + $0x168] ss:$12 sps:$4 sm:$0xff]   ;;  %v13711_v1 = vld [vmem:[%s18737_s0 + $0x184] ss:$12 sps:$4 sm:$0xff]  }
  0x41   :  { %2490 = vmatprep.subr.bf16.mxu1 %v13752_v37  ;;  %v13805_v37 = vld [vmem:[%s18736_s1 + $0xd4] ss:$24 sps:$4 sm:$0xff]  }
  0x42   :  { %1554 = vmatmul.mubr.bf16.vlgmr.msra.gmra.mrb[0].mxu0 %v13649_v2 }
  0x43   :  { %1845 = vmatpush1.bf16.msra.mxu0 %v13650_v3  ;;  %1563 = vmatprep.mubr.bf16.mxu0 %v13654_v4  ;;  %v13714_v3 = vld [vmem:[%s18737_s0 + $0x19c] ss:$12 sps:$4 sm:$0xff]  }
  0x44   :  { %2200 = vmatmul.mubr.bf16.vlgmr.msra.gmra.mrb[0].mxu1 %v13649_v2  ;;  %1846 = vmatprep.subr.bf16.mxu0 %v13665_v5  ;;  %v13713_v2 = vld [vmem:[%s18737_s0 + $0x180] ss:$12 sps:$4 sm:$0xff]  }
  0x45   :  { %2209 = vmatprep.mubr.bf16.mxu1 %v13654_v4  ;;  %2491 = vmatpush1.bf16.msra.mxu1 %v13750_v38  ;;  %v13716_v4 = vld [vmem:[%s18737_s0 + $0x198] ss:$12 sps:$4 sm:$0xff]   ;;  %v13717_v5 = vld [vmem:[%s18737_s0 + $0x1b4] ss:$12 sps:$4 sm:$0xff]  }
  0x46   :  { %2492 = vmatprep.subr.bf16.mxu1 %v13757_v39  ;;  %v13791_v38 = vld [vmem:[%s18737_s0 + $0x38] ss:$12 sps:$4 sm:$0xff]   ;;  %v13803_v39 = vld [vmem:[%s18736_s1 + $0xd0] ss:$24 sps:$4 sm:$0xff]  }
  0x47   :  { %1847 = vmatpush1.bf16.msra.mxu0 %v13663_v6  ;;  %v13719_v6 = vld [vmem:[%s18737_s0 + $0x1b0] ss:$12 sps:$4 sm:$0xff]  }
  0x48   :  { %1848 = vmatprep.subr.bf16.mxu0 %v13680_v7  ;;  %v13723_v7 = vld [vmem:[%s18737_s0 + $0x1cc] ss:$12 sps:$4 sm:$0xff]  }
  0x49   :  { %2493 = vmatpush1.bf16.msra.mxu1 %v13755_v41  ;;  %v13808_v41 = vld [vmem:[%s18736_s1 + $0x100] ss:$24 sps:$4 sm:$0xff]  }
  0x4a   :  { %1564 = vmatmul.mubr.bf16.gmra.mrb[4].mxu0 %v13656_v8  ;;  %2494 = vmatprep.subr.bf16.mxu1 %v13761_v43  ;;  %v13792_v43 = vld [vmem:[%s18737_s0 + $0x50] ss:$12 sps:$4 sm:$0xff]  }
  0x4b   :  { %1573 = vmatprep.mubr.bf16.mxu0 %v13657_v9  ;;  %1849 = vmatpush1.bf16.msra.mxu0 %v13678_v10  ;;  %v13728_v10 = vld [vmem:[%s18737_s0 + $0x1e0] ss:$12 sps:$4 sm:$0xff]  }
  0x4c   :  { %2210 = vmatmul.mubr.bf16.gmra.mrb[4].mxu1 %v13656_v8  ;;  %1850 = vmatprep.subr.bf16.mxu0 %v13694_v11  ;;  %v13725_v8 = vld [vmem:[%s18737_s0 + $0x1c8] ss:$12 sps:$4 sm:$0xff]  }
  0x4d   :  { %2219 = vmatprep.mubr.bf16.mxu1 %v13657_v9  ;;  %2495 = vmatpush1.bf16.msra.mxu1 %v13759_v44  ;;  %v13726_v9 = vld [vmem:[%s18737_s0 + $0x1e4] ss:$12 sps:$4 sm:$0xff]   ;;  %v13729_v11 = vld [vmem:[%s18737_s0 + $0x1fc] ss:$12 sps:$4 sm:$0xff]  }
  0x4e   :  { %2496 = vmatprep.subr.bf16.mxu1 %v13766_v45  ;;  %v13812_v44 = vld [vmem:[%s18736_s1 + $0x130] ss:$24 sps:$4 sm:$0xff]   ;;  %v13819_v45 = vld [vmem:[%s18736_s1 + $0x164] ss:$24 sps:$4 sm:$0xff]  }
  0x4f   :  { %1851 = vmatpush1.bf16.msra.mxu0 %v13692_v12  ;;  %v13731_v12 = vld [vmem:[%s18737_s0 + $0x1f8] ss:$12 sps:$4 sm:$0xff]  }
  0x50   :  { %1852 = vmatprep.subr.bf16.mxu0 %v13707_v14  ;;  %v13737_v14 = vld [vmem:[%s18737_s0 + $0x210] ss:$12 sps:$4 sm:$0xff]  }
  0x51   :  { %2497 = vmatpush1.bf16.msra.mxu1 %v13764_v47  ;;  %v13824_v47 = vld [vmem:[%s18736_s1 + $0x194] ss:$24 sps:$4 sm:$0xff]  }
  0x52   :  { %1574 = vmatmul.mubr.bf16.gmra.mrb[8].mxu0 %v13659_v13  ;;  %2498 = vmatprep.subr.bf16.mxu1 %v13770_v49  ;;  %v13822_v49 = vld [vmem:[%s18736_s1 + $0x190] ss:$24 sps:$4 sm:$0xff]  }
  0x53   :  { %1583 = vmatprep.mubr.bf16.mxu0 %v13660_v15  ;;  %1853 = vmatpush1.bf16.msra.mxu0 %v13705_v16  ;;  %v13740_v16 = vld [vmem:[%s18737_s0 + $0x228] ss:$12 sps:$4 sm:$0xff]  }
  0x54   :  { %2220 = vmatmul.mubr.bf16.gmra.mrb[8].mxu1 %v13659_v13  ;;  %1854 = vmatprep.subr.bf16.mxu0 %v13722_v18  ;;  %v13735_v13 = vld [vmem:[%s18737_s0 + $0x214] ss:$12 sps:$4 sm:$0xff]  }
  0x55   :  { %2229 = vmatprep.mubr.bf16.mxu1 %v13660_v15  ;;  %2499 = vmatpush1.bf16.msra.mxu1 %v13768_v50  ;;  %v13738_v15 = vld [vmem:[%s18737_s0 + $0x22c] ss:$12 sps:$4 sm:$0xff]   ;;  %v13829_v50 = vld [vmem:[%s18736_s1 + $0x1c4] ss:$24 sps:$4 sm:$0xff]  }
  0x56   :  { %2500 = vmatprep.subr.bf16.mxu1 %v13775_v51  ;;  %v13743_v18 = vld [vmem:[%s18737_s0 + $0x240] ss:$12 sps:$4 sm:$0xff]  }
  0x57   :  { %1855 = vmatpush1.bf16.msra.mxu0 %v13720_v17  ;;  %v13741_v17 = vld [vmem:[%s18737_s0 + $0x244] ss:$12 sps:$4 sm:$0xff]   ;;  %v13827_v51 = vld [vmem:[%s18736_s1 + $0x1c0] ss:$24 sps:$4 sm:$0xff]  }
  0x58   :  { %1856 = vmatprep.subr.bf16.mxu0 %v13734_v27  ;;  %v18750_v27 = vmov 0  }
  0x59   :  { %2501 = vmatpush1.bf16.msra.mxu1 %v13773_v53  ;;  %v13797_v53 = vld [vmem:[%s18737_s0 + $0x80] ss:$12 sps:$4 sm:$0xff]  }
  0x5a   :  { %1584 = vmatmul.mubr.bf16.gmra.mrb[12].mxu0 %v13662_v19  ;;  %2502 = vmatprep.subr.bf16.mxu1 %v13779_v55  ;;  %v13839_v55 = vld [vmem:[%s18736_s1 + $0x224] ss:$24 sps:$4 sm:$0xff]  }
  0x5b   :  { %1593 = vmatprep.mubr.bf16.mxu0 %v13666_v20  ;;  %1857 = vmatpush1.bf16.msra.mxu0 %v13732_v26  ;;  %v13776_v26 = vld [vmem:[%s18737_s0 + $0x2a0] ss:$12 sps:$4 sm:$0xff]  }
  0x5c   :  { %2230 = vmatmul.mubr.bf16.gmra.mrb[12].mxu1 %v13662_v19  ;;  %1858 = vmatprep.subr.bf16.mxu0 %v13749_v36  ;;  %v13744_v19 = vld [vmem:[%s18737_s0 + $0x25c] ss:$12 sps:$4 sm:$0xff]   ;;  %v13798_v36 = vld [vmem:[%s18736_s1 + $0xa0] ss:$24 sps:$4 sm:$0xff]  }
  0x5d   :  { %2239 = vmatprep.mubr.bf16.mxu1 %v13666_v20  ;;  %2503 = vmatpush1.bf16.msra.mxu1 %v13777_v56  ;;  %v13746_v20 = vld [vmem:[%s18737_s0 + $0x258] ss:$12 sps:$4 sm:$0xff]  }
  0x5e   :  { %2504 = vmatprep.subr.bf16.mxu1 %v13782_v57  ;;  %v13837_v56 = vld [vmem:[%s18736_s1 + $0x220] ss:$24 sps:$4 sm:$0xff]   ;;  %v13843_v57 = vld [vmem:[%s18736_s1 + $0x254] ss:$24 sps:$4 sm:$0xff]  }
  0x5f   :  { %1859 = vmatpush1.bf16.msra.mxu0 %v13747_v35  ;;  %v13800_v35 = vld [vmem:[%s18736_s1 + $0xa4] ss:$24 sps:$4 sm:$0xff]  }
  0x60   :  { %2813 = vmatprep.subr.bf16.mxu0 %v13786_v61  ;;  %v13846_v61 = vld [vmem:[%s18736_s1 + $0x280] ss:$24 sps:$4 sm:$0xff]  }
  0x61   :  { %2505 = vmatpush1.bf16.msra.mxu1 %v13780_v59  ;;  %v13841_v59 = vld [vmem:[%s18736_s1 + $0x250] ss:$24 sps:$4 sm:$0xff]  }
  0x62   :  { %1594 = vmatmul.mubr.bf16.gmra.mrb[16].mxu0 %v13668_v21 }
  0x63   :  { %1603 = vmatprep.mubr.bf16.mxu0 %v13669_v22 }
  0x64   :  { %2240 = vmatmul.mubr.bf16.gmra.mrb[16].mxu1 %v13668_v21  ;;  %v13753_v21 = vld [vmem:[%s18737_s0 + $0x274] ss:$12 sps:$4 sm:$0xff]  }
  0x65   :  { %2249 = vmatprep.mubr.bf16.mxu1 %v13669_v22  ;;  %v13758_v22 = vld [vmem:[%s18737_s0 + $0x270] ss:$12 sps:$4 sm:$0xff]  }
  0x6a   :  { %1604 = vmatmul.mubr.bf16.gmra.mrb[20].mxu0 %v13671_v23 }
  0x6b   :  { %1613 = vmatprep.mubr.bf16.mxu0 %v13672_v24 }
  0x6c   :  { %2250 = vmatmul.mubr.bf16.gmra.mrb[20].mxu1 %v13671_v23  ;;  %v13762_v23 = vld [vmem:[%s18737_s0 + $0x28c] ss:$12 sps:$4 sm:$0xff]  }
  0x6d   :  { %2259 = vmatprep.mubr.bf16.mxu1 %v13672_v24  ;;  %v13767_v24 = vld [vmem:[%s18737_s0 + $0x288] ss:$12 sps:$4 sm:$0xff]  }
  0x72   :  { %1614 = vmatmul.mubr.bf16.gmra.mrb[24].mxu0 %v13674_v25 }
  0x73   :  { %1623 = vmatprep.mubr.bf16.mxu0 %v13675_v28 }
  0x74   :  { %2260 = vmatmul.mubr.bf16.gmra.mrb[24].mxu1 %v13674_v25  ;;  %v13771_v25 = vld [vmem:[%s18737_s0 + $0x2a4] ss:$12 sps:$4 sm:$0xff]  }
  0x75   :  { %2269 = vmatprep.mubr.bf16.mxu1 %v13675_v28  ;;  %v13783_v28 = vld [vmem:[%s18737_s0 + $0x8] ss:$12 sps:$4 sm:$0xff]  }
  0x7a   :  { %1624 = vmatmul.mubr.bf16.gmra.mrb[28].mxu0 %v13677_v29 }
  0x7b   :  { %1633 = vmatprep.mubr.bf16.mxu0 %v13681_v30 }
  0x7c   :  { %2270 = vmatmul.mubr.bf16.gmra.mrb[28].mxu1 %v13677_v29  ;;  %v13784_v29 = vld [vmem:[%s18736_s1 + $0x10] ss:$24 sps:$4 sm:$0xff]  }
  0x7d   :  { %2279 = vmatprep.mubr.bf16.mxu1 %v13681_v30  ;;  %v13790_v30 = vld [vmem:[%s18736_s1 + $0x44] ss:$24 sps:$4 sm:$0xff]  }
  0x82   :  { %1634 = vmatmul.mubr.bf16.gmra.mrb[32].mxu0 %v13683_v31 }
  0x83   :  { %1643 = vmatprep.mubr.bf16.mxu0 %v13684_v32 }
  0x84   :  { %2280 = vmatmul.mubr.bf16.gmra.mrb[32].mxu1 %v13683_v31  ;;  %v13788_v31 = vld [vmem:[%s18736_s1 + $0x40] ss:$24 sps:$4 sm:$0xff]  }
  0x85   :  { %2289 = vmatprep.mubr.bf16.mxu1 %v13684_v32  ;;  %v13795_v32 = vld [vmem:[%s18736_s1 + $0x74] ss:$24 sps:$4 sm:$0xff]  }
  0x8a   :  { %1644 = vmatmul.mubr.bf16.gmra.mrb[36].mxu0 %v13686_v33 }
  0x8b   :  { %1653 = vmatprep.mubr.bf16.mxu0 %v13687_v34 }
  0x8c   :  { %2290 = vmatmul.mubr.bf16.gmra.mrb[36].mxu1 %v13686_v33  ;;  %v13787_v33 = vld [vmem:[%s18737_s0 + $0x20] ss:$12 sps:$4 sm:$0xff]  }
  0x8d   :  { %2299 = vmatprep.mubr.bf16.mxu1 %v13687_v34  ;;  %v13793_v34 = vld [vmem:[%s18736_s1 + $0x70] ss:$24 sps:$4 sm:$0xff]  }
  0x92   :  { %1654 = vmatmul.mubr.bf16.gmra.mrb[40].mxu0 %v13689_v40 }
  0x93   :  { %1663 = vmatprep.mubr.bf16.mxu0 %v13690_v42 }
  0x94   :  { %2300 = vmatmul.mubr.bf16.gmra.mrb[40].mxu1 %v13689_v40  ;;  %v13810_v40 = vld [vmem:[%s18736_s1 + $0x104] ss:$24 sps:$4 sm:$0xff]  }
  0x95   :  { %2309 = vmatprep.mubr.bf16.mxu1 %v13690_v42  ;;  %v13814_v42 = vld [vmem:[%s18736_s1 + $0x134] ss:$24 sps:$4 sm:$0xff]  }
  0x9a   :  { %1664 = vmatmul.mubr.bf16.gmra.mrb[44].mxu0 %v13695_v46 }
  0x9b   :  { %1673 = vmatprep.mubr.bf16.mxu0 %v13696_v48 }
  0x9c   :  { %2310 = vmatmul.mubr.bf16.gmra.mrb[44].mxu1 %v13695_v46  ;;  %v13817_v46 = vld [vmem:[%s18736_s1 + $0x160] ss:$24 sps:$4 sm:$0xff]  }
  0x9d   :  { %2319 = vmatprep.mubr.bf16.mxu1 %v13696_v48  ;;  %v13796_v48 = vld [vmem:[%s18737_s0 + $0x68] ss:$12 sps:$4 sm:$0xff]  }
  0xa2   :  { %1674 = vmatmul.mubr.bf16.gmra.mrb[48].mxu0 %v13698_v52 }
  0xa3   :  { %1683 = vmatprep.mubr.bf16.mxu0 %v13699_v54 }
  0xa4   :  { %2320 = vmatmul.mubr.bf16.gmra.mrb[48].mxu1 %v13698_v52  ;;  %v13834_v52 = vld [vmem:[%s18736_s1 + $0x1f4] ss:$24 sps:$4 sm:$0xff]  }
  0xa5   :  { %2329 = vmatprep.mubr.bf16.mxu1 %v13699_v54  ;;  %v13832_v54 = vld [vmem:[%s18736_s1 + $0x1f0] ss:$24 sps:$4 sm:$0xff]  }
  0xaa   :  { %1684 = vmatmul.mubr.bf16.gmra.mrb[52].mxu0 %v13701_v58 }
  0xab   :  { %1693 = vmatprep.mubr.bf16.mxu0 %v13702_v60 }
  0xac   :  { %2330 = vmatmul.mubr.bf16.gmra.mrb[52].mxu1 %v13701_v58  ;;  %v13801_v58 = vld [vmem:[%s18737_s0 + $0x98] ss:$12 sps:$4 sm:$0xff]  }
  0xad   :  { %2339 = vmatprep.mubr.bf16.mxu1 %v13702_v60  ;;  %v13802_v60 = vld [vmem:[%s18737_s0 + $0xb0] ss:$12 sps:$4 sm:$0xff]  }
  0xb2   :  { %1694 = vmatmul.mubr.bf16.gmra.mrb[56].mxu0 %v13704_v62 }
  0xb3   :  { %1703 = vmatprep.mubr.bf16.mxu0 %v13708_v63 }
  0xb4   :  { %2340 = vmatmul.mubr.bf16.gmra.mrb[56].mxu1 %v13704_v62  ;;  %v13848_v62 = vld [vmem:[%s18736_s1 + $0x284] ss:$24 sps:$4 sm:$0xff]  }
  0xb5   :  { %2349 = vmatprep.mubr.bf16.mxu1 %v13708_v63  ;;  %v13806_v63 = vld [vmem:[%s18737_s0 + $0xc8] ss:$12 sps:$4 sm:$0xff]  }
  0xba   :  { %1704 = vmatmul.mubr.bf16.gmra.mrb[60].mxu0 %v13710_v0 }
  0xbb   :  { %1713 = vmatprep.mubr.bf16.mxu0 %v13711_v1 }
  0xbc   :  { %2350 = vmatmul.mubr.bf16.gmra.mrb[60].mxu1 %v13710_v0  ;;  %v13807_v0 = vld [vmem:[%s18737_s0 + $0xe0] ss:$12 sps:$4 sm:$0xff]  }
  0xbd   :  { %2359 = vmatprep.mubr.bf16.mxu1 %v13711_v1  ;;  %v13851_v1 = vld [vmem:[%s18736_s1 + $0x2b0] ss:$24 sps:$4 sm:$0xff]  }
  0xc2   :  { %1714 = vmatmul.mubr.bf16.gmra.mrb[64].mxu0 %v13713_v2 }
  0xc3   :  { %1723 = vmatprep.mubr.bf16.mxu0 %v13714_v3 }
  0xc4   :  { %2360 = vmatmul.mubr.bf16.gmra.mrb[64].mxu1 %v13713_v2  ;;  %v13853_v2 = vld [vmem:[%s18736_s1 + $0x2b4] ss:$24 sps:$4 sm:$0xff]  }
  0xc5   :  { %2369 = vmatprep.mubr.bf16.mxu1 %v13714_v3  ;;  %v13811_v3 = vld [vmem:[%s18737_s0 + $0xf8] ss:$12 sps:$4 sm:$0xff]  }
  0xca   :  { %1724 = vmatmul.mubr.bf16.gmra.mrb[68].mxu0 %v13716_v4 }
  0xcb   :  { %1733 = vmatprep.mubr.bf16.mxu0 %v13717_v5 }
  0xcc   :  { %2370 = vmatmul.mubr.bf16.gmra.mrb[68].mxu1 %v13716_v4  ;;  %v13815_v4 = vld [vmem:[%s18737_s0 + $0x110] ss:$12 sps:$4 sm:$0xff]  }
  0xcd   :  { %2379 = vmatprep.mubr.bf16.mxu1 %v13717_v5  ;;  %v13816_v5 = vld [vmem:[%s18737_s0 + $0x128] ss:$12 sps:$4 sm:$0xff]  }
  0xd2   :  { %1734 = vmatmul.mubr.bf16.gmra.mrb[72].mxu0 %v13719_v6 }
  0xd3   :  { %1743 = vmatprep.mubr.bf16.mxu0 %v13723_v7 }
  0xd4   :  { %2380 = vmatmul.mubr.bf16.gmra.mrb[72].mxu1 %v13719_v6  ;;  %v13856_v6 = vld [vmem:[%s18736_s1 + $0x2e0] ss:$24 sps:$4 sm:$0xff]  }
  0xd5   :  { %2389 = vmatprep.mubr.bf16.mxu1 %v13723_v7  ;;  %v13858_v7 = vld [vmem:[%s18736_s1 + $0x2e4] ss:$24 sps:$4 sm:$0xff]  }
  0xda   :  { %1744 = vmatmul.mubr.bf16.gmra.mrb[76].mxu0 %v13725_v8 }
  0xdb   :  { %1753 = vmatprep.mubr.bf16.mxu0 %v13726_v9 }
  0xdc   :  { %2390 = vmatmul.mubr.bf16.gmra.mrb[76].mxu1 %v13725_v8  ;;  %v13820_v8 = vld [vmem:[%s18737_s0 + $0x140] ss:$12 sps:$4 sm:$0xff]  }
  0xdd   :  { %2399 = vmatprep.mubr.bf16.mxu1 %v13726_v9  ;;  %v13821_v9 = vld [vmem:[%s18737_s0 + $0x158] ss:$12 sps:$4 sm:$0xff]  }
  0xe2   :  { %1754 = vmatmul.mubr.bf16.gmra.mrb[80].mxu0 %v13728_v10 }
  0xe3   :  { %1763 = vmatprep.mubr.bf16.mxu0 %v13729_v11 }
  0xe4   :  { %2400 = vmatmul.mubr.bf16.gmra.mrb[80].mxu1 %v13728_v10  ;;  %v13862_v10 = vld [vmem:[%s18736_s1 + $0x314] ss:$24 sps:$4 sm:$0xff]  }
  0xe5   :  { %2409 = vmatprep.mubr.bf16.mxu1 %v13729_v11  ;;  %v13825_v11 = vld [vmem:[%s18737_s0 + $0x170] ss:$12 sps:$4 sm:$0xff]  }
  0xea   :  { %1764 = vmatmul.mubr.bf16.gmra.mrb[84].mxu0 %v13731_v12 }
  0xeb   :  { %1773 = vmatprep.mubr.bf16.mxu0 %v13735_v13 }
  0xec   :  { %2410 = vmatmul.mubr.bf16.gmra.mrb[84].mxu1 %v13731_v12  ;;  %v13826_v12 = vld [vmem:[%s18737_s0 + $0x188] ss:$12 sps:$4 sm:$0xff]  }
  0xed   :  { %2419 = vmatprep.mubr.bf16.mxu1 %v13735_v13  ;;  %v13830_v13 = vld [vmem:[%s18737_s0 + $0x1a0] ss:$12 sps:$4 sm:$0xff]  }
  0xf2   :  { %1774 = vmatmul.mubr.bf16.gmra.mrb[88].mxu0 %v13737_v14 }
  0xf3   :  { %1783 = vmatprep.mubr.bf16.mxu0 %v13738_v15 }
  0xf4   :  { %2420 = vmatmul.mubr.bf16.gmra.mrb[88].mxu1 %v13737_v14  ;;  %v13831_v14 = vld [vmem:[%s18737_s0 + $0x1b8] ss:$12 sps:$4 sm:$0xff]  }
  0xf5   :  { %2429 = vmatprep.mubr.bf16.mxu1 %v13738_v15  ;;  %v13835_v15 = vld [vmem:[%s18737_s0 + $0x1d0] ss:$12 sps:$4 sm:$0xff]  }
  0xfa   :  { %1784 = vmatmul.mubr.bf16.gmra.mrb[92].mxu0 %v13740_v16 }
  0xfb   :  { %1793 = vmatprep.mubr.bf16.mxu0 %v13741_v17 }
  0xfc   :  { %2430 = vmatmul.mubr.bf16.gmra.mrb[92].mxu1 %v13740_v16  ;;  %v13836_v16 = vld [vmem:[%s18737_s0 + $0x1e8] ss:$12 sps:$4 sm:$0xff]  }
  0xfd   :  { %2439 = vmatprep.mubr.bf16.mxu1 %v13741_v17  ;;  %v13840_v17 = vld [vmem:[%s18737_s0 + $0x200] ss:$12 sps:$4 sm:$0xff]  }
 0x102   :  { %1794 = vmatmul.mubr.bf16.gmra.mrb[96].mxu0 %v13743_v18 }
 0x103   :  { %1803 = vmatprep.mubr.bf16.mxu0 %v13744_v19 }
 0x104   :  { %2440 = vmatmul.mubr.bf16.gmra.mrb[96].mxu1 %v13743_v18  ;;  %v13844_v18 = vld [vmem:[%s18737_s0 + $0x218] ss:$12 sps:$4 sm:$0xff]  }
 0x105   :  { %2449 = vmatprep.mubr.bf16.mxu1 %v13744_v19  ;;  %v13845_v19 = vld [vmem:[%s18737_s0 + $0x230] ss:$12 sps:$4 sm:$0xff]  }
 0x10a   :  { %1804 = vmatmul.mubr.bf16.gmra.mrb[100].mxu0 %v13746_v20 }
 0x10b   :  { %1813 = vmatprep.mubr.bf16.mxu0 %v13753_v21 }
 0x10c   :  { %2450 = vmatmul.mubr.bf16.gmra.mrb[100].mxu1 %v13746_v20  ;;  %v13849_v20 = vld [vmem:[%s18737_s0 + $0x248] ss:$12 sps:$4 sm:$0xff]  }
 0x10d   :  { %2459 = vmatprep.mubr.bf16.mxu1 %v13753_v21  ;;  %v13850_v21 = vld [vmem:[%s18737_s0 + $0x260] ss:$12 sps:$4 sm:$0xff]  }
 0x112   :  { %1814 = vmatmul.mubr.bf16.gmra.mrb[104].mxu0 %v13758_v22 }
 0x113   :  { %1823 = vmatprep.mubr.bf16.mxu0 %v13762_v23 }
 0x114   :  { %2460 = vmatmul.mubr.bf16.gmra.mrb[104].mxu1 %v13758_v22  ;;  %v307_v22 = vlaneseq }
 0x115   :  { %2469 = vmatprep.mubr.bf16.mxu1 %v13762_v23 }
 0x116   :  { %v15300_v23 = vshrl.u32 %v307_v22, 7 }
 0x11a   :  { %1824 = vmatmul.mubr.bf16.gmra.mrb[108].mxu0 %v13767_v24 }
 0x11b   :  { %1833 = vmatprep.mubr.bf16.mxu0 %v13771_v25 }
 0x11c   :  { %2470 = vmatmul.mubr.bf16.gmra.mrb[108].mxu1 %v13767_v24  ;;  %v13854_v24 = vld [vmem:[%s18737_s0 + $0x278] ss:$12 sps:$4 sm:$0xff]  }
 0x11d   :  { %2479 = vmatprep.mubr.bf16.mxu1 %v13771_v25  ;;  %v15308_v25 = vsub.s32 0, %v15300_v23 }
 0x11f   :  { %18756 = vst [vmem:[#allocation6_spill] sm:$0xff] %v15308_v25 }
 0x122   :  { %1834 = vmatmul.mubr.bf16.gmra.mrb[112].mxu0 %v13776_v26 }
 0x123   :  { %1876 = vmatprep.mubr.bf16.mxu0 %v18750_v27 }
 0x124   :  { %2480 = vmatmul.mubr.bf16.gmra.mrb[112].mxu1 %v13776_v26  ;;  %v305_v26 = vld [vmem:[%s18738_s2] sm:$0x3f] }
 0x125   :  { %2522 = vmatprep.mubr.bf16.mxu1 %v18750_v27 }
 0x12a   :  { %1877 = vmatmul.mubr.bf16.vlgmr.msra.gmra.mrb[0].mxu0 %v13783_v28 }
 0x12b   :  { %2814 = vmatpush1.bf16.msra.mxu0 %v13784_v29  ;;  %1886 = vmatprep.mubr.bf16.mxu0 %v18750_v27  ;;  %v317_v29 = vsub.s32 2, %v15300_v23 }
 0x12c   :  { %2523 = vmatmul.mubr.bf16.vlgmr.msra.gmra.mrb[0].mxu1 %v13783_v28  ;;  %2815 = vmatprep.subr.bf16.mxu0 %v13790_v30  ;;  %v15314_v28 = vsub.s32 1, %v15300_v23  ;;  %v321_v30 = vsub.s32 3, %v15300_v23 }
 0x12d   :  { %2532 = vmatprep.mubr.bf16.mxu1 %v18750_v27 }
 0x12e   :  { %18757 = vst [vmem:[#allocation7_spill] sm:$0xff] %v15314_v28 }
 0x12f   :  { %2816 = vmatpush1.bf16.msra.mxu0 %v13788_v31  ;;  %v15319_v31 = vrot.slane %v305_v26, %v15308_v25 }
 0x130   :  { %2817 = vmatprep.subr.bf16.mxu0 %v13795_v32  ;;  %v15322_v32 = vrot.slane %v305_v26, %v15314_v28 }
 0x132   :  { %1887 = vmatmul.mubr.bf16.gmra.mrb[4].mxu0 %v13787_v33 }
 0x133   :  { %1896 = vmatprep.mubr.bf16.mxu0 %v18750_v27  ;;  %2818 = vmatpush1.bf16.msra.mxu0 %v13793_v34 }
 0x134   :  { %2533 = vmatmul.mubr.bf16.gmra.mrb[4].mxu1 %v13787_v33  ;;  %2819 = vmatprep.subr.bf16.mxu0 %v13800_v35  ;;  %v15325_v33 = vrot.slane %v305_v26, %v317_v29  ;;  %v15327_v35 = vrot.slane %v305_v26, %v321_v30 }
 0x135   :  { %2542 = vmatprep.mubr.bf16.mxu1 %v18750_v27 }
 0x137   :  { %2820 = vmatpush1.bf16.msra.mxu0 %v13798_v36 }
 0x138   :  { %2821 = vmatprep.subr.bf16.mxu0 %v13805_v37 }
 0x13a   :  { %1897 = vmatmul.mubr.bf16.gmra.mrb[8].mxu0 %v13791_v38 }
 0x13b   :  { %1906 = vmatprep.mubr.bf16.mxu0 %v18750_v27  ;;  %2822 = vmatpush1.bf16.msra.mxu0 %v13803_v39 }
 0x13c   :  { %2543 = vmatmul.mubr.bf16.gmra.mrb[8].mxu1 %v13791_v38  ;;  %2823 = vmatprep.subr.bf16.mxu0 %v13810_v40  ;;  %v13855_v38 = vld [vmem:[%s18737_s0 + $0x290] ss:$12 sps:$4 sm:$0xff]  }
 0x13d   :  { %2552 = vmatprep.mubr.bf16.mxu1 %v18750_v27 }
 0x13f   :  { %2824 = vmatpush1.bf16.msra.mxu0 %v13808_v41 }
 0x140   :  { %2825 = vmatprep.subr.bf16.mxu0 %v13814_v42 }
 0x142   :  { %1907 = vmatmul.mubr.bf16.gmra.mrb[12].mxu0 %v13792_v43 }
 0x143   :  { %1916 = vmatprep.mubr.bf16.mxu0 %v18750_v27  ;;  %2826 = vmatpush1.bf16.msra.mxu0 %v13812_v44 }
 0x144   :  { %2553 = vmatmul.mubr.bf16.gmra.mrb[12].mxu1 %v13792_v43  ;;  %2827 = vmatprep.subr.bf16.mxu0 %v13819_v45 }
 0x145   :  { %2562 = vmatprep.mubr.bf16.mxu1 %v18750_v27 }
 0x147   :  { %2828 = vmatpush1.bf16.msra.mxu0 %v13817_v46 }
 0x148   :  { %2829 = vmatprep.subr.bf16.mxu0 %v13824_v47 }
 0x14a   :  { %1917 = vmatmul.mubr.bf16.gmra.mrb[16].mxu0 %v13796_v48 }
 0x14b   :  { %1926 = vmatprep.mubr.bf16.mxu0 %v18750_v27  ;;  %2830 = vmatpush1.bf16.msra.mxu0 %v13822_v49 }
 0x14c   :  { %2563 = vmatmul.mubr.bf16.gmra.mrb[16].mxu1 %v13796_v48  ;;  %2831 = vmatprep.subr.bf16.mxu0 %v13829_v50 }
 0x14d   :  { %2572 = vmatprep.mubr.bf16.mxu1 %v18750_v27 }
 0x14f   :  { %2832 = vmatpush1.bf16.msra.mxu0 %v13827_v51 }
 0x150   :  { %2833 = vmatprep.subr.bf16.mxu0 %v13834_v52 }
 0x152   :  { %1927 = vmatmul.mubr.bf16.gmra.mrb[20].mxu0 %v13797_v53 }
 0x153   :  { %1936 = vmatprep.mubr.bf16.mxu0 %v18750_v27  ;;  %2834 = vmatpush1.bf16.msra.mxu0 %v13832_v54 }
 0x154   :  { %2573 = vmatmul.mubr.bf16.gmra.mrb[20].mxu1 %v13797_v53  ;;  %2835 = vmatprep.subr.bf16.mxu0 %v13839_v55 }
 0x155   :  { %2582 = vmatprep.mubr.bf16.mxu1 %v18750_v27 }
 0x157   :  { %2836 = vmatpush1.bf16.msra.mxu0 %v13837_v56 }
 0x158   :  { %2837 = vmatprep.subr.bf16.mxu0 %v13843_v57 }
 0x15a   :  { %1937 = vmatmul.mubr.bf16.gmra.mrb[24].mxu0 %v13801_v58 }
 0x15b   :  { %1946 = vmatprep.mubr.bf16.mxu0 %v18750_v27  ;;  %2838 = vmatpush1.bf16.msra.mxu0 %v13841_v59 }
 0x15c   :  { %2583 = vmatmul.mubr.bf16.gmra.mrb[24].mxu1 %v13801_v58  ;;  %2839 = vmatprep.subr.bf16.mxu0 %v13848_v62 }
 0x15d   :  { %2592 = vmatprep.mubr.bf16.mxu1 %v18750_v27 }
 0x15f   :  { %2840 = vmatpush1.bf16.msra.mxu0 %v13846_v61 }
 0x160   :  { %2841 = vmatprep.subr.bf16.mxu0 %v13853_v2 }
 0x162   :  { %1947 = vmatmul.mubr.bf16.gmra.mrb[28].mxu0 %v13802_v60 }
 0x163   :  { %1956 = vmatprep.mubr.bf16.mxu0 %v18750_v27  ;;  %2842 = vmatpush1.bf16.msra.mxu0 %v13851_v1 }
 0x164   :  { %2593 = vmatmul.mubr.bf16.gmra.mrb[28].mxu1 %v13802_v60  ;;  %2843 = vmatprep.subr.bf16.mxu0 %v13858_v7 }
 0x165   :  { %2602 = vmatprep.mubr.bf16.mxu1 %v18750_v27 }
 0x167   :  { %2844 = vmatpush1.bf16.msra.mxu0 %v13856_v6 }
 0x168   :  { %3136 = vmatprep.subr.bf16.mxu0 %v13862_v10 }
 0x16a   :  { %1957 = vmatmul.mubr.bf16.gmra.mrb[32].mxu0 %v13806_v63 }
 0x16b   :  { %1966 = vmatprep.mubr.bf16.mxu0 %v18750_v27 }
 0x16c   :  { %2603 = vmatmul.mubr.bf16.gmra.mrb[32].mxu1 %v13806_v63 }
 0x16d   :  { %2612 = vmatprep.mubr.bf16.mxu1 %v18750_v27 }
 0x172   :  { %1967 = vmatmul.mubr.bf16.gmra.mrb[36].mxu0 %v13807_v0 }
 0x173   :  { %1976 = vmatprep.mubr.bf16.mxu0 %v18750_v27 }
 0x174   :  { %2613 = vmatmul.mubr.bf16.gmra.mrb[36].mxu1 %v13807_v0 }
 0x175   :  { %2622 = vmatprep.mubr.bf16.mxu1 %v18750_v27 }
 0x17a   :  { %1977 = vmatmul.mubr.bf16.gmra.mrb[40].mxu0 %v13811_v3 }
 0x17b   :  { %1986 = vmatprep.mubr.bf16.mxu0 %v18750_v27 }
 0x17c   :  { %2623 = vmatmul.mubr.bf16.gmra.mrb[40].mxu1 %v13811_v3 }
 0x17d   :  { %2632 = vmatprep.mubr.bf16.mxu1 %v18750_v27 }
 0x182   :  { %1987 = vmatmul.mubr.bf16.gmra.mrb[44].mxu0 %v13815_v4 }
 0x183   :  { %1996 = vmatprep.mubr.bf16.mxu0 %v18750_v27 }
 0x184   :  { %2633 = vmatmul.mubr.bf16.gmra.mrb[44].mxu1 %v13815_v4 }
 0x185   :  { %2642 = vmatprep.mubr.bf16.mxu1 %v18750_v27 }
 0x18a   :  { %1997 = vmatmul.mubr.bf16.gmra.mrb[48].mxu0 %v13816_v5 }
 0x18b   :  { %2006 = vmatprep.mubr.bf16.mxu0 %v18750_v27 }
 0x18c   :  { %2643 = vmatmul.mubr.bf16.gmra.mrb[48].mxu1 %v13816_v5  ;;  %v13859_v5 = vld [vmem:[%s18737_s0 + $0x2a8] ss:$12 sps:$4 sm:$0xff]  }
 0x18d   :  { %2652 = vmatprep.mubr.bf16.mxu1 %v18750_v27 }
 0x192   :  { %2007 = vmatmul.mubr.bf16.gmra.mrb[52].mxu0 %v13820_v8 }
 0x193   :  { %2016 = vmatprep.mubr.bf16.mxu0 %v18750_v27 }
 0x194   :  { %2653 = vmatmul.mubr.bf16.gmra.mrb[52].mxu1 %v13820_v8 }
 0x195   :  { %2662 = vmatprep.mubr.bf16.mxu1 %v18750_v27 }
 0x19a   :  { %2017 = vmatmul.mubr.bf16.gmra.mrb[56].mxu0 %v13821_v9 }
 0x19b   :  { %2026 = vmatprep.mubr.bf16.mxu0 %v18750_v27 }
 0x19c   :  { %2663 = vmatmul.mubr.bf16.gmra.mrb[56].mxu1 %v13821_v9 }
 0x19d   :  { %2672 = vmatprep.mubr.bf16.mxu1 %v18750_v27 }
 0x1a2   :  { %2027 = vmatmul.mubr.bf16.gmra.mrb[60].mxu0 %v13825_v11 }
 0x1a3   :  { %2036 = vmatprep.mubr.bf16.mxu0 %v18750_v27 }
 0x1a4   :  { %2673 = vmatmul.mubr.bf16.gmra.mrb[60].mxu1 %v13825_v11 }
 0x1a5   :  { %2682 = vmatprep.mubr.bf16.mxu1 %v18750_v27 }
 0x1aa   :  { %2037 = vmatmul.mubr.bf16.gmra.mrb[64].mxu0 %v13826_v12 }
 0x1ab   :  { %2046 = vmatprep.mubr.bf16.mxu0 %v18750_v27 }
 0x1ac   :  { %2683 = vmatmul.mubr.bf16.gmra.mrb[64].mxu1 %v13826_v12 }
 0x1ad   :  { %2692 = vmatprep.mubr.bf16.mxu1 %v18750_v27 }
 0x1b2   :  { %2047 = vmatmul.mubr.bf16.gmra.mrb[68].mxu0 %v13830_v13 }
 0x1b3   :  { %2056 = vmatprep.mubr.bf16.mxu0 %v18750_v27 }
 0x1b4   :  { %2693 = vmatmul.mubr.bf16.gmra.mrb[68].mxu1 %v13830_v13 }
 0x1b5   :  { %2702 = vmatprep.mubr.bf16.mxu1 %v18750_v27 }
 0x1ba   :  { %2057 = vmatmul.mubr.bf16.gmra.mrb[72].mxu0 %v13831_v14 }
 0x1bb   :  { %2066 = vmatprep.mubr.bf16.mxu0 %v18750_v27 }
 0x1bc   :  { %2703 = vmatmul.mubr.bf16.gmra.mrb[72].mxu1 %v13831_v14 }
 0x1bd   :  { %2712 = vmatprep.mubr.bf16.mxu1 %v18750_v27 }
 0x1c2   :  { %2067 = vmatmul.mubr.bf16.gmra.mrb[76].mxu0 %v13835_v15 }
 0x1c3   :  { %2076 = vmatprep.mubr.bf16.mxu0 %v18750_v27 }
 0x1c4   :  { %2713 = vmatmul.mubr.bf16.gmra.mrb[76].mxu1 %v13835_v15 }
 0x1c5   :  { %2722 = vmatprep.mubr.bf16.mxu1 %v18750_v27 }
 0x1ca   :  { %2077 = vmatmul.mubr.bf16.gmra.mrb[80].mxu0 %v13836_v16 }
 0x1cb   :  { %2086 = vmatprep.mubr.bf16.mxu0 %v18750_v27 }
 0x1cc   :  { %2723 = vmatmul.mubr.bf16.gmra.mrb[80].mxu1 %v13836_v16 }
 0x1cd   :  { %2732 = vmatprep.mubr.bf16.mxu1 %v18750_v27 }
 0x1d2   :  { %2087 = vmatmul.mubr.bf16.gmra.mrb[84].mxu0 %v13840_v17 }
 0x1d3   :  { %2096 = vmatprep.mubr.bf16.mxu0 %v18750_v27 }
 0x1d4   :  { %2733 = vmatmul.mubr.bf16.gmra.mrb[84].mxu1 %v13840_v17 }
 0x1d5   :  { %2742 = vmatprep.mubr.bf16.mxu1 %v18750_v27 }
 0x1da   :  { %2097 = vmatmul.mubr.bf16.gmra.mrb[88].mxu0 %v13844_v18 }
 0x1db   :  { %2106 = vmatprep.mubr.bf16.mxu0 %v18750_v27 }
 0x1dc   :  { %2743 = vmatmul.mubr.bf16.gmra.mrb[88].mxu1 %v13844_v18 }
 0x1dd   :  { %2752 = vmatprep.mubr.bf16.mxu1 %v18750_v27 }
 0x1e2   :  { %2107 = vmatmul.mubr.bf16.gmra.mrb[92].mxu0 %v13845_v19 }
 0x1e3   :  { %2116 = vmatprep.mubr.bf16.mxu0 %v18750_v27 }
 0x1e4   :  { %2753 = vmatmul.mubr.bf16.gmra.mrb[92].mxu1 %v13845_v19 }
 0x1e5   :  { %2762 = vmatprep.mubr.bf16.mxu1 %v18750_v27 }
 0x1ea   :  { %2117 = vmatmul.mubr.bf16.gmra.mrb[96].mxu0 %v13849_v20 }
 0x1eb   :  { %2126 = vmatprep.mubr.bf16.mxu0 %v18750_v27 }
 0x1ec   :  { %2763 = vmatmul.mubr.bf16.gmra.mrb[96].mxu1 %v13849_v20 }
 0x1ed   :  { %2772 = vmatprep.mubr.bf16.mxu1 %v18750_v27 }
 0x1f2   :  { %2127 = vmatmul.mubr.bf16.gmra.mrb[100].mxu0 %v13850_v21 }
 0x1f3   :  { %2136 = vmatprep.mubr.bf16.mxu0 %v18750_v27 }
 0x1f4   :  { %2773 = vmatmul.mubr.bf16.gmra.mrb[100].mxu1 %v13850_v21 }
 0x1f5   :  { %2782 = vmatprep.mubr.bf16.mxu1 %v18750_v27 }
 0x1fa   :  { %2137 = vmatmul.mubr.bf16.gmra.mrb[104].mxu0 %v13854_v24 }
 0x1fb   :  { %2146 = vmatprep.mubr.bf16.mxu0 %v18750_v27 }
 0x1fc   :  { %2783 = vmatmul.mubr.bf16.gmra.mrb[104].mxu1 %v13854_v24 }
 0x1fd   :  { %v1878_v34 = vpop.f32.mrb[0].mxu0  ;;  %2792 = vmatprep.mubr.bf16.mxu1 %v18750_v27 }
 0x1fe   :  { %v12309_v36 = vadd.f32 %v1878_v34, %v15319_v31  ;;  %v1880_v37 = vpop.f32.mrb[1].mxu0 }
 0x1ff   :  { %v12310_v39 = vadd.f32 %v1880_v37, %v15322_v32  ;;  %v1882_v40 = vpop.f32.mrb[2].mxu0  ;;  %v2524_v41 = vpop.f32.mrb[0].mxu1  ;;  %v14448_v37 = vld [vmem:[%s18737_s0 + $0x4] ss:$12 sps:$4 sm:$0xff]  }
 0x200   :  { %v3807_v42 = vmul.f32 0.01, %v12309_v36  ;;  %v12311_v43 = vadd.f32 %v1882_v40, %v15319_v31  ;;  %v1884_v44 = vpop.f32.mrb[3].mxu0  ;;  %v12425_v45 = vadd.f32 %v2524_v41, %v15325_v33  ;;  %vm3459_vm0 = vcmp.ge.f32.partialorder %v12309_v36, 0.0  ;;  %v2526_v46 = vpop.f32.mrb[1].mxu1 }
 0x201   :  { %v3808_v47 = vmul.f32 0.01, %v12310_v39  ;;  %v12312_v48 = vadd.f32 %v1884_v44, %v15322_v32  ;;  %vm3460_vm1 = vcmp.ge.f32.partialorder %v12310_v39, 0.0  ;;  %v12426_v49 = vadd.f32 %v2526_v46, %v15327_v35  ;;  %v2528_v50 = vpop.f32.mrb[2].mxu1 }
 0x202   :  { %v3813_v51 = vmul.f32 0.01, %v12311_v43  ;;  %vm3461_vm2 = vcmp.ge.f32.partialorder %v12425_v45, 0.0  ;;  %v3809_v52 = vmul.f32 0.01, %v12425_v45  ;;  %v4155_v53 = vsel %vm3459_vm0, %v12309_v36, %v3807_v42  ;;  %2147 = vmatmul.mubr.bf16.gmra.mrb[108].mxu0 %v13855_v38  ;;  %v2530_v54 = vpop.f32.mrb[3].mxu1 }
 0x203   :  { %v3814_v55 = vmul.f32 0.01, %v12312_v48  ;;  %v4156_v56 = vsel %vm3460_vm1, %v12310_v39, %v3808_v47  ;;  %vm3462_vm3 = vcmp.ge.f32.partialorder %v12426_v49, 0.0  ;;  %v3810_v57 = vmul.f32 0.01, %v12426_v49  ;;  %2156 = vmatprep.mubr.bf16.mxu0 %v18750_v27 }
 0x204   :  { %v4157_v58 = vsel %vm3461_vm2, %v12425_v45, %v3809_v52  ;;  %v4503_v59 = vadd.f32 %v4156_v56, %v4155_v53  ;;  %v12427_v60 = vadd.f32 %v2528_v50, %v15325_v33  ;;  %vm3465_vm4 = vcmp.ge.f32.partialorder %v12311_v43, 0.0  ;;  %2793 = vmatmul.mubr.bf16.gmra.mrb[108].mxu1 %v13855_v38 }
 0x205   :  { %v4158_v61 = vsel %vm3462_vm3, %v12426_v49, %v3810_v57  ;;  %vm3466_vm5 = vcmp.ge.f32.partialorder %v12312_v48, 0.0  ;;  %v4161_v62 = vsel %vm3465_vm4, %v12311_v43, %v3813_v51  ;;  %v12428_v63 = vadd.f32 %v2530_v54, %v15327_v35  ;;  %v1888_v0 = vpop.f32.mrb[4].mxu0  ;;  %2802 = vmatprep.mubr.bf16.mxu1 %v18750_v27 }
 0x206   :  { %v4561_v1 = vadd.f32 %v4503_v59, %v4157_v58  ;;  %vm3467_vm6 = vcmp.ge.f32.partialorder %v12427_v60, 0.0  ;;  %v3815_v2 = vmul.f32 0.01, %v12427_v60  ;;  %v4162_v3 = vsel %vm3466_vm5, %v12312_v48, %v3814_v55  ;;  %v1890_v4 = vpop.f32.mrb[5].mxu0  ;;  %v13860_v48 = vld [vmem:[%s18736_s1 + $0x310] ss:$24 sps:$4 sm:$0xff]  }
 0x207   :  { %v4504_v6 = vadd.f32 %v4162_v3, %v4161_v62  ;;  %vm3468_vm7 = vcmp.ge.f32.partialorder %v12428_v63, 0.0  ;;  %v3816_v7 = vmul.f32 0.01, %v12428_v63  ;;  %v12313_v8 = vadd.f32 %v1888_v0, %v15319_v31  ;;  %v1892_v9 = vpop.f32.mrb[6].mxu0  ;;  %v2534_v10 = vpop.f32.mrb[4].mxu1 }
 0x208   :  { %v15347_v11 = vadd.f32 %v4561_v1, %v4158_v61  ;;  %v4163_v12 = vsel %vm3467_vm6, %v12427_v60, %v3815_v2  ;;  %v12314_v13 = vadd.f32 %v1890_v4, %v15322_v32  ;;  %v12315_v14 = vadd.f32 %v1892_v9, %v15319_v31  ;;  %v1894_v15 = vpop.f32.mrb[7].mxu0  ;;  %v2536_v16 = vpop.f32.mrb[5].mxu1  ;;  %v13865_v60 = vld [vmem:[%s18736_s1 + $0x344] ss:$24 sps:$4 sm:$0xff]  }
 0x209   :  { %v4562_v17 = vadd.f32 %v4504_v6, %v4163_v12  ;;  %v4164_v18 = vsel %vm3468_vm7, %v12428_v63, %v3816_v7  ;;  %v3819_v19 = vmul.f32 0.01, %v12313_v8  ;;  %v12316_v20 = vadd.f32 %v1894_v15, %v15322_v32  ;;  %v2538_v21 = vpop.f32.mrb[6].mxu1  ;;  %v14450_v12 = vld [vmem:[%s18737_s0 + $0x1c] ss:$12 sps:$4 sm:$0xff]  }
 0x20a   :  { %v3820_v22 = vmul.f32 0.01, %v12314_v13  ;;  %v3825_v24 = vmul.f32 0.01, %v12315_v14  ;;  %v12429_v26 = vadd.f32 %v2534_v10, %v15325_v33  ;;  %vm3471_vm8 = vcmp.ge.f32.partialorder %v12313_v8, 0.0  ;;  %2157 = vmatmul.mubr.bf16.gmra.mrb[112].mxu0 %v13859_v5  ;;  %v2540_v29 = vpop.f32.mrb[7].mxu1 }
 0x20b   :  { %v15353_v30 = vadd.f32 %v4562_v17, %v4164_v18  ;;  %v3826_v34 = vmul.f32 0.01, %v12316_v20  ;;  %vm3472_vm9 = vcmp.ge.f32.partialorder %v12314_v13, 0.0  ;;  %v4167_v36 = vsel %vm3471_vm8, %v12313_v8, %v3819_v19  ;;  %2845 = vmatprep.mubr.bf16.mxu0 %v14448_v37 }
 0x20c   :  { %vm3473_vm10 = vcmp.ge.f32.partialorder %v12429_v26, 0.0  ;;  %v3821_v38 = vmul.f32 0.01, %v12429_v26  ;;  %v4168_v39 = vsel %vm3472_vm9, %v12314_v13, %v3820_v22  ;;  %v12430_v40 = vadd.f32 %v2536_v16, %v15327_v35  ;;  %2803 = vmatmul.mubr.bf16.gmra.mrb[112].mxu1 %v13859_v5  ;;  %v14449_v5 = vld [vmem:[%s18737_s0] ss:$12 sps:$4 sm:$0xff]  }
 0x20d   :  { %v4505_v41 = vadd.f32 %v4168_v39, %v4167_v36  ;;  %v12431_v42 = vadd.f32 %v2538_v21, %v15325_v33  ;;  %vm3477_vm11 = vcmp.ge.f32.partialorder %v12315_v14, 0.0  ;;  %vm3478_vm12 = vcmp.ge.f32.partialorder %v12316_v20, 0.0  ;;  %v1898_v43 = vpop.f32.mrb[8].mxu0  ;;  %v13863_v13 = vld [vmem:[%s18736_s1 + $0x340] ss:$24 sps:$4 sm:$0xff]  }
 0x20e   :  { %v4169_v44 = vsel %vm3473_vm10, %v12429_v26, %v3821_v38  ;;  %vm3474_vm13 = vcmp.ge.f32.partialorder %v12430_v40, 0.0  ;;  %v3822_v45 = vmul.f32 0.01, %v12430_v40  ;;  %v4173_v46 = vsel %vm3477_vm11, %v12315_v14, %v3825_v24  ;;  %v1900_v47 = vpop.f32.mrb[9].mxu0  ;;  %v13868_v16 = vld [vmem:[%s18736_s1 + $0x374] ss:$24 sps:$4 sm:$0xff]  }
 0x20f   :  { %v4563_v49 = vadd.f32 %v4505_v41, %v4169_v44  ;;  %vm3479_vm14 = vcmp.ge.f32.partialorder %v12431_v42, 0.0  ;;  %v3827_v50 = vmul.f32 0.01, %v12431_v42  ;;  %v4174_v51 = vsel %vm3478_vm12, %v12316_v20, %v3826_v34  ;;  %v1902_v52 = vpop.f32.mrb[10].mxu0  ;;  %v2544_v53 = vpop.f32.mrb[8].mxu1 }
 0x210   :  { %v4170_v54 = vsel %vm3474_vm13, %v12430_v40, %v3822_v45  ;;  %v4506_v55 = vadd.f32 %v4174_v51, %v4173_v46  ;;  %v12432_v56 = vadd.f32 %v2540_v29, %v15327_v35  ;;  %v12317_v57 = vadd.f32 %v1898_v43, %v15319_v31  ;;  %v1904_v58 = vpop.f32.mrb[11].mxu0  ;;  %v2546_v59 = vpop.f32.mrb[9].mxu1  ;;  %v13866_v44 = vld [vmem:[%s18736_s1 + $0x370] ss:$24 sps:$4 sm:$0xff]  }
 0x211   :  { %v15368_v61 = vadd.f32 %v4563_v49, %v4170_v54  ;;  %v4175_v62 = vsel %vm3479_vm14, %v12431_v42, %v3827_v50  ;;  %v12318_v63 = vadd.f32 %v1900_v47, %v15322_v32  ;;  %v12319_v0 = vadd.f32 %v1902_v52, %v15319_v31  ;;  %v2548_v1 = vpop.f32.mrb[10].mxu1  ;;  %v13871_v49 = vld [vmem:[%s18736_s1 + $0x3a4] ss:$24 sps:$4 sm:$0xff]  }
 0x212   :  { %v4564_v2 = vadd.f32 %v4506_v55, %v4175_v62  ;;  %vm3480_vm15 = vcmp.ge.f32.partialorder %v12432_v56, 0.0  ;;  %v3828_v3 = vmul.f32 0.01, %v12432_v56  ;;  %v3831_v4 = vmul.f32 0.01, %v12317_v57  ;;  %2846 = vmatmul.mubr.bf16.vlgmr.msra.gmra.mrb[116].mxu0 %v14449_v5  ;;  %v2550_v6 = vpop.f32.mrb[11].mxu1 }
 0x213   :  { %v3832_v7 = vmul.f32 0.01, %v12318_v63  ;;  %v3837_v8 = vmul.f32 0.01, %v12319_v0  ;;  %v12320_v9 = vadd.f32 %v1904_v58, %v15322_v32  ;;  %v12433_v10 = vadd.f32 %v2544_v53, %v15325_v33  ;;  %3137 = vmatpush1.bf16.msra.mxu0 %v13860_v48  ;;  %2855 = vmatprep.mubr.bf16.mxu0 %v14450_v12  ;;  %v14451_v53 = vld [vmem:[%s18737_s0 + $0x18] ss:$12 sps:$4 sm:$0xff]  }
 0x214   :  { %v4176_v14 = vsel %vm3480_vm15, %v12432_v56, %v3828_v3  ;;  %vm3483_vm0 = vcmp.ge.f32.partialorder %v12317_v57, 0.0  ;;  %vm3484_vm1 = vcmp.ge.f32.partialorder %v12318_v63, 0.0  ;;  %v12434_v15 = vadd.f32 %v2546_v59, %v15327_v35  ;;  %3138 = vmatprep.subr.bf16.mxu0 %v13865_v60  ;;  %v14452_v59 = vld [vmem:[%s18737_s0 + $0x34] ss:$12 sps:$4 sm:$0xff]  }
 0x215   :  { %v15387_v17 = vadd.f32 %v4564_v2, %v4176_v14  ;;  %v3838_v18 = vmul.f32 0.01, %v12320_v9  ;;  %vm3485_vm2 = vcmp.ge.f32.partialorder %v12433_v10, 0.0  ;;  %v3833_v19 = vmul.f32 0.01, %v12433_v10  ;;  %v1908_v20 = vpop.f32.mrb[12].mxu0 }
 0x216   :  { %v4179_v21 = vsel %vm3483_vm0, %v12317_v57, %v3831_v4  ;;  %v4180_v22 = vsel %vm3484_vm1, %v12318_v63, %v3832_v7  ;;  %vm3486_vm3 = vcmp.ge.f32.partialorder %v12434_v15, 0.0  ;;  %v3834_v24 = vmul.f32 0.01, %v12434_v15  ;;  %v1910_v26 = vpop.f32.mrb[13].mxu0 }
 0x217   :  { %18758 = vst [vmem:[#allocation8_spill] sm:$0xff] %v15387_v17  ;;  %v4181_v29 = vsel %vm3485_vm2, %v12433_v10, %v3833_v19  ;;  %v4507_v34 = vadd.f32 %v4180_v22, %v4179_v21  ;;  %v12435_v36 = vadd.f32 %v2548_v1, %v15325_v33  ;;  %vm3489_vm4 = vcmp.ge.f32.partialorder %v12319_v0, 0.0  ;;  %v1912_v37 = vpop.f32.mrb[14].mxu0  ;;  %v2554_v38 = vpop.f32.mrb[12].mxu1  ;;  %3139 = vmatpush1.bf16.msra.mxu0 %v13863_v13  ;;  %v13869_v1 = vld [vmem:[%s18736_s1 + $0x3a0] ss:$24 sps:$4 sm:$0xff]  }
 0x218   :  { %v4182_v39 = vsel %vm3486_vm3, %v12434_v15, %v3834_v24  ;;  %vm3490_vm5 = vcmp.ge.f32.partialorder %v12320_v9, 0.0  ;;  %v4185_v40 = vsel %vm3489_vm4, %v12319_v0, %v3837_v8  ;;  %v12436_v41 = vadd.f32 %v2550_v6, %v15327_v35  ;;  %v1914_v42 = vpop.f32.mrb[15].mxu0  ;;  %v2556_v43 = vpop.f32.mrb[13].mxu1  ;;  %3140 = vmatprep.subr.bf16.mxu0 %v13868_v16 }
 0x219   :  { %v4565_v45 = vadd.f32 %v4507_v34, %v4181_v29  ;;  %vm3491_vm6 = vcmp.ge.f32.partialorder %v12435_v36, 0.0  ;;  %v3839_v46 = vmul.f32 0.01, %v12435_v36  ;;  %v4186_v47 = vsel %vm3490_vm5, %v12320_v9, %v3838_v18  ;;  %v2558_v48 = vpop.f32.mrb[14].mxu1 }
 0x21a   :  { %v4508_v50 = vadd.f32 %v4186_v47, %v4185_v40  ;;  %vm3492_vm7 = vcmp.ge.f32.partialorder %v12436_v41, 0.0  ;;  %v3840_v51 = vmul.f32 0.01, %v12436_v41  ;;  %v12321_v52 = vadd.f32 %v1908_v20, %v15319_v31  ;;  %2856 = vmatmul.mubr.bf16.gmra.mrb[120].mxu0 %v14451_v53  ;;  %v2560_v54 = vpop.f32.mrb[15].mxu1 }
 0x21b   :  { %v15401_v55 = vadd.f32 %v4565_v45, %v4182_v39  ;;  %v4187_v56 = vsel %vm3491_vm6, %v12435_v36, %v3839_v46  ;;  %v12322_v57 = vadd.f32 %v1910_v26, %v15322_v32  ;;  %v12323_v58 = vadd.f32 %v1912_v37, %v15319_v31  ;;  %2865 = vmatprep.mubr.bf16.mxu0 %v14452_v59  ;;  %v14453_v37 = vld [vmem:[%s18737_s0 + $0x30] ss:$12 sps:$4 sm:$0xff]  }
 0x21c   :  { %v4566_v60 = vadd.f32 %v4508_v50, %v4187_v56  ;;  %v4188_v62 = vsel %vm3492_vm7, %v12436_v41, %v3840_v51  ;;  %v3843_v63 = vmul.f32 0.01, %v12321_v52  ;;  %v12324_v0 = vadd.f32 %v1914_v42, %v15322_v32  ;;  %3141 = vmatpush1.bf16.msra.mxu0 %v13866_v44 }
 0x21d   :  { %18759 = vst [vmem:[#allocation9_spill] sm:$0xff] %v15401_v55  ;;  %v3844_v2 = vmul.f32 0.01, %v12322_v57  ;;  %v3849_v3 = vmul.f32 0.01, %v12323_v58  ;;  %v12437_v4 = vadd.f32 %v2554_v38, %v15325_v33  ;;  %vm3495_vm8 = vcmp.ge.f32.partialorder %v12321_v52, 0.0  ;;  %3142 = vmatprep.subr.bf16.mxu0 %v13871_v49 }
 0x21e   :  { %v1918_v5 = vpop.f32.mrb[16].mxu0  ;;  %v15413_v6 = vadd.f32 %v4566_v60, %v4188_v62  ;;  %v3850_v7 = vmul.f32 0.01, %v12324_v0  ;;  %vm3496_vm9 = vcmp.ge.f32.partialorder %v12322_v57, 0.0  ;;  %v4191_v8 = vsel %vm3495_vm8, %v12321_v52, %v3843_v63  ;;  %v13874_v49 = vld [vmem:[%s18736_s1 + $0x3d4] ss:$24 sps:$4 sm:$0xff]  }
 0x21f   :  { %v1920_v9 = vpop.f32.mrb[17].mxu0  ;;  %vm3497_vm10 = vcmp.ge.f32.partialorder %v12437_v4, 0.0  ;;  %v3845_v10 = vmul.f32 0.01, %v12437_v4  ;;  %v4192_v12 = vsel %vm3496_vm9, %v12322_v57, %v3844_v2  ;;  %v12438_v13 = vadd.f32 %v2556_v43, %v15327_v35  ;;  %v2564_v15 = vpop.f32.mrb[16].mxu1 }
 0x220   :  { %18760 = vst [vmem:[#allocation10_spill] sm:$0xff] %v15413_v6  ;;  %v1922_v14 = vpop.f32.mrb[18].mxu0  ;;  %v4509_v16 = vadd.f32 %v4192_v12, %v4191_v8  ;;  %v12439_v18 = vadd.f32 %v2558_v48, %v15325_v33  ;;  %vm3501_vm11 = vcmp.ge.f32.partialorder %v12323_v58, 0.0  ;;  %vm3502_vm12 = vcmp.ge.f32.partialorder %v12324_v0, 0.0  ;;  %v2566_v20 = vpop.f32.mrb[17].mxu1  ;;  %3143 = vmatpush1.bf16.msra.mxu0 %v13869_v1 }
 0x221   :  { %v1924_v19 = vpop.f32.mrb[19].mxu0  ;;  %v4193_v21 = vsel %vm3497_vm10, %v12437_v4, %v3845_v10  ;;  %vm3498_vm13 = vcmp.ge.f32.partialorder %v12438_v13, 0.0  ;;  %v3846_v22 = vmul.f32 0.01, %v12438_v13  ;;  %v4197_v24 = vsel %vm3501_vm11, %v12323_v58, %v3849_v3  ;;  %v2568_v26 = vpop.f32.mrb[18].mxu1  ;;  %3144 = vmatprep.subr.bf16.mxu0 %v13874_v49 }
 0x222   :  { %v4567_v29 = vadd.f32 %v4509_v16, %v4193_v21  ;;  %vm3503_vm14 = vcmp.ge.f32.partialorder %v12439_v18, 0.0  ;;  %v3851_v34 = vmul.f32 0.01, %v12439_v18  ;;  %v4198_v36 = vsel %vm3502_vm12, %v12324_v0, %v3850_v7  ;;  %2866 = vmatmul.mubr.bf16.gmra.mrb[124].mxu0 %v14453_v37  ;;  %v2570_v38 = vpop.f32.mrb[19].mxu1  ;;  %v14454_v43 = vld [vmem:[%s18737_s0 + $0x4c] ss:$12 sps:$4 sm:$0xff]  }
 0x223   :  { %v4194_v39 = vsel %vm3498_vm13, %v12438_v13, %v3846_v22  ;;  %v4510_v40 = vadd.f32 %v4198_v36, %v4197_v24  ;;  %v12440_v41 = vadd.f32 %v2560_v54, %v15327_v35  ;;  %v12325_v42 = vadd.f32 %v1918_v5, %v15319_v31  ;;  %2875 = vmatprep.mubr.bf16.mxu0 %v14454_v43  ;;  %v13872_v48 = vld [vmem:[%s18736_s1 + $0x3d0] ss:$24 sps:$4 sm:$0xff]  }
 0x224   :  { %v15425_v44 = vadd.f32 %v4567_v29, %v4194_v39  ;;  %v4199_v45 = vsel %vm3503_vm14, %v12439_v18, %v3851_v34  ;;  %v12326_v46 = vadd.f32 %v1920_v9, %v15322_v32  ;;  %v12327_v47 = vadd.f32 %v1922_v14, %v15319_v31  ;;  %3145 = vmatpush1.bf16.msra.mxu0 %v13872_v48  ;;  %v14456_v21 = vld [vmem:[%s18737_s0 + $0x64] ss:$12 sps:$4 sm:$0xff]  }
 0x225   :  { %v4568_v50 = vadd.f32 %v4510_v40, %v4199_v45  ;;  %vm3504_vm15 = vcmp.ge.f32.partialorder %v12440_v41, 0.0  ;;  %v3852_v51 = vmul.f32 0.01, %v12440_v41  ;;  %v3855_v52 = vmul.f32 0.01, %v12325_v42  ;;  %v1928_v53 = vpop.f32.mrb[20].mxu0 }
 0x226   :  { %18761 = vst [vmem:[#allocation11_spill] sm:$0xff] %v15425_v44  ;;  %v3856_v54 = vmul.f32 0.01, %v12326_v46  ;;  %v3861_v56 = vmul.f32 0.01, %v12327_v47  ;;  %v12328_v57 = vadd.f32 %v1924_v19, %v15322_v32  ;;  %v12441_v58 = vadd.f32 %v2564_v15, %v15325_v33  ;;  %v1930_v59 = vpop.f32.mrb[21].mxu0 }
 0x227   :  { %v4200_v60 = vsel %vm3504_vm15, %v12440_v41, %v3852_v51  ;;  %vm3507_vm0 = vcmp.ge.f32.partialorder %v12325_v42, 0.0  ;;  %vm3508_vm1 = vcmp.ge.f32.partialorder %v12326_v46, 0.0  ;;  %v12442_v62 = vadd.f32 %v2566_v20, %v15327_v35  ;;  %v1932_v63 = vpop.f32.mrb[22].mxu0  ;;  %v2574_v0 = vpop.f32.mrb[20].mxu1  ;;  %v14455_v15 = vld [vmem:[%s18737_s0 + $0x48] ss:$12 sps:$4 sm:$0xff]  }
 0x228   :  { %v15438_v1 = vadd.f32 %v4568_v50, %v4200_v60  ;;  %v3862_v2 = vmul.f32 0.01, %v12328_v57  ;;  %vm3509_vm2 = vcmp.ge.f32.partialorder %v12441_v58, 0.0  ;;  %v3857_v3 = vmul.f32 0.01, %v12441_v58  ;;  %v1934_v4 = vpop.f32.mrb[23].mxu0 }
 0x229   :  { %v4203_v5 = vsel %vm3507_vm0, %v12325_v42, %v3855_v52  ;;  %v4204_v7 = vsel %vm3508_vm1, %v12326_v46, %v3856_v54  ;;  %vm3510_vm3 = vcmp.ge.f32.partialorder %v12442_v62, 0.0  ;;  %v3858_v8 = vmul.f32 0.01, %v12442_v62  ;;  %v2576_v9 = vpop.f32.mrb[21].mxu1 }
 0x22a   :  { %18762 = vst [vmem:[#allocation12_spill] sm:$0xff] %v15438_v1  ;;  %v4205_v10 = vsel %vm3509_vm2, %v12441_v58, %v3857_v3  ;;  %v4511_v12 = vadd.f32 %v4204_v7, %v4203_v5  ;;  %v12443_v13 = vadd.f32 %v2568_v26, %v15325_v33  ;;  %vm3513_vm4 = vcmp.ge.f32.partialorder %v12327_v47, 0.0  ;;  %v2578_v14 = vpop.f32.mrb[22].mxu1  ;;  %2876 = vmatmul.mubr.bf16.gmra.mrb[128].mxu0 %v14455_v15  ;;  %v14458_v5 = vld [vmem:[%s18737_s0 + $0x7c] ss:$12 sps:$4 sm:$0xff]  }
 0x22b   :  { %v4206_v16 = vsel %vm3510_vm3, %v12442_v62, %v3858_v8  ;;  %vm3514_vm5 = vcmp.ge.f32.partialorder %v12328_v57, 0.0  ;;  %v4209_v18 = vsel %vm3513_vm4, %v12327_v47, %v3861_v56  ;;  %v12444_v19 = vadd.f32 %v2570_v38, %v15327_v35  ;;  %v2580_v20 = vpop.f32.mrb[23].mxu1  ;;  %2885 = vmatprep.mubr.bf16.mxu0 %v14456_v21 }
 0x22c   :  { %v4569_v22 = vadd.f32 %v4511_v12, %v4205_v10  ;;  %vm3515_vm6 = vcmp.ge.f32.partialorder %v12443_v13, 0.0  ;;  %v3863_v24 = vmul.f32 0.01, %v12443_v13  ;;  %v4210_v26 = vsel %vm3514_vm5, %v12328_v57, %v3862_v2  ;;  %v14457_v2 = vld [vmem:[%s18737_s0 + $0x60] ss:$12 sps:$4 sm:$0xff]  }
 0x22d   :  { %v4512_v29 = vadd.f32 %v4210_v26, %v4209_v18  ;;  %vm3516_vm7 = vcmp.ge.f32.partialorder %v12444_v19, 0.0  ;;  %v3864_v34 = vmul.f32 0.01, %v12444_v19  ;;  %v12329_v36 = vadd.f32 %v1928_v53, %v15319_v31  ;;  %v1938_v37 = vpop.f32.mrb[24].mxu0 }
 0x22e   :  { %v15449_v39 = vadd.f32 %v4569_v22, %v4206_v16  ;;  %v4211_v40 = vsel %vm3515_vm6, %v12443_v13, %v3863_v24  ;;  %v12330_v38 = vadd.f32 %v1930_v59, %v15322_v32  ;;  %v12331_v41 = vadd.f32 %v1932_v63, %v15319_v31  ;;  %v1940_v42 = vpop.f32.mrb[25].mxu0 }
 0x22f   :  { %v4570_v43 = vadd.f32 %v4512_v29, %v4211_v40  ;;  %v4212_v45 = vsel %vm3516_vm7, %v12444_v19, %v3864_v34  ;;  %v3867_v46 = vmul.f32 0.01, %v12329_v36  ;;  %v12332_v47 = vadd.f32 %v1934_v4, %v15322_v32  ;;  %v1942_v48 = vpop.f32.mrb[26].mxu0  ;;  %v2584_v49 = vpop.f32.mrb[24].mxu1 }
 0x230   :  { %18763 = vst [vmem:[#allocation13_spill] sm:$0xff] %v15449_v39  ;;  %v3868_v50 = vmul.f32 0.01, %v12330_v38  ;;  %v3873_v51 = vmul.f32 0.01, %v12331_v41  ;;  %v12445_v52 = vadd.f32 %v2574_v0, %v15325_v33  ;;  %vm3519_vm8 = vcmp.ge.f32.partialorder %v12329_v36, 0.0 }
 0x231   :  { %v1944_v53 = vpop.f32.mrb[27].mxu0  ;;  %v15455_v54 = vadd.f32 %v4570_v43, %v4212_v45  ;;  %v3874_v56 = vmul.f32 0.01, %v12332_v47  ;;  %vm3520_vm9 = vcmp.ge.f32.partialorder %v12330_v38, 0.0  ;;  %v4215_v57 = vsel %vm3519_vm8, %v12329_v36, %v3867_v46  ;;  %v2586_v58 = vpop.f32.mrb[25].mxu1 }
 0x232   :  { %vm3521_vm10 = vcmp.ge.f32.partialorder %v12445_v52, 0.0  ;;  %v3869_v59 = vmul.f32 0.01, %v12445_v52  ;;  %v4216_v60 = vsel %vm3520_vm9, %v12330_v38, %v3868_v50  ;;  %v12446_v62 = vadd.f32 %v2576_v9, %v15327_v35  ;;  %v15458_v63 = vpop.f32.mrb[26].mxu1  ;;  %2886 = vmatmul.mubr.bf16.gmra.mrb[132].mxu0 %v14457_v2  ;;  %v14459_v50 = vld [vmem:[%s18737_s0 + $0x78] ss:$12 sps:$4 sm:$0xff]  }
 0x233   :  { %18764 = vst [vmem:[#allocation14_spill] sm:$0xff] %v15455_v54  ;;  %v4513_v0 = vadd.f32 %v4216_v60, %v4215_v57  ;;  %v12447_v3 = vadd.f32 %v2578_v14, %v15325_v33  ;;  %vm3525_vm11 = vcmp.ge.f32.partialorder %v12331_v41, 0.0  ;;  %vm3526_vm12 = vcmp.ge.f32.partialorder %v12332_v47, 0.0  ;;  %v2590_v4 = vpop.f32.mrb[27].mxu1  ;;  %2895 = vmatprep.mubr.bf16.mxu0 %v14458_v5 }
 0x234   :  { %v4217_v7 = vsel %vm3521_vm10, %v12445_v52, %v3869_v59  ;;  %vm3522_vm13 = vcmp.ge.f32.partialorder %v12446_v62, 0.0  ;;  %v3870_v8 = vmul.f32 0.01, %v12446_v62  ;;  %v4221_v9 = vsel %vm3525_vm11, %v12331_v41, %v3873_v51 }
 0x235   :  { %v4571_v10 = vadd.f32 %v4513_v0, %v4217_v7  ;;  %vm3527_vm14 = vcmp.ge.f32.partialorder %v12447_v3, 0.0  ;;  %v3875_v12 = vmul.f32 0.01, %v12447_v3  ;;  %v4222_v13 = vsel %vm3526_vm12, %v12332_v47, %v3874_v56  ;;  %v1948_v15 = vpop.f32.mrb[28].mxu0 }
 0x236   :  { %v4218_v16 = vsel %vm3522_vm13, %v12446_v62, %v3870_v8  ;;  %v4514_v18 = vadd.f32 %v4222_v13, %v4221_v9  ;;  %v12448_v14 = vadd.f32 %v2580_v20, %v15327_v35  ;;  %v12333_v19 = vadd.f32 %v1938_v37, %v15319_v31  ;;  %v1950_v21 = vpop.f32.mrb[29].mxu0 }
 0x237   :  { %v15469_v22 = vadd.f32 %v4571_v10, %v4218_v16  ;;  %v4223_v24 = vsel %vm3527_vm14, %v12447_v3, %v3875_v12  ;;  %v12334_v26 = vadd.f32 %v1940_v42, %v15322_v32  ;;  %v12335_v29 = vadd.f32 %v1942_v48, %v15319_v31  ;;  %v1952_v34 = vpop.f32.mrb[30].mxu0  ;;  %v15473_v36 = vpop.f32.mrb[28].mxu1 }
 0x238   :  { %v4572_v40 = vadd.f32 %v4514_v18, %v4223_v24  ;;  %vm3528_vm15 = vcmp.ge.f32.partialorder %v12448_v14, 0.0  ;;  %v3876_v38 = vmul.f32 0.01, %v12448_v14  ;;  %vm3531_vm0 = vcmp.ge.f32.partialorder %v12333_v19, 0.0  ;;  %v1954_v41 = vpop.f32.mrb[31].mxu0  ;;  %v15475_v43 = vpop.f32.mrb[29].mxu1 }
 0x239   :  { %18765 = vst [vmem:[#allocation15_spill] sm:$0xff] %v15469_v22  ;;  %v3879_v20 = vmul.f32 0.01, %v12333_v19  ;;  %vm3532_vm1 = vcmp.ge.f32.partialorder %v12334_v26, 0.0  ;;  %v3880_v37 = vmul.f32 0.01, %v12334_v26  ;;  %v12336_v42 = vadd.f32 %v1944_v53, %v15322_v32 }
 0x23a   :  { %vm3537_vm2 = vcmp.ge.f32.partialorder %v12335_v29, 0.0  ;;  %v4224_v45 = vsel %vm3528_vm15, %v12448_v14, %v3876_v38  ;;  %v3885_v46 = vmul.f32 0.01, %v12335_v29  ;;  %v12449_v47 = vadd.f32 %v2584_v49, %v15325_v33  ;;  %v15479_v48 = vpop.f32.mrb[30].mxu1  ;;  %2896 = vmatmul.mubr.bf16.gmra.mrb[136].mxu0 %v14459_v50  ;;  %v14460_v53 = vld [vmem:[%s18737_s0 + $0x94] ss:$12 sps:$4 sm:$0xff]  }
 0x23b   :  { %v15484_v51 = vadd.f32 %v4572_v40, %v4224_v45  ;;  %v4227_v52 = vsel %vm3531_vm0, %v12333_v19, %v3879_v20  ;;  %v4228_v56 = vsel %vm3532_vm1, %v12334_v26, %v3880_v37  ;;  %v12450_v57 = vadd.f32 %v2586_v58, %v15327_v35  ;;  %v15487_v59 = vpop.f32.mrb[31].mxu1  ;;  %2905 = vmatprep.mubr.bf16.mxu0 %v14460_v53  ;;  %v14461_v37 = vld [vmem:[%s18737_s0 + $0x90] ss:$12 sps:$4 sm:$0xff]  }
 0x23c   :  { %v4233_v49 = vsel %vm3537_vm2, %v12335_v29, %v3885_v46  ;;  %vm3538_vm3 = vcmp.ge.f32.partialorder %v12336_v42, 0.0  ;;  %v3886_v60 = vmul.f32 0.01, %v12336_v42  ;;  %vm3533_vm4 = vcmp.ge.f32.partialorder %v12449_v47, 0.0 }
 0x23d   :  { %18766 = vst [vmem:[#allocation16_spill] sm:$0xff] %v15484_v51  ;;  %v3881_v62 = vmul.f32 0.01, %v12449_v47  ;;  %v4515_v2 = vadd.f32 %v4228_v56, %v4227_v52  ;;  %vm3534_vm5 = vcmp.ge.f32.partialorder %v12450_v57, 0.0  ;;  %v3882_v0 = vmul.f32 0.01, %v12450_v57 }
 0x23e   :  { %v1958_v3 = vpop.f32.mrb[32].mxu0  ;;  %v4234_v5 = vsel %vm3538_vm3, %v12336_v42, %v3886_v60  ;;  %v12451_v58 = vadd.f32 %v15458_v63, %v15325_v33  ;;  %v12452_v7 = vadd.f32 %v2590_v4, %v15327_v35  ;;  %v12337_v8 = vadd.f32 %v1948_v15, %v15319_v31  ;;  %v14462_v52 = vld [vmem:[%s18737_s0 + $0xac] ss:$12 sps:$4 sm:$0xff]  }
 0x23f   :  { %v15496_v9 = vpop.f32.mrb[33].mxu0  ;;  %v4229_v10 = vsel %vm3533_vm4, %v12449_v47, %v3881_v62  ;;  %v4230_v12 = vsel %vm3534_vm5, %v12450_v57, %v3882_v0  ;;  %v4516_v13 = vadd.f32 %v4234_v5, %v4233_v49  ;;  %v12338_v16 = vadd.f32 %v1950_v21, %v15322_v32  ;;  %v15501_v14 = vpop.f32.mrb[32].mxu1 }
 0x240   :  { %v15499_v18 = vpop.f32.mrb[34].mxu0  ;;  %v4573_v19 = vadd.f32 %v4515_v2, %v4229_v10  ;;  %vm3539_vm6 = vcmp.ge.f32.partialorder %v12451_v58, 0.0  ;;  %v3887_v24 = vmul.f32 0.01, %v12451_v58  ;;  %vm3540_vm7 = vcmp.ge.f32.partialorder %v12452_v7, 0.0  ;;  %v15505_v4 = vpop.f32.mrb[33].mxu1 }
 0x241   :  { %v15503_v63 = vpop.f32.mrb[35].mxu0  ;;  %v3888_v15 = vmul.f32 0.01, %v12452_v7  ;;  %vm3543_vm8 = vcmp.ge.f32.partialorder %v12337_v8, 0.0  ;;  %v3891_v26 = vmul.f32 0.01, %v12337_v8  ;;  %v12339_v38 = vadd.f32 %v1952_v34, %v15319_v31 }
 0x242   :  { %vm3544_vm9 = vcmp.ge.f32.partialorder %v12338_v16, 0.0  ;;  %v15507_v29 = vadd.f32 %v4573_v19, %v4230_v12  ;;  %v4235_v40 = vsel %vm3539_vm6, %v12451_v58, %v3887_v24  ;;  %v3892_v21 = vmul.f32 0.01, %v12338_v16  ;;  %v15510_v20 = vpop.f32.mrb[34].mxu1  ;;  %2906 = vmatmul.mubr.bf16.gmra.mrb[140].mxu0 %v14461_v37  ;;  %v14463_v37 = vld [vmem:[%s18737_s0 + $0xa8] ss:$12 sps:$4 sm:$0xff]  }
 0x243   :  { %v4574_v45 = vadd.f32 %v4516_v13, %v4235_v40  ;;  %v4236_v46 = vsel %vm3540_vm7, %v12452_v7, %v3888_v15  ;;  %v4239_v42 = vsel %vm3543_vm8, %v12337_v8, %v3891_v26  ;;  %v12340_v47 = vadd.f32 %v1954_v41, %v15322_v32  ;;  %v15516_v50 = vpop.f32.mrb[35].mxu1  ;;  %2915 = vmatprep.mubr.bf16.mxu0 %v14462_v52  ;;  %v13875_v13 = vld [vmem:[%s18736_s1 + $0x400] ss:$24 sps:$4 sm:$0xff]  }
 0x244   :  { %18767 = vst [vmem:[#allocation17_spill] sm:$0xff] %v15507_v29  ;;  %v4240_v34 = vsel %vm3544_vm9, %v12338_v16, %v3892_v21  ;;  %vm3549_vm10 = vcmp.ge.f32.partialorder %v12339_v38, 0.0  ;;  %v3897_v56 = vmul.f32 0.01, %v12339_v38  ;;  %v12453_v57 = vadd.f32 %v15473_v36, %v15325_v33 }
 0x245   :  { %v15523_v53 = vadd.f32 %v4574_v45, %v4236_v46  ;;  %vm3550_vm11 = vcmp.ge.f32.partialorder %v12340_v47, 0.0  ;;  %v3898_v49 = vmul.f32 0.01, %v12340_v47  ;;  %v4517_v60 = vadd.f32 %v4240_v34, %v4239_v42  ;;  %v15525_v62 = vpop.f32.mrb[36].mxu0  ;;  %v14464_v34 = vld [vmem:[%s18737_s0 + $0xc4] ss:$12 sps:$4 sm:$0xff]  }
 0x246   :  { %v4245_v41 = vsel %vm3549_vm10, %v12339_v38, %v3897_v56  ;;  %vm3545_vm12 = vcmp.ge.f32.partialorder %v12453_v57, 0.0  ;;  %v3893_v2 = vmul.f32 0.01, %v12453_v57  ;;  %v12454_v0 = vadd.f32 %v15475_v43, %v15327_v35  ;;  %v15529_v5 = vpop.f32.mrb[37].mxu0  ;;  %v13877_v43 = vld [vmem:[%s18736_s1 + $0x404] ss:$24 sps:$4 sm:$0xff]  }
 0x247   :  { %18768 = vst [vmem:[#allocation18_spill] sm:$0xff] %v15523_v53  ;;  %v4246_v58 = vsel %vm3550_vm11, %v12340_v47, %v3898_v49  ;;  %v12455_v7 = vadd.f32 %v15479_v48, %v15325_v33  ;;  %v12456_v36 = vadd.f32 %v15487_v59, %v15327_v35  ;;  %v12341_v8 = vadd.f32 %v1958_v3, %v15319_v31  ;;  %v15536_v10 = vpop.f32.mrb[38].mxu0  ;;  %v15538_v12 = vpop.f32.mrb[36].mxu1 }
 0x248   :  { %v4241_v16 = vsel %vm3545_vm12, %v12453_v57, %v3893_v2  ;;  %vm3546_vm13 = vcmp.ge.f32.partialorder %v12454_v0, 0.0  ;;  %v3894_v48 = vmul.f32 0.01, %v12454_v0  ;;  %v4518_v19 = vadd.f32 %v4246_v58, %v4245_v41  ;;  %v15546_v24 = vpop.f32.mrb[39].mxu0  ;;  %v15548_v59 = vpop.f32.mrb[37].mxu1  ;;  %3146 = vmatprep.subr.bf16.mxu0 %v13877_v43 }
 0x249   :  { %v4575_v3 = vadd.f32 %v4517_v60, %v4241_v16  ;;  %vm3551_vm14 = vcmp.ge.f32.partialorder %v12455_v7, 0.0  ;;  %v3899_v15 = vmul.f32 0.01, %v12455_v7  ;;  %vm3552_vm15 = vcmp.ge.f32.partialorder %v12456_v36, 0.0  ;;  %v15550_v26 = vpop.f32.mrb[38].mxu1  ;;  %3147 = vmatpush1.bf16.msra.mxu0 %v13875_v13 }
 0x24a   :  { %v4242_v40 = vsel %vm3546_vm13, %v12454_v0, %v3894_v48  ;;  %v3900_v21 = vmul.f32 0.01, %v12456_v36  ;;  %vm3555_vm0 = vcmp.ge.f32.partialorder %v12341_v8, 0.0  ;;  %v3903_v38 = vmul.f32 0.01, %v12341_v8  ;;  %2916 = vmatmul.mubr.bf16.gmra.mrb[144].mxu0 %v14463_v37  ;;  %v15555_v45 = vpop.f32.mrb[39].mxu1 }
 0x24b   :  { %v15557_v46 = vadd.f32 %v4575_v3, %v4242_v40  ;;  %v4247_v42 = vsel %vm3551_vm14, %v12455_v7, %v3899_v15  ;;  %v12342_v47 = vadd.f32 %v15496_v9, %v15322_v32  ;;  %v12343_v52 = vadd.f32 %v15499_v18, %v15319_v31  ;;  %2925 = vmatprep.mubr.bf16.mxu0 %v14464_v34 }
 0x24c   :  { %v4576_v56 = vadd.f32 %v4518_v19, %v4247_v42  ;;  %v4248_v57 = vsel %vm3552_vm15, %v12456_v36, %v3900_v21  ;;  %v4251_v49 = vsel %vm3555_vm0, %v12341_v8, %v3903_v38  ;;  %v12344_v60 = vadd.f32 %v15503_v63, %v15322_v32 }
 0x24d   :  { %18769 = vst [vmem:[#allocation19_spill] sm:$0xff] %v15557_v46  ;;  %vm3556_vm1 = vcmp.ge.f32.partialorder %v12342_v47, 0.0  ;;  %v3904_v41 = vmul.f32 0.01, %v12342_v47  ;;  %vm3561_vm2 = vcmp.ge.f32.partialorder %v12343_v52, 0.0  ;;  %v12457_v0 = vadd.f32 %v15501_v14, %v15325_v33  ;;  %v15573_v58 = vpop.f32.mrb[40].mxu0 }
 0x24e   :  { %v3909_v9 = vmul.f32 0.01, %v12343_v52  ;;  %v15569_v2 = vadd.f32 %v4576_v56, %v4248_v57  ;;  %vm3562_vm3 = vcmp.ge.f32.partialorder %v12344_v60, 0.0  ;;  %v3910_v18 = vmul.f32 0.01, %v12344_v60  ;;  %v15579_v13 = vpop.f32.mrb[41].mxu0 }
 0x24f   :  { %v4252_v7 = vsel %vm3556_vm1, %v12342_v47, %v3904_v41  ;;  %v12458_v8 = vadd.f32 %v15505_v4, %v15327_v35  ;;  %v12459_v63 = vadd.f32 %v15510_v20, %v15325_v33  ;;  %v15581_v43 = vpop.f32.mrb[40].mxu1  ;;  %vm3557_vm4 = vcmp.ge.f32.partialorder %v12457_v0, 0.0  ;;  %v15583_v3 = vpop.f32.mrb[42].mxu0  ;;  %v14465_v47 = vld [vmem:[%s18737_s0 + $0xc0] ss:$12 sps:$4 sm:$0xff]  }
 0x250   :  { %18770 = vst [vmem:[#allocation20_spill] sm:$0xff] %v15569_v2  ;;  %v4257_v36 = vsel %vm3561_vm2, %v12343_v52, %v3909_v9  ;;  %v4258_v16 = vsel %vm3562_vm3, %v12344_v60, %v3910_v18  ;;  %v3905_v48 = vmul.f32 0.01, %v12457_v0  ;;  %v4519_v19 = vadd.f32 %v4252_v7, %v4251_v49  ;;  %v15585_v14 = vpop.f32.mrb[41].mxu1  ;;  %v15591_v37 = vpop.f32.mrb[43].mxu0 }
 0x251   :  { %vm3558_vm5 = vcmp.ge.f32.partialorder %v12458_v8, 0.0  ;;  %v3906_v15 = vmul.f32 0.01, %v12458_v8  ;;  %vm3563_vm6 = vcmp.ge.f32.partialorder %v12459_v63, 0.0  ;;  %v3911_v40 = vmul.f32 0.01, %v12459_v63 }
 0x252   :  { %v4253_v4 = vsel %vm3557_vm4, %v12457_v0, %v3905_v48  ;;  %v4520_v21 = vadd.f32 %v4258_v16, %v4257_v36  ;;  %v12460_v20 = vadd.f32 %v15516_v50, %v15327_v35  ;;  %v12345_v38 = vadd.f32 %v15525_v62, %v15319_v31  ;;  %v15593_v42 = vpop.f32.mrb[42].mxu1  ;;  %2926 = vmatmul.mubr.bf16.gmra.mrb[148].mxu0 %v14465_v47  ;;  %v14466_v50 = vld [vmem:[%s18737_s0 + $0xdc] ss:$12 sps:$4 sm:$0xff]  }
 0x253   :  { %v4577_v52 = vadd.f32 %v4519_v19, %v4253_v4  ;;  %v4254_v34 = vsel %vm3558_vm5, %v12458_v8, %v3906_v15  ;;  %v4259_v56 = vsel %vm3563_vm6, %v12459_v63, %v3911_v40  ;;  %v12346_v57 = vadd.f32 %v15529_v5, %v15322_v32  ;;  %v15600_v49 = vpop.f32.mrb[43].mxu1  ;;  %2935 = vmatprep.mubr.bf16.mxu0 %v14466_v50 }
 0x254   :  { %v4578_v62 = vadd.f32 %v4520_v21, %v4259_v56  ;;  %vm3564_vm7 = vcmp.ge.f32.partialorder %v12460_v20, 0.0  ;;  %v3912_v60 = vmul.f32 0.01, %v12460_v20  ;;  %vm3567_vm8 = vcmp.ge.f32.partialorder %v12345_v38, 0.0 }
 0x255   :  { %v15605_v41 = vadd.f32 %v4577_v52, %v4254_v34  ;;  %v3915_v9 = vmul.f32 0.01, %v12345_v38  ;;  %vm3568_vm9 = vcmp.ge.f32.partialorder %v12346_v57, 0.0  ;;  %v3916_v18 = vmul.f32 0.01, %v12346_v57  ;;  %v15607_v0 = vpop.f32.mrb[44].mxu0 }
 0x256   :  { %v4260_v7 = vsel %vm3564_vm7, %v12460_v20, %v3912_v60  ;;  %v12347_v5 = vadd.f32 %v15536_v10, %v15319_v31  ;;  %v12348_v36 = vadd.f32 %v15546_v24, %v15322_v32  ;;  %v12461_v8 = vadd.f32 %v15538_v12, %v15325_v33  ;;  %v15615_v63 = vpop.f32.mrb[45].mxu0 }
 0x257   :  { %18771 = vst [vmem:[#allocation21_spill] sm:$0xff] %v15605_v41  ;;  %v15617_v16 = vadd.f32 %v4578_v62, %v4260_v7  ;;  %v4263_v48 = vsel %vm3567_vm8, %v12345_v38, %v3915_v9  ;;  %v4264_v19 = vsel %vm3568_vm9, %v12346_v57, %v3916_v18  ;;  %v12462_v15 = vadd.f32 %v15548_v59, %v15327_v35  ;;  %v15621_v40 = vpop.f32.mrb[46].mxu0  ;;  %v15623_v4 = vpop.f32.mrb[44].mxu1  ;;  %v14467_v57 = vld [vmem:[%s18737_s0 + $0xd8] ss:$12 sps:$4 sm:$0xff]  }
 0x258   :  { %vm3573_vm10 = vcmp.ge.f32.partialorder %v12347_v5, 0.0  ;;  %v3921_v10 = vmul.f32 0.01, %v12347_v5  ;;  %vm3574_vm11 = vcmp.ge.f32.partialorder %v12348_v36, 0.0  ;;  %v3922_v24 = vmul.f32 0.01, %v12348_v36 }
 0x259   :  { %18772 = vst [vmem:[#allocation22_spill] sm:$0xff] %v15617_v16  ;;  %vm3569_vm12 = vcmp.ge.f32.partialorder %v12461_v8, 0.0  ;;  %v3917_v21 = vmul.f32 0.01, %v12461_v8  ;;  %v4521_v12 = vadd.f32 %v4264_v19, %v4263_v48  ;;  %vm3570_vm13 = vcmp.ge.f32.partialorder %v12462_v15, 0.0  ;;  %v15625_v20 = vpop.f32.mrb[47].mxu0 }
 0x25a   :  { %v15627_v47 = vpop.f32.mrb[45].mxu1  ;;  %v4269_v38 = vsel %vm3573_vm10, %v12347_v5, %v3921_v10  ;;  %v4270_v52 = vsel %vm3574_vm11, %v12348_v36, %v3922_v24  ;;  %v3918_v34 = vmul.f32 0.01, %v12462_v15  ;;  %v12463_v59 = vadd.f32 %v15550_v26, %v15325_v33  ;;  %2936 = vmatmul.mubr.bf16.gmra.mrb[152].mxu0 %v14467_v57  ;;  %v14468_v26 = vld [vmem:[%s18737_s0 + $0xf4] ss:$12 sps:$4 sm:$0xff]  }
 0x25b   :  { %v15631_v56 = vpop.f32.mrb[46].mxu1  ;;  %v4265_v50 = vsel %vm3569_vm12, %v12461_v8, %v3917_v21  ;;  %v4522_v62 = vadd.f32 %v4270_v52, %v4269_v38  ;;  %v12464_v60 = vadd.f32 %v15555_v45, %v15327_v35  ;;  %v12349_v9 = vadd.f32 %v15573_v58, %v15319_v31  ;;  %2945 = vmatprep.mubr.bf16.mxu0 %v14468_v26 }
 0x25c   :  { %v15640_v18 = vpop.f32.mrb[47].mxu1  ;;  %v4579_v7 = vadd.f32 %v4521_v12, %v4265_v50  ;;  %v4266_v5 = vsel %vm3570_vm13, %v12462_v15, %v3918_v34  ;;  %vm3575_vm14 = vcmp.ge.f32.partialorder %v12463_v59, 0.0  ;;  %v3923_v36 = vmul.f32 0.01, %v12463_v59 }
 0x25d   :  { %vm3576_vm15 = vcmp.ge.f32.partialorder %v12464_v60, 0.0  ;;  %v3924_v8 = vmul.f32 0.01, %v12464_v60  ;;  %vm3579_vm0 = vcmp.ge.f32.partialorder %v12349_v9, 0.0  ;;  %v3927_v48 = vmul.f32 0.01, %v12349_v9 }
 0x25e   :  { %v15646_v45 = vadd.f32 %v4579_v7, %v4266_v5  ;;  %v4271_v19 = vsel %vm3575_vm14, %v12463_v59, %v3923_v36  ;;  %v12350_v58 = vadd.f32 %v15579_v13, %v15322_v32  ;;  %v12351_v10 = vadd.f32 %v15583_v3, %v15319_v31  ;;  %v15652_v24 = vpop.f32.mrb[48].mxu0 }
 0x25f   :  { %v4580_v21 = vadd.f32 %v4522_v62, %v4271_v19  ;;  %v4272_v12 = vsel %vm3576_vm15, %v12464_v60, %v3924_v8  ;;  %v4275_v15 = vsel %vm3579_vm0, %v12349_v9, %v3927_v48  ;;  %v12352_v38 = vadd.f32 %v15591_v37, %v15322_v32  ;;  %v15656_v52 = vpop.f32.mrb[49].mxu0  ;;  %v15658_v34 = vpop.f32.mrb[48].mxu1 }
 0x260   :  { %18773 = vst [vmem:[#allocation23_spill] sm:$0xff] %v15646_v45  ;;  %vm3580_vm1 = vcmp.ge.f32.partialorder %v12350_v58, 0.0  ;;  %v3928_v59 = vmul.f32 0.01, %v12350_v58  ;;  %vm3585_vm2 = vcmp.ge.f32.partialorder %v12351_v10, 0.0  ;;  %v12465_v50 = vadd.f32 %v15581_v43, %v15325_v33  ;;  %v15664_v62 = vpop.f32.mrb[50].mxu0 }
 0x261   :  { %v3933_v57 = vmul.f32 0.01, %v12351_v10  ;;  %v15660_v13 = vadd.f32 %v4580_v21, %v4272_v12  ;;  %vm3586_vm3 = vcmp.ge.f32.partialorder %v12352_v38, 0.0  ;;  %v3934_v3 = vmul.f32 0.01, %v12352_v38  ;;  %v15666_v60 = vpop.f32.mrb[49].mxu1 }
 0x262   :  { %v4276_v37 = vsel %vm3580_vm1, %v12350_v58, %v3928_v59  ;;  %v12466_v26 = vadd.f32 %v15585_v14, %v15327_v35  ;;  %v12467_v7 = vadd.f32 %v15593_v42, %v15325_v33  ;;  %v15672_v5 = vpop.f32.mrb[51].mxu0  ;;  %v15674_v36 = vpop.f32.mrb[50].mxu1  ;;  %v14469_v43 = vld [vmem:[%s18737_s0 + $0xf0] ss:$12 sps:$4 sm:$0xff]   ;;  %vm3581_vm4 = vcmp.ge.f32.partialorder %v12465_v50, 0.0 }
 0x263   :  { %18774 = vst [vmem:[#allocation24_spill] sm:$0xff] %v15660_v13  ;;  %v4281_v9 = vsel %vm3585_vm2, %v12351_v10, %v3933_v57  ;;  %2946 = vmatmul.mubr.bf16.gmra.mrb[156].mxu0 %v14469_v43  ;;  %v4282_v8 = vsel %vm3586_vm3, %v12352_v38, %v3934_v3  ;;  %v3929_v48 = vmul.f32 0.01, %v12465_v50  ;;  %v4523_v19 = vadd.f32 %v4276_v37, %v4275_v15  ;;  %v15679_v58 = vpop.f32.mrb[51].mxu1  ;;  %v14470_v14 = vld [vmem:[%s18737_s0 + $0x10c] ss:$12 sps:$4 sm:$0xff]  }
 0x264   :  { %2955 = vmatprep.mubr.bf16.mxu0 %v14470_v14  ;;  %vm3582_vm5 = vcmp.ge.f32.partialorder %v12466_v26, 0.0  ;;  %v3930_v42 = vmul.f32 0.01, %v12466_v26  ;;  %vm3587_vm6 = vcmp.ge.f32.partialorder %v12467_v7, 0.0  ;;  %v3935_v10 = vmul.f32 0.01, %v12467_v7 }
 0x265   :  { %v4277_v21 = vsel %vm3581_vm4, %v12465_v50, %v3929_v48  ;;  %v4524_v12 = vadd.f32 %v4282_v8, %v4281_v9  ;;  %v12468_v59 = vadd.f32 %v15600_v49, %v15327_v35  ;;  %v12353_v38 = vadd.f32 %v15607_v0, %v15319_v31  ;;  %v15688_v15 = vpop.f32.mrb[52].mxu0 }
 0x266   :  { %v4581_v57 = vadd.f32 %v4523_v19, %v4277_v21  ;;  %v4278_v3 = vsel %vm3582_vm5, %v12466_v26, %v3930_v42  ;;  %v4283_v37 = vsel %vm3587_vm6, %v12467_v7, %v3935_v10  ;;  %v12354_v43 = vadd.f32 %v15615_v63, %v15322_v32  ;;  %v15692_v14 = vpop.f32.mrb[53].mxu0 }
 0x267   :  { %v4582_v27 = vadd.f32 %v4524_v12, %v4283_v37  ;;  %vm3588_vm7 = vcmp.ge.f32.partialorder %v12468_v59, 0.0  ;;  %v3936_v50 = vmul.f32 0.01, %v12468_v59  ;;  %vm3591_vm8 = vcmp.ge.f32.partialorder %v12353_v38, 0.0  ;;  %v15694_v9 = vpop.f32.mrb[54].mxu0  ;;  %v15696_v49 = vpop.f32.mrb[52].mxu1 }
 0x268   :  { %v15698_v8 = vadd.f32 %v4581_v57, %v4278_v3  ;;  %v3939_v0 = vmul.f32 0.01, %v12353_v38  ;;  %vm3592_vm9 = vcmp.ge.f32.partialorder %v12354_v43, 0.0  ;;  %v3940_v48 = vmul.f32 0.01, %v12354_v43  ;;  %v15700_v26 = vpop.f32.mrb[55].mxu0 }
 0x269   :  { %v4284_v7 = vsel %vm3588_vm7, %v12468_v59, %v3936_v50  ;;  %v12355_v63 = vadd.f32 %v15621_v40, %v15319_v31  ;;  %v12356_v19 = vadd.f32 %v15625_v20, %v15322_v32  ;;  %v12469_v42 = vadd.f32 %v15623_v4, %v15325_v33  ;;  %v15708_v10 = vpop.f32.mrb[53].mxu1  ;;  %v14471_v40 = vld [vmem:[%s18737_s0 + $0x108] ss:$12 sps:$4 sm:$0xff]  }
 0x26a   :  { %18775 = vst [vmem:[#allocation25_spill] sm:$0xff] %v15698_v8  ;;  %v15710_v21 = vadd.f32 %v4582_v27, %v4284_v7  ;;  %v4287_v12 = vsel %vm3591_vm8, %v12353_v38, %v3939_v0  ;;  %v4288_v57 = vsel %vm3592_vm9, %v12354_v43, %v3940_v48  ;;  %v12470_v3 = vadd.f32 %v15627_v47, %v15327_v35  ;;  %v15714_v37 = vpop.f32.mrb[54].mxu1  ;;  %v14472_v27 = vld [vmem:[%s18737_s0 + $0x124] ss:$12 sps:$4 sm:$0xff]  }
 0x26b   :  { %2956 = vmatmul.mubr.bf16.gmra.mrb[160].mxu0 %v14471_v40  ;;  %vm3597_vm10 = vcmp.ge.f32.partialorder %v12355_v63, 0.0  ;;  %v3945_v20 = vmul.f32 0.01, %v12355_v63  ;;  %vm3598_vm11 = vcmp.ge.f32.partialorder %v12356_v19, 0.0  ;;  %v3946_v4 = vmul.f32 0.01, %v12356_v19 }
 0x26c   :  { %18776 = vst [vmem:[#allocation26_spill] sm:$0xff] %v15710_v21  ;;  %2965 = vmatprep.mubr.bf16.mxu0 %v14472_v27  ;;  %vm3593_vm12 = vcmp.ge.f32.partialorder %v12469_v42, 0.0  ;;  %v3941_v59 = vmul.f32 0.01, %v12469_v42  ;;  %v4525_v38 = vadd.f32 %v4288_v57, %v4287_v12  ;;  %vm3594_vm13 = vcmp.ge.f32.partialorder %v12470_v3, 0.0  ;;  %v15722_v47 = vpop.f32.mrb[55].mxu1 }
 0x26d   :  { %v4293_v43 = vsel %vm3597_vm10, %v12355_v63, %v3945_v20  ;;  %v4294_v50 = vsel %vm3598_vm11, %v12356_v19, %v3946_v4  ;;  %v3942_v0 = vmul.f32 0.01, %v12470_v3  ;;  %v12471_v48 = vadd.f32 %v15631_v56, %v15325_v33  ;;  %v15726_v7 = vpop.f32.mrb[56].mxu0  ;;  %v13878_v40 = vld [vmem:[%s18736_s1 + $0x430] ss:$24 sps:$4 sm:$0xff]  }
 0x26e   :  { %v4289_v28 = vsel %vm3593_vm12, %v12469_v42, %v3941_v59  ;;  %v4526_v27 = vadd.f32 %v4294_v50, %v4293_v43  ;;  %v12472_v12 = vadd.f32 %v15640_v18, %v15327_v35  ;;  %v12357_v57 = vadd.f32 %v15652_v24, %v15319_v31  ;;  %v15735_v63 = vpop.f32.mrb[57].mxu0  ;;  %v13880_v56 = vld [vmem:[%s18736_s1 + $0x434] ss:$24 sps:$4 sm:$0xff]  }
 0x26f   :  { %v4583_v19 = vadd.f32 %v4525_v38, %v4289_v28  ;;  %v4290_v20 = vsel %vm3594_vm13, %v12470_v3, %v3942_v0  ;;  %vm3599_vm14 = vcmp.ge.f32.partialorder %v12471_v48, 0.0  ;;  %v3947_v4 = vmul.f32 0.01, %v12471_v48  ;;  %v15740_v25 = vpop.f32.mrb[58].mxu0  ;;  %v15742_v42 = vpop.f32.mrb[56].mxu1  ;;  %3148 = vmatprep.subr.bf16.mxu0 %v13880_v56 }
 0x270   :  { %vm3600_vm15 = vcmp.ge.f32.partialorder %v12472_v12, 0.0  ;;  %v3948_v59 = vmul.f32 0.01, %v12472_v12  ;;  %vm3603_vm0 = vcmp.ge.f32.partialorder %v12357_v57, 0.0  ;;  %v3951_v18 = vmul.f32 0.01, %v12357_v57  ;;  %3149 = vmatpush1.bf16.msra.mxu0 %v13878_v40 }
 0x271   :  { %v15744_v24 = vadd.f32 %v4583_v19, %v4290_v20  ;;  %v4295_v43 = vsel %vm3599_vm14, %v12471_v48, %v3947_v4  ;;  %v12358_v50 = vadd.f32 %v15656_v52, %v15322_v32  ;;  %v12359_v28 = vadd.f32 %v15664_v62, %v15319_v31  ;;  %v15750_v3 = vpop.f32.mrb[59].mxu0  ;;  %v15752_v38 = vpop.f32.mrb[57].mxu1  ;;  %v14473_v52 = vld [vmem:[%s18737_s0 + $0x120] ss:$12 sps:$4 sm:$0xff]   ;;  %v14474_v40 = vld [vmem:[%s18737_s0 + $0x13c] ss:$12 sps:$4 sm:$0xff]  }
 0x272   :  { %v4584_v0 = vadd.f32 %v4526_v27, %v4295_v43  ;;  %v4296_v21 = vsel %vm3600_vm15, %v12472_v12, %v3948_v59  ;;  %v4299_v8 = vsel %vm3603_vm0, %v12357_v57, %v3951_v18  ;;  %v12360_v56 = vadd.f32 %v15672_v5, %v15322_v32  ;;  %v15756_v19 = vpop.f32.mrb[58].mxu1 }
 0x273   :  { %18777 = vst [vmem:[#allocation27_spill] sm:$0xff] %v15744_v24  ;;  %2966 = vmatmul.mubr.bf16.gmra.mrb[164].mxu0 %v14473_v52  ;;  %vm3604_vm1 = vcmp.ge.f32.partialorder %v12358_v50, 0.0  ;;  %v3952_v62 = vmul.f32 0.01, %v12358_v50  ;;  %vm3609_vm2 = vcmp.ge.f32.partialorder %v12359_v28, 0.0  ;;  %v12473_v12 = vadd.f32 %v15658_v34, %v15325_v33  ;;  %v15768_v57 = vpop.f32.mrb[59].mxu1 }
 0x274   :  { %v3957_v48 = vmul.f32 0.01, %v12359_v28  ;;  %2975 = vmatprep.mubr.bf16.mxu0 %v14474_v40  ;;  %v15764_v27 = vadd.f32 %v4584_v0, %v4296_v21  ;;  %vm3610_vm3 = vcmp.ge.f32.partialorder %v12360_v56, 0.0  ;;  %v3958_v5 = vmul.f32 0.01, %v12360_v56 }
 0x275   :  { %v4300_v20 = vsel %vm3604_vm1, %v12358_v50, %v3952_v62  ;;  %v12474_v59 = vadd.f32 %v15666_v60, %v15327_v35  ;;  %v12475_v18 = vadd.f32 %v15674_v36, %v15325_v33  ;;  %v15774_v43 = vpop.f32.mrb[60].mxu0  ;;  %vm3605_vm4 = vcmp.ge.f32.partialorder %v12473_v12, 0.0 }
 0x276   :  { %18778 = vst [vmem:[#allocation28_spill] sm:$0xff] %v15764_v27  ;;  %v4305_v4 = vsel %vm3609_vm2, %v12359_v28, %v3957_v48  ;;  %v4306_v52 = vsel %vm3610_vm3, %v12360_v56, %v3958_v5  ;;  %v3953_v21 = vmul.f32 0.01, %v12473_v12  ;;  %v4527_v0 = vadd.f32 %v4300_v20, %v4299_v8  ;;  %v15776_v40 = vpop.f32.mrb[61].mxu0 }
 0x277   :  { %vm3606_vm5 = vcmp.ge.f32.partialorder %v12474_v59, 0.0  ;;  %v3954_v34 = vmul.f32 0.01, %v12474_v59  ;;  %vm3611_vm6 = vcmp.ge.f32.partialorder %v12475_v18, 0.0  ;;  %v3959_v27 = vmul.f32 0.01, %v12475_v18 }
 0x278   :  { %v4301_v50 = vsel %vm3605_vm4, %v12473_v12, %v3953_v21  ;;  %v4528_v28 = vadd.f32 %v4306_v52, %v4305_v4  ;;  %v12476_v60 = vadd.f32 %v15679_v58, %v15327_v35  ;;  %v12361_v36 = vadd.f32 %v15688_v15, %v15319_v31  ;;  %v15782_v62 = vpop.f32.mrb[62].mxu0  ;;  %v15784_v56 = vpop.f32.mrb[60].mxu1  ;;  %v14475_v15 = vld [vmem:[%s18737_s0 + $0x138] ss:$12 sps:$4 sm:$0xff]   ;;  %v14476_v21 = vld [vmem:[%s18737_s0 + $0x154] ss:$12 sps:$4 sm:$0xff]  }
 0x279   :  { %v4585_v48 = vadd.f32 %v4527_v0, %v4301_v50  ;;  %v4302_v8 = vsel %vm3606_vm5, %v12474_v59, %v3954_v34  ;;  %v4307_v5 = vsel %vm3611_vm6, %v12475_v18, %v3959_v27  ;;  %v12362_v20 = vadd.f32 %v15692_v14, %v15322_v32  ;;  %v15788_v24 = vpop.f32.mrb[63].mxu0  ;;  %v15790_v12 = vpop.f32.mrb[61].mxu1 }
 0x27a   :  { %v4586_v4 = vadd.f32 %v4528_v28, %v4307_v5  ;;  %vm3612_vm7 = vcmp.ge.f32.partialorder %v12476_v60, 0.0  ;;  %v3960_v58 = vmul.f32 0.01, %v12476_v60  ;;  %vm3615_vm8 = vcmp.ge.f32.partialorder %v12361_v36, 0.0  ;;  %v15792_v52 = vpop.f32.mrb[62].mxu1 }
 0x27b   :  { %2976 = vmatmul.mubr.bf16.gmra.mrb[168].mxu0 %v14475_v15  ;;  %v15797_v59 = vadd.f32 %v4585_v48, %v4302_v8  ;;  %v3963_v27 = vmul.f32 0.01, %v12361_v36  ;;  %vm3616_vm9 = vcmp.ge.f32.partialorder %v12362_v20, 0.0  ;;  %v3964_v14 = vmul.f32 0.01, %v12362_v20  ;;  %v15799_v18 = vpop.f32.mrb[63].mxu1 }
 0x27c   :  { %2985 = vmatprep.mubr.bf16.mxu0 %v14476_v21  ;;  %v4308_v0 = vsel %vm3612_vm7, %v12476_v60, %v3960_v58  ;;  %v12363_v34 = vadd.f32 %v15694_v9, %v15319_v31  ;;  %v12364_v50 = vadd.f32 %v15700_v26, %v15322_v32  ;;  %v12477_v28 = vadd.f32 %v15696_v49, %v15325_v33 }
 0x27d   :  { %18779 = vst [vmem:[#allocation29_spill] sm:$0xff] %v15797_v59  ;;  %v15810_v48 = vadd.f32 %v4586_v4, %v4308_v0  ;;  %v4311_v8 = vsel %vm3615_vm8, %v12361_v36, %v3963_v27  ;;  %v4312_v5 = vsel %vm3616_vm9, %v12362_v20, %v3964_v14  ;;  %v12478_v15 = vadd.f32 %v15708_v10, %v15327_v35  ;;  %v15815_v59 = vpop.f32.mrb[64].mxu0 }
 0x27e   :  { %vm3621_vm10 = vcmp.ge.f32.partialorder %v12363_v34, 0.0  ;;  %v3969_v60 = vmul.f32 0.01, %v12363_v34  ;;  %vm3622_vm11 = vcmp.ge.f32.partialorder %v12364_v50, 0.0  ;;  %v3970_v9 = vmul.f32 0.01, %v12364_v50 }
 0x27f   :  { %18780 = vst [vmem:[#allocation30_spill] sm:$0xff] %v15810_v48  ;;  %vm3617_vm12 = vcmp.ge.f32.partialorder %v12477_v28, 0.0  ;;  %v3965_v58 = vmul.f32 0.01, %v12477_v28  ;;  %v4529_v26 = vadd.f32 %v4312_v5, %v4311_v8  ;;  %vm3618_vm13 = vcmp.ge.f32.partialorder %v12478_v15, 0.0  ;;  %v15817_v21 = vpop.f32.mrb[65].mxu0 }
 0x280   :  { %v15819_v49 = vpop.f32.mrb[64].mxu1  ;;  %v4317_v4 = vsel %vm3621_vm10, %v12363_v34, %v3969_v60  ;;  %v4318_v36 = vsel %vm3622_vm11, %v12364_v50, %v3970_v9  ;;  %v3966_v20 = vmul.f32 0.01, %v12478_v15  ;;  %v12479_v10 = vadd.f32 %v15714_v37, %v15325_v33  ;;  %v15823_v27 = vpop.f32.mrb[66].mxu0 }
 0x281   :  { %v15825_v14 = vpop.f32.mrb[65].mxu1  ;;  %v4313_v0 = vsel %vm3617_vm12, %v12477_v28, %v3965_v58  ;;  %v4530_v48 = vadd.f32 %v4318_v36, %v4317_v4  ;;  %v12480_v8 = vadd.f32 %v15722_v47, %v15327_v35  ;;  %v12365_v5 = vadd.f32 %v15726_v7, %v15319_v31  ;;  %v15831_v13 = vpop.f32.mrb[67].mxu0  ;;  %v14477_v28 = vld [vmem:[%s18737_s0 + $0x150] ss:$12 sps:$4 sm:$0xff]   ;;  %v14478_v58 = vld [vmem:[%s18737_s0 + $0x16c] ss:$12 sps:$4 sm:$0xff]  }
 0x282   :  { %v15833_v34 = vpop.f32.mrb[66].mxu1  ;;  %v4587_v50 = vadd.f32 %v4529_v26, %v4313_v0  ;;  %v4314_v60 = vsel %vm3618_vm13, %v12478_v15, %v3966_v20  ;;  %vm3623_vm14 = vcmp.ge.f32.partialorder %v12479_v10, 0.0  ;;  %v3971_v37 = vmul.f32 0.01, %v12479_v10 }
 0x283   :  { %2986 = vmatmul.mubr.bf16.gmra.mrb[172].mxu0 %v14477_v28  ;;  %v15839_v9 = vpop.f32.mrb[67].mxu1  ;;  %vm3624_vm15 = vcmp.ge.f32.partialorder %v12480_v8, 0.0  ;;  %v3972_v47 = vmul.f32 0.01, %v12480_v8  ;;  %vm3627_vm0 = vcmp.ge.f32.partialorder %v12365_v5, 0.0  ;;  %v12366_v4 = vadd.f32 %v15735_v63, %v15322_v32 }
 0x284   :  { %v3975_v7 = vmul.f32 0.01, %v12365_v5  ;;  %2995 = vmatprep.mubr.bf16.mxu0 %v14478_v58  ;;  %v15844_v26 = vadd.f32 %v4587_v50, %v4314_v60  ;;  %v4319_v15 = vsel %vm3623_vm14, %v12479_v10, %v3971_v37  ;;  %v12367_v36 = vadd.f32 %v15740_v25, %v15319_v31 }
 0x285   :  { %v4588_v20 = vadd.f32 %v4530_v48, %v4319_v15  ;;  %v4320_v0 = vsel %vm3624_vm15, %v12480_v8, %v3972_v47  ;;  %v12368_v45 = vadd.f32 %v15750_v3, %v15322_v32  ;;  %v15852_v16 = vpop.f32.mrb[68].mxu0  ;;  %vm3628_vm1 = vcmp.ge.f32.partialorder %v12366_v4, 0.0 }
 0x286   :  { %18781 = vst [vmem:[#allocation31_spill] sm:$0xff] %v15844_v26  ;;  %v4323_v28 = vsel %vm3627_vm0, %v12365_v5, %v3975_v7  ;;  %v3976_v41 = vmul.f32 0.01, %v12366_v4  ;;  %vm3633_vm2 = vcmp.ge.f32.partialorder %v12367_v36, 0.0  ;;  %v3981_v50 = vmul.f32 0.01, %v12367_v36 }
 0x287   :  { %v15854_v60 = vadd.f32 %v4588_v20, %v4320_v0  ;;  %vm3634_vm3 = vcmp.ge.f32.partialorder %v12368_v45, 0.0  ;;  %v3982_v10 = vmul.f32 0.01, %v12368_v45  ;;  %v12481_v63 = vadd.f32 %v15742_v42, %v15325_v33  ;;  %v15858_v25 = vpop.f32.mrb[69].mxu0  ;;  %v15860_v48 = vpop.f32.mrb[68].mxu1 }
 0x288   :  { %v4324_v8 = vsel %vm3628_vm1, %v12366_v4, %v3976_v41  ;;  %v4329_v5 = vsel %vm3633_vm2, %v12367_v36, %v3981_v50  ;;  %v12482_v3 = vadd.f32 %v15752_v38, %v15327_v35  ;;  %v12483_v37 = vadd.f32 %v15756_v19, %v15325_v33  ;;  %v15866_v47 = vpop.f32.mrb[70].mxu0  ;;  %v15868_v7 = vpop.f32.mrb[69].mxu1  ;;  %v14479_v38 = vld [vmem:[%s18737_s0 + $0x168] ss:$12 sps:$4 sm:$0xff]  }
 0x289   :  { %18782 = vst [vmem:[#allocation32_spill] sm:$0xff] %v15854_v60  ;;  %v4330_v58 = vsel %vm3634_vm3, %v12368_v45, %v3982_v10  ;;  %vm3629_vm4 = vcmp.ge.f32.partialorder %v12481_v63, 0.0  ;;  %v3977_v15 = vmul.f32 0.01, %v12481_v63  ;;  %v4531_v42 = vadd.f32 %v4324_v8, %v4323_v28  ;;  %v15870_v20 = vpop.f32.mrb[71].mxu0  ;;  %v15872_v0 = vpop.f32.mrb[70].mxu1 }
 0x28a   :  { %vm3630_vm5 = vcmp.ge.f32.partialorder %v12482_v3, 0.0  ;;  %v3978_v41 = vmul.f32 0.01, %v12482_v3  ;;  %vm3635_vm6 = vcmp.ge.f32.partialorder %v12483_v37, 0.0  ;;  %v3983_v4 = vmul.f32 0.01, %v12483_v37 }
 0x28b   :  { %2996 = vmatmul.mubr.bf16.gmra.mrb[176].mxu0 %v14479_v38  ;;  %v4325_v19 = vsel %vm3629_vm4, %v12481_v63, %v3977_v15  ;;  %v4532_v36 = vadd.f32 %v4330_v58, %v4329_v5  ;;  %v12484_v45 = vadd.f32 %v15768_v57, %v15327_v35  ;;  %v12369_v28 = vadd.f32 %v15774_v43, %v15319_v31  ;;  %v15881_v50 = vpop.f32.mrb[71].mxu1  ;;  %v14480_v10 = vld [vmem:[%s18737_s0 + $0x184] ss:$12 sps:$4 sm:$0xff]   ;;  %v13881_v57 = vld [vmem:[%s18736_s1 + $0x460] ss:$24 sps:$4 sm:$0xff]  }
 0x28c   :  { %3005 = vmatprep.mubr.bf16.mxu0 %v14480_v10  ;;  %v4589_v8 = vadd.f32 %v4531_v42, %v4325_v19  ;;  %v4326_v60 = vsel %vm3630_vm5, %v12482_v3, %v3978_v41  ;;  %v4331_v26 = vsel %vm3635_vm6, %v12483_v37, %v3983_v4  ;;  %v12370_v63 = vadd.f32 %v15776_v40, %v15322_v32  ;;  %v13883_v43 = vld [vmem:[%s18736_s1 + $0x464] ss:$24 sps:$4 sm:$0xff]  }
 0x28d   :  { %v4590_v5 = vadd.f32 %v4532_v36, %v4331_v26  ;;  %vm3636_vm7 = vcmp.ge.f32.partialorder %v12484_v45, 0.0  ;;  %v3984_v58 = vmul.f32 0.01, %v12484_v45  ;;  %vm3639_vm8 = vcmp.ge.f32.partialorder %v12369_v28, 0.0  ;;  %v15894_v15 = vpop.f32.mrb[72].mxu0  ;;  %3150 = vmatprep.subr.bf16.mxu0 %v13883_v43 }
 0x28e   :  { %v15896_v42 = vadd.f32 %v4589_v8, %v4326_v60  ;;  %v3987_v3 = vmul.f32 0.01, %v12369_v28  ;;  %vm3640_vm9 = vcmp.ge.f32.partialorder %v12370_v63, 0.0  ;;  %v3988_v37 = vmul.f32 0.01, %v12370_v63  ;;  %v15898_v40 = vpop.f32.mrb[73].mxu0  ;;  %3151 = vmatpush1.bf16.msra.mxu0 %v13881_v57 }
 0x28f   :  { %v4332_v41 = vsel %vm3636_vm7, %v12484_v45, %v3984_v58  ;;  %v12371_v4 = vadd.f32 %v15782_v62, %v15319_v31  ;;  %v12372_v26 = vadd.f32 %v15788_v24, %v15322_v32  ;;  %v12485_v38 = vadd.f32 %v15784_v56, %v15325_v33  ;;  %v15906_v19 = vpop.f32.mrb[74].mxu0  ;;  %v15908_v60 = vpop.f32.mrb[72].mxu1 }
 0x290   :  { %18783 = vst [vmem:[#allocation33_spill] sm:$0xff] %v15896_v42  ;;  %v15910_v36 = vadd.f32 %v4590_v5, %v4332_v41  ;;  %v4335_v10 = vsel %vm3639_vm8, %v12369_v28, %v3987_v3  ;;  %v4336_v8 = vsel %vm3640_vm9, %v12370_v63, %v3988_v37  ;;  %v12486_v45 = vadd.f32 %v15790_v12, %v15327_v35  ;;  %v15915_v62 = vpop.f32.mrb[75].mxu0  ;;  %v15917_v43 = vpop.f32.mrb[73].mxu1  ;;  %v14481_v28 = vld [vmem:[%s18737_s0 + $0x180] ss:$12 sps:$4 sm:$0xff]  }
 0x291   :  { %v4533_v24 = vadd.f32 %v4336_v8, %v4335_v10  ;;  %vm3645_vm10 = vcmp.ge.f32.partialorder %v12371_v4, 0.0  ;;  %v3993_v56 = vmul.f32 0.01, %v12371_v4  ;;  %vm3646_vm11 = vcmp.ge.f32.partialorder %v12372_v26, 0.0  ;;  %v15919_v58 = vpop.f32.mrb[74].mxu1 }
 0x292   :  { %18784 = vst [vmem:[#allocation34_spill] sm:$0xff] %v15910_v36  ;;  %v3994_v42 = vmul.f32 0.01, %v12372_v26  ;;  %vm3641_vm12 = vcmp.ge.f32.partialorder %v12485_v38, 0.0  ;;  %v3989_v57 = vmul.f32 0.01, %v12485_v38  ;;  %v12487_v5 = vadd.f32 %v15792_v52, %v15325_v33 }
 0x293   :  { %vm3642_vm13 = vcmp.ge.f32.partialorder %v12486_v45, 0.0  ;;  %3006 = vmatmul.mubr.bf16.gmra.mrb[180].mxu0 %v14481_v28  ;;  %v4341_v12 = vsel %vm3645_vm10, %v12371_v4, %v3993_v56  ;;  %v3990_v63 = vmul.f32 0.01, %v12486_v45  ;;  %v12488_v3 = vadd.f32 %v15799_v18, %v15327_v35  ;;  %v15928_v37 = vpop.f32.mrb[75].mxu1  ;;  %v14482_v41 = vld [vmem:[%s18737_s0 + $0x19c] ss:$12 sps:$4 sm:$0xff]  }
 0x294   :  { %3015 = vmatprep.mubr.bf16.mxu0 %v14482_v41  ;;  %v4342_v10 = vsel %vm3646_vm11, %v12372_v26, %v3994_v42  ;;  %v4337_v8 = vsel %vm3641_vm12, %v12485_v38, %v3989_v57  ;;  %v12373_v28 = vadd.f32 %v15815_v59, %v15319_v31  ;;  %v12374_v4 = vadd.f32 %v15817_v21, %v15322_v32 }
 0x295   :  { %v4534_v56 = vadd.f32 %v4342_v10, %v4341_v12  ;;  %v4591_v52 = vadd.f32 %v4533_v24, %v4337_v8  ;;  %v4338_v36 = vsel %vm3642_vm13, %v12486_v45, %v3990_v63  ;;  %vm3647_vm14 = vcmp.ge.f32.partialorder %v12487_v5, 0.0  ;;  %v15938_v18 = vpop.f32.mrb[76].mxu0 }
 0x296   :  { %v3995_v2 = vmul.f32 0.01, %v12487_v5  ;;  %vm3648_vm15 = vcmp.ge.f32.partialorder %v12488_v3, 0.0  ;;  %v3996_v46 = vmul.f32 0.01, %v12488_v3  ;;  %vm3651_vm0 = vcmp.ge.f32.partialorder %v12373_v28, 0.0 }
 0x297   :  { %v15940_v41 = vadd.f32 %v4591_v52, %v4338_v36  ;;  %v3999_v42 = vmul.f32 0.01, %v12373_v28  ;;  %vm3652_vm1 = vcmp.ge.f32.partialorder %v12374_v4, 0.0  ;;  %v4000_v26 = vmul.f32 0.01, %v12374_v4  ;;  %v15942_v59 = vpop.f32.mrb[77].mxu0 }
 0x298   :  { %v4343_v38 = vsel %vm3647_vm14, %v12487_v5, %v3995_v2  ;;  %v4344_v21 = vsel %vm3648_vm15, %v12488_v3, %v3996_v46  ;;  %v12375_v24 = vadd.f32 %v15823_v27, %v15319_v31  ;;  %v12376_v45 = vadd.f32 %v15831_v13, %v15322_v32  ;;  %v15948_v57 = vpop.f32.mrb[78].mxu0  ;;  %v15950_v12 = vpop.f32.mrb[76].mxu1  ;;  %v13884_v36 = vld [vmem:[%s18739_s3] ss:$8 sps:$4 sm:$0xff]   ;;  %v13886_v13 = vld [vmem:[%s18739_s3 + $0x4] ss:$8 sps:$4 sm:$0xff]  }
 0x299   :  { %18785 = vst [vmem:[#allocation35_spill] sm:$0xff] %v15940_v41  ;;  %v4592_v63 = vadd.f32 %v4534_v56, %v4343_v38  ;;  %v4347_v10 = vsel %vm3651_vm0, %v12373_v28, %v3999_v42  ;;  %v4348_v8 = vsel %vm3652_vm1, %v12374_v4, %v4000_v26  ;;  %v12489_v46 = vadd.f32 %v15819_v49, %v15325_v33  ;;  %v15957_v2 = vpop.f32.mrb[79].mxu0  ;;  %v15959_v27 = vpop.f32.mrb[77].mxu1  ;;  %v14483_v28 = vld [vmem:[%s18737_s0 + $0x198] ss:$12 sps:$4 sm:$0xff]  }
 0x29a   :  { %v4535_v5 = vadd.f32 %v4348_v8, %v4347_v10  ;;  %vm3657_vm2 = vcmp.ge.f32.partialorder %v12375_v24, 0.0  ;;  %v4005_v3 = vmul.f32 0.01, %v12375_v24  ;;  %vm3658_vm3 = vcmp.ge.f32.partialorder %v12376_v45, 0.0  ;;  %v15964_v52 = vpop.f32.mrb[78].mxu1  ;;  %7071 = vmatprep.subr.bf16.mxu1 %v13886_v13 }
 0x29b   :  { %3016 = vmatmul.mubr.bf16.gmra.mrb[184].mxu0 %v14483_v28  ;;  %v15969_v49 = vadd.f32 %v4592_v63, %v4344_v21  ;;  %v4006_v4 = vmul.f32 0.01, %v12376_v45  ;;  %vm3653_vm4 = vcmp.ge.f32.partialorder %v12489_v46, 0.0  ;;  %v4001_v56 = vmul.f32 0.01, %v12489_v46  ;;  %v15971_v42 = vpop.f32.mrb[79].mxu1  ;;  %7072 = vmatpush1.bf16.msra.mxu1 %v13884_v36 }
 0x29c   :  { %v14484_v26 = vld [vmem:[%s18737_s0 + $0x1b4] ss:$12 sps:$4 sm:$0xff]   ;;  %v4353_v38 = vsel %vm3657_vm2, %v12375_v24, %v4005_v3  ;;  %v12490_v10 = vadd.f32 %v15825_v14, %v15327_v35  ;;  %v12491_v8 = vadd.f32 %v15833_v34, %v15325_v33  ;;  %v12492_v21 = vadd.f32 %v15839_v9, %v15327_v35  ;;  %v13887_v63 = vld [vmem:[%s18739_s3 + $0x10] ss:$8 sps:$4 sm:$0xff]   ;;  %v13892_v9 = vld [vmem:[%s18739_s3 + $0x24] ss:$8 sps:$4 sm:$0xff]  }
 0x29d   :  { %18786 = vst [vmem:[#allocation36_spill] sm:$0xff] %v15969_v49  ;;  %3025 = vmatprep.mubr.bf16.mxu0 %v14484_v26  ;;  %v13889_v28 = vld [vmem:[%s18739_s3 + $0x14] ss:$8 sps:$4 sm:$0xff]   ;;  %v4354_v24 = vsel %vm3658_vm3, %v12376_v45, %v4006_v4  ;;  %v4349_v13 = vsel %vm3653_vm4, %v12489_v46, %v4001_v56  ;;  %v12377_v14 = vadd.f32 %v15852_v16, %v15319_v31  ;;  %v15993_v3 = vpop.f32.mrb[80].mxu0  ;;  %v13890_v16 = vld [vmem:[%s18739_s3 + $0x20] ss:$8 sps:$4 sm:$0xff]  }
 0x29e   :  { %v12378_v34 = vadd.f32 %v15858_v25, %v15322_v32  ;;  %v4536_v36 = vadd.f32 %v4354_v24, %v4353_v38  ;;  %v4593_v26 = vadd.f32 %v4535_v5, %v4349_v13  ;;  %vm3654_vm5 = vcmp.ge.f32.partialorder %v12490_v10, 0.0  ;;  %v15998_v41 = vpop.f32.mrb[81].mxu0  ;;  %7073 = vmatprep.subr.bf16.mxu1 %v13889_v28 }
 0x29f   :  { %v4002_v49 = vmul.f32 0.01, %v12490_v10  ;;  %vm3659_vm6 = vcmp.ge.f32.partialorder %v12491_v8, 0.0  ;;  %v4007_v45 = vmul.f32 0.01, %v12491_v8  ;;  %vm3660_vm7 = vcmp.ge.f32.partialorder %v12492_v21, 0.0  ;;  %7074 = vmatpush1.bf16.msra.mxu1 %v13887_v63 }
 0x2a0   :  { %v4008_v25 = vmul.f32 0.01, %v12492_v21  ;;  %vm3663_vm8 = vcmp.ge.f32.partialorder %v12377_v14, 0.0  ;;  %v4011_v4 = vmul.f32 0.01, %v12377_v14  ;;  %vm3664_vm9 = vcmp.ge.f32.partialorder %v12378_v34, 0.0  ;;  %7075 = vmatprep.subr.bf16.mxu1 %v13892_v9 }
 0x2a1   :  { %v4350_v46 = vsel %vm3654_vm5, %v12490_v10, %v4002_v49  ;;  %v16003_v56 = vpop.f32.mrb[82].mxu0  ;;  %v16005_v5 = vpop.f32.mrb[80].mxu1  ;;  %v4355_v28 = vsel %vm3659_vm6, %v12491_v8, %v4007_v45  ;;  %v4012_v13 = vmul.f32 0.01, %v12378_v34  ;;  %v12379_v10 = vadd.f32 %v15866_v47, %v15319_v31  ;;  %v14485_v8 = vld [vmem:[%s18737_s0 + $0x1b0] ss:$12 sps:$4 sm:$0xff]  }
 0x2a2   :  { %v16007_v38 = vadd.f32 %v4593_v26, %v4350_v46  ;;  %v4356_v24 = vsel %vm3660_vm7, %v12492_v21, %v4008_v25  ;;  %v16009_v53 = vpop.f32.mrb[83].mxu0  ;;  %v16011_v29 = vpop.f32.mrb[81].mxu1  ;;  %v4594_v51 = vadd.f32 %v4536_v36, %v4355_v28  ;;  %v4359_v49 = vsel %vm3663_vm8, %v12377_v14, %v4011_v4  ;;  %v13893_v21 = vld [vmem:[%s18739_s3 + $0x30] ss:$8 sps:$4 sm:$0xff]   ;;  %v13895_v63 = vld [vmem:[%s18739_s3 + $0x34] ss:$8 sps:$4 sm:$0xff]  }
 0x2a3   :  { %v12380_v22 = vadd.f32 %v15870_v20, %v15322_v32  ;;  %v16017_v54 = vpop.f32.mrb[82].mxu1  ;;  %3026 = vmatmul.mubr.bf16.gmra.mrb[188].mxu0 %v14485_v8  ;;  %v4360_v47 = vsel %vm3664_vm9, %v12378_v34, %v4012_v13  ;;  %v12493_v20 = vadd.f32 %v15860_v48, %v15325_v33  ;;  %v12494_v14 = vadd.f32 %v15868_v7, %v15327_v35  ;;  %v14486_v26 = vld [vmem:[%s18737_s0 + $0x1cc] ss:$12 sps:$4 sm:$0xff]  }
 0x2a4   :  { %18787 = vst [vmem:[#allocation37_spill] sm:$0xff] %v16007_v38  ;;  %v12495_v9 = vadd.f32 %v15872_v0, %v15325_v33  ;;  %v16035_v36 = vpop.f32.mrb[83].mxu1  ;;  %3035 = vmatprep.mubr.bf16.mxu0 %v14486_v26  ;;  %v16040_v45 = vadd.f32 %v4594_v51, %v4356_v24  ;;  %v4537_v25 = vadd.f32 %v4360_v47, %v4359_v49  ;;  %vm3669_vm10 = vcmp.ge.f32.partialorder %v12379_v10, 0.0 }
 0x2a5   :  { %v4017_v34 = vmul.f32 0.01, %v12379_v10  ;;  %7076 = vmatpush1.bf16.msra.mxu1 %v13890_v16  ;;  %vm3670_vm11 = vcmp.ge.f32.partialorder %v12380_v22, 0.0  ;;  %v4018_v48 = vmul.f32 0.01, %v12380_v22  ;;  %vm3665_vm12 = vcmp.ge.f32.partialorder %v12493_v20, 0.0 }
 0x2a6   :  { %18788 = vst [vmem:[#allocation38_spill] sm:$0xff] %v16040_v45  ;;  %v4013_v7 = vmul.f32 0.01, %v12493_v20  ;;  %7077 = vmatprep.subr.bf16.mxu1 %v13895_v63  ;;  %vm3666_vm13 = vcmp.ge.f32.partialorder %v12494_v14, 0.0  ;;  %v4014_v0 = vmul.f32 0.01, %v12494_v14  ;;  %v12496_v51 = vadd.f32 %v15881_v50, %v15327_v35 }
 0x2a7   :  { %v4365_v46 = vsel %vm3669_vm10, %v12379_v10, %v4017_v34  ;;  %vm3671_vm14 = vcmp.ge.f32.partialorder %v12495_v9, 0.0  ;;  %v16042_v4 = vpop.f32.mrb[84].mxu0  ;;  %v4366_v28 = vsel %vm3670_vm11, %v12380_v22, %v4018_v48  ;;  %v4019_v8 = vmul.f32 0.01, %v12495_v9  ;;  %v16048_v16 = vpop.f32.mrb[84].mxu1 }
 0x2a8   :  { %v4361_v13 = vsel %vm3665_vm12, %v12493_v20, %v4013_v7  ;;  %v16046_v24 = vpop.f32.mrb[85].mxu0  ;;  %v4538_v49 = vadd.f32 %v4366_v28, %v4365_v46  ;;  %v4362_v26 = vsel %vm3666_vm13, %v12494_v14, %v4014_v0  ;;  %v12381_v10 = vadd.f32 %v15894_v15, %v15319_v31  ;;  %v16054_v34 = vpop.f32.mrb[85].mxu1  ;;  %v14487_v46 = vld [vmem:[%s18737_s0 + $0x1c8] ss:$12 sps:$4 sm:$0xff]   ;;  %v14488_v28 = vld [vmem:[%s18737_s0 + $0x1e4] ss:$12 sps:$4 sm:$0xff]  }
 0x2a9   :  { %v4595_v47 = vadd.f32 %v4537_v25, %v4361_v13  ;;  %v16052_v63 = vpop.f32.mrb[86].mxu0  ;;  %7078 = vmatpush1.bf16.msra.mxu1 %v13893_v21  ;;  %v4367_v22 = vsel %vm3671_vm14, %v12495_v9, %v4019_v8  ;;  %vm3672_vm15 = vcmp.ge.f32.partialorder %v12496_v51, 0.0  ;;  %v4020_v20 = vmul.f32 0.01, %v12496_v51  ;;  %v16060_v7 = vpop.f32.mrb[86].mxu1 }
 0x2aa   :  { %v12382_v50 = vadd.f32 %v15898_v40, %v15322_v32  ;;  %v16058_v48 = vpop.f32.mrb[87].mxu0  ;;  %v4596_v14 = vadd.f32 %v4538_v49, %v4367_v22  ;;  %vm3675_vm0 = vcmp.ge.f32.partialorder %v12381_v10, 0.0  ;;  %v4023_v15 = vmul.f32 0.01, %v12381_v10  ;;  %v16067_v21 = vpop.f32.mrb[87].mxu1 }
 0x2ab   :  { %v16062_v25 = vadd.f32 %v4595_v47, %v4362_v26  ;;  %3036 = vmatmul.mubr.bf16.gmra.mrb[192].mxu0 %v14487_v46  ;;  %v4368_v9 = vsel %vm3672_vm15, %v12496_v51, %v4020_v20  ;;  %v12383_v40 = vadd.f32 %v15906_v19, %v15319_v31  ;;  %v12384_v49 = vadd.f32 %v15915_v62, %v15322_v32 }
 0x2ac   :  { %vm3676_vm1 = vcmp.ge.f32.partialorder %v12382_v50, 0.0  ;;  %v4024_v0 = vmul.f32 0.01, %v12382_v50  ;;  %3045 = vmatprep.mubr.bf16.mxu0 %v14488_v28  ;;  %v16074_v13 = vadd.f32 %v4596_v14, %v4368_v9  ;;  %v4371_v8 = vsel %vm3675_vm0, %v12381_v10, %v4023_v15 }
 0x2ad   :  { %18789 = vst [vmem:[#allocation39_spill] sm:$0xff] %v16062_v25  ;;  %v12497_v47 = vadd.f32 %v15908_v60, %v15325_v33  ;;  %vm3681_vm2 = vcmp.ge.f32.partialorder %v12383_v40, 0.0  ;;  %v4029_v26 = vmul.f32 0.01, %v12383_v40  ;;  %v12498_v19 = vadd.f32 %v15917_v43, %v15327_v35  ;;  %v16082_v22 = vpop.f32.mrb[88].mxu0 }
 0x2ae   :  { %18790 = vst [vmem:[#allocation40_spill] sm:$0xff] %v16074_v13  ;;  %v4372_v51 = vsel %vm3676_vm1, %v12382_v50, %v4024_v0  ;;  %vm3682_vm3 = vcmp.ge.f32.partialorder %v12384_v49, 0.0  ;;  %v4030_v46 = vmul.f32 0.01, %v12384_v49  ;;  %v16084_v14 = vpop.f32.mrb[89].mxu0  ;;  %v12499_v50 = vadd.f32 %v15919_v58, %v15325_v33 }
 0x2af   :  { %v4539_v20 = vadd.f32 %v4372_v51, %v4371_v8  ;;  %vm3677_vm4 = vcmp.ge.f32.partialorder %v12497_v47, 0.0  ;;  %v4377_v10 = vsel %vm3681_vm2, %v12383_v40, %v4029_v26  ;;  %v4025_v15 = vmul.f32 0.01, %v12497_v47  ;;  %v16086_v9 = vpop.f32.mrb[90].mxu0  ;;  %v16096_v8 = vpop.f32.mrb[88].mxu1 }
 0x2b0   :  { %vm3678_vm5 = vcmp.ge.f32.partialorder %v12498_v19, 0.0  ;;  %v4026_v62 = vmul.f32 0.01, %v12498_v19  ;;  %v4378_v60 = vsel %vm3682_vm3, %v12384_v49, %v4030_v46  ;;  %v12500_v43 = vadd.f32 %v15928_v37, %v15327_v35  ;;  %v16094_v28 = vpop.f32.mrb[91].mxu0  ;;  %v16100_v49 = vpop.f32.mrb[89].mxu1 }
 0x2b1   :  { %v12385_v0 = vadd.f32 %v15938_v18, %v15319_v31  ;;  %v4540_v40 = vadd.f32 %v4378_v60, %v4377_v10  ;;  %v4373_v51 = vsel %vm3677_vm4, %v12497_v47, %v4025_v15  ;;  %v12386_v13 = vadd.f32 %v15942_v59, %v15322_v32  ;;  %v16102_v37 = vpop.f32.mrb[90].mxu1  ;;  %v14489_v18 = vld [vmem:[%s18737_s0 + $0x1e0] ss:$12 sps:$4 sm:$0xff]   ;;  %v14490_v59 = vld [vmem:[%s18737_s0 + $0x1fc] ss:$12 sps:$4 sm:$0xff]  }
 0x2b2   :  { %v4374_v26 = vsel %vm3678_vm5, %v12498_v19, %v4026_v62  ;;  %v4597_v46 = vadd.f32 %v4539_v20, %v4373_v51  ;;  %vm3683_vm6 = vcmp.ge.f32.partialorder %v12499_v50, 0.0  ;;  %v4031_v58 = vmul.f32 0.01, %v12499_v50  ;;  %v16114_v62 = vpop.f32.mrb[91].mxu1  ;;  %v13896_v60 = vld [vmem:[%s18739_s3 + $0x40] ss:$8 sps:$4 sm:$0xff]  }
 0x2b3   :  { %vm3684_vm7 = vcmp.ge.f32.partialorder %v12500_v43, 0.0  ;;  %3046 = vmatmul.mubr.bf16.gmra.mrb[196].mxu0 %v14489_v18  ;;  %v4032_v25 = vmul.f32 0.01, %v12500_v43  ;;  %vm3687_vm8 = vcmp.ge.f32.partialorder %v12385_v0, 0.0  ;;  %v4035_v47 = vmul.f32 0.01, %v12385_v0 }
 0x2b4   :  { %vm3688_vm9 = vcmp.ge.f32.partialorder %v12386_v13, 0.0  ;;  %3055 = vmatprep.mubr.bf16.mxu0 %v14490_v59  ;;  %v16110_v19 = vadd.f32 %v4597_v46, %v4374_v26  ;;  %v4379_v20 = vsel %vm3683_vm6, %v12499_v50, %v4031_v58  ;;  %v4036_v10 = vmul.f32 0.01, %v12386_v13  ;;  %v13898_v50 = vld [vmem:[%s18739_s3 + $0x44] ss:$8 sps:$4 sm:$0xff]  }
 0x2b5   :  { %v12387_v15 = vadd.f32 %v15948_v57, %v15319_v31  ;;  %v4598_v51 = vadd.f32 %v4540_v40, %v4379_v20  ;;  %v4380_v18 = vsel %vm3684_vm7, %v12500_v43, %v4032_v25  ;;  %v4383_v45 = vsel %vm3687_vm8, %v12385_v0, %v4035_v47  ;;  %v16122_v26 = vpop.f32.mrb[92].mxu0  ;;  %7079 = vmatprep.subr.bf16.mxu1 %v13898_v50 }
 0x2b6   :  { %18791 = vst [vmem:[#allocation41_spill] sm:$0xff] %v16110_v19  ;;  %v12388_v59 = vadd.f32 %v15957_v2, %v15322_v32  ;;  %v4384_v57 = vsel %vm3688_vm9, %v12386_v13, %v4036_v10  ;;  %v12501_v58 = vadd.f32 %v15950_v12, %v15325_v33  ;;  %v16129_v19 = vpop.f32.mrb[93].mxu0  ;;  %v12502_v20 = vadd.f32 %v15959_v27, %v15327_v35 }
 0x2b7   :  { %vm3693_vm10 = vcmp.ge.f32.partialorder %v12387_v15, 0.0  ;;  %v4041_v46 = vmul.f32 0.01, %v12387_v15  ;;  %v16131_v40 = vadd.f32 %v4598_v51, %v4380_v18  ;;  %v4541_v25 = vadd.f32 %v4384_v57, %v4383_v45  ;;  %v16133_v2 = vpop.f32.mrb[94].mxu0  ;;  %v16135_v0 = vpop.f32.mrb[92].mxu1  ;;  %7080 = vmatpush1.bf16.msra.mxu1 %v13896_v60 }
 0x2b8   :  { %vm3694_vm11 = vcmp.ge.f32.partialorder %v12388_v59, 0.0  ;;  %v4042_v43 = vmul.f32 0.01, %v12388_v59  ;;  %vm3689_vm12 = vcmp.ge.f32.partialorder %v12501_v58, 0.0  ;;  %v4037_v13 = vmul.f32 0.01, %v12501_v58 }
 0x2b9   :  { %18792 = vst [vmem:[#allocation42_spill] sm:$0xff] %v16131_v40  ;;  %v4389_v47 = vsel %vm3693_vm10, %v12387_v15, %v4041_v46  ;;  %v16139_v10 = vpop.f32.mrb[95].mxu0  ;;  %v16141_v12 = vpop.f32.mrb[93].mxu1  ;;  %v12503_v45 = vadd.f32 %v15964_v52, %v15325_v33  ;;  %v12504_v18 = vadd.f32 %v15971_v42, %v15327_v35  ;;  %v12389_v15 = vadd.f32 %v15993_v3, %v15319_v31  ;;  %v14491_v60 = vld [vmem:[%s18737_s0 + $0x1f8] ss:$12 sps:$4 sm:$0xff]  }
 0x2ba   :  { %v4390_v51 = vsel %vm3694_vm11, %v12388_v59, %v4042_v43  ;;  %v16149_v50 = vpop.f32.mrb[94].mxu1  ;;  %v4385_v46 = vsel %vm3689_vm12, %v12501_v58, %v4037_v13  ;;  %vm3690_vm13 = vcmp.ge.f32.partialorder %v12502_v20, 0.0  ;;  %v4038_v27 = vmul.f32 0.01, %v12502_v20  ;;  %v14492_v42 = vld [vmem:[%s18737_s0 + $0x214] ss:$12 sps:$4 sm:$0xff]  }
 0x2bb   :  { %v4542_v57 = vadd.f32 %v4390_v51, %v4389_v47  ;;  %3056 = vmatmul.mubr.bf16.gmra.mrb[200].mxu0 %v14491_v60  ;;  %v16154_v59 = vpop.f32.mrb[95].mxu1  ;;  %v4599_v52 = vadd.f32 %v4541_v25, %v4385_v46  ;;  %vm3695_vm14 = vcmp.ge.f32.partialorder %v12503_v45, 0.0  ;;  %v4043_v43 = vmul.f32 0.01, %v12503_v45 }
 0x2bc   :  { %vm3696_vm15 = vcmp.ge.f32.partialorder %v12504_v18, 0.0  ;;  %3065 = vmatprep.mubr.bf16.mxu0 %v14492_v42  ;;  %v4386_v3 = vsel %vm3690_vm13, %v12502_v20, %v4038_v27  ;;  %v4044_v58 = vmul.f32 0.01, %v12504_v18  ;;  %vm3699_vm0 = vcmp.ge.f32.partialorder %v12389_v15, 0.0 }
 0x2bd   :  { %v4047_v47 = vmul.f32 0.01, %v12389_v15  ;;  %v16159_v13 = vadd.f32 %v4599_v52, %v4386_v3  ;;  %v4391_v51 = vsel %vm3695_vm14, %v12503_v45, %v4043_v43  ;;  %v12390_v60 = vadd.f32 %v15998_v41, %v15322_v32  ;;  %v16165_v46 = vpop.f32.mrb[96].mxu0 }
 0x2be   :  { %v12391_v25 = vadd.f32 %v16003_v56, %v15319_v31  ;;  %v4600_v40 = vadd.f32 %v4542_v57, %v4391_v51  ;;  %v4392_v38 = vsel %vm3696_vm15, %v12504_v18, %v4044_v58  ;;  %v12392_v20 = vadd.f32 %v16009_v53, %v15322_v32  ;;  %v16169_v27 = vpop.f32.mrb[97].mxu0 }
 0x2bf   :  { %18793 = vst [vmem:[#allocation43_spill] sm:$0xff] %v16159_v13  ;;  %v4395_v39 = vsel %vm3699_vm0, %v12389_v15, %v4047_v47  ;;  %vm3700_vm1 = vcmp.ge.f32.partialorder %v12390_v60, 0.0  ;;  %v4048_v52 = vmul.f32 0.01, %v12390_v60  ;;  %v12505_v56 = vadd.f32 %v16005_v5, %v15325_v33  ;;  %v16175_v42 = vpop.f32.mrb[98].mxu0  ;;  %v16177_v18 = vpop.f32.mrb[96].mxu1 }
 0x2c0   :  { %vm3705_vm2 = vcmp.ge.f32.partialorder %v12391_v25, 0.0  ;;  %v4053_v45 = vmul.f32 0.01, %v12391_v25  ;;  %v16171_v43 = vadd.f32 %v4600_v40, %v4392_v38  ;;  %vm3706_vm3 = vcmp.ge.f32.partialorder %v12392_v20, 0.0  ;;  %v16183_v58 = vpop.f32.mrb[99].mxu0  ;;  %v16185_v38 = vpop.f32.mrb[97].mxu1 }
 0x2c1   :  { %v4054_v41 = vmul.f32 0.01, %v12392_v20  ;;  %v4396_v15 = vsel %vm3700_vm1, %v12390_v60, %v4048_v52  ;;  %v12506_v53 = vadd.f32 %v16011_v29, %v15327_v35  ;;  %v12507_v3 = vadd.f32 %v16017_v54, %v15325_v33  ;;  %v16187_v51 = vpop.f32.mrb[98].mxu1  ;;  %v14493_v60 = vld [vmem:[%s18737_s0 + $0x210] ss:$12 sps:$4 sm:$0xff]  }
 0x2c2   :  { %18794 = vst [vmem:[#allocation44_spill] sm:$0xff] %v16171_v43  ;;  %v4401_v57 = vsel %vm3705_vm2, %v12391_v25, %v4053_v45  ;;  %v4543_v40 = vadd.f32 %v4396_v15, %v4395_v39  ;;  %vm3701_vm4 = vcmp.ge.f32.partialorder %v12505_v56, 0.0  ;;  %v4049_v5 = vmul.f32 0.01, %v12505_v56  ;;  %v13899_v29 = vld [vmem:[%s18739_s3 + $0x50] ss:$8 sps:$4 sm:$0xff]  }
 0x2c3   :  { %v4402_v47 = vsel %vm3706_vm3, %v12392_v20, %v4054_v41  ;;  %3066 = vmatmul.mubr.bf16.gmra.mrb[204].mxu0 %v14493_v60  ;;  %vm3702_vm5 = vcmp.ge.f32.partialorder %v12506_v53, 0.0  ;;  %v4050_v25 = vmul.f32 0.01, %v12506_v53  ;;  %vm3707_vm6 = vcmp.ge.f32.partialorder %v12507_v3, 0.0  ;;  %v16195_v52 = vpop.f32.mrb[99].mxu1 }
 0x2c4   :  { %v4544_v54 = vadd.f32 %v4402_v47, %v4401_v57  ;;  %v14494_v39 = vld [vmem:[%s18737_s0 + $0x22c] ss:$12 sps:$4 sm:$0xff]   ;;  %v4397_v20 = vsel %vm3701_vm4, %v12505_v56, %v4049_v5  ;;  %v4055_v45 = vmul.f32 0.01, %v12507_v3  ;;  %v12508_v41 = vadd.f32 %v16035_v36, %v15327_v35  ;;  %v13901_v57 = vld [vmem:[%s18739_s3 + $0x54] ss:$8 sps:$4 sm:$0xff]  }
 0x2c5   :  { %3075 = vmatprep.mubr.bf16.mxu0 %v14494_v39  ;;  %v12393_v15 = vadd.f32 %v16042_v4, %v15319_v31  ;;  %v4601_v47 = vadd.f32 %v4543_v40, %v4397_v20  ;;  %v4398_v60 = vsel %vm3702_vm5, %v12506_v53, %v4050_v25  ;;  %v12394_v43 = vadd.f32 %v16046_v24, %v15322_v32  ;;  %v16211_v56 = vpop.f32.mrb[100].mxu0 }
 0x2c6   :  { %v12395_v39 = vadd.f32 %v16052_v63, %v15319_v31  ;;  %v4403_v5 = vsel %vm3707_vm6, %v12507_v3, %v4055_v45  ;;  %vm3708_vm7 = vcmp.ge.f32.partialorder %v12508_v41, 0.0  ;;  %v4056_v36 = vmul.f32 0.01, %v12508_v41  ;;  %v16213_v13 = vpop.f32.mrb[101].mxu0  ;;  %7081 = vmatprep.subr.bf16.mxu1 %v13901_v57 }
 0x2c7   :  { %vm3711_vm8 = vcmp.ge.f32.partialorder %v12393_v15, 0.0  ;;  %v16215_v4 = vadd.f32 %v4601_v47, %v4398_v60  ;;  %v4602_v1 = vadd.f32 %v4544_v54, %v4403_v5  ;;  %v4059_v40 = vmul.f32 0.01, %v12393_v15  ;;  %v16217_v53 = vpop.f32.mrb[102].mxu0  ;;  %v16219_v24 = vpop.f32.mrb[100].mxu1  ;;  %7082 = vmatpush1.bf16.msra.mxu1 %v13899_v29 }
 0x2c8   :  { %vm3712_vm9 = vcmp.ge.f32.partialorder %v12394_v43, 0.0  ;;  %v4404_v63 = vsel %vm3708_vm7, %v12508_v41, %v4056_v36  ;;  %v4060_v25 = vmul.f32 0.01, %v12394_v43  ;;  %vm3717_vm10 = vcmp.ge.f32.partialorder %v12395_v39, 0.0  ;;  %v16221_v20 = vpop.f32.mrb[103].mxu0  ;;  %v16230_v60 = vpop.f32.mrb[101].mxu1 }
 0x2c9   :  { %18795 = vst [vmem:[#allocation45_spill] sm:$0xff] %v16215_v4  ;;  %v4065_v3 = vmul.f32 0.01, %v12395_v39  ;;  %v16223_v45 = vadd.f32 %v4602_v1, %v4404_v63  ;;  %v4407_v57 = vsel %vm3711_vm8, %v12393_v15, %v4059_v40  ;;  %v12396_v54 = vadd.f32 %v16058_v48, %v15322_v32  ;;  %v16236_v1 = vpop.f32.mrb[102].mxu1  ;;  %v14495_v15 = vld [vmem:[%s18737_s0 + $0x228] ss:$12 sps:$4 sm:$0xff]  }
 0x2ca   :  { %v12509_v47 = vadd.f32 %v16048_v16, %v15325_v33  ;;  %v4408_v5 = vsel %vm3712_vm9, %v12394_v43, %v4060_v25  ;;  %v12510_v41 = vadd.f32 %v16054_v34, %v15327_v35  ;;  %v12511_v36 = vadd.f32 %v16060_v7, %v15325_v33  ;;  %v16241_v40 = vpop.f32.mrb[103].mxu1  ;;  %v14496_v34 = vld [vmem:[%s18737_s0 + $0x244] ss:$12 sps:$4 sm:$0xff]  }
 0x2cb   :  { %18796 = vst [vmem:[#allocation46_spill] sm:$0xff] %v16223_v45  ;;  %v4413_v29 = vsel %vm3717_vm10, %v12395_v39, %v4065_v3  ;;  %3076 = vmatmul.mubr.bf16.gmra.mrb[208].mxu0 %v14495_v15  ;;  %v4545_v48 = vadd.f32 %v4408_v5, %v4407_v57  ;;  %vm3718_vm11 = vcmp.ge.f32.partialorder %v12396_v54, 0.0  ;;  %v4066_v16 = vmul.f32 0.01, %v12396_v54 }
 0x2cc   :  { %vm3713_vm12 = vcmp.ge.f32.partialorder %v12509_v47, 0.0  ;;  %3085 = vmatprep.mubr.bf16.mxu0 %v14496_v34  ;;  %v4061_v43 = vmul.f32 0.01, %v12509_v47  ;;  %vm3714_vm13 = vcmp.ge.f32.partialorder %v12510_v41, 0.0  ;;  %v4062_v7 = vmul.f32 0.01, %v12510_v41 }
 0x2cd   :  { %vm3719_vm14 = vcmp.ge.f32.partialorder %v12511_v36, 0.0  ;;  %v4414_v39 = vsel %vm3718_vm11, %v12396_v54, %v4066_v16  ;;  %v4067_v63 = vmul.f32 0.01, %v12511_v36  ;;  %v12512_v25 = vadd.f32 %v16067_v21, %v15327_v35  ;;  %v16250_v57 = vpop.f32.mrb[104].mxu0 }
 0x2ce   :  { %v12397_v3 = vadd.f32 %v16082_v22, %v15319_v31  ;;  %v4546_v5 = vadd.f32 %v4414_v39, %v4413_v29  ;;  %v4409_v15 = vsel %vm3713_vm12, %v12509_v47, %v4061_v43  ;;  %v4410_v45 = vsel %vm3714_vm13, %v12510_v41, %v4062_v7  ;;  %v16254_v4 = vpop.f32.mrb[105].mxu0 }
 0x2cf   :  { %v12398_v34 = vadd.f32 %v16084_v14, %v15322_v32  ;;  %v4603_v44 = vadd.f32 %v4545_v48, %v4409_v15  ;;  %v4415_v6 = vsel %vm3719_vm14, %v12511_v36, %v4067_v63  ;;  %vm3720_vm15 = vcmp.ge.f32.partialorder %v12512_v25, 0.0  ;;  %v16256_v16 = vpop.f32.mrb[106].mxu0  ;;  %v16258_v21 = vpop.f32.mrb[104].mxu1 }
 0x2d0   :  { %v4068_v54 = vmul.f32 0.01, %v12512_v25  ;;  %v4604_v55 = vadd.f32 %v4546_v5, %v4415_v6  ;;  %vm3723_vm0 = vcmp.ge.f32.partialorder %v12397_v3, 0.0  ;;  %v4071_v22 = vmul.f32 0.01, %v12397_v3  ;;  %v16260_v29 = vpop.f32.mrb[107].mxu0 }
 0x2d1   :  { %vm3724_vm1 = vcmp.ge.f32.partialorder %v12398_v34, 0.0  ;;  %v16262_v47 = vpop.f32.mrb[105].mxu1  ;;  %v16264_v41 = vadd.f32 %v4603_v44, %v4410_v45  ;;  %v4072_v43 = vmul.f32 0.01, %v12398_v34  ;;  %v12399_v36 = vadd.f32 %v16086_v9, %v15319_v31  ;;  %v14497_v44 = vld [vmem:[%s18737_s0 + $0x240] ss:$12 sps:$4 sm:$0xff]  }
 0x2d2   :  { %v4416_v14 = vsel %vm3720_vm15, %v12512_v25, %v4068_v54  ;;  %v16268_v48 = vpop.f32.mrb[106].mxu1  ;;  %v4419_v39 = vsel %vm3723_vm0, %v12397_v3, %v4071_v22  ;;  %v12400_v6 = vadd.f32 %v16094_v28, %v15322_v32  ;;  %v12513_v63 = vadd.f32 %v16096_v8, %v15325_v33  ;;  %v13902_v9 = vld [vmem:[%s18739_s3 + $0x60] ss:$8 sps:$4 sm:$0xff]  }
 0x2d3   :  { %18797 = vst [vmem:[#allocation47_spill] sm:$0xff] %v16264_v41  ;;  %v16270_v7 = vadd.f32 %v4604_v55, %v4416_v14  ;;  %3086 = vmatmul.mubr.bf16.gmra.mrb[212].mxu0 %v14497_v44  ;;  %v16279_v45 = vpop.f32.mrb[107].mxu1  ;;  %v13904_v55 = vld [vmem:[%s18739_s3 + $0x64] ss:$8 sps:$4 sm:$0xff]   ;;  %v4420_v28 = vsel %vm3724_vm1, %v12398_v34, %v4072_v43  ;;  %vm3729_vm2 = vcmp.ge.f32.partialorder %v12399_v36, 0.0  ;;  %v12514_v8 = vadd.f32 %v16100_v49, %v15327_v35 }
 0x2d4   :  { %v4077_v25 = vmul.f32 0.01, %v12399_v36  ;;  %v14498_v3 = vld [vmem:[%s18737_s0 + $0x25c] ss:$12 sps:$4 sm:$0xff]   ;;  %v4547_v5 = vadd.f32 %v4420_v28, %v4419_v39  ;;  %vm3730_vm3 = vcmp.ge.f32.partialorder %v12400_v6, 0.0  ;;  %vm3725_vm4 = vcmp.ge.f32.partialorder %v12513_v63, 0.0  ;;  %7083 = vmatprep.subr.bf16.mxu1 %v13904_v55 }
 0x2d5   :  { %18798 = vst [vmem:[#allocation48_spill] sm:$0xff] %v16270_v7  ;;  %3095 = vmatprep.mubr.bf16.mxu0 %v14498_v3  ;;  %v4078_v15 = vmul.f32 0.01, %v12400_v6  ;;  %v4073_v22 = vmul.f32 0.01, %v12513_v63  ;;  %vm3726_vm5 = vcmp.ge.f32.partialorder %v12514_v8, 0.0  ;;  %7084 = vmatpush1.bf16.msra.mxu1 %v13902_v9  ;;  %v12515_v49 = vadd.f32 %v16102_v37, %v15325_v33 }
 0x2d6   :  { %v4425_v54 = vsel %vm3729_vm2, %v12399_v36, %v4077_v25  ;;  %v4074_v14 = vmul.f32 0.01, %v12514_v8  ;;  %v16293_v34 = vpop.f32.mrb[108].mxu0  ;;  %v12516_v44 = vadd.f32 %v16114_v62, %v15327_v35  ;;  %v12401_v39 = vadd.f32 %v16122_v26, %v15319_v31 }
 0x2d7   :  { %v4426_v43 = vsel %vm3730_vm3, %v12400_v6, %v4078_v15  ;;  %v16301_v28 = vpop.f32.mrb[109].mxu0  ;;  %v4421_v36 = vsel %vm3725_vm4, %v12513_v63, %v4073_v22  ;;  %v12402_v3 = vadd.f32 %v16129_v19, %v15322_v32  ;;  %v16307_v6 = vpop.f32.mrb[108].mxu1  ;;  %vm3731_vm6 = vcmp.ge.f32.partialorder %v12515_v49, 0.0 }
 0x2d8   :  { %v4548_v55 = vadd.f32 %v4426_v43, %v4425_v54  ;;  %v4422_v25 = vsel %vm3726_vm5, %v12514_v8, %v4074_v14  ;;  %v16305_v7 = vpop.f32.mrb[110].mxu0  ;;  %v4605_v9 = vadd.f32 %v4547_v5, %v4421_v36  ;;  %v4079_v37 = vmul.f32 0.01, %v12515_v49  ;;  %v16311_v15 = vpop.f32.mrb[109].mxu1  ;;  %v14499_v5 = vld [vmem:[%s18737_s0 + $0x258] ss:$12 sps:$4 sm:$0xff]  }
 0x2d9   :  { %vm3732_vm7 = vcmp.ge.f32.partialorder %v12516_v44, 0.0  ;;  %v16309_v62 = vpop.f32.mrb[111].mxu0  ;;  %v4080_v26 = vmul.f32 0.01, %v12516_v44  ;;  %vm3735_vm8 = vcmp.ge.f32.partialorder %v12401_v39, 0.0  ;;  %vm3736_vm9 = vcmp.ge.f32.partialorder %v12402_v3, 0.0 }
 0x2da   :  { %v4083_v54 = vmul.f32 0.01, %v12401_v39  ;;  %v16313_v63 = vadd.f32 %v4605_v9, %v4422_v25  ;;  %v4427_v8 = vsel %vm3731_vm6, %v12515_v49, %v4079_v37  ;;  %v4084_v19 = vmul.f32 0.01, %v12402_v3  ;;  %v16317_v14 = vpop.f32.mrb[110].mxu1 }
 0x2db   :  { %v12403_v22 = vadd.f32 %v16133_v2, %v15319_v31  ;;  %3096 = vmatmul.mubr.bf16.gmra.mrb[216].mxu0 %v14499_v5  ;;  %v4606_v43 = vadd.f32 %v4548_v55, %v4427_v8  ;;  %v4428_v36 = vsel %vm3732_vm7, %v12516_v44, %v4080_v26  ;;  %v12404_v17 = vadd.f32 %v16139_v10, %v15322_v32  ;;  %v16324_v25 = vpop.f32.mrb[111].mxu1  ;;  %v14500_v49 = vld [vmem:[%s18737_s0 + $0x274] ss:$12 sps:$4 sm:$0xff]  }
 0x2dc   :  { %18799 = vst [vmem:[#allocation49_spill] sm:$0xff] %v16313_v63  ;;  %v4431_v41 = vsel %vm3735_vm8, %v12401_v39, %v4083_v54  ;;  %3105 = vmatprep.mubr.bf16.mxu0 %v14500_v49  ;;  %v4432_v2 = vsel %vm3736_vm9, %v12402_v3, %v4084_v19  ;;  %v12517_v37 = vadd.f32 %v16135_v0, %v15325_v33 }
 0x2dd   :  { %vm3741_vm10 = vcmp.ge.f32.partialorder %v12403_v22, 0.0  ;;  %v4089_v9 = vmul.f32 0.01, %v12403_v22  ;;  %v16331_v5 = vadd.f32 %v4606_v43, %v4428_v36  ;;  %v4549_v44 = vadd.f32 %v4432_v2, %v4431_v41  ;;  %v16333_v55 = vpop.f32.mrb[112].mxu0 }
 0x2de   :  { %vm3742_vm11 = vcmp.ge.f32.partialorder %v12404_v17, 0.0  ;;  %v4090_v39 = vmul.f32 0.01, %v12404_v17  ;;  %vm3737_vm12 = vcmp.ge.f32.partialorder %v12517_v37, 0.0  ;;  %v4085_v26 = vmul.f32 0.01, %v12517_v37 }
 0x2df   :  { %18800 = vst [vmem:[#allocation50_spill] sm:$0xff] %v16331_v5  ;;  %v4437_v10 = vsel %vm3741_vm10, %v12403_v22, %v4089_v9  ;;  %v12518_v54 = vadd.f32 %v16141_v12, %v15327_v35  ;;  %v16337_v8 = vpop.f32.mrb[113].mxu0  ;;  %v12519_v19 = vadd.f32 %v16149_v50, %v15325_v33  ;;  %v12520_v0 = vadd.f32 %v16154_v59, %v15327_v35  ;;  %v16347_v22 = vpop.f32.mrb[112].mxu1 }
 0x2e0   :  { %v4438_v3 = vsel %vm3742_vm11, %v12404_v17, %v4090_v39  ;;  %v12405_v41 = vadd.f32 %v16165_v46, %v15319_v31  ;;  %v16345_v43 = vpop.f32.mrb[114].mxu0  ;;  %v4433_v49 = vsel %vm3737_vm12, %v12517_v37, %v4085_v26  ;;  %v16351_v17 = vpop.f32.mrb[113].mxu1  ;;  %v14501_v37 = vld [vmem:[%s18737_s0 + $0x270] ss:$12 sps:$4 sm:$0xff]   ;;  %v12521_v63 = vadd.f32 %v16177_v18, %v15325_v33 }
 0x2e1   :  { %v4550_v36 = vadd.f32 %v4438_v3, %v4437_v10  ;;  %vm3738_vm13 = vcmp.ge.f32.partialorder %v12518_v54, 0.0  ;;  %v4086_v12 = vmul.f32 0.01, %v12518_v54  ;;  %v16349_v2 = vpop.f32.mrb[115].mxu0  ;;  %v4607_v9 = vadd.f32 %v4549_v44, %v4433_v49  ;;  %v16353_v59 = vpop.f32.mrb[114].mxu1 }
 0x2e2   :  { %vm3743_vm14 = vcmp.ge.f32.partialorder %v12519_v19, 0.0  ;;  %v4091_v50 = vmul.f32 0.01, %v12519_v19  ;;  %vm3744_vm15 = vcmp.ge.f32.partialorder %v12520_v0, 0.0  ;;  %v4092_v46 = vmul.f32 0.01, %v12520_v0 }
 0x2e3   :  { %v4434_v39 = vsel %vm3738_vm13, %v12518_v54, %v4086_v12  ;;  %vm3747_vm0 = vcmp.ge.f32.partialorder %v12405_v41, 0.0  ;;  %v4095_v5 = vmul.f32 0.01, %v12405_v41  ;;  %3106 = vmatmul.mubr.bf16.gmra.mrb[220].mxu0 %v14501_v37  ;;  %v16358_v10 = vpop.f32.mrb[115].mxu1  ;;  %v12406_v44 = vadd.f32 %v16169_v27, %v15322_v32  ;;  %v14502_v54 = vld [vmem:[%s18737_s0 + $0x28c] ss:$12 sps:$4 sm:$0xff]  }
 0x2e4   :  { %v16360_v26 = vadd.f32 %v4607_v9, %v4434_v39  ;;  %v4439_v3 = vsel %vm3743_vm14, %v12519_v19, %v4091_v50  ;;  %v12407_v49 = vadd.f32 %v16175_v42, %v15319_v31  ;;  %3115 = vmatprep.mubr.bf16.mxu0 %v14502_v54  ;;  %v13905_v12 = vld [vmem:[%s18739_s3 + $0x70] ss:$8 sps:$4 sm:$0xff]   ;;  %v13907_v9 = vld [vmem:[%s18739_s3 + $0x74] ss:$8 sps:$4 sm:$0xff]   ;;  %v4440_v50 = vsel %vm3744_vm15, %v12520_v0, %v4092_v46 }
 0x2e5   :  { %v4608_v19 = vadd.f32 %v4550_v36, %v4439_v3  ;;  %v4443_v27 = vsel %vm3747_vm0, %v12405_v41, %v4095_v5  ;;  %v12408_v42 = vadd.f32 %v16183_v58, %v15322_v32  ;;  %vm3748_vm1 = vcmp.ge.f32.partialorder %v12406_v44, 0.0  ;;  %7085 = vmatprep.subr.bf16.mxu1 %v13907_v9 }
 0x2e6   :  { %18801 = vst [vmem:[#allocation51_spill] sm:$0xff] %v16360_v26  ;;  %v4096_v39 = vmul.f32 0.01, %v12406_v44  ;;  %vm3753_vm2 = vcmp.ge.f32.partialorder %v12407_v49, 0.0  ;;  %v4101_v37 = vmul.f32 0.01, %v12407_v49  ;;  %7086 = vmatpush1.bf16.msra.mxu1 %v13905_v12  ;;  %v12522_v5 = vadd.f32 %v16185_v38, %v15327_v35 }
 0x2e7   :  { %v16378_v54 = vadd.f32 %v4608_v19, %v4440_v50  ;;  %vm3754_vm3 = vcmp.ge.f32.partialorder %v12408_v42, 0.0  ;;  %v4102_v26 = vmul.f32 0.01, %v12408_v42  ;;  %v12523_v58 = vadd.f32 %v16187_v51, %v15325_v33  ;;  %v14503_v38 = vld [vmem:[%s18737_s0 + $0x288] ss:$12 sps:$4 sm:$0xff]  }
 0x2e8   :  { %v4444_v36 = vsel %vm3748_vm1, %v12406_v44, %v4096_v39  ;;  %v4449_v3 = vsel %vm3753_vm2, %v12407_v49, %v4101_v37  ;;  %vm3749_vm4 = vcmp.ge.f32.partialorder %v12521_v63, 0.0  ;;  %v4097_v46 = vmul.f32 0.01, %v12521_v63  ;;  %v13908_v51 = vld [vmem:[%s18739_s3 + $0x80] ss:$8 sps:$4 sm:$0xff]  }
 0x2e9   :  { %18802 = vst [vmem:[#allocation52_spill] sm:$0xff] %v16378_v54  ;;  %v4551_v0 = vadd.f32 %v4444_v36, %v4443_v27  ;;  %v4450_v41 = vsel %vm3754_vm3, %v12408_v42, %v4102_v26  ;;  %vm3750_vm5 = vcmp.ge.f32.partialorder %v12522_v5, 0.0  ;;  %v4098_v19 = vmul.f32 0.01, %v12522_v5  ;;  %v14504_v12 = vld [vmem:[%s18737_s0 + $0x2a4] ss:$12 sps:$4 sm:$0xff]  }
 0x2ea   :  { %v4552_v9 = vadd.f32 %v4450_v41, %v4449_v3  ;;  %vm3755_vm6 = vcmp.ge.f32.partialorder %v12523_v58, 0.0  ;;  %v4445_v50 = vsel %vm3749_vm4, %v12521_v63, %v4097_v46  ;;  %v4103_v54 = vmul.f32 0.01, %v12523_v58  ;;  %v13910_v63 = vld [vmem:[%s18739_s3 + $0x84] ss:$8 sps:$4 sm:$0xff]  }
 0x2eb   :  { %v12524_v18 = vadd.f32 %v16195_v52, %v15327_v35  ;;  %v12409_v44 = vadd.f32 %v16211_v56, %v15319_v31  ;;  %3116 = vmatmul.mubr.bf16.gmra.mrb[224].mxu0 %v14503_v38  ;;  %v4609_v26 = vadd.f32 %v4551_v0, %v4445_v50  ;;  %v4446_v49 = vsel %vm3750_vm5, %v12522_v5, %v4098_v19 }
 0x2ec   :  { %v12410_v52 = vadd.f32 %v16213_v13, %v15322_v32  ;;  %v12411_v56 = vadd.f32 %v16217_v53, %v15319_v31  ;;  %3125 = vmatprep.mubr.bf16.mxu0 %v14504_v12  ;;  %v4451_v27 = vsel %vm3755_vm6, %v12523_v58, %v4103_v54  ;;  %7087 = vmatprep.subr.bf16.mxu1 %v13910_v63  ;;  %v18803_v63 = vmov 0  }
 0x2ed   :  { %vm3756_vm7 = vcmp.ge.f32.partialorder %v12524_v18, 0.0  ;;  %v4104_v42 = vmul.f32 0.01, %v12524_v18  ;;  %vm3759_vm8 = vcmp.ge.f32.partialorder %v12409_v44, 0.0  ;;  %v16406_v39 = vadd.f32 %v4609_v26, %v4446_v49  ;;  %7088 = vmatpush1.bf16.msra.mxu1 %v13908_v51 }
 0x2ee   :  { %v4610_v37 = vadd.f32 %v4552_v9, %v4451_v27  ;;  %v4107_v36 = vmul.f32 0.01, %v12409_v44  ;;  %vm3760_vm9 = vcmp.ge.f32.partialorder %v12410_v52, 0.0  ;;  %v4108_v3 = vmul.f32 0.01, %v12410_v52 }
 0x2ef   :  { %v4452_v13 = vsel %vm3756_vm7, %v12524_v18, %v4104_v42  ;;  %vm3765_vm10 = vcmp.ge.f32.partialorder %v12411_v56, 0.0  ;;  %v4113_v53 = vmul.f32 0.01, %v12411_v56  ;;  %v12412_v54 = vadd.f32 %v16221_v20, %v15322_v32 }
 0x2f0   :  { %v16408_v5 = vadd.f32 %v4610_v37, %v4452_v13  ;;  %v4455_v0 = vsel %vm3759_vm8, %v12409_v44, %v4107_v36  ;;  %v12525_v58 = vadd.f32 %v16219_v24, %v15325_v33  ;;  %v4456_v41 = vsel %vm3760_vm9, %v12410_v52, %v4108_v3  ;;  %v14505_v24 = vld [vmem:[%s18737_s0 + $0x2a0] ss:$12 sps:$4 sm:$0xff]  }
 0x2f1   :  { %v4461_v46 = vsel %vm3765_vm10, %v12411_v56, %v4113_v53  ;;  %v12526_v9 = vadd.f32 %v16230_v60, %v15327_v35  ;;  %v12527_v19 = vadd.f32 %v16236_v1, %v15325_v33  ;;  %v4553_v50 = vadd.f32 %v4456_v41, %v4455_v0 }
 0x2f2   :  { %vm3766_vm11 = vcmp.ge.f32.partialorder %v12412_v54, 0.0  ;;  %v4114_v18 = vmul.f32 0.01, %v12412_v54  ;;  %vm3761_vm12 = vcmp.ge.f32.partialorder %v12525_v58, 0.0  ;;  %v4109_v38 = vmul.f32 0.01, %v12525_v58 }
 0x2f3   :  { %vm3762_vm13 = vcmp.ge.f32.partialorder %v12526_v9, 0.0  ;;  %v4110_v44 = vmul.f32 0.01, %v12526_v9  ;;  %vm3767_vm14 = vcmp.ge.f32.partialorder %v12527_v19, 0.0  ;;  %3126 = vmatmul.mubr.bf16.gmra.mrb[228].mxu0 %v14505_v24  ;;  %v4115_v51 = vmul.f32 0.01, %v12527_v19 }
 0x2f4   :  { %v4462_v20 = vsel %vm3766_vm11, %v12412_v54, %v4114_v18  ;;  %v12528_v60 = vadd.f32 %v16241_v40, %v15327_v35  ;;  %v12413_v1 = vadd.f32 %v16250_v57, %v15319_v31  ;;  %3168 = vmatprep.mubr.bf16.mxu0 %v18803_v63  ;;  %v4457_v49 = vsel %vm3761_vm12, %v12525_v58, %v4109_v38 }
 0x2f5   :  { %v4554_v26 = vadd.f32 %v4462_v20, %v4461_v46  ;;  %v4458_v52 = vsel %vm3762_vm13, %v12526_v9, %v4110_v44  ;;  %v12414_v56 = vadd.f32 %v16254_v4, %v15322_v32  ;;  %v4611_v12 = vadd.f32 %v4553_v50, %v4457_v49  ;;  %v13913_v20 = vld [vmem:[%s18739_s3 + $0x94] ss:$8 sps:$4 sm:$0xff]  }
 0x2f6   :  { %v4463_v27 = vsel %vm3767_vm14, %v12527_v19, %v4115_v51  ;;  %vm3768_vm15 = vcmp.ge.f32.partialorder %v12528_v60, 0.0  ;;  %v4116_v42 = vmul.f32 0.01, %v12528_v60  ;;  %vm3771_vm0 = vcmp.ge.f32.partialorder %v12413_v1, 0.0  ;;  %7089 = vmatprep.subr.bf16.mxu1 %v13913_v20 }
 0x2f7   :  { %v4612_v37 = vadd.f32 %v4554_v26, %v4463_v27  ;;  %v4119_v36 = vmul.f32 0.01, %v12413_v1  ;;  %vm3772_vm1 = vcmp.ge.f32.partialorder %v12414_v56, 0.0  ;;  %v16428_v40 = vadd.f32 %v4611_v12, %v4458_v52 }
 0x2f8   :  { %v4464_v13 = vsel %vm3768_vm15, %v12528_v60, %v4116_v42  ;;  %v4120_v57 = vmul.f32 0.01, %v12414_v56  ;;  %v12415_v3 = vadd.f32 %v16256_v16, %v15319_v31  ;;  %v12416_v4 = vadd.f32 %v16260_v29, %v15322_v32  ;;  %v14506_v16 = vld [vmem:[%s18737_s0 + $0x8] ss:$12 sps:$4 sm:$0xff]   ;;  %v13911_v29 = vld [vmem:[%s18739_s3 + $0x90] ss:$8 sps:$4 sm:$0xff]  }
 0x2f9   :  { %v16432_v53 = vadd.f32 %v4612_v37, %v4464_v13  ;;  %v4467_v0 = vsel %vm3771_vm0, %v12413_v1, %v4119_v36  ;;  %v12529_v54 = vadd.f32 %v16258_v21, %v15325_v33  ;;  %v12530_v46 = vadd.f32 %v16262_v47, %v15327_v35  ;;  %7090 = vmatpush1.bf16.msra.mxu1 %v13911_v29 }
 0x2fa   :  { %v4468_v58 = vsel %vm3772_vm1, %v12414_v56, %v4120_v57  ;;  %vm3777_vm2 = vcmp.ge.f32.partialorder %v12415_v3, 0.0  ;;  %v4125_v41 = vmul.f32 0.01, %v12415_v3  ;;  %vm3778_vm3 = vcmp.ge.f32.partialorder %v12416_v4, 0.0 }
 0x2fb   :  { %v4555_v9 = vadd.f32 %v4468_v58, %v4467_v0  ;;  %v4126_v19 = vmul.f32 0.01, %v12416_v4  ;;  %vm3773_vm4 = vcmp.ge.f32.partialorder %v12529_v54, 0.0  ;;  %3169 = vmatmul.mubr.bf16.vlgmr.msra.gmra.mrb[116].mxu0 %v14506_v16  ;;  %v4121_v50 = vmul.f32 0.01, %v12529_v54 }
 0x2fc   :  { %v4473_v21 = vsel %vm3777_vm2, %v12415_v3, %v4125_v41  ;;  %vm3774_vm5 = vcmp.ge.f32.partialorder %v12530_v46, 0.0  ;;  %v4122_v18 = vmul.f32 0.01, %v12530_v46  ;;  %3178 = vmatprep.mubr.bf16.mxu0 %v18803_v63  ;;  %v12531_v38 = vadd.f32 %v16268_v48, %v15325_v33  ;;  %v14507_v0 = vld [vmem:[%s18737_s0 + $0x20] ss:$12 sps:$4 sm:$0xff]  }
 0x2fd   :  { %v4474_v47 = vsel %vm3778_vm3, %v12416_v4, %v4126_v19  ;;  %v12532_v44 = vadd.f32 %v16279_v45, %v15327_v35  ;;  %v12417_v24 = vadd.f32 %v16293_v34, %v15319_v31  ;;  %v4469_v60 = vsel %vm3773_vm4, %v12529_v54, %v4121_v50 }
 0x2fe   :  { %v4556_v51 = vadd.f32 %v4474_v47, %v4473_v21  ;;  %v4470_v1 = vsel %vm3774_vm5, %v12530_v46, %v4122_v18  ;;  %v12418_v26 = vadd.f32 %v16301_v28, %v15322_v32  ;;  %v4613_v49 = vadd.f32 %v4555_v9, %v4469_v60 }
 0x2ff   :  { %vm3779_vm6 = vcmp.ge.f32.partialorder %v12531_v38, 0.0  ;;  %v4127_v52 = vmul.f32 0.01, %v12531_v38  ;;  %vm3780_vm7 = vcmp.ge.f32.partialorder %v12532_v44, 0.0  ;;  %v4128_v48 = vmul.f32 0.01, %v12532_v44 }
 0x300   :  { %vm3783_vm8 = vcmp.ge.f32.partialorder %v12417_v24, 0.0  ;;  %v4131_v45 = vmul.f32 0.01, %v12417_v24  ;;  %vm3784_vm9 = vcmp.ge.f32.partialorder %v12418_v26, 0.0  ;;  %v16458_v34 = vadd.f32 %v4613_v49, %v4470_v1  ;;  %v14508_v1 = vld [vmem:[%s18737_s0 + $0x38] ss:$12 sps:$4 sm:$0xff]  }
 0x301   :  { %v4475_v56 = vsel %vm3779_vm6, %v12531_v38, %v4127_v52  ;;  %v4132_v12 = vmul.f32 0.01, %v12418_v26  ;;  %v12419_v27 = vadd.f32 %v16305_v7, %v15319_v31  ;;  %v4476_v37 = vsel %vm3780_vm7, %v12532_v44, %v4128_v48 }
 0x302   :  { %v4614_v42 = vadd.f32 %v4556_v51, %v4475_v56  ;;  %v4479_v28 = vsel %vm3783_vm8, %v12417_v24, %v4131_v45  ;;  %v12420_v36 = vadd.f32 %v16309_v62, %v15322_v32  ;;  %v12533_v3 = vadd.f32 %v16307_v6, %v15325_v33 }
 0x303   :  { %v4480_v13 = vsel %vm3784_vm9, %v12418_v26, %v4132_v12  ;;  %vm3789_vm10 = vcmp.ge.f32.partialorder %v12419_v27, 0.0  ;;  %v4137_v57 = vmul.f32 0.01, %v12419_v27  ;;  %3179 = vmatmul.mubr.bf16.gmra.mrb[120].mxu0 %v14507_v0  ;;  %v12534_v41 = vadd.f32 %v16311_v15, %v15327_v35  ;;  %v13914_v26 = vld [vmem:[%s18739_s3 + $0xa0] ss:$8 sps:$4 sm:$0xff]  }
 0x304   :  { %v16469_v4 = vadd.f32 %v4614_v42, %v4476_v37  ;;  %v4557_v7 = vadd.f32 %v4480_v13, %v4479_v28  ;;  %vm3790_vm11 = vcmp.ge.f32.partialorder %v12420_v36, 0.0  ;;  %v4138_v54 = vmul.f32 0.01, %v12420_v36  ;;  %3188 = vmatprep.mubr.bf16.mxu0 %v18803_v63 }
 0x305   :  { %v4485_v58 = vsel %vm3789_vm10, %v12419_v27, %v4137_v57  ;;  %vm3785_vm12 = vcmp.ge.f32.partialorder %v12533_v3, 0.0  ;;  %v4133_v62 = vmul.f32 0.01, %v12533_v3  ;;  %v12535_v6 = vadd.f32 %v16317_v14, %v15325_v33 }
 0x306   :  { %v4486_v46 = vsel %vm3790_vm11, %v12420_v36, %v4138_v54  ;;  %v12536_v9 = vadd.f32 %v16324_v25, %v15327_v35  ;;  %v12421_v19 = vadd.f32 %v16333_v55, %v15319_v31  ;;  %vm3786_vm13 = vcmp.ge.f32.partialorder %v12534_v41, 0.0 }
 0x307   :  { %v4558_v16 = vadd.f32 %v4486_v46, %v4485_v58  ;;  %v4481_v29 = vsel %vm3785_vm12, %v12533_v3, %v4133_v62  ;;  %v4134_v21 = vmul.f32 0.01, %v12534_v41  ;;  %vm3791_vm14 = vcmp.ge.f32.partialorder %v12535_v6, 0.0  ;;  %v13919_v62 = vld [vmem:[%s18739_s3 + $0xb4] ss:$8 sps:$4 sm:$0xff]  }
 0x308   :  { %v4615_v50 = vadd.f32 %v4557_v7, %v4481_v29  ;;  %v4139_v18 = vmul.f32 0.01, %v12535_v6  ;;  %vm3792_vm15 = vcmp.ge.f32.partialorder %v12536_v9, 0.0  ;;  %v4140_v15 = vmul.f32 0.01, %v12536_v9 }
 0x309   :  { %v4482_v47 = vsel %vm3786_vm13, %v12534_v41, %v4134_v21  ;;  %vm3795_vm0 = vcmp.ge.f32.partialorder %v12421_v19, 0.0  ;;  %v4143_v38 = vmul.f32 0.01, %v12421_v19  ;;  %v12422_v25 = vadd.f32 %v16337_v8, %v15322_v32  ;;  %v13916_v8 = vld [vmem:[%s18739_s3 + $0xa4] ss:$8 sps:$4 sm:$0xff]  }
 0x30a   :  { %v16480_v44 = vadd.f32 %v4615_v50, %v4482_v47  ;;  %v4487_v14 = vsel %vm3791_vm14, %v12535_v6, %v4139_v18  ;;  %v12423_v55 = vadd.f32 %v16345_v43, %v15319_v31  ;;  %v4488_v20 = vsel %vm3792_vm15, %v12536_v9, %v4140_v15  ;;  %7091 = vmatprep.subr.bf16.mxu1 %v13916_v8  ;;  %v14511_v41 = vld [vmem:[%s18737_s0 + $0x80] ss:$12 sps:$4 sm:$0xff]   ;;  %v14512_v46 = vld [vmem:[%s18737_s0 + $0x98] ss:$12 sps:$4 sm:$0xff]   ;;  %v13925_v29 = vld [vmem:[%s18739_s3 + $0xd4] ss:$8 sps:$4 sm:$0xff]  }
 0x30b   :  { %v4616_v24 = vadd.f32 %v4558_v16, %v4487_v14  ;;  %v4491_v51 = vsel %vm3795_vm0, %v12421_v19, %v4143_v38  ;;  %v12424_v60 = vadd.f32 %v16349_v2, %v15322_v32  ;;  %3189 = vmatmul.mubr.bf16.gmra.mrb[124].mxu0 %v14508_v1  ;;  %vm3796_vm1 = vcmp.ge.f32.partialorder %v12422_v25, 0.0  ;;  %7092 = vmatpush1.bf16.msra.mxu1 %v13914_v26  ;;  %v13920_v6 = vld [vmem:[%s18739_s3 + $0xc0] ss:$8 sps:$4 sm:$0xff]   ;;  %v13922_v9 = vld [vmem:[%s18739_s3 + $0xc4] ss:$8 sps:$4 sm:$0xff]  }
 0x30c   :  { %v4144_v31 = vmul.f32 0.01, %v12422_v25  ;;  %vm3801_vm2 = vcmp.ge.f32.partialorder %v12423_v55, 0.0  ;;  %v4149_v43 = vmul.f32 0.01, %v12423_v55  ;;  %3198 = vmatprep.mubr.bf16.mxu0 %v18803_v63  ;;  %v12537_v49 = vadd.f32 %v16347_v22, %v15325_v33  ;;  %7093 = vmatprep.subr.bf16.mxu1 %v13919_v62 }
 0x30d   :  { %v16498_v32 = vadd.f32 %v4616_v24, %v4488_v20  ;;  %vm3802_vm3 = vcmp.ge.f32.partialorder %v12424_v60, 0.0  ;;  %v4150_v2 = vmul.f32 0.01, %v12424_v60  ;;  %v12538_v45 = vadd.f32 %v16351_v17, %v15327_v35  ;;  %v14513_v19 = vld [vmem:[%s18737_s0 + $0xb0] ss:$12 sps:$4 sm:$0xff]  }
 0x30e   :  { %v4492_v52 = vsel %vm3796_vm1, %v12422_v25, %v4144_v31  ;;  %v4497_v48 = vsel %vm3801_vm2, %v12423_v55, %v4149_v43  ;;  %v12539_v56 = vadd.f32 %v16353_v59, %v15325_v33  ;;  %vm3797_vm4 = vcmp.ge.f32.partialorder %v12537_v49, 0.0  ;;  %v14509_v33 = vld [vmem:[%s18737_s0 + $0x50] ss:$12 sps:$4 sm:$0xff]   ;;  %v14514_v21 = vld [vmem:[%s18737_s0 + $0xc8] ss:$12 sps:$4 sm:$0xff]  }
 0x30f   :  { %v4559_v12 = vadd.f32 %v4492_v52, %v4491_v51  ;;  %v4498_v27 = vsel %vm3802_vm3, %v12424_v60, %v4150_v2  ;;  %v4145_v42 = vmul.f32 0.01, %v12537_v49  ;;  %vm3798_vm5 = vcmp.ge.f32.partialorder %v12538_v45, 0.0  ;;  %v13923_v16 = vld [vmem:[%s18739_s3 + $0xd0] ss:$8 sps:$4 sm:$0xff]  }
 0x310   :  { %v4560_v37 = vadd.f32 %v4498_v27, %v4497_v48  ;;  %v4146_v28 = vmul.f32 0.01, %v12538_v45  ;;  %vm3803_vm6 = vcmp.ge.f32.partialorder %v12539_v56, 0.0  ;;  %v4151_v22 = vmul.f32 0.01, %v12539_v56 }
 0x311   :  { %v4493_v36 = vsel %vm3797_vm4, %v12537_v49, %v4145_v42  ;;  %v12540_v13 = vadd.f32 %v16358_v10, %v15327_v35  ;;  %v14510_v35 = vld [vmem:[%s18737_s0 + $0x68] ss:$12 sps:$4 sm:$0xff]   ;;  %v13917_v10 = vld [vmem:[%s18739_s3 + $0xb0] ss:$8 sps:$4 sm:$0xff]   ;;  %v14515_v50 = vld [vmem:[%s18737_s0 + $0xe0] ss:$12 sps:$4 sm:$0xff]  }
 0x312   :  { %v4617_v57 = vadd.f32 %v4559_v12, %v4493_v36  ;;  %v4494_v3 = vsel %vm3798_vm5, %v12538_v45, %v4146_v28  ;;  %v4499_v17 = vsel %vm3803_vm6, %v12539_v56, %v4151_v22  ;;  %7094 = vmatpush1.bf16.msra.mxu1 %v13917_v10  ;;  %v13926_v18 = vld [vmem:[%s18739_s3 + $0xe0] ss:$8 sps:$4 sm:$0xff]   ;;  %v13928_v47 = vld [vmem:[%s18739_s3 + $0xe4] ss:$8 sps:$4 sm:$0xff]   ;;  %v14517_v38 = vld [vmem:[%s18737_s0 + $0x110] ss:$12 sps:$4 sm:$0xff]  }
 0x313   :  { %vm3804_vm7 = vcmp.ge.f32.partialorder %v12540_v13, 0.0  ;;  %v4152_v0 = vmul.f32 0.01, %v12540_v13  ;;  %3199 = vmatmul.mubr.bf16.gmra.mrb[128].mxu0 %v14509_v33  ;;  %v4618_v7 = vadd.f32 %v4560_v37, %v4499_v17  ;;  %7095 = vmatprep.subr.bf16.mxu1 %v13922_v9  ;;  %v14516_v15 = vld [vmem:[%s18737_s0 + $0xf8] ss:$12 sps:$4 sm:$0xff]   ;;  %v325_v56 = vsub.s32 4, %v15300_v23 }
 0x314   :  { %v16511_v59 = vadd.f32 %v4617_v57, %v4494_v3  ;;  %3208 = vmatprep.mubr.bf16.mxu0 %v18803_v63  ;;  %v14518_v14 = vld [vmem:[%s18737_s0 + $0x128] ss:$12 sps:$4 sm:$0xff]   ;;  %v13929_v25 = vld [vmem:[%s18739_s3 + $0xf0] ss:$8 sps:$4 sm:$0xff]   ;;  %v14519_v24 = vld [vmem:[%s18737_s0 + $0x140] ss:$12 sps:$4 sm:$0xff]  }
 0x315   :  { %v4500_v54 = vsel %vm3804_vm7, %v12540_v13, %v4152_v0  ;;  %v13931_v55 = vld [vmem:[%s18739_s3 + $0xf4] ss:$8 sps:$4 sm:$0xff]   ;;  %v13934_v20 = vld [vmem:[%s18739_s3 + $0x104] ss:$8 sps:$4 sm:$0xff]   ;;  %v329_v12 = vsub.s32 5, %v15300_v23 }
 0x316   :  { %v16514_v58 = vadd.f32 %v4618_v7, %v4500_v54  ;;  %7096 = vmatpush1.bf16.msra.mxu1 %v13920_v6  ;;  %v14520_v51 = vld [vmem:[%s18737_s0 + $0x158] ss:$12 sps:$4 sm:$0xff]   ;;  %v14521_v60 = vld [vmem:[%s18737_s0 + $0x170] ss:$12 sps:$4 sm:$0xff]   ;;  %v14522_v1 = vld [vmem:[%s18737_s0 + $0x188] ss:$12 sps:$4 sm:$0xff]  }
 0x317   :  { %7097 = vmatprep.subr.bf16.mxu1 %v13925_v29  ;;  %v14523_v26 = vld [vmem:[%s18737_s0 + $0x1a0] ss:$12 sps:$4 sm:$0xff]   ;;  %v14524_v8 = vld [vmem:[%s18737_s0 + $0x1b8] ss:$12 sps:$4 sm:$0xff]   ;;  %v14525_v31 = vld [vmem:[%s18737_s0 + $0x1d0] ss:$12 sps:$4 sm:$0xff]  }
 0x318   :  { %v14526_v43 = vld [vmem:[%s18737_s0 + $0x1e8] ss:$12 sps:$4 sm:$0xff]   ;;  %v14527_v2 = vld [vmem:[%s18737_s0 + $0x200] ss:$12 sps:$4 sm:$0xff]   ;;  %v14528_v49 = vld [vmem:[%s18737_s0 + $0x218] ss:$12 sps:$4 sm:$0xff]  }
 0x319   :  { %v14529_v52 = vld [vmem:[%s18737_s0 + $0x230] ss:$12 sps:$4 sm:$0xff]   ;;  %v14530_v48 = vld [vmem:[%s18737_s0 + $0x248] ss:$12 sps:$4 sm:$0xff]   ;;  %v14531_v45 = vld [vmem:[%s18737_s0 + $0x260] ss:$12 sps:$4 sm:$0xff]  }
 0x31a   :  { %7098 = vmatpush1.bf16.msra.mxu1 %v13923_v16  ;;  %v14532_v27 = vld [vmem:[%s18737_s0 + $0x278] ss:$12 sps:$4 sm:$0xff]   ;;  %v14534_v10 = vld [vmem:[%s18737_s0 + $0x290] ss:$12 sps:$4 sm:$0xff]  }
 0x31b   :  { %3209 = vmatmul.mubr.bf16.gmra.mrb[132].mxu0 %v14510_v35  ;;  %7099 = vmatprep.subr.bf16.mxu1 %v13928_v47  ;;  %v14533_v42 = vld [vmem:[%s18738_s2] sm:$0x3f] }
 0x31c   :  { %3218 = vmatprep.mubr.bf16.mxu0 %v18803_v63  ;;  %v16645_v37 = vrot.slane %v14533_v42, %v325_v56  ;;  %v16647_v28 = vrot.slane %v14533_v42, %v329_v12 }
 0x31e   :  { %7100 = vmatpush1.bf16.msra.mxu1 %v13926_v18 }
 0x31f   :  { %7101 = vmatprep.subr.bf16.mxu1 %v13931_v55 }
 0x322   :  { %7102 = vmatpush1.bf16.msra.mxu1 %v13929_v25 }
 0x323   :  { %3219 = vmatmul.mubr.bf16.gmra.mrb[136].mxu0 %v14511_v41  ;;  %7244 = vmatprep.subr.bf16.mxu1 %v13934_v20 }
 0x324   :  { %3228 = vmatprep.mubr.bf16.mxu0 %v18803_v63 }
 0x32b   :  { %3229 = vmatmul.mubr.bf16.gmra.mrb[140].mxu0 %v14512_v46 }
 0x32c   :  { %3238 = vmatprep.mubr.bf16.mxu0 %v18803_v63 }
 0x333   :  { %3239 = vmatmul.mubr.bf16.gmra.mrb[144].mxu0 %v14513_v19 }
 0x334   :  { %3248 = vmatprep.mubr.bf16.mxu0 %v18803_v63 }
 0x33b   :  { %3249 = vmatmul.mubr.bf16.gmra.mrb[148].mxu0 %v14514_v21 }
 0x33c   :  { %3258 = vmatprep.mubr.bf16.mxu0 %v18803_v63 }
 0x343   :  { %3259 = vmatmul.mubr.bf16.gmra.mrb[152].mxu0 %v14515_v50 }
 0x344   :  { %3268 = vmatprep.mubr.bf16.mxu0 %v18803_v63 }
 0x34b   :  { %3269 = vmatmul.mubr.bf16.gmra.mrb[156].mxu0 %v14516_v15 }
 0x34c   :  { %3278 = vmatprep.mubr.bf16.mxu0 %v18803_v63 }
 0x353   :  { %3279 = vmatmul.mubr.bf16.gmra.mrb[160].mxu0 %v14517_v38 }
 0x354   :  { %3288 = vmatprep.mubr.bf16.mxu0 %v18803_v63 }
 0x35b   :  { %3289 = vmatmul.mubr.bf16.gmra.mrb[164].mxu0 %v14518_v14 }
 0x35c   :  { %3298 = vmatprep.mubr.bf16.mxu0 %v18803_v63 }
 0x363   :  { %3299 = vmatmul.mubr.bf16.gmra.mrb[168].mxu0 %v14519_v24 }
 0x364   :  { %3308 = vmatprep.mubr.bf16.mxu0 %v18803_v63 }
 0x36b   :  { %3309 = vmatmul.mubr.bf16.gmra.mrb[172].mxu0 %v14520_v51  ;;  %v14535_v51 = vld [vmem:[%s18737_s0 + $0x2a8] ss:$12 sps:$4 sm:$0xff]  }
 0x36c   :  { %3318 = vmatprep.mubr.bf16.mxu0 %v18803_v63 }
 0x373   :  { %3319 = vmatmul.mubr.bf16.gmra.mrb[176].mxu0 %v14521_v60 }
 0x374   :  { %3328 = vmatprep.mubr.bf16.mxu0 %v18803_v63 }
 0x37b   :  { %3329 = vmatmul.mubr.bf16.gmra.mrb[180].mxu0 %v14522_v1 }
 0x37c   :  { %3338 = vmatprep.mubr.bf16.mxu0 %v18803_v63 }
 0x383   :  { %3339 = vmatmul.mubr.bf16.gmra.mrb[184].mxu0 %v14523_v26 }
 0x384   :  { %3348 = vmatprep.mubr.bf16.mxu0 %v18803_v63 }
 0x38b   :  { %3349 = vmatmul.mubr.bf16.gmra.mrb[188].mxu0 %v14524_v8 }
 0x38c   :  { %3358 = vmatprep.mubr.bf16.mxu0 %v18803_v63 }
 0x393   :  { %3359 = vmatmul.mubr.bf16.gmra.mrb[192].mxu0 %v14525_v31  ;;  %v18804_v31 = vld [vmem:[#allocation8_spill] sm:$0xff] }
 0x394   :  { %3368 = vmatprep.mubr.bf16.mxu0 %v18803_v63 }
 0x39b   :  { %3369 = vmatmul.mubr.bf16.gmra.mrb[196].mxu0 %v14526_v43 }
 0x39c   :  { %3378 = vmatprep.mubr.bf16.mxu0 %v18803_v63 }
 0x3a3   :  { %3379 = vmatmul.mubr.bf16.gmra.mrb[200].mxu0 %v14527_v2 }
 0x3a4   :  { %3388 = vmatprep.mubr.bf16.mxu0 %v18803_v63 }
 0x3ab   :  { %3389 = vmatmul.mubr.bf16.gmra.mrb[204].mxu0 %v14528_v49 }
 0x3ac   :  { %3398 = vmatprep.mubr.bf16.mxu0 %v18803_v63 }
 0x3b3   :  { %3399 = vmatmul.mubr.bf16.gmra.mrb[208].mxu0 %v14529_v52 }
 0x3b4   :  { %3408 = vmatprep.mubr.bf16.mxu0 %v18803_v63 }
 0x3bb   :  { %3409 = vmatmul.mubr.bf16.gmra.mrb[212].mxu0 %v14530_v48 }
 0x3bc   :  { %3418 = vmatprep.mubr.bf16.mxu0 %v18803_v63 }
 0x3c3   :  { %3419 = vmatmul.mubr.bf16.gmra.mrb[216].mxu0 %v14531_v45 }
 0x3c4   :  { %3428 = vmatprep.mubr.bf16.mxu0 %v18803_v63 }
 0x3cb   :  { %3429 = vmatmul.mubr.bf16.gmra.mrb[220].mxu0 %v14532_v27 }
 0x3cc   :  { %3438 = vmatprep.mubr.bf16.mxu0 %v18803_v63 }
 0x3ce   :  { %v3170_v36 = vpop.f32.mrb[116].mxu0 }
 0x3cf   :  { %v12541_v22 = vadd.f32 %v3170_v36, %v16645_v37  ;;  %v3172_v13 = vpop.f32.mrb[117].mxu0 }
 0x3d0   :  { %v12542_v23 = vadd.f32 %v3172_v13, %v16647_v28  ;;  %v3174_v57 = vpop.f32.mrb[118].mxu0 }
 0x3d1   :  { %vm3463_vm8 = vcmp.ge.f32.partialorder %v12541_v22, 0.0  ;;  %v3811_v3 = vmul.f32 0.01, %v12541_v22  ;;  %v12543_v17 = vadd.f32 %v3174_v57, %v16645_v37  ;;  %v3176_v0 = vpop.f32.mrb[119].mxu0  ;;  %v13932_v57 = vld [vmem:[%s18739_s3 + $0x100] ss:$8 sps:$4 sm:$0xff]  }
 0x3d2   :  { %vm3464_vm9 = vcmp.ge.f32.partialorder %v12542_v23, 0.0  ;;  %v3812_v33 = vmul.f32 0.01, %v12542_v23  ;;  %v12544_v7 = vadd.f32 %v3176_v0, %v16647_v28  ;;  %v13937_v0 = vld [vmem:[%s18739_s3 + $0x114] ss:$8 sps:$4 sm:$0xff]  }
 0x3d3   :  { %v4159_v54 = vsel %vm3463_vm8, %v12541_v22, %v3811_v3  ;;  %vm3469_vm10 = vcmp.ge.f32.partialorder %v12543_v17, 0.0  ;;  %v3817_v35 = vmul.f32 0.01, %v12543_v17  ;;  %3439 = vmatmul.mubr.bf16.gmra.mrb[224].mxu0 %v14534_v10 }
 0x3d4   :  { %v4677_v62 = vadd.f32 %v15347_v11, %v4159_v54  ;;  %v4160_v41 = vsel %vm3464_vm9, %v12542_v23, %v3812_v33  ;;  %vm3470_vm11 = vcmp.ge.f32.partialorder %v12544_v7, 0.0  ;;  %v3818_v46 = vmul.f32 0.01, %v12544_v7  ;;  %3448 = vmatprep.mubr.bf16.mxu0 %v18803_v63  ;;  %v18805_v33 = vld [vmem:[#allocation9_spill] sm:$0xff] }
 0x3d5   :  { %v4165_v6 = vsel %vm3469_vm10, %v12543_v17, %v3817_v35 }
 0x3d6   :  { %v4735_v9 = vadd.f32 %v4677_v62, %v4160_v41  ;;  %v4678_v19 = vadd.f32 %v15353_v30, %v4165_v6  ;;  %v4166_v16 = vsel %vm3470_vm11, %v12544_v7, %v3818_v46  ;;  %v3180_v29 = vpop.f32.mrb[120].mxu0  ;;  %v18806_v62 = vld [vmem:[#allocation10_spill] sm:$0xff] }
 0x3d7   :  { %v12545_v21 = vadd.f32 %v3180_v29, %v16645_v37  ;;  %v3182_v50 = vpop.f32.mrb[121].mxu0 }
 0x3d8   :  { %v4736_v18 = vadd.f32 %v4678_v19, %v4166_v16  ;;  %v12546_v47 = vadd.f32 %v3182_v50, %v16647_v28  ;;  %v3184_v15 = vpop.f32.mrb[122].mxu0  ;;  %v13935_v19 = vld [vmem:[%s18739_s3 + $0x110] ss:$8 sps:$4 sm:$0xff]  }
 0x3d9   :  { %vm3475_vm12 = vcmp.ge.f32.partialorder %v12545_v21, 0.0  ;;  %v3823_v11 = vmul.f32 0.01, %v12545_v21  ;;  %v12547_v38 = vadd.f32 %v3184_v15, %v16645_v37  ;;  %v3186_v14 = vpop.f32.mrb[123].mxu0 }
 0x3da   :  { %v4793_v25 = vpack.c.bf16 %v4736_v18, %v4735_v9  ;;  %vm3476_vm13 = vcmp.ge.f32.partialorder %v12546_v47, 0.0  ;;  %v3824_v55 = vmul.f32 0.01, %v12546_v47  ;;  %v12548_v24 = vadd.f32 %v3186_v14, %v16647_v28 }
 0x3db   :  { %v4171_v30 = vsel %vm3475_vm12, %v12545_v21, %v3823_v11  ;;  %vm3481_vm14 = vcmp.ge.f32.partialorder %v12547_v38, 0.0  ;;  %v3829_v20 = vmul.f32 0.01, %v12547_v38  ;;  %3449 = vmatmul.mubr.bf16.gmra.mrb[228].mxu0 %v14535_v51  ;;  %v13940_v21 = vld [vmem:[%s18739_s3 + $0x124] ss:$8 sps:$4 sm:$0xff]  }
 0x3dc   :  { %v4679_v60 = vadd.f32 %v15368_v61, %v4171_v30  ;;  %v4172_v1 = vsel %vm3476_vm13, %v12546_v47, %v3824_v55  ;;  %vm3482_vm15 = vcmp.ge.f32.partialorder %v12548_v24, 0.0  ;;  %v3830_v26 = vmul.f32 0.01, %v12548_v24  ;;  %8836 = vmatprep.mubr.bf16.mxu0 %v18803_v63  ;;  %v13943_v51 = vld [vmem:[%s18739_s3 + $0x134] ss:$8 sps:$4 sm:$0xff]  }
 0x3dd   :  { %v4177_v8 = vsel %vm3481_vm14, %v12547_v38, %v3829_v20 }
 0x3de   :  { %v4680_v43 = vadd.f32 %v18804_v31, %v4177_v8  ;;  %v4178_v2 = vsel %vm3482_vm15, %v12548_v24, %v3830_v26  ;;  %v3190_v49 = vpop.f32.mrb[124].mxu0  ;;  %v4737_v52 = vadd.f32 %v4679_v60, %v4172_v1  ;;  %v13938_v24 = vld [vmem:[%s18739_s3 + $0x120] ss:$8 sps:$4 sm:$0xff]  }
 0x3df   :  { %v12549_v48 = vadd.f32 %v3190_v49, %v16645_v37  ;;  %v3192_v45 = vpop.f32.mrb[125].mxu0  ;;  %v18807_v60 = vld [vmem:[#allocation11_spill] sm:$0xff] }
 0x3e0   :  { %v12550_v56 = vadd.f32 %v3192_v45, %v16647_v28  ;;  %v3194_v12 = vpop.f32.mrb[126].mxu0  ;;  %v4738_v27 = vadd.f32 %v4680_v43, %v4178_v2  ;;  %v18808_v2 = vld [vmem:[#allocation12_spill] sm:$0xff] }
 0x3e1   :  { %vm3487_vm0 = vcmp.ge.f32.partialorder %v12549_v48, 0.0  ;;  %v3835_v61 = vmul.f32 0.01, %v12549_v48  ;;  %v12551_v42 = vadd.f32 %v3194_v12, %v16645_v37  ;;  %v3196_v36 = vpop.f32.mrb[127].mxu0  ;;  %v13941_v45 = vld [vmem:[%s18739_s3 + $0x130] ss:$8 sps:$4 sm:$0xff]  }
 0x3e2   :  { %vm3488_vm1 = vcmp.ge.f32.partialorder %v12550_v56, 0.0  ;;  %v3836_v22 = vmul.f32 0.01, %v12550_v56  ;;  %v12552_v13 = vadd.f32 %v3196_v36, %v16647_v28  ;;  %v4794_v23 = vpack.c.bf16 %v4738_v27, %v4737_v52  ;;  %v13946_v27 = vld [vmem:[%s18739_s3 + $0x144] ss:$8 sps:$4 sm:$0xff]  }
 0x3e3   :  { %v4183_v3 = vsel %vm3487_vm0, %v12549_v48, %v3835_v61  ;;  %vm3493_vm2 = vcmp.ge.f32.partialorder %v12551_v42, 0.0  ;;  %v3841_v17 = vmul.f32 0.01, %v12551_v42 }
 0x3e4   :  { %v4681_v7 = vadd.f32 %v18805_v33, %v4183_v3  ;;  %v4184_v54 = vsel %vm3488_vm1, %v12550_v56, %v3836_v22  ;;  %vm3494_vm3 = vcmp.ge.f32.partialorder %v12552_v13, 0.0  ;;  %v3842_v35 = vmul.f32 0.01, %v12552_v13  ;;  %7103 = vmatprep.mubr.bf16.mxu1 %v4794_v23 }
 0x3e5   :  { %v4189_v10 = vsel %vm3493_vm2, %v12551_v42, %v3841_v17  ;;  %7104 = vmatmul.mubr.bf16.vlgmr.msra.gmra.mrb[116].mxu1 %v4793_v25 }
 0x3e6   :  { %v4682_v41 = vadd.f32 %v18806_v62, %v4189_v10  ;;  %v4190_v46 = vsel %vm3494_vm3, %v12552_v13, %v3842_v35  ;;  %v3200_v6 = vpop.f32.mrb[128].mxu0  ;;  %7245 = vmatpush1.bf16.msra.mxu1 %v13932_v57  ;;  %v4739_v9 = vadd.f32 %v4681_v7, %v4184_v54  ;;  %v13949_v54 = vld [vmem:[%s18739_s3 + $0x154] ss:$8 sps:$4 sm:$0xff]  }
 0x3e7   :  { %v12553_v16 = vadd.f32 %v3200_v6, %v16645_v37  ;;  %v3202_v29 = vpop.f32.mrb[129].mxu0  ;;  %7246 = vmatprep.subr.bf16.mxu1 %v13937_v0  ;;  %v13944_v0 = vld [vmem:[%s18739_s3 + $0x140] ss:$8 sps:$4 sm:$0xff]   ;;  %v18809_v35 = vld [vmem:[#allocation13_spill] sm:$0xff] }
 0x3e8   :  { %v12554_v50 = vadd.f32 %v3202_v29, %v16647_v28  ;;  %v3204_v18 = vpop.f32.mrb[130].mxu0  ;;  %v4740_v47 = vadd.f32 %v4682_v41, %v4190_v46 }
 0x3e9   :  { %vm3499_vm4 = vcmp.ge.f32.partialorder %v12553_v16, 0.0  ;;  %v3847_v15 = vmul.f32 0.01, %v12553_v16  ;;  %v12555_v11 = vadd.f32 %v3204_v18, %v16645_v37  ;;  %v3206_v38 = vpop.f32.mrb[131].mxu0 }
 0x3ea   :  { %vm3500_vm5 = vcmp.ge.f32.partialorder %v12554_v50, 0.0  ;;  %v3848_v14 = vmul.f32 0.01, %v12554_v50  ;;  %v12556_v25 = vadd.f32 %v3206_v38, %v16647_v28  ;;  %v16692_v55 = vpack.c.bf16 %v4740_v47, %v4739_v9  ;;  %7247 = vmatpush1.bf16.msra.mxu1 %v13935_v19  ;;  %v18810_v9 = vld [vmem:[#allocation14_spill] sm:$0xff] }
 0x3eb   :  { %v4195_v30 = vsel %vm3499_vm4, %v12553_v16, %v3847_v15  ;;  %vm3505_vm6 = vcmp.ge.f32.partialorder %v12555_v11, 0.0  ;;  %v3853_v20 = vmul.f32 0.01, %v12555_v11  ;;  %7248 = vmatprep.subr.bf16.mxu1 %v13940_v21  ;;  %v13947_v21 = vld [vmem:[%s18739_s3 + $0x150] ss:$8 sps:$4 sm:$0xff]  }
 0x3ec   :  { %v4683_v1 = vadd.f32 %v18807_v60, %v4195_v30  ;;  %v4196_v26 = vsel %vm3500_vm5, %v12554_v50, %v3848_v14  ;;  %vm3506_vm7 = vcmp.ge.f32.partialorder %v12556_v25, 0.0  ;;  %v3854_v8 = vmul.f32 0.01, %v12556_v25  ;;  %7113 = vmatprep.mubr.bf16.mxu1 %v16692_v55  ;;  %v13952_v47 = vld [vmem:[%s18739_s3 + $0x164] ss:$8 sps:$4 sm:$0xff]  }
 0x3ed   :  { %v4201_v31 = vsel %vm3505_vm6, %v12555_v11, %v3853_v20  ;;  %7114 = vmatmul.mubr.bf16.gmra.mrb[120].mxu1 %v4794_v23  ;;  %v13950_v60 = vld [vmem:[%s18739_s3 + $0x160] ss:$8 sps:$4 sm:$0xff]  }
 0x3ee   :  { %v4741_v43 = vadd.f32 %v4683_v1, %v4196_v26  ;;  %v4684_v49 = vadd.f32 %v18808_v2, %v4201_v31  ;;  %v4202_v52 = vsel %vm3506_vm7, %v12556_v25, %v3854_v8  ;;  %v3210_v48 = vpop.f32.mrb[132].mxu0  ;;  %7249 = vmatpush1.bf16.msra.mxu1 %v13938_v24  ;;  %v13955_v8 = vld [vmem:[%s18739_s3 + $0x174] ss:$8 sps:$4 sm:$0xff]   ;;  %v18811_v31 = vld [vmem:[#allocation15_spill] sm:$0xff] }
 0x3ef   :  { %v12557_v56 = vadd.f32 %v3210_v48, %v16645_v37  ;;  %v3212_v12 = vpop.f32.mrb[133].mxu0  ;;  %7250 = vmatprep.subr.bf16.mxu1 %v13943_v51 }
 0x3f0   :  { %v4742_v61 = vadd.f32 %v4684_v49, %v4202_v52  ;;  %v12558_v42 = vadd.f32 %v3212_v12, %v16647_v28  ;;  %v3214_v36 = vpop.f32.mrb[134].mxu0 }
 0x3f1   :  { %vm3511_vm8 = vcmp.ge.f32.partialorder %v12557_v56, 0.0  ;;  %v3859_v22 = vmul.f32 0.01, %v12557_v56  ;;  %v12559_v13 = vadd.f32 %v3214_v36, %v16645_v37  ;;  %v3216_v23 = vpop.f32.mrb[135].mxu0 }
 0x3f2   :  { %vm3512_vm9 = vcmp.ge.f32.partialorder %v12558_v42, 0.0  ;;  %v3860_v57 = vmul.f32 0.01, %v12558_v42  ;;  %v12560_v3 = vadd.f32 %v3216_v23, %v16647_v28  ;;  %v16713_v17 = vpack.c.bf16 %v4742_v61, %v4741_v43  ;;  %7251 = vmatpush1.bf16.msra.mxu1 %v13941_v45  ;;  %v18812_v45 = vld [vmem:[#allocation16_spill] sm:$0xff] }
 0x3f3   :  { %v4207_v33 = vsel %vm3511_vm8, %v12557_v56, %v3859_v22  ;;  %vm3517_vm10 = vcmp.ge.f32.partialorder %v12559_v13, 0.0  ;;  %v3865_v7 = vmul.f32 0.01, %v12559_v13  ;;  %7252 = vmatprep.subr.bf16.mxu1 %v13946_v27  ;;  %v13953_v61 = vld [vmem:[%s18739_s3 + $0x170] ss:$8 sps:$4 sm:$0xff]  }
 0x3f4   :  { %v4685_v10 = vadd.f32 %v18809_v35, %v4207_v33  ;;  %v4208_v62 = vsel %vm3512_vm9, %v12558_v42, %v3860_v57  ;;  %vm3518_vm11 = vcmp.ge.f32.partialorder %v12560_v3, 0.0  ;;  %v3866_v41 = vmul.f32 0.01, %v12560_v3  ;;  %7123 = vmatprep.mubr.bf16.mxu1 %v16713_v17  ;;  %v13958_v22 = vld [vmem:[%s18739_s3 + $0x184] ss:$8 sps:$4 sm:$0xff]  }
 0x3f5   :  { %v4213_v46 = vsel %vm3517_vm10, %v12559_v13, %v3865_v7  ;;  %7124 = vmatmul.mubr.bf16.gmra.mrb[124].mxu1 %v16692_v55 }
 0x3f6   :  { %v4743_v6 = vadd.f32 %v4685_v10, %v4208_v62  ;;  %v4686_v19 = vadd.f32 %v18810_v9, %v4213_v46  ;;  %v4214_v16 = vsel %vm3518_vm11, %v12560_v3, %v3866_v41  ;;  %v3220_v29 = vpop.f32.mrb[136].mxu0  ;;  %7253 = vmatpush1.bf16.msra.mxu1 %v13944_v0  ;;  %v13956_v10 = vld [vmem:[%s18739_s3 + $0x180] ss:$8 sps:$4 sm:$0xff]   ;;  %v13961_v46 = vld [vmem:[%s18739_s3 + $0x194] ss:$8 sps:$4 sm:$0xff]  }
 0x3f7   :  { %v12561_v50 = vadd.f32 %v3220_v29, %v16645_v37  ;;  %v3222_v18 = vpop.f32.mrb[137].mxu0  ;;  %7254 = vmatprep.subr.bf16.mxu1 %v13949_v54 }
 0x3f8   :  { %v4744_v15 = vadd.f32 %v4686_v19, %v4214_v16  ;;  %v12562_v11 = vadd.f32 %v3222_v18, %v16647_v28  ;;  %v3224_v38 = vpop.f32.mrb[138].mxu0 }
 0x3f9   :  { %vm3523_vm12 = vcmp.ge.f32.partialorder %v12561_v50, 0.0  ;;  %v3871_v14 = vmul.f32 0.01, %v12561_v50  ;;  %v12563_v25 = vadd.f32 %v3224_v38, %v16645_v37  ;;  %v3226_v24 = vpop.f32.mrb[139].mxu0 }
 0x3fa   :  { %v16734_v30 = vpack.c.bf16 %v4744_v15, %v4743_v6  ;;  %vm3524_vm13 = vcmp.ge.f32.partialorder %v12562_v11, 0.0  ;;  %v3872_v20 = vmul.f32 0.01, %v12562_v11  ;;  %v12564_v51 = vadd.f32 %v3226_v24, %v16647_v28  ;;  %7255 = vmatpush1.bf16.msra.mxu1 %v13947_v21  ;;  %v18813_v6 = vld [vmem:[#allocation17_spill] sm:$0xff] }
 0x3fb   :  { %v4219_v1 = vsel %vm3523_vm12, %v12561_v50, %v3871_v14  ;;  %vm3529_vm14 = vcmp.ge.f32.partialorder %v12563_v25, 0.0  ;;  %v3877_v26 = vmul.f32 0.01, %v12563_v25  ;;  %7256 = vmatprep.subr.bf16.mxu1 %v13952_v47  ;;  %v18814_v50 = vld [vmem:[#allocation18_spill] sm:$0xff] }
 0x3fc   :  { %v4687_v43 = vadd.f32 %v18811_v31, %v4219_v1  ;;  %v4220_v2 = vsel %vm3524_vm13, %v12562_v11, %v3872_v20  ;;  %vm3530_vm15 = vcmp.ge.f32.partialorder %v12564_v51, 0.0  ;;  %v3878_v49 = vmul.f32 0.01, %v12564_v51  ;;  %7133 = vmatprep.mubr.bf16.mxu1 %v16734_v30  ;;  %v13959_v11 = vld [vmem:[%s18739_s3 + $0x190] ss:$8 sps:$4 sm:$0xff]  }
 0x3fd   :  { %v4225_v52 = vsel %vm3529_vm14, %v12563_v25, %v3877_v26  ;;  %7134 = vmatmul.mubr.bf16.gmra.mrb[128].mxu1 %v16713_v17  ;;  %v13964_v25 = vld [vmem:[%s18739_s3 + $0x1a4] ss:$8 sps:$4 sm:$0xff]  }
 0x3fe   :  { %v4745_v48 = vadd.f32 %v4687_v43, %v4220_v2  ;;  %v4688_v56 = vadd.f32 %v18812_v45, %v4225_v52  ;;  %v4226_v12 = vsel %vm3530_vm15, %v12564_v51, %v3878_v49  ;;  %v3230_v27 = vpop.f32.mrb[140].mxu0  ;;  %7257 = vmatpush1.bf16.msra.mxu1 %v13950_v60  ;;  %v13962_v2 = vld [vmem:[%s18739_s3 + $0x1a0] ss:$8 sps:$4 sm:$0xff]  }
 0x3ff   :  { %v12565_v42 = vadd.f32 %v3230_v27, %v16645_v37  ;;  %v3232_v36 = vpop.f32.mrb[141].mxu0  ;;  %7258 = vmatprep.subr.bf16.mxu1 %v13955_v8  ;;  %v18815_v45 = vld [vmem:[#allocation19_spill] sm:$0xff] }
 0x400   :  { %v4746_v13 = vadd.f32 %v4688_v56, %v4226_v12  ;;  %v12566_v23 = vadd.f32 %v3232_v36, %v16647_v28  ;;  %v3234_v57 = vpop.f32.mrb[142].mxu0  ;;  %v18816_v36 = vld [vmem:[#allocation20_spill] sm:$0xff] }
 0x401   :  { %vm3535_vm0 = vcmp.ge.f32.partialorder %v12565_v42, 0.0  ;;  %v3883_v3 = vmul.f32 0.01, %v12565_v42  ;;  %v12567_v0 = vadd.f32 %v3234_v57, %v16645_v37  ;;  %v3236_v33 = vpop.f32.mrb[143].mxu0  ;;  %v13965_v57 = vld [vmem:[%s18739_s3 + $0x1b0] ss:$8 sps:$4 sm:$0xff]  }
 0x402   :  { %v16756_v7 = vpack.c.bf16 %v4746_v13, %v4745_v48  ;;  %vm3536_vm1 = vcmp.ge.f32.partialorder %v12566_v23, 0.0  ;;  %v3884_v54 = vmul.f32 0.01, %v12566_v23  ;;  %v12568_v35 = vadd.f32 %v3236_v33, %v16647_v28  ;;  %7259 = vmatpush1.bf16.msra.mxu1 %v13953_v61  ;;  %v13967_v48 = vld [vmem:[%s18739_s3 + $0x1b4] ss:$8 sps:$4 sm:$0xff]  }
 0x403   :  { %v4231_v62 = vsel %vm3535_vm0, %v12565_v42, %v3883_v3  ;;  %vm3541_vm2 = vcmp.ge.f32.partialorder %v12567_v0, 0.0  ;;  %v3889_v41 = vmul.f32 0.01, %v12567_v0  ;;  %7260 = vmatprep.subr.bf16.mxu1 %v13958_v22  ;;  %v13970_v33 = vld [vmem:[%s18739_s3 + $0x1c4] ss:$8 sps:$4 sm:$0xff]  }
 0x404   :  { %v4689_v9 = vadd.f32 %v18813_v6, %v4231_v62  ;;  %v4232_v19 = vsel %vm3536_vm1, %v12566_v23, %v3884_v54  ;;  %vm3542_vm3 = vcmp.ge.f32.partialorder %v12568_v35, 0.0  ;;  %v3890_v16 = vmul.f32 0.01, %v12568_v35  ;;  %7143 = vmatprep.mubr.bf16.mxu1 %v16756_v7 }
 0x405   :  { %v4237_v29 = vsel %vm3541_vm2, %v12567_v0, %v3889_v41  ;;  %7144 = vmatmul.mubr.bf16.gmra.mrb[132].mxu1 %v16734_v30 }
 0x406   :  { %v4747_v21 = vadd.f32 %v4689_v9, %v4232_v19  ;;  %v4690_v18 = vadd.f32 %v18814_v50, %v4237_v29  ;;  %v4238_v47 = vsel %vm3542_vm3, %v12568_v35, %v3890_v16  ;;  %v3240_v15 = vpop.f32.mrb[144].mxu0  ;;  %7261 = vmatpush1.bf16.msra.mxu1 %v13956_v10  ;;  %v13968_v16 = vld [vmem:[%s18739_s3 + $0x1c0] ss:$8 sps:$4 sm:$0xff]   ;;  %v13973_v50 = vld [vmem:[%s18739_s3 + $0x1d4] ss:$8 sps:$4 sm:$0xff]  }
 0x407   :  { %v12569_v38 = vadd.f32 %v3240_v15, %v16645_v37  ;;  %v3242_v14 = vpop.f32.mrb[145].mxu0  ;;  %7262 = vmatprep.subr.bf16.mxu1 %v13961_v46 }
 0x408   :  { %v4748_v24 = vadd.f32 %v4690_v18, %v4238_v47  ;;  %v12570_v20 = vadd.f32 %v3242_v14, %v16647_v28  ;;  %v3244_v51 = vpop.f32.mrb[146].mxu0  ;;  %v18817_v18 = vld [vmem:[#allocation21_spill] sm:$0xff] }
 0x409   :  { %vm3547_vm4 = vcmp.ge.f32.partialorder %v12569_v38, 0.0  ;;  %v3895_v60 = vmul.f32 0.01, %v12569_v38  ;;  %v12571_v1 = vadd.f32 %v3244_v51, %v16645_v37  ;;  %v3246_v26 = vpop.f32.mrb[147].mxu0 }
 0x40a   :  { %v16778_v8 = vpack.c.bf16 %v4748_v24, %v4747_v21  ;;  %vm3548_vm5 = vcmp.ge.f32.partialorder %v12570_v20, 0.0  ;;  %v3896_v31 = vmul.f32 0.01, %v12570_v20  ;;  %v12572_v43 = vadd.f32 %v3246_v26, %v16647_v28  ;;  %7263 = vmatpush1.bf16.msra.mxu1 %v13959_v11 }
 0x40b   :  { %v4243_v49 = vsel %vm3547_vm4, %v12569_v38, %v3895_v60  ;;  %vm3553_vm6 = vcmp.ge.f32.partialorder %v12571_v1, 0.0  ;;  %v3901_v52 = vmul.f32 0.01, %v12571_v1  ;;  %7264 = vmatprep.subr.bf16.mxu1 %v13964_v25  ;;  %v18818_v25 = vld [vmem:[#allocation22_spill] sm:$0xff]  ;;  %v13971_v60 = vld [vmem:[%s18739_s3 + $0x1d0] ss:$8 sps:$4 sm:$0xff]  }
 0x40c   :  { %v4691_v56 = vadd.f32 %v18815_v45, %v4243_v49  ;;  %v4244_v12 = vsel %vm3548_vm5, %v12570_v20, %v3896_v31  ;;  %vm3554_vm7 = vcmp.ge.f32.partialorder %v12572_v43, 0.0  ;;  %v3902_v27 = vmul.f32 0.01, %v12572_v43  ;;  %7153 = vmatprep.mubr.bf16.mxu1 %v16778_v8  ;;  %v13976_v31 = vld [vmem:[%s18739_s3 + $0x1e4] ss:$8 sps:$4 sm:$0xff]  }
 0x40d   :  { %v4249_v61 = vsel %vm3553_vm6, %v12571_v1, %v3901_v52  ;;  %7154 = vmatmul.mubr.bf16.gmra.mrb[136].mxu1 %v16756_v7 }
 0x40e   :  { %v4749_v42 = vadd.f32 %v4691_v56, %v4244_v12  ;;  %v4692_v22 = vadd.f32 %v18816_v36, %v4249_v61  ;;  %v4250_v13 = vsel %vm3554_vm7, %v12572_v43, %v3902_v27  ;;  %v3250_v23 = vpop.f32.mrb[148].mxu0  ;;  %7265 = vmatpush1.bf16.msra.mxu1 %v13962_v2  ;;  %v13974_v61 = vld [vmem:[%s18739_s3 + $0x1e0] ss:$8 sps:$4 sm:$0xff]  }
 0x40f   :  { %v12573_v3 = vadd.f32 %v3250_v23, %v16645_v37  ;;  %v3252_v0 = vpop.f32.mrb[149].mxu0  ;;  %7266 = vmatprep.subr.bf16.mxu1 %v13967_v48 }
 0x410   :  { %v4750_v54 = vadd.f32 %v4692_v22, %v4250_v13  ;;  %v12574_v35 = vadd.f32 %v3252_v0, %v16647_v28  ;;  %v3254_v10 = vpop.f32.mrb[150].mxu0  ;;  %v13979_v22 = vld [vmem:[%s18739_s3 + $0x1f4] ss:$8 sps:$4 sm:$0xff]   ;;  %v18819_v13 = vld [vmem:[#allocation23_spill] sm:$0xff] }
 0x411   :  { %vm3559_vm8 = vcmp.ge.f32.partialorder %v12573_v3, 0.0  ;;  %v3907_v62 = vmul.f32 0.01, %v12573_v3  ;;  %v12575_v41 = vadd.f32 %v3254_v10, %v16645_v37  ;;  %v3256_v46 = vpop.f32.mrb[151].mxu0 }
 0x412   :  { %v16800_v6 = vpack.c.bf16 %v4750_v54, %v4749_v42  ;;  %vm3560_vm9 = vcmp.ge.f32.partialorder %v12574_v35, 0.0  ;;  %v3908_v9 = vmul.f32 0.01, %v12574_v35  ;;  %v12576_v19 = vadd.f32 %v3256_v46, %v16647_v28  ;;  %7267 = vmatpush1.bf16.msra.mxu1 %v13965_v57  ;;  %v18820_v54 = vld [vmem:[#allocation24_spill] sm:$0xff] }
 0x413   :  { %v4255_v29 = vsel %vm3559_vm8, %v12573_v3, %v3907_v62  ;;  %vm3565_vm10 = vcmp.ge.f32.partialorder %v12575_v41, 0.0  ;;  %v3913_v21 = vmul.f32 0.01, %v12575_v41  ;;  %7268 = vmatprep.subr.bf16.mxu1 %v13970_v33 }
 0x414   :  { %v4693_v47 = vadd.f32 %v18817_v18, %v4255_v29  ;;  %v4256_v15 = vsel %vm3560_vm9, %v12574_v35, %v3908_v9  ;;  %vm3566_vm11 = vcmp.ge.f32.partialorder %v12576_v19, 0.0  ;;  %v3914_v11 = vmul.f32 0.01, %v12576_v19  ;;  %7163 = vmatprep.mubr.bf16.mxu1 %v16800_v6 }
 0x415   :  { %v4261_v38 = vsel %vm3565_vm10, %v12575_v41, %v3913_v21  ;;  %7164 = vmatmul.mubr.bf16.gmra.mrb[140].mxu1 %v16778_v8  ;;  %v13977_v41 = vld [vmem:[%s18739_s3 + $0x1f0] ss:$8 sps:$4 sm:$0xff]  }
 0x416   :  { %v4751_v14 = vadd.f32 %v4693_v47, %v4256_v15  ;;  %v4694_v24 = vadd.f32 %v18818_v25, %v4261_v38  ;;  %v4262_v20 = vsel %vm3566_vm11, %v12576_v19, %v3914_v11  ;;  %v3260_v51 = vpop.f32.mrb[152].mxu0  ;;  %7269 = vmatpush1.bf16.msra.mxu1 %v13968_v16  ;;  %v13982_v19 = vld [vmem:[%s18739_s3 + $0x204] ss:$8 sps:$4 sm:$0xff]  }
 0x417   :  { %v12577_v1 = vadd.f32 %v3260_v51, %v16645_v37  ;;  %v3262_v26 = vpop.f32.mrb[153].mxu0  ;;  %7270 = vmatprep.subr.bf16.mxu1 %v13973_v50 }
 0x418   :  { %v4752_v43 = vadd.f32 %v4694_v24, %v4262_v20  ;;  %v12578_v2 = vadd.f32 %v3262_v26, %v16647_v28  ;;  %v3264_v49 = vpop.f32.mrb[154].mxu0  ;;  %v18821_v24 = vld [vmem:[#allocation25_spill] sm:$0xff] }
 0x419   :  { %vm3571_vm12 = vcmp.ge.f32.partialorder %v12577_v1, 0.0  ;;  %v3919_v52 = vmul.f32 0.01, %v12577_v1  ;;  %v12579_v48 = vadd.f32 %v3264_v49, %v16645_v37  ;;  %v3266_v45 = vpop.f32.mrb[155].mxu0 }
 0x41a   :  { %v16822_v56 = vpack.c.bf16 %v4752_v43, %v4751_v14  ;;  %vm3572_vm13 = vcmp.ge.f32.partialorder %v12578_v2, 0.0  ;;  %v3920_v12 = vmul.f32 0.01, %v12578_v2  ;;  %v12580_v27 = vadd.f32 %v3266_v45, %v16647_v28  ;;  %7271 = vmatpush1.bf16.msra.mxu1 %v13971_v60 }
 0x41b   :  { %v4267_v42 = vsel %vm3571_vm12, %v12577_v1, %v3919_v52  ;;  %vm3577_vm14 = vcmp.ge.f32.partialorder %v12579_v48, 0.0  ;;  %v3925_v36 = vmul.f32 0.01, %v12579_v48  ;;  %7272 = vmatprep.subr.bf16.mxu1 %v13976_v31  ;;  %v18822_v31 = vld [vmem:[#allocation26_spill] sm:$0xff] }
 0x41c   :  { %v4695_v23 = vadd.f32 %v18819_v13, %v4267_v42  ;;  %v4268_v57 = vsel %vm3572_vm13, %v12578_v2, %v3920_v12  ;;  %vm3578_vm15 = vcmp.ge.f32.partialorder %v12580_v27, 0.0  ;;  %v3926_v3 = vmul.f32 0.01, %v12580_v27  ;;  %7173 = vmatprep.mubr.bf16.mxu1 %v16822_v56 }
 0x41d   :  { %v4273_v0 = vsel %vm3577_vm14, %v12579_v48, %v3925_v36  ;;  %7174 = vmatmul.mubr.bf16.gmra.mrb[144].mxu1 %v16800_v6 }
 0x41e   :  { %v4753_v33 = vadd.f32 %v4695_v23, %v4268_v57  ;;  %v4696_v35 = vadd.f32 %v18820_v54, %v4273_v0  ;;  %v4274_v10 = vsel %vm3578_vm15, %v12580_v27, %v3926_v3  ;;  %v3270_v62 = vpop.f32.mrb[156].mxu0  ;;  %7273 = vmatpush1.bf16.msra.mxu1 %v13974_v61  ;;  %v18823_v0 = vld [vmem:[#allocation27_spill] sm:$0xff] }
 0x41f   :  { %v12581_v46 = vadd.f32 %v3270_v62, %v16645_v37  ;;  %v3272_v9 = vpop.f32.mrb[157].mxu0  ;;  %7274 = vmatprep.subr.bf16.mxu1 %v13979_v22 }
 0x420   :  { %v4754_v16 = vadd.f32 %v4696_v35, %v4274_v10  ;;  %v12582_v29 = vadd.f32 %v3272_v9, %v16647_v28  ;;  %v3274_v21 = vpop.f32.mrb[158].mxu0 }
 0x421   :  { %vm3583_vm0 = vcmp.ge.f32.partialorder %v12581_v46, 0.0  ;;  %v3931_v50 = vmul.f32 0.01, %v12581_v46  ;;  %v12583_v18 = vadd.f32 %v3274_v21, %v16645_v37  ;;  %v3276_v47 = vpop.f32.mrb[159].mxu0 }
 0x422   :  { %v16844_v15 = vpack.c.bf16 %v4754_v16, %v4753_v33  ;;  %vm3584_vm1 = vcmp.ge.f32.partialorder %v12582_v29, 0.0  ;;  %v3932_v11 = vmul.f32 0.01, %v12582_v29  ;;  %v12584_v38 = vadd.f32 %v3276_v47, %v16647_v28  ;;  %7275 = vmatpush1.bf16.msra.mxu1 %v13977_v41  ;;  %v18824_v41 = vld [vmem:[#allocation28_spill] sm:$0xff] }
 0x423   :  { %v4279_v14 = vsel %vm3583_vm0, %v12581_v46, %v3931_v50  ;;  %vm3589_vm2 = vcmp.ge.f32.partialorder %v12583_v18, 0.0  ;;  %v3937_v25 = vmul.f32 0.01, %v12583_v18  ;;  %7417 = vmatprep.subr.bf16.mxu1 %v13982_v19 }
 0x424   :  { %v4697_v20 = vadd.f32 %v18821_v24, %v4279_v14  ;;  %v4280_v51 = vsel %vm3584_vm1, %v12582_v29, %v3932_v11  ;;  %vm3590_vm3 = vcmp.ge.f32.partialorder %v12584_v38, 0.0  ;;  %v3938_v60 = vmul.f32 0.01, %v12584_v38  ;;  %7183 = vmatprep.mubr.bf16.mxu1 %v16844_v15 }
 0x425   :  { %v4285_v1 = vsel %vm3589_vm2, %v12583_v18, %v3937_v25  ;;  %7184 = vmatmul.mubr.bf16.gmra.mrb[148].mxu1 %v16822_v56 }
 0x426   :  { %v4755_v26 = vadd.f32 %v4697_v20, %v4280_v51  ;;  %v4698_v43 = vadd.f32 %v18822_v31, %v4285_v1  ;;  %v4286_v2 = vsel %vm3590_vm3, %v12584_v38, %v3938_v60  ;;  %v3280_v49 = vpop.f32.mrb[160].mxu0  ;;  %v18825_v60 = vld [vmem:[#allocation29_spill] sm:$0xff] }
 0x427   :  { %v12585_v52 = vadd.f32 %v3280_v49, %v16645_v37  ;;  %v3282_v48 = vpop.f32.mrb[161].mxu0  ;;  %v18826_v49 = vld [vmem:[#allocation30_spill] sm:$0xff] }
 0x428   :  { %v4756_v45 = vadd.f32 %v4698_v43, %v4286_v2  ;;  %v12586_v12 = vadd.f32 %v3282_v48, %v16647_v28  ;;  %v3284_v27 = vpop.f32.mrb[162].mxu0 }
 0x429   :  { %vm3595_vm4 = vcmp.ge.f32.partialorder %v12585_v52, 0.0  ;;  %v3943_v61 = vmul.f32 0.01, %v12585_v52  ;;  %v12587_v42 = vadd.f32 %v3284_v27, %v16645_v37  ;;  %v3286_v36 = vpop.f32.mrb[163].mxu0 }
 0x42a   :  { %v16854_v22 = vpack.c.bf16 %v4756_v45, %v4755_v26  ;;  %vm3596_vm5 = vcmp.ge.f32.partialorder %v12586_v12, 0.0  ;;  %v3944_v13 = vmul.f32 0.01, %v12586_v12  ;;  %v12588_v23 = vadd.f32 %v3286_v36, %v16647_v28 }
 0x42b   :  { %v4291_v57 = vsel %vm3595_vm4, %v12585_v52, %v3943_v61  ;;  %vm3601_vm6 = vcmp.ge.f32.partialorder %v12587_v42, 0.0  ;;  %v3949_v3 = vmul.f32 0.01, %v12587_v42 }
 0x42c   :  { %v4699_v33 = vadd.f32 %v18823_v0, %v4291_v57  ;;  %v4292_v54 = vsel %vm3596_vm5, %v12586_v12, %v3944_v13  ;;  %vm3602_vm7 = vcmp.ge.f32.partialorder %v12588_v23, 0.0  ;;  %v3950_v35 = vmul.f32 0.01, %v12588_v23  ;;  %7193 = vmatprep.mubr.bf16.mxu1 %v16854_v22 }
 0x42d   :  { %v4297_v10 = vsel %vm3601_vm6, %v12587_v42, %v3949_v3  ;;  %7194 = vmatmul.mubr.bf16.gmra.mrb[152].mxu1 %v16844_v15 }
 0x42e   :  { %v4757_v62 = vadd.f32 %v4699_v33, %v4292_v54  ;;  %v4700_v46 = vadd.f32 %v18824_v41, %v4297_v10  ;;  %v4298_v9 = vsel %vm3602_vm7, %v12588_v23, %v3950_v35  ;;  %v3290_v19 = vpop.f32.mrb[164].mxu0  ;;  %v18827_v10 = vld [vmem:[#allocation31_spill] sm:$0xff] }
 0x42f   :  { %v12589_v16 = vadd.f32 %v3290_v19, %v16645_v37  ;;  %v3292_v29 = vpop.f32.mrb[165].mxu0 }
 0x430   :  { %v4758_v21 = vadd.f32 %v4700_v46, %v4298_v9  ;;  %v12590_v50 = vadd.f32 %v3292_v29, %v16647_v28  ;;  %v3294_v18 = vpop.f32.mrb[166].mxu0 }
 0x431   :  { %vm3607_vm8 = vcmp.ge.f32.partialorder %v12589_v16, 0.0  ;;  %v3955_v47 = vmul.f32 0.01, %v12589_v16  ;;  %v12591_v11 = vadd.f32 %v3294_v18, %v16645_v37  ;;  %v3296_v38 = vpop.f32.mrb[167].mxu0 }
 0x432   :  { %v16864_v14 = vpack.c.bf16 %v4758_v21, %v4757_v62  ;;  %vm3608_vm9 = vcmp.ge.f32.partialorder %v12590_v50, 0.0  ;;  %v3956_v25 = vmul.f32 0.01, %v12590_v50  ;;  %v12592_v24 = vadd.f32 %v3296_v38, %v16647_v28 }
 0x433   :  { %v4303_v20 = vsel %vm3607_vm8, %v12589_v16, %v3955_v47  ;;  %vm3613_vm10 = vcmp.ge.f32.partialorder %v12591_v11, 0.0  ;;  %v3961_v51 = vmul.f32 0.01, %v12591_v11  ;;  %v18828_v16 = vld [vmem:[#allocation32_spill] sm:$0xff] }
 0x434   :  { %v4701_v1 = vadd.f32 %v18825_v60, %v4303_v20  ;;  %v4304_v26 = vsel %vm3608_vm9, %v12590_v50, %v3956_v25  ;;  %vm3614_vm11 = vcmp.ge.f32.partialorder %v12592_v24, 0.0  ;;  %v3962_v31 = vmul.f32 0.01, %v12592_v24  ;;  %7203 = vmatprep.mubr.bf16.mxu1 %v16864_v14 }
 0x435   :  { %v4309_v43 = vsel %vm3613_vm10, %v12591_v11, %v3961_v51  ;;  %7204 = vmatmul.mubr.bf16.gmra.mrb[156].mxu1 %v16854_v22 }
 0x436   :  { %v4759_v2 = vadd.f32 %v4701_v1, %v4304_v26  ;;  %v4702_v52 = vadd.f32 %v18826_v49, %v4309_v43  ;;  %v4310_v48 = vsel %vm3614_vm11, %v12592_v24, %v3962_v31  ;;  %v3300_v45 = vpop.f32.mrb[168].mxu0 }
 0x437   :  { %v12593_v12 = vadd.f32 %v3300_v45, %v16645_v37  ;;  %v3302_v27 = vpop.f32.mrb[169].mxu0 }
 0x438   :  { %v4760_v61 = vadd.f32 %v4702_v52, %v4310_v48  ;;  %v12594_v42 = vadd.f32 %v3302_v27, %v16647_v28  ;;  %v3304_v36 = vpop.f32.mrb[170].mxu0  ;;  %v18830_v27 = vld [vmem:[#allocation34_spill] sm:$0xff] }
 0x439   :  { %vm3619_vm12 = vcmp.ge.f32.partialorder %v12593_v12, 0.0  ;;  %v3967_v13 = vmul.f32 0.01, %v12593_v12  ;;  %v12595_v23 = vadd.f32 %v3304_v36, %v16645_v37  ;;  %v3306_v57 = vpop.f32.mrb[171].mxu0 }
 0x43a   :  { %v16874_v3 = vpack.c.bf16 %v4760_v61, %v4759_v2  ;;  %vm3620_vm13 = vcmp.ge.f32.partialorder %v12594_v42, 0.0  ;;  %v3968_v0 = vmul.f32 0.01, %v12594_v42  ;;  %v12596_v33 = vadd.f32 %v3306_v57, %v16647_v28  ;;  %v18829_v2 = vld [vmem:[#allocation33_spill] sm:$0xff] }
 0x43b   :  { %v4315_v54 = vsel %vm3619_vm12, %v12593_v12, %v3967_v13  ;;  %vm3625_vm14 = vcmp.ge.f32.partialorder %v12595_v23, 0.0  ;;  %v3973_v35 = vmul.f32 0.01, %v12595_v23 }
 0x43c   :  { %v4703_v62 = vadd.f32 %v18827_v10, %v4315_v54  ;;  %v4316_v41 = vsel %vm3620_vm13, %v12594_v42, %v3968_v0  ;;  %vm3626_vm15 = vcmp.ge.f32.partialorder %v12596_v33, 0.0  ;;  %v3974_v46 = vmul.f32 0.01, %v12596_v33  ;;  %7213 = vmatprep.mubr.bf16.mxu1 %v16874_v3 }
 0x43d   :  { %v4321_v9 = vsel %vm3625_vm14, %v12595_v23, %v3973_v35  ;;  %7214 = vmatmul.mubr.bf16.gmra.mrb[160].mxu1 %v16864_v14 }
 0x43e   :  { %v4761_v19 = vadd.f32 %v4703_v62, %v4316_v41  ;;  %v4704_v29 = vadd.f32 %v18828_v16, %v4321_v9  ;;  %v4322_v21 = vsel %vm3626_vm15, %v12596_v33, %v3974_v46  ;;  %v3310_v50 = vpop.f32.mrb[172].mxu0  ;;  %v18831_v16 = vld [vmem:[#allocation35_spill] sm:$0xff] }
 0x43f   :  { %v12597_v18 = vadd.f32 %v3310_v50, %v16645_v37  ;;  %v3312_v47 = vpop.f32.mrb[173].mxu0 }
 0x440   :  { %v4762_v11 = vadd.f32 %v4704_v29, %v4322_v21  ;;  %v12598_v38 = vadd.f32 %v3312_v47, %v16647_v28  ;;  %v3314_v25 = vpop.f32.mrb[174].mxu0 }
 0x441   :  { %vm3631_vm0 = vcmp.ge.f32.partialorder %v12597_v18, 0.0  ;;  %v3979_v24 = vmul.f32 0.01, %v12597_v18  ;;  %v12599_v20 = vadd.f32 %v3314_v25, %v16645_v37  ;;  %v3316_v51 = vpop.f32.mrb[175].mxu0 }
 0x442   :  { %v16884_v60 = vpack.c.bf16 %v4762_v11, %v4761_v19  ;;  %vm3632_vm1 = vcmp.ge.f32.partialorder %v12598_v38, 0.0  ;;  %v3980_v1 = vmul.f32 0.01, %v12598_v38  ;;  %v12600_v26 = vadd.f32 %v3316_v51, %v16647_v28  ;;  %v18832_v11 = vld [vmem:[#allocation36_spill] sm:$0xff] }
 0x443   :  { %v4327_v31 = vsel %vm3631_vm0, %v12597_v18, %v3979_v24  ;;  %vm3637_vm2 = vcmp.ge.f32.partialorder %v12599_v20, 0.0  ;;  %v3985_v43 = vmul.f32 0.01, %v12599_v20 }
 0x444   :  { %v4705_v49 = vadd.f32 %v18829_v2, %v4327_v31  ;;  %v4328_v52 = vsel %vm3632_vm1, %v12598_v38, %v3980_v1  ;;  %vm3638_vm3 = vcmp.ge.f32.partialorder %v12600_v26, 0.0  ;;  %v3986_v48 = vmul.f32 0.01, %v12600_v26  ;;  %7223 = vmatprep.mubr.bf16.mxu1 %v16884_v60 }
 0x445   :  { %v4333_v45 = vsel %vm3637_vm2, %v12599_v20, %v3985_v43  ;;  %7224 = vmatmul.mubr.bf16.gmra.mrb[164].mxu1 %v16874_v3 }
 0x446   :  { %v4763_v12 = vadd.f32 %v4705_v49, %v4328_v52  ;;  %v4706_v61 = vadd.f32 %v18830_v27, %v4333_v45  ;;  %v4334_v42 = vsel %vm3638_vm3, %v12600_v26, %v3986_v48  ;;  %v3320_v36 = vpop.f32.mrb[176].mxu0 }
 0x447   :  { %v12601_v13 = vadd.f32 %v3320_v36, %v16645_v37  ;;  %v3322_v23 = vpop.f32.mrb[177].mxu0  ;;  %v18833_v36 = vld [vmem:[#allocation37_spill] sm:$0xff] }
 0x448   :  { %v4764_v57 = vadd.f32 %v4706_v61, %v4334_v42  ;;  %v12602_v0 = vadd.f32 %v3322_v23, %v16647_v28  ;;  %v3324_v33 = vpop.f32.mrb[178].mxu0  ;;  %v13985_v42 = vld [vmem:[%s18739_s3 + $0x214] ss:$8 sps:$4 sm:$0xff]  }
 0x449   :  { %vm3643_vm4 = vcmp.ge.f32.partialorder %v12601_v13, 0.0  ;;  %v3991_v54 = vmul.f32 0.01, %v12601_v13  ;;  %v12603_v35 = vadd.f32 %v3324_v33, %v16645_v37  ;;  %v3326_v10 = vpop.f32.mrb[179].mxu0 }
 0x44a   :  { %v16894_v62 = vpack.c.bf16 %v4764_v57, %v4763_v12  ;;  %vm3644_vm5 = vcmp.ge.f32.partialorder %v12602_v0, 0.0  ;;  %v3992_v41 = vmul.f32 0.01, %v12602_v0  ;;  %v12604_v46 = vadd.f32 %v3326_v10, %v16647_v28  ;;  %v13980_v12 = vld [vmem:[%s18739_s3 + $0x200] ss:$8 sps:$4 sm:$0xff]  }
 0x44b   :  { %v4339_v9 = vsel %vm3643_vm4, %v12601_v13, %v3991_v54  ;;  %vm3649_vm6 = vcmp.ge.f32.partialorder %v12603_v35, 0.0  ;;  %v3997_v19 = vmul.f32 0.01, %v12603_v35  ;;  %v18834_v54 = vld [vmem:[#allocation38_spill] sm:$0xff] }
 0x44c   :  { %v4707_v29 = vadd.f32 %v18831_v16, %v4339_v9  ;;  %v4340_v21 = vsel %vm3644_vm5, %v12602_v0, %v3992_v41  ;;  %vm3650_vm7 = vcmp.ge.f32.partialorder %v12604_v46, 0.0  ;;  %v3998_v50 = vmul.f32 0.01, %v12604_v46  ;;  %7233 = vmatprep.mubr.bf16.mxu1 %v16894_v62 }
 0x44d   :  { %v4345_v18 = vsel %vm3649_vm6, %v12603_v35, %v3997_v19  ;;  %7234 = vmatmul.mubr.bf16.gmra.mrb[168].mxu1 %v16884_v60 }
 0x44e   :  { %v4765_v47 = vadd.f32 %v4707_v29, %v4340_v21  ;;  %v4708_v38 = vadd.f32 %v18832_v11, %v4345_v18  ;;  %v4346_v25 = vsel %vm3650_vm7, %v12604_v46, %v3998_v50  ;;  %v3330_v24 = vpop.f32.mrb[180].mxu0  ;;  %7276 = vmatprep.mubr.bf16.mxu1 %v16713_v17  ;;  %v13983_v46 = vld [vmem:[%s18739_s3 + $0x210] ss:$8 sps:$4 sm:$0xff]  }
 0x44f   :  { %v12605_v20 = vadd.f32 %v3330_v24, %v16645_v37  ;;  %v3332_v51 = vpop.f32.mrb[181].mxu0  ;;  %v13986_v24 = vld [vmem:[%s18739_s3 + $0x220] ss:$8 sps:$4 sm:$0xff]  }
 0x450   :  { %v4766_v1 = vadd.f32 %v4708_v38, %v4346_v25  ;;  %v12606_v26 = vadd.f32 %v3332_v51, %v16647_v28  ;;  %v3334_v31 = vpop.f32.mrb[182].mxu0 }
 0x451   :  { %vm3655_vm8 = vcmp.ge.f32.partialorder %v12605_v20, 0.0  ;;  %v4003_v43 = vmul.f32 0.01, %v12605_v20  ;;  %v12607_v2 = vadd.f32 %v3334_v31, %v16645_v37  ;;  %v3336_v49 = vpop.f32.mrb[183].mxu0 }
 0x452   :  { %v16905_v52 = vpack.c.bf16 %v4766_v1, %v4765_v47  ;;  %vm3656_vm9 = vcmp.ge.f32.partialorder %v12606_v26, 0.0  ;;  %v4004_v48 = vmul.f32 0.01, %v12606_v26  ;;  %v12608_v45 = vadd.f32 %v3336_v49, %v16647_v28  ;;  %v13991_v1 = vld [vmem:[%s18739_s3 + $0x234] ss:$8 sps:$4 sm:$0xff]  }
 0x453   :  { %v4351_v27 = vsel %vm3655_vm8, %v12605_v20, %v4003_v43  ;;  %vm3661_vm10 = vcmp.ge.f32.partialorder %v12607_v2, 0.0  ;;  %v4009_v61 = vmul.f32 0.01, %v12607_v2 }
 0x454   :  { %v4709_v13 = vadd.f32 %v18833_v36, %v4351_v27  ;;  %v4352_v23 = vsel %vm3656_vm9, %v12606_v26, %v4004_v48  ;;  %vm3662_vm11 = vcmp.ge.f32.partialorder %v12608_v45, 0.0  ;;  %v4010_v57 = vmul.f32 0.01, %v12608_v45  ;;  %v18835_v26 = vld [vmem:[#allocation39_spill] sm:$0xff] }
 0x455   :  { %v4357_v0 = vsel %vm3661_vm10, %v12607_v2, %v4009_v61  ;;  %7277 = vmatmul.mubr.bf16.vlgmr.msra.gmra.mrb[116].mxu1 %v16692_v55  ;;  %v13988_v55 = vld [vmem:[%s18739_s3 + $0x224] ss:$8 sps:$4 sm:$0xff]  }
 0x456   :  { %v4767_v33 = vadd.f32 %v4709_v13, %v4352_v23  ;;  %v4710_v35 = vadd.f32 %v18834_v54, %v4357_v0  ;;  %v4358_v10 = vsel %vm3662_vm11, %v12608_v45, %v4010_v57  ;;  %v3340_v41 = vpop.f32.mrb[184].mxu0  ;;  %7286 = vmatprep.mubr.bf16.mxu1 %v16734_v30  ;;  %7418 = vmatpush1.bf16.msra.mxu1 %v13980_v12  ;;  %v18836_v45 = vld [vmem:[#allocation40_spill] sm:$0xff] }
 0x457   :  { %v12609_v9 = vadd.f32 %v3340_v41, %v16645_v37  ;;  %v3342_v19 = vpop.f32.mrb[185].mxu0  ;;  %7419 = vmatprep.subr.bf16.mxu1 %v13985_v42  ;;  %v13989_v42 = vld [vmem:[%s18739_s3 + $0x230] ss:$8 sps:$4 sm:$0xff]  }
 0x458   :  { %v4768_v16 = vadd.f32 %v4710_v35, %v4358_v10  ;;  %v12610_v29 = vadd.f32 %v3342_v19, %v16647_v28  ;;  %v3344_v21 = vpop.f32.mrb[186].mxu0 }
 0x459   :  { %vm3667_vm12 = vcmp.ge.f32.partialorder %v12609_v9, 0.0  ;;  %v4015_v50 = vmul.f32 0.01, %v12609_v9  ;;  %v12611_v18 = vadd.f32 %v3344_v21, %v16645_v37  ;;  %v3346_v47 = vpop.f32.mrb[187].mxu0 }
 0x45a   :  { %v16927_v11 = vpack.c.bf16 %v4768_v16, %v4767_v33  ;;  %vm3668_vm13 = vcmp.ge.f32.partialorder %v12610_v29, 0.0  ;;  %v4016_v38 = vmul.f32 0.01, %v12610_v29  ;;  %v12612_v25 = vadd.f32 %v3346_v47, %v16647_v28  ;;  %7420 = vmatpush1.bf16.msra.mxu1 %v13983_v46  ;;  %v13997_v16 = vld [vmem:[%s18739_s3 + $0x254] ss:$8 sps:$4 sm:$0xff]  }
 0x45b   :  { %v4363_v20 = vsel %vm3667_vm12, %v12609_v9, %v4015_v50  ;;  %vm3673_vm14 = vcmp.ge.f32.partialorder %v12611_v18, 0.0  ;;  %v4021_v51 = vmul.f32 0.01, %v12611_v18  ;;  %7421 = vmatprep.subr.bf16.mxu1 %v13988_v55  ;;  %v13992_v9 = vld [vmem:[%s18739_s3 + $0x240] ss:$8 sps:$4 sm:$0xff]  }
 0x45c   :  { %v4711_v31 = vadd.f32 %v18835_v26, %v4363_v20  ;;  %v4364_v43 = vsel %vm3668_vm13, %v12610_v29, %v4016_v38  ;;  %vm3674_vm15 = vcmp.ge.f32.partialorder %v12612_v25, 0.0  ;;  %v4022_v2 = vmul.f32 0.01, %v12612_v25  ;;  %v18837_v29 = vld [vmem:[#allocation41_spill] sm:$0xff] }
 0x45d   :  { %v4369_v49 = vsel %vm3673_vm14, %v12611_v18, %v4021_v51  ;;  %7287 = vmatmul.mubr.bf16.gmra.mrb[120].mxu1 %v16713_v17  ;;  %v13994_v17 = vld [vmem:[%s18739_s3 + $0x244] ss:$8 sps:$4 sm:$0xff]  }
 0x45e   :  { %v4769_v48 = vadd.f32 %v4711_v31, %v4364_v43  ;;  %v4712_v12 = vadd.f32 %v18836_v45, %v4369_v49  ;;  %v4370_v27 = vsel %vm3674_vm15, %v12612_v25, %v4022_v2  ;;  %v3350_v61 = vpop.f32.mrb[188].mxu0  ;;  %7296 = vmatprep.mubr.bf16.mxu1 %v16756_v7  ;;  %7422 = vmatpush1.bf16.msra.mxu1 %v13986_v24  ;;  %v18838_v25 = vld [vmem:[#allocation42_spill] sm:$0xff] }
 0x45f   :  { %v12613_v36 = vadd.f32 %v3350_v61, %v16645_v37  ;;  %v3352_v13 = vpop.f32.mrb[189].mxu0  ;;  %7423 = vmatprep.subr.bf16.mxu1 %v13991_v1  ;;  %v13995_v1 = vld [vmem:[%s18739_s3 + $0x250] ss:$8 sps:$4 sm:$0xff]   ;;  %v14000_v43 = vld [vmem:[%s18739_s3 + $0x264] ss:$8 sps:$4 sm:$0xff]  }
 0x460   :  { %v4770_v23 = vadd.f32 %v4712_v12, %v4370_v27  ;;  %v12614_v57 = vadd.f32 %v3352_v13, %v16647_v28  ;;  %v3354_v0 = vpop.f32.mrb[190].mxu0  ;;  %v13998_v13 = vld [vmem:[%s18739_s3 + $0x260] ss:$8 sps:$4 sm:$0xff]  }
 0x461   :  { %vm3679_vm0 = vcmp.ge.f32.partialorder %v12613_v36, 0.0  ;;  %v4027_v33 = vmul.f32 0.01, %v12613_v36  ;;  %v12615_v54 = vadd.f32 %v3354_v0, %v16645_v37  ;;  %v3356_v35 = vpop.f32.mrb[191].mxu0  ;;  %v18839_v0 = vld [vmem:[#allocation43_spill] sm:$0xff] }
 0x462   :  { %v16949_v10 = vpack.c.bf16 %v4770_v23, %v4769_v48  ;;  %vm3680_vm1 = vcmp.ge.f32.partialorder %v12614_v57, 0.0  ;;  %v4028_v41 = vmul.f32 0.01, %v12614_v57  ;;  %v12616_v46 = vadd.f32 %v3356_v35, %v16647_v28  ;;  %7424 = vmatpush1.bf16.msra.mxu1 %v13989_v42 }
 0x463   :  { %v4375_v19 = vsel %vm3679_vm0, %v12613_v36, %v4027_v33  ;;  %vm3685_vm2 = vcmp.ge.f32.partialorder %v12615_v54, 0.0  ;;  %v4033_v55 = vmul.f32 0.01, %v12615_v54  ;;  %7425 = vmatprep.subr.bf16.mxu1 %v13994_v17 }
 0x464   :  { %v4713_v21 = vadd.f32 %v18837_v29, %v4375_v19  ;;  %v4376_v50 = vsel %vm3680_vm1, %v12614_v57, %v4028_v41  ;;  %vm3686_vm3 = vcmp.ge.f32.partialorder %v12616_v46, 0.0  ;;  %v4034_v18 = vmul.f32 0.01, %v12616_v46  ;;  %v14003_v57 = vld [vmem:[%s18739_s3 + $0x274] ss:$8 sps:$4 sm:$0xff]  }
 0x465   :  { %v4381_v47 = vsel %vm3685_vm2, %v12615_v54, %v4033_v55  ;;  %7297 = vmatmul.mubr.bf16.gmra.mrb[124].mxu1 %v16734_v30  ;;  %v14001_v29 = vld [vmem:[%s18739_s3 + $0x270] ss:$8 sps:$4 sm:$0xff]  }
 0x466   :  { %v4771_v38 = vadd.f32 %v4713_v21, %v4376_v50  ;;  %v4714_v24 = vadd.f32 %v18838_v25, %v4381_v47  ;;  %v4382_v20 = vsel %vm3686_vm3, %v12616_v46, %v4034_v18  ;;  %v3360_v51 = vpop.f32.mrb[192].mxu0  ;;  %7306 = vmatprep.mubr.bf16.mxu1 %v16778_v8  ;;  %7426 = vmatpush1.bf16.msra.mxu1 %v13992_v9  ;;  %v18840_v9 = vld [vmem:[#allocation44_spill] sm:$0xff]  ;;  %v14006_v18 = vld [vmem:[%s18739_s3 + $0x284] ss:$8 sps:$4 sm:$0xff]  }
 0x467   :  { %v12617_v26 = vadd.f32 %v3360_v51, %v16645_v37  ;;  %v3362_v31 = vpop.f32.mrb[193].mxu0  ;;  %7427 = vmatprep.subr.bf16.mxu1 %v13997_v16 }
 0x468   :  { %v4772_v2 = vadd.f32 %v4714_v24, %v4382_v20  ;;  %v12618_v49 = vadd.f32 %v3362_v31, %v16647_v28  ;;  %v3364_v48 = vpop.f32.mrb[194].mxu0 }
 0x469   :  { %vm3691_vm4 = vcmp.ge.f32.partialorder %v12617_v26, 0.0  ;;  %v4039_v45 = vmul.f32 0.01, %v12617_v26  ;;  %v12619_v12 = vadd.f32 %v3364_v48, %v16645_v37  ;;  %v3366_v27 = vpop.f32.mrb[195].mxu0  ;;  %v14009_v48 = vld [vmem:[%s18739_s3 + $0x294] ss:$8 sps:$4 sm:$0xff]  }
 0x46a   :  { %v16971_v61 = vpack.c.bf16 %v4772_v2, %v4771_v38  ;;  %vm3692_vm5 = vcmp.ge.f32.partialorder %v12618_v49, 0.0  ;;  %v4040_v42 = vmul.f32 0.01, %v12618_v49  ;;  %v12620_v36 = vadd.f32 %v3366_v27, %v16647_v28  ;;  %7428 = vmatpush1.bf16.msra.mxu1 %v13995_v1 }
 0x46b   :  { %v4387_v17 = vsel %vm3691_vm4, %v12617_v26, %v4039_v45  ;;  %vm3697_vm6 = vcmp.ge.f32.partialorder %v12619_v12, 0.0  ;;  %v4045_v23 = vmul.f32 0.01, %v12619_v12  ;;  %7429 = vmatprep.subr.bf16.mxu1 %v14000_v43  ;;  %v14004_v43 = vld [vmem:[%s18739_s3 + $0x280] ss:$8 sps:$4 sm:$0xff]   ;;  %v18841_v45 = vld [vmem:[#allocation45_spill] sm:$0xff] }
 0x46c   :  { %v4715_v33 = vadd.f32 %v18839_v0, %v4387_v17  ;;  %v4388_v54 = vsel %vm3692_vm5, %v12618_v49, %v4040_v42  ;;  %vm3698_vm7 = vcmp.ge.f32.partialorder %v12620_v36, 0.0  ;;  %v4046_v35 = vmul.f32 0.01, %v12620_v36  ;;  %v18842_v17 = vld [vmem:[#allocation46_spill] sm:$0xff] }
 0x46d   :  { %v4393_v41 = vsel %vm3697_vm6, %v12619_v12, %v4045_v23  ;;  %7307 = vmatmul.mubr.bf16.gmra.mrb[128].mxu1 %v16756_v7 }
 0x46e   :  { %v4773_v46 = vadd.f32 %v4715_v33, %v4388_v54  ;;  %v4716_v19 = vadd.f32 %v18840_v9, %v4393_v41  ;;  %v4394_v55 = vsel %vm3698_vm7, %v12620_v36, %v4046_v35  ;;  %v3370_v16 = vpop.f32.mrb[196].mxu0  ;;  %7316 = vmatprep.mubr.bf16.mxu1 %v16800_v6  ;;  %7430 = vmatpush1.bf16.msra.mxu1 %v13998_v13  ;;  %v14007_v33 = vld [vmem:[%s18739_s3 + $0x290] ss:$8 sps:$4 sm:$0xff]   ;;  %v14012_v41 = vld [vmem:[%s18739_s3 + $0x2a4] ss:$8 sps:$4 sm:$0xff]  }
 0x46f   :  { %v12621_v21 = vadd.f32 %v3370_v16, %v16645_v37  ;;  %v3372_v50 = vpop.f32.mrb[197].mxu0  ;;  %7431 = vmatprep.subr.bf16.mxu1 %v14003_v57 }
 0x470   :  { %v4774_v47 = vadd.f32 %v4716_v19, %v4394_v55  ;;  %v12622_v38 = vadd.f32 %v3372_v50, %v16647_v28  ;;  %v3374_v25 = vpop.f32.mrb[198].mxu0 }
 0x471   :  { %vm3703_vm8 = vcmp.ge.f32.partialorder %v12621_v21, 0.0  ;;  %v4051_v24 = vmul.f32 0.01, %v12621_v21  ;;  %v12623_v20 = vadd.f32 %v3374_v25, %v16645_v37  ;;  %v3376_v51 = vpop.f32.mrb[199].mxu0 }
 0x472   :  { %v16993_v1 = vpack.c.bf16 %v4774_v47, %v4773_v46  ;;  %vm3704_vm9 = vcmp.ge.f32.partialorder %v12622_v38, 0.0  ;;  %v4052_v26 = vmul.f32 0.01, %v12622_v38  ;;  %v12624_v31 = vadd.f32 %v3376_v51, %v16647_v28  ;;  %7432 = vmatpush1.bf16.msra.mxu1 %v14001_v29  ;;  %v14010_v47 = vld [vmem:[%s18739_s3 + $0x2a0] ss:$8 sps:$4 sm:$0xff]  }
 0x473   :  { %v4399_v2 = vsel %vm3703_vm8, %v12621_v21, %v4051_v24  ;;  %vm3709_vm10 = vcmp.ge.f32.partialorder %v12623_v20, 0.0  ;;  %v4057_v49 = vmul.f32 0.01, %v12623_v20  ;;  %7433 = vmatprep.subr.bf16.mxu1 %v14006_v18  ;;  %v14015_v24 = vld [vmem:[%s18739_s3 + $0x2b4] ss:$8 sps:$4 sm:$0xff]  }
 0x474   :  { %v4717_v12 = vadd.f32 %v18841_v45, %v4399_v2  ;;  %v4400_v27 = vsel %vm3704_vm9, %v12622_v38, %v4052_v26  ;;  %vm3710_vm11 = vcmp.ge.f32.partialorder %v12624_v31, 0.0  ;;  %v4058_v42 = vmul.f32 0.01, %v12624_v31 }
 0x475   :  { %v4405_v36 = vsel %vm3709_vm10, %v12623_v20, %v4057_v49  ;;  %7317 = vmatmul.mubr.bf16.gmra.mrb[132].mxu1 %v16778_v8  ;;  %v18843_v20 = vld [vmem:[#allocation47_spill] sm:$0xff]  ;;  %v18844_v49 = vld [vmem:[#allocation48_spill] sm:$0xff] }
 0x476   :  { %v4775_v13 = vadd.f32 %v4717_v12, %v4400_v27  ;;  %v4718_v23 = vadd.f32 %v18842_v17, %v4405_v36  ;;  %v4406_v57 = vsel %vm3710_vm11, %v12624_v31, %v4058_v42  ;;  %v3380_v0 = vpop.f32.mrb[200].mxu0  ;;  %7326 = vmatprep.mubr.bf16.mxu1 %v16822_v56  ;;  %7434 = vmatpush1.bf16.msra.mxu1 %v14004_v43  ;;  %v14013_v27 = vld [vmem:[%s18739_s3 + $0x2b0] ss:$8 sps:$4 sm:$0xff]  }
 0x477   :  { %v12625_v54 = vadd.f32 %v3380_v0, %v16645_v37  ;;  %v3382_v35 = vpop.f32.mrb[201].mxu0  ;;  %7435 = vmatprep.subr.bf16.mxu1 %v14009_v48 }
 0x478   :  { %v4776_v46 = vadd.f32 %v4718_v23, %v4406_v57  ;;  %v12626_v9 = vadd.f32 %v3382_v35, %v16647_v28  ;;  %v3384_v19 = vpop.f32.mrb[202].mxu0 }
 0x479   :  { %vm3715_vm12 = vcmp.ge.f32.partialorder %v12625_v54, 0.0  ;;  %v4063_v55 = vmul.f32 0.01, %v12625_v54  ;;  %v12627_v16 = vadd.f32 %v3384_v19, %v16645_v37  ;;  %v3386_v29 = vpop.f32.mrb[203].mxu0 }
 0x47a   :  { %v17015_v21 = vpack.c.bf16 %v4776_v46, %v4775_v13  ;;  %vm3716_vm13 = vcmp.ge.f32.partialorder %v12626_v9, 0.0  ;;  %v4064_v50 = vmul.f32 0.01, %v12626_v9  ;;  %v12628_v18 = vadd.f32 %v3386_v29, %v16647_v28  ;;  %7436 = vmatpush1.bf16.msra.mxu1 %v14007_v33  ;;  %v14018_v13 = vld [vmem:[%s18739_s3 + $0x2c4] ss:$8 sps:$4 sm:$0xff]   ;;  %v18845_v29 = vld [vmem:[#allocation49_spill] sm:$0xff] }
 0x47b   :  { %v4411_v38 = vsel %vm3715_vm12, %v12625_v54, %v4063_v55  ;;  %vm3721_vm14 = vcmp.ge.f32.partialorder %v12627_v16, 0.0  ;;  %v4069_v25 = vmul.f32 0.01, %v12627_v16  ;;  %7437 = vmatprep.subr.bf16.mxu1 %v14012_v41 }
 0x47c   :  { %v4719_v51 = vadd.f32 %v18843_v20, %v4411_v38  ;;  %v4412_v26 = vsel %vm3716_vm13, %v12626_v9, %v4064_v50  ;;  %vm3722_vm15 = vcmp.ge.f32.partialorder %v12628_v18, 0.0  ;;  %v4070_v31 = vmul.f32 0.01, %v12628_v18  ;;  %v14016_v9 = vld [vmem:[%s18739_s3 + $0x2c0] ss:$8 sps:$4 sm:$0xff]  }
 0x47d   :  { %v4417_v43 = vsel %vm3721_vm14, %v12627_v16, %v4069_v25  ;;  %7327 = vmatmul.mubr.bf16.gmra.mrb[136].mxu1 %v16800_v6  ;;  %v14021_v16 = vld [vmem:[%s18739_s3 + $0x2d4] ss:$8 sps:$4 sm:$0xff]  }
 0x47e   :  { %v4777_v2 = vadd.f32 %v4719_v51, %v4412_v26  ;;  %v4720_v48 = vadd.f32 %v18844_v49, %v4417_v43  ;;  %v4418_v45 = vsel %vm3722_vm15, %v12628_v18, %v4070_v31  ;;  %v3390_v12 = vpop.f32.mrb[204].mxu0  ;;  %7336 = vmatprep.mubr.bf16.mxu1 %v16844_v15  ;;  %7438 = vmatpush1.bf16.msra.mxu1 %v14010_v47  ;;  %v14019_v31 = vld [vmem:[%s18739_s3 + $0x2d0] ss:$8 sps:$4 sm:$0xff]   ;;  %v14024_v49 = vld [vmem:[%s18739_s3 + $0x2e4] ss:$8 sps:$4 sm:$0xff]  }
 0x47f   :  { %v12629_v42 = vadd.f32 %v3390_v12, %v16645_v37  ;;  %v3392_v36 = vpop.f32.mrb[205].mxu0  ;;  %7439 = vmatprep.subr.bf16.mxu1 %v14015_v24  ;;  %v18846_v24 = vld [vmem:[#allocation50_spill] sm:$0xff] }
 0x480   :  { %v4778_v17 = vadd.f32 %v4720_v48, %v4418_v45  ;;  %v12630_v23 = vadd.f32 %v3392_v36, %v16647_v28  ;;  %v3394_v57 = vpop.f32.mrb[206].mxu0 }
 0x481   :  { %vm3727_vm0 = vcmp.ge.f32.partialorder %v12629_v42, 0.0  ;;  %v4075_v0 = vmul.f32 0.01, %v12629_v42  ;;  %v12631_v33 = vadd.f32 %v3394_v57, %v16645_v37  ;;  %v3396_v54 = vpop.f32.mrb[207].mxu0  ;;  %v14022_v57 = vld [vmem:[%s18739_s3 + $0x2e0] ss:$8 sps:$4 sm:$0xff]  }
 0x482   :  { %v17037_v35 = vpack.c.bf16 %v4778_v17, %v4777_v2  ;;  %vm3728_vm1 = vcmp.ge.f32.partialorder %v12630_v23, 0.0  ;;  %v4076_v41 = vmul.f32 0.01, %v12630_v23  ;;  %v12632_v46 = vadd.f32 %v3396_v54, %v16647_v28  ;;  %7440 = vmatpush1.bf16.msra.mxu1 %v14013_v27  ;;  %v14027_v54 = vld [vmem:[%s18739_s3 + $0x2f4] ss:$8 sps:$4 sm:$0xff]  }
 0x483   :  { %v4423_v19 = vsel %vm3727_vm0, %v12629_v42, %v4075_v0  ;;  %vm3733_vm2 = vcmp.ge.f32.partialorder %v12631_v33, 0.0  ;;  %v4081_v55 = vmul.f32 0.01, %v12631_v33  ;;  %7441 = vmatprep.subr.bf16.mxu1 %v14018_v13 }
 0x484   :  { %v4721_v50 = vadd.f32 %v18845_v29, %v4423_v19  ;;  %v4424_v18 = vsel %vm3728_vm1, %v12630_v23, %v4076_v41  ;;  %vm3734_vm3 = vcmp.ge.f32.partialorder %v12632_v46, 0.0  ;;  %v4082_v47 = vmul.f32 0.01, %v12632_v46  ;;  %v18847_v41 = vld [vmem:[#allocation51_spill] sm:$0xff]  ;;  %v18848_v29 = vld [vmem:[#allocation52_spill] sm:$0xff] }
 0x485   :  { %v4429_v38 = vsel %vm3733_vm2, %v12631_v33, %v4081_v55  ;;  %7337 = vmatmul.mubr.bf16.gmra.mrb[140].mxu1 %v16822_v56 }
 0x486   :  { %v4779_v25 = vadd.f32 %v4721_v50, %v4424_v18  ;;  %v4722_v20 = vadd.f32 %v18846_v24, %v4429_v38  ;;  %v4430_v51 = vsel %vm3734_vm3, %v12632_v46, %v4082_v47  ;;  %v3400_v26 = vpop.f32.mrb[208].mxu0  ;;  %7346 = vmatprep.mubr.bf16.mxu1 %v16854_v22  ;;  %7442 = vmatpush1.bf16.msra.mxu1 %v14016_v9  ;;  %v14025_v38 = vld [vmem:[%s18739_s3 + $0x2f0] ss:$8 sps:$4 sm:$0xff]  }
 0x487   :  { %v12633_v43 = vadd.f32 %v3400_v26, %v16645_v37  ;;  %v3402_v2 = vpop.f32.mrb[209].mxu0  ;;  %7443 = vmatprep.subr.bf16.mxu1 %v14021_v16 }
 0x488   :  { %v4780_v48 = vadd.f32 %v4722_v20, %v4430_v51  ;;  %v12634_v45 = vadd.f32 %v3402_v2, %v16647_v28  ;;  %v3404_v12 = vpop.f32.mrb[210].mxu0  ;;  %v14030_v20 = vld [vmem:[%s18739_s3 + $0x304] ss:$8 sps:$4 sm:$0xff]  }
 0x489   :  { %vm3739_vm4 = vcmp.ge.f32.partialorder %v12633_v43, 0.0  ;;  %v4087_v27 = vmul.f32 0.01, %v12633_v43  ;;  %v12635_v42 = vadd.f32 %v3404_v12, %v16645_v37  ;;  %v3406_v36 = vpop.f32.mrb[211].mxu0 }
 0x48a   :  { %v17059_v13 = vpack.c.bf16 %v4780_v48, %v4779_v25  ;;  %vm3740_vm5 = vcmp.ge.f32.partialorder %v12634_v45, 0.0  ;;  %v4088_v17 = vmul.f32 0.01, %v12634_v45  ;;  %v12636_v23 = vadd.f32 %v3406_v36, %v16647_v28  ;;  %7444 = vmatpush1.bf16.msra.mxu1 %v14019_v31 }
 0x48b   :  { %v4435_v0 = vsel %vm3739_vm4, %v12633_v43, %v4087_v27  ;;  %vm3745_vm6 = vcmp.ge.f32.partialorder %v12635_v42, 0.0  ;;  %v4093_v33 = vmul.f32 0.01, %v12635_v42  ;;  %7445 = vmatprep.subr.bf16.mxu1 %v14024_v49 }
 0x48c   :  { %v4723_v46 = vadd.f32 %v18847_v41, %v4435_v0  ;;  %v4436_v9 = vsel %vm3740_vm5, %v12634_v45, %v4088_v17  ;;  %vm3746_vm7 = vcmp.ge.f32.partialorder %v12636_v23, 0.0  ;;  %v4094_v19 = vmul.f32 0.01, %v12636_v23 }
 0x48d   :  { %v4441_v55 = vsel %vm3745_vm6, %v12635_v42, %v4093_v33  ;;  %7347 = vmatmul.mubr.bf16.gmra.mrb[144].mxu1 %v16844_v15 }
 0x48e   :  { %v4781_v16 = vadd.f32 %v4723_v46, %v4436_v9  ;;  %v4724_v50 = vadd.f32 %v18848_v29, %v4441_v55  ;;  %v4442_v18 = vsel %vm3746_vm7, %v12636_v23, %v4094_v19  ;;  %v3410_v47 = vpop.f32.mrb[212].mxu0  ;;  %7356 = vmatprep.mubr.bf16.mxu1 %v16864_v14  ;;  %7446 = vmatpush1.bf16.msra.mxu1 %v14022_v57 }
 0x48f   :  { %v12637_v25 = vadd.f32 %v3410_v47, %v16645_v37  ;;  %v3412_v24 = vpop.f32.mrb[213].mxu0  ;;  %7447 = vmatprep.subr.bf16.mxu1 %v14027_v54 }
 0x490   :  { %v4782_v51 = vadd.f32 %v4724_v50, %v4442_v18  ;;  %v12638_v26 = vadd.f32 %v3412_v24, %v16647_v28  ;;  %v3414_v31 = vpop.f32.mrb[214].mxu0 }
 0x491   :  { %vm3751_vm8 = vcmp.ge.f32.partialorder %v12637_v25, 0.0  ;;  %v4099_v43 = vmul.f32 0.01, %v12637_v25  ;;  %v12639_v2 = vadd.f32 %v3414_v31, %v16645_v37  ;;  %v3416_v49 = vpop.f32.mrb[215].mxu0 }
 0x492   :  { %v17081_v48 = vpack.c.bf16 %v4782_v51, %v4781_v16  ;;  %vm3752_vm9 = vcmp.ge.f32.partialorder %v12638_v26, 0.0  ;;  %v4100_v45 = vmul.f32 0.01, %v12638_v26  ;;  %v12640_v12 = vadd.f32 %v3416_v49, %v16647_v28  ;;  %7448 = vmatpush1.bf16.msra.mxu1 %v14025_v38 }
 0x493   :  { %v4447_v27 = vsel %vm3751_vm8, %v12637_v25, %v4099_v43  ;;  %vm3757_vm10 = vcmp.ge.f32.partialorder %v12639_v2, 0.0  ;;  %v4105_v42 = vmul.f32 0.01, %v12639_v2  ;;  %7590 = vmatprep.subr.bf16.mxu1 %v14030_v20 }
 0x494   :  { %v4725_v36 = vadd.f32 %v16406_v39, %v4447_v27  ;;  %v4448_v17 = vsel %vm3752_vm9, %v12638_v26, %v4100_v45  ;;  %vm3758_vm11 = vcmp.ge.f32.partialorder %v12640_v12, 0.0  ;;  %v4106_v23 = vmul.f32 0.01, %v12640_v12 }
 0x495   :  { %v4453_v57 = vsel %vm3757_vm10, %v12639_v2, %v4105_v42  ;;  %7357 = vmatmul.mubr.bf16.gmra.mrb[148].mxu1 %v16854_v22 }
 0x496   :  { %v4783_v0 = vadd.f32 %v4725_v36, %v4448_v17  ;;  %v4726_v33 = vadd.f32 %v16408_v5, %v4453_v57  ;;  %v4454_v54 = vsel %vm3758_vm11, %v12640_v12, %v4106_v23  ;;  %v3420_v41 = vpop.f32.mrb[216].mxu0  ;;  %7366 = vmatprep.mubr.bf16.mxu1 %v16874_v3 }
 0x497   :  { %v12641_v46 = vadd.f32 %v3420_v41, %v16645_v37  ;;  %v3422_v9 = vpop.f32.mrb[217].mxu0 }
 0x498   :  { %v4784_v19 = vadd.f32 %v4726_v33, %v4454_v54  ;;  %v12642_v55 = vadd.f32 %v3422_v9, %v16647_v28  ;;  %v3424_v39 = vpop.f32.mrb[218].mxu0 }
 0x499   :  { %vm3763_vm12 = vcmp.ge.f32.partialorder %v12641_v46, 0.0  ;;  %v4111_v16 = vmul.f32 0.01, %v12641_v46  ;;  %v12643_v29 = vadd.f32 %v3424_v39, %v16645_v37  ;;  %v3426_v50 = vpop.f32.mrb[219].mxu0 }
 0x49a   :  { %v17091_v18 = vpack.c.bf16 %v4784_v19, %v4783_v0  ;;  %vm3764_vm13 = vcmp.ge.f32.partialorder %v12642_v55, 0.0  ;;  %v4112_v5 = vmul.f32 0.01, %v12642_v55  ;;  %v12644_v47 = vadd.f32 %v3426_v50, %v16647_v28 }
 0x49b   :  { %v4459_v38 = vsel %vm3763_vm12, %v12641_v46, %v4111_v16  ;;  %vm3769_vm14 = vcmp.ge.f32.partialorder %v12643_v29, 0.0  ;;  %v4117_v25 = vmul.f32 0.01, %v12643_v29 }
 0x49c   :  { %v4727_v24 = vadd.f32 %v16428_v40, %v4459_v38  ;;  %v4460_v20 = vsel %vm3764_vm13, %v12642_v55, %v4112_v5  ;;  %vm3770_vm15 = vcmp.ge.f32.partialorder %v12644_v47, 0.0  ;;  %v4118_v51 = vmul.f32 0.01, %v12644_v47 }
 0x49d   :  { %v4465_v26 = vsel %vm3769_vm14, %v12643_v29, %v4117_v25  ;;  %7367 = vmatmul.mubr.bf16.gmra.mrb[152].mxu1 %v16864_v14 }
 0x49e   :  { %v4785_v31 = vadd.f32 %v4727_v24, %v4460_v20  ;;  %v4728_v43 = vadd.f32 %v16432_v53, %v4465_v26  ;;  %v4466_v2 = vsel %vm3770_vm15, %v12644_v47, %v4118_v51  ;;  %v3430_v49 = vpop.f32.mrb[220].mxu0  ;;  %7376 = vmatprep.mubr.bf16.mxu1 %v16884_v60 }
 0x49f   :  { %v12645_v45 = vadd.f32 %v3430_v49, %v16645_v37  ;;  %v3432_v12 = vpop.f32.mrb[221].mxu0 }
 0x4a0   :  { %v4786_v27 = vadd.f32 %v4728_v43, %v4466_v2  ;;  %v12646_v42 = vadd.f32 %v3432_v12, %v16647_v28  ;;  %v3434_v40 = vpop.f32.mrb[222].mxu0 }
 0x4a1   :  { %vm3775_vm0 = vcmp.ge.f32.partialorder %v12645_v45, 0.0  ;;  %v4123_v36 = vmul.f32 0.01, %v12645_v45  ;;  %v12647_v17 = vadd.f32 %v3434_v40, %v16645_v37  ;;  %v3436_v23 = vpop.f32.mrb[223].mxu0 }
 0x4a2   :  { %vm3776_vm1 = vcmp.ge.f32.partialorder %v12646_v42, 0.0  ;;  %v4124_v57 = vmul.f32 0.01, %v12646_v42  ;;  %v12648_v53 = vadd.f32 %v3436_v23, %v16647_v28  ;;  %v17102_v0 = vpack.c.bf16 %v4786_v27, %v4785_v31 }
 0x4a3   :  { %v4471_v33 = vsel %vm3775_vm0, %v12645_v45, %v4123_v36  ;;  %vm3781_vm2 = vcmp.ge.f32.partialorder %v12647_v17, 0.0  ;;  %v4129_v54 = vmul.f32 0.01, %v12647_v17 }
 0x4a4   :  { %v4729_v41 = vadd.f32 %v16458_v34, %v4471_v33  ;;  %v4472_v46 = vsel %vm3776_vm1, %v12646_v42, %v4124_v57  ;;  %vm3782_vm3 = vcmp.ge.f32.partialorder %v12648_v53, 0.0  ;;  %v4130_v9 = vmul.f32 0.01, %v12648_v53 }
 0x4a5   :  { %v4477_v19 = vsel %vm3781_vm2, %v12647_v17, %v4129_v54  ;;  %7377 = vmatmul.mubr.bf16.gmra.mrb[156].mxu1 %v16874_v3 }
 0x4a6   :  { %v4730_v55 = vadd.f32 %v16469_v4, %v4477_v19  ;;  %v4478_v39 = vsel %vm3782_vm3, %v12648_v53, %v4130_v9  ;;  %v3440_v16 = vpop.f32.mrb[224].mxu0  ;;  %7386 = vmatprep.mubr.bf16.mxu1 %v16894_v62  ;;  %v4787_v29 = vadd.f32 %v4729_v41, %v4472_v46 }
 0x4a7   :  { %v12649_v50 = vadd.f32 %v3440_v16, %v16645_v37  ;;  %v3442_v5 = vpop.f32.mrb[225].mxu0 }
 0x4a8   :  { %v12650_v47 = vadd.f32 %v3442_v5, %v16647_v28  ;;  %v3444_v38 = vpop.f32.mrb[226].mxu0  ;;  %v4788_v34 = vadd.f32 %v4730_v55, %v4478_v39 }
 0x4a9   :  { %vm3787_vm4 = vcmp.ge.f32.partialorder %v12649_v50, 0.0  ;;  %v4135_v25 = vmul.f32 0.01, %v12649_v50  ;;  %v12651_v24 = vadd.f32 %v3444_v38, %v16645_v37  ;;  %v3446_v20 = vpop.f32.mrb[227].mxu0 }
 0x4aa   :  { %vm3788_vm5 = vcmp.ge.f32.partialorder %v12650_v47, 0.0  ;;  %v4136_v51 = vmul.f32 0.01, %v12650_v47  ;;  %v12652_v4 = vadd.f32 %v3446_v20, %v16647_v28  ;;  %v17112_v26 = vpack.c.bf16 %v4788_v34, %v4787_v29  ;;  %v14031_v34 = vld [vmem:[%s18739_s3 + $0x310] ss:$8 sps:$4 sm:$0xff]  }
 0x4ab   :  { %v4483_v31 = vsel %vm3787_vm4, %v12649_v50, %v4135_v25  ;;  %vm3793_vm6 = vcmp.ge.f32.partialorder %v12651_v24, 0.0  ;;  %v4141_v43 = vmul.f32 0.01, %v12651_v24  ;;  %v14036_v25 = vld [vmem:[%s18739_s3 + $0x324] ss:$8 sps:$4 sm:$0xff]  }
 0x4ac   :  { %v4731_v2 = vadd.f32 %v16480_v44, %v4483_v31  ;;  %v4484_v49 = vsel %vm3788_vm5, %v12650_v47, %v4136_v51  ;;  %vm3794_vm7 = vcmp.ge.f32.partialorder %v12652_v4, 0.0  ;;  %v4142_v45 = vmul.f32 0.01, %v12652_v4  ;;  %v14037_v20 = vld [vmem:[%s18739_s3 + $0x330] ss:$8 sps:$4 sm:$0xff]  }
 0x4ad   :  { %v4489_v12 = vsel %vm3793_vm6, %v12651_v24, %v4141_v43  ;;  %7387 = vmatmul.mubr.bf16.gmra.mrb[160].mxu1 %v16884_v60  ;;  %v14034_v24 = vld [vmem:[%s18739_s3 + $0x320] ss:$8 sps:$4 sm:$0xff]   ;;  %v14042_v51 = vld [vmem:[%s18739_s3 + $0x344] ss:$8 sps:$4 sm:$0xff]   ;;  %v14043_v31 = vld [vmem:[%s18739_s3 + $0x350] ss:$8 sps:$4 sm:$0xff]  }
 0x4ae   :  { %v4732_v27 = vadd.f32 %v16498_v32, %v4489_v12  ;;  %v4490_v42 = vsel %vm3794_vm7, %v12652_v4, %v4142_v45  ;;  %v3450_v40 = vpop.f32.mrb[228].mxu0  ;;  %7396 = vmatprep.mubr.bf16.mxu1 %v16905_v52  ;;  %v4789_v36 = vadd.f32 %v4731_v2, %v4484_v49  ;;  %v14040_v4 = vld [vmem:[%s18739_s3 + $0x340] ss:$8 sps:$4 sm:$0xff]   ;;  %v14048_v43 = vld [vmem:[%s18739_s3 + $0x364] ss:$8 sps:$4 sm:$0xff]  }
 0x4af   :  { %v12653_v17 = vadd.f32 %v3450_v40, %v16645_v37  ;;  %v3452_v23 = vpop.f32.mrb[229].mxu0  ;;  %v14046_v2 = vld [vmem:[%s18739_s3 + $0x360] ss:$8 sps:$4 sm:$0xff]   ;;  %v14051_v49 = vld [vmem:[%s18739_s3 + $0x374] ss:$8 sps:$4 sm:$0xff]  }
 0x4b0   :  { %v12654_v57 = vadd.f32 %v3452_v23, %v16647_v28  ;;  %v3454_v53 = vpop.f32.mrb[230].mxu0  ;;  %v4790_v44 = vadd.f32 %v4732_v27, %v4490_v42  ;;  %v14049_v45 = vld [vmem:[%s18739_s3 + $0x370] ss:$8 sps:$4 sm:$0xff]   ;;  %v14054_v12 = vld [vmem:[%s18739_s3 + $0x384] ss:$8 sps:$4 sm:$0xff]  }
 0x4b1   :  { %vm3799_vm8 = vcmp.ge.f32.partialorder %v12653_v17, 0.0  ;;  %v4147_v33 = vmul.f32 0.01, %v12653_v17  ;;  %v12655_v54 = vadd.f32 %v3454_v53, %v16645_v37  ;;  %v3456_v41 = vpop.f32.mrb[231].mxu0  ;;  %v14052_v27 = vld [vmem:[%s18739_s3 + $0x380] ss:$8 sps:$4 sm:$0xff]  }
 0x4b2   :  { %vm3800_vm9 = vcmp.ge.f32.partialorder %v12654_v57, 0.0  ;;  %v4148_v46 = vmul.f32 0.01, %v12654_v57  ;;  %v12656_v32 = vadd.f32 %v3456_v41, %v16647_v28  ;;  %v17122_v9 = vpack.c.bf16 %v4790_v44, %v4789_v36  ;;  %v14057_v42 = vld [vmem:[%s18739_s3 + $0x394] ss:$8 sps:$4 sm:$0xff]  }
 0x4b3   :  { %v4495_v19 = vsel %vm3799_vm8, %v12653_v17, %v4147_v33  ;;  %vm3805_vm10 = vcmp.ge.f32.partialorder %v12655_v54, 0.0  ;;  %v4153_v55 = vmul.f32 0.01, %v12655_v54  ;;  %v14055_v40 = vld [vmem:[%s18739_s3 + $0x390] ss:$8 sps:$4 sm:$0xff]  }
 0x4b4   :  { %v4733_v39 = vadd.f32 %v16511_v59, %v4495_v19  ;;  %v4496_v16 = vsel %vm3800_vm9, %v12654_v57, %v4148_v46  ;;  %vm3806_vm11 = vcmp.ge.f32.partialorder %v12656_v32, 0.0  ;;  %v4154_v29 = vmul.f32 0.01, %v12656_v32  ;;  %v14028_v59 = vld [vmem:[%s18739_s3 + $0x300] ss:$8 sps:$4 sm:$0xff]  }
 0x4b5   :  { %v4501_v50 = vsel %vm3805_vm10, %v12655_v54, %v4153_v55  ;;  %7397 = vmatmul.mubr.bf16.gmra.mrb[164].mxu1 %v16894_v62  ;;  %v14060_v36 = vld [vmem:[%s18739_s3 + $0x3a4] ss:$8 sps:$4 sm:$0xff]   ;;  %v14058_v17 = vld [vmem:[%s18739_s3 + $0x3a0] ss:$8 sps:$4 sm:$0xff]   ;;  %v14063_v23 = vld [vmem:[%s18739_s3 + $0x3b4] ss:$8 sps:$4 sm:$0xff]  }
 0x4b6   :  { %v4734_v37 = vadd.f32 %v16514_v58, %v4501_v50  ;;  %v4502_v5 = vsel %vm3806_vm11, %v12656_v32, %v4154_v29  ;;  %7406 = vmatprep.mubr.bf16.mxu1 %v16927_v11  ;;  %v17128_v47 = vadd.f32 %v4733_v39, %v4496_v16  ;;  %v14033_v58 = vld [vmem:[%s18739_s3 + $0x314] ss:$8 sps:$4 sm:$0xff]   ;;  %v14061_v57 = vld [vmem:[%s18739_s3 + $0x3b0] ss:$8 sps:$4 sm:$0xff]   ;;  %v14066_v53 = vld [vmem:[%s18739_s3 + $0x3c4] ss:$8 sps:$4 sm:$0xff]  }
 0x4b7   :  { %v14064_v44 = vld [vmem:[%s18739_s3 + $0x3c0] ss:$8 sps:$4 sm:$0xff]   ;;  %v14069_v33 = vld [vmem:[%s18739_s3 + $0x3d4] ss:$8 sps:$4 sm:$0xff]   ;;  %v14067_v54 = vld [vmem:[%s18739_s3 + $0x3d0] ss:$8 sps:$4 sm:$0xff]  }
 0x4b8   :  { %v17130_v28 = vadd.f32 %v4734_v37, %v4502_v5  ;;  %v14072_v41 = vld [vmem:[%s18739_s3 + $0x3e4] ss:$8 sps:$4 sm:$0xff]   ;;  %v14070_v46 = vld [vmem:[%s18739_s3 + $0x3e0] ss:$8 sps:$4 sm:$0xff]   ;;  %v14075_v32 = vld [vmem:[%s18739_s3 + $0x3f4] ss:$8 sps:$4 sm:$0xff]  }
 0x4b9   :  { %v14073_v19 = vld [vmem:[%s18739_s3 + $0x3f0] ss:$8 sps:$4 sm:$0xff]   ;;  %v14078_v55 = vld [vmem:[%s18739_s3 + $0x404] ss:$8 sps:$4 sm:$0xff]   ;;  %v14076_v39 = vld [vmem:[%s18739_s3 + $0x400] ss:$8 sps:$4 sm:$0xff]  }
 0x4ba   :  { %v4821_v38 = vpack.c.bf16 %v17130_v28, %v17128_v47  ;;  %v14081_v16 = vld [vmem:[%s18739_s3 + $0x414] ss:$8 sps:$4 sm:$0xff]   ;;  %v14079_v29 = vld [vmem:[%s18739_s3 + $0x410] ss:$8 sps:$4 sm:$0xff]   ;;  %v14084_v50 = vld [vmem:[%s18739_s3 + $0x424] ss:$8 sps:$4 sm:$0xff]  }
 0x4bb   :  { %v14082_v37 = vld [vmem:[%s18739_s3 + $0x420] ss:$8 sps:$4 sm:$0xff]   ;;  %v14085_v5 = vld [vmem:[%s18739_s3 + $0x430] ss:$8 sps:$4 sm:$0xff]  }
 0x4bd   :  { %7407 = vmatmul.mubr.bf16.gmra.mrb[168].mxu1 %v16905_v52 }
 0x4be   :  { %7449 = vmatprep.mubr.bf16.mxu1 %v16756_v7 }
 0x4c5   :  { %7450 = vmatmul.mubr.bf16.vlgmr.msra.gmra.mrb[116].mxu1 %v16734_v30  ;;  %v14039_v30 = vld [vmem:[%s18739_s3 + $0x334] ss:$8 sps:$4 sm:$0xff]  }
 0x4c6   :  { %7459 = vmatprep.mubr.bf16.mxu1 %v16778_v8  ;;  %7591 = vmatpush1.bf16.msra.mxu1 %v14028_v59  ;;  %v14090_v59 = vld [vmem:[%s18739_s3 + $0x444] ss:$8 sps:$4 sm:$0xff]  }
 0x4c7   :  { %7592 = vmatprep.subr.bf16.mxu1 %v14033_v58  ;;  %v14088_v58 = vld [vmem:[%s18739_s3 + $0x440] ss:$8 sps:$4 sm:$0xff]  }
 0x4ca   :  { %7593 = vmatpush1.bf16.msra.mxu1 %v14031_v34  ;;  %v14091_v34 = vld [vmem:[%s18739_s3 + $0x450] ss:$8 sps:$4 sm:$0xff]  }
 0x4cb   :  { %7594 = vmatprep.subr.bf16.mxu1 %v14036_v25  ;;  %v14096_v25 = vld [vmem:[%s18739_s3 + $0x464] ss:$8 sps:$4 sm:$0xff]  }
 0x4cd   :  { %7460 = vmatmul.mubr.bf16.gmra.mrb[120].mxu1 %v16756_v7  ;;  %v14045_v7 = vld [vmem:[%s18739_s3 + $0x354] ss:$8 sps:$4 sm:$0xff]  }
 0x4ce   :  { %7469 = vmatprep.mubr.bf16.mxu1 %v16800_v6  ;;  %7595 = vmatpush1.bf16.msra.mxu1 %v14034_v24  ;;  %v14094_v24 = vld [vmem:[%s18739_s3 + $0x460] ss:$8 sps:$4 sm:$0xff]  }
 0x4cf   :  { %7596 = vmatprep.subr.bf16.mxu1 %v14039_v30  ;;  %v14099_v30 = vld [vmem:[%s18739_s3 + $0x474] ss:$8 sps:$4 sm:$0xff]  }
 0x4d2   :  { %7597 = vmatpush1.bf16.msra.mxu1 %v14037_v20  ;;  %v14097_v20 = vld [vmem:[%s18739_s3 + $0x470] ss:$8 sps:$4 sm:$0xff]  }
 0x4d3   :  { %7598 = vmatprep.subr.bf16.mxu1 %v14042_v51  ;;  %v14102_v51 = vld [vmem:[%s18739_s3 + $0x484] ss:$8 sps:$4 sm:$0xff]  }
 0x4d5   :  { %7470 = vmatmul.mubr.bf16.gmra.mrb[124].mxu1 %v16778_v8 }
 0x4d6   :  { %7479 = vmatprep.mubr.bf16.mxu1 %v16822_v56  ;;  %7599 = vmatpush1.bf16.msra.mxu1 %v14040_v4  ;;  %v14100_v4 = vld [vmem:[%s18739_s3 + $0x480] ss:$8 sps:$4 sm:$0xff]  }
 0x4d7   :  { %7600 = vmatprep.subr.bf16.mxu1 %v14045_v7  ;;  %v14105_v7 = vld [vmem:[%s18739_s3 + $0x494] ss:$8 sps:$4 sm:$0xff]  }
 0x4da   :  { %7601 = vmatpush1.bf16.msra.mxu1 %v14043_v31  ;;  %v14103_v31 = vld [vmem:[%s18739_s3 + $0x490] ss:$8 sps:$4 sm:$0xff]  }
 0x4db   :  { %7602 = vmatprep.subr.bf16.mxu1 %v14048_v43  ;;  %v14108_v43 = vld [vmem:[%s18739_s3 + $0x4a4] ss:$8 sps:$4 sm:$0xff]  }
 0x4dd   :  { %7480 = vmatmul.mubr.bf16.gmra.mrb[128].mxu1 %v16800_v6 }
 0x4de   :  { %7489 = vmatprep.mubr.bf16.mxu1 %v16844_v15  ;;  %7603 = vmatpush1.bf16.msra.mxu1 %v14046_v2  ;;  %v14106_v2 = vld [vmem:[%s18739_s3 + $0x4a0] ss:$8 sps:$4 sm:$0xff]  }
 0x4df   :  { %7604 = vmatprep.subr.bf16.mxu1 %v14051_v49  ;;  %v14111_v49 = vld [vmem:[%s18739_s3 + $0x4b4] ss:$8 sps:$4 sm:$0xff]  }
 0x4e2   :  { %7605 = vmatpush1.bf16.msra.mxu1 %v14049_v45  ;;  %v14109_v45 = vld [vmem:[%s18739_s3 + $0x4b0] ss:$8 sps:$4 sm:$0xff]  }
 0x4e3   :  { %7606 = vmatprep.subr.bf16.mxu1 %v14054_v12  ;;  %v14114_v12 = vld [vmem:[%s18739_s3 + $0x4c4] ss:$8 sps:$4 sm:$0xff]  }
 0x4e5   :  { %7490 = vmatmul.mubr.bf16.gmra.mrb[132].mxu1 %v16822_v56 }
 0x4e6   :  { %7499 = vmatprep.mubr.bf16.mxu1 %v16854_v22  ;;  %7607 = vmatpush1.bf16.msra.mxu1 %v14052_v27  ;;  %v14112_v27 = vld [vmem:[%s18739_s3 + $0x4c0] ss:$8 sps:$4 sm:$0xff]  }
 0x4e7   :  { %7608 = vmatprep.subr.bf16.mxu1 %v14057_v42  ;;  %v14117_v42 = vld [vmem:[%s18739_s3 + $0x4d4] ss:$8 sps:$4 sm:$0xff]  }
 0x4ea   :  { %7609 = vmatpush1.bf16.msra.mxu1 %v14055_v40  ;;  %v14115_v40 = vld [vmem:[%s18739_s3 + $0x4d0] ss:$8 sps:$4 sm:$0xff]  }
 0x4eb   :  { %7610 = vmatprep.subr.bf16.mxu1 %v14060_v36  ;;  %v14120_v36 = vld [vmem:[%s18739_s3 + $0x4e4] ss:$8 sps:$4 sm:$0xff]  }
 0x4ed   :  { %7500 = vmatmul.mubr.bf16.gmra.mrb[136].mxu1 %v16844_v15 }
 0x4ee   :  { %7509 = vmatprep.mubr.bf16.mxu1 %v16864_v14  ;;  %7611 = vmatpush1.bf16.msra.mxu1 %v14058_v17  ;;  %v14118_v17 = vld [vmem:[%s18739_s3 + $0x4e0] ss:$8 sps:$4 sm:$0xff]  }
 0x4ef   :  { %7612 = vmatprep.subr.bf16.mxu1 %v14063_v23  ;;  %v14123_v23 = vld [vmem:[%s18739_s3 + $0x4f4] ss:$8 sps:$4 sm:$0xff]  }
 0x4f2   :  { %7613 = vmatpush1.bf16.msra.mxu1 %v14061_v57  ;;  %v14121_v57 = vld [vmem:[%s18739_s3 + $0x4f0] ss:$8 sps:$4 sm:$0xff]  }
 0x4f3   :  { %7614 = vmatprep.subr.bf16.mxu1 %v14066_v53  ;;  %v14126_v53 = vld [vmem:[%s18739_s3 + $0x504] ss:$8 sps:$4 sm:$0xff]  }
 0x4f5   :  { %7510 = vmatmul.mubr.bf16.gmra.mrb[140].mxu1 %v16854_v22 }
 0x4f6   :  { %7519 = vmatprep.mubr.bf16.mxu1 %v16874_v3  ;;  %7615 = vmatpush1.bf16.msra.mxu1 %v14064_v44  ;;  %v14124_v44 = vld [vmem:[%s18739_s3 + $0x500] ss:$8 sps:$4 sm:$0xff]  }
 0x4f7   :  { %7616 = vmatprep.subr.bf16.mxu1 %v14069_v33  ;;  %v14129_v33 = vld [vmem:[%s18739_s3 + $0x514] ss:$8 sps:$4 sm:$0xff]  }
 0x4fa   :  { %7617 = vmatpush1.bf16.msra.mxu1 %v14067_v54  ;;  %v14127_v54 = vld [vmem:[%s18739_s3 + $0x510] ss:$8 sps:$4 sm:$0xff]  }
 0x4fb   :  { %7618 = vmatprep.subr.bf16.mxu1 %v14072_v41  ;;  %v14132_v41 = vld [vmem:[%s18739_s3 + $0x524] ss:$8 sps:$4 sm:$0xff]  }
 0x4fd   :  { %7520 = vmatmul.mubr.bf16.gmra.mrb[144].mxu1 %v16864_v14 }
 0x4fe   :  { %7529 = vmatprep.mubr.bf16.mxu1 %v16884_v60  ;;  %7619 = vmatpush1.bf16.msra.mxu1 %v14070_v46  ;;  %v14130_v46 = vld [vmem:[%s18739_s3 + $0x520] ss:$8 sps:$4 sm:$0xff]  }
 0x4ff   :  { %7620 = vmatprep.subr.bf16.mxu1 %v14075_v32  ;;  %v14133_v32 = vld [vmem:[%s18739_s3 + $0x530] ss:$8 sps:$4 sm:$0xff]  }
 0x502   :  { %7621 = vmatpush1.bf16.msra.mxu1 %v14073_v19  ;;  %v14138_v19 = vld [vmem:[%s18739_s3 + $0x544] ss:$8 sps:$4 sm:$0xff]  }
 0x503   :  { %7763 = vmatprep.subr.bf16.mxu1 %v14078_v55  ;;  %v14136_v55 = vld [vmem:[%s18739_s3 + $0x540] ss:$8 sps:$4 sm:$0xff]  }
 0x505   :  { %7530 = vmatmul.mubr.bf16.gmra.mrb[148].mxu1 %v16874_v3 }
 0x506   :  { %7539 = vmatprep.mubr.bf16.mxu1 %v16894_v62 }
 0x50d   :  { %7540 = vmatmul.mubr.bf16.gmra.mrb[152].mxu1 %v16884_v60 }
 0x50e   :  { %7549 = vmatprep.mubr.bf16.mxu1 %v16905_v52 }
 0x515   :  { %7550 = vmatmul.mubr.bf16.gmra.mrb[156].mxu1 %v16894_v62 }
 0x516   :  { %7559 = vmatprep.mubr.bf16.mxu1 %v16927_v11 }
 0x51d   :  { %7560 = vmatmul.mubr.bf16.gmra.mrb[160].mxu1 %v16905_v52 }
 0x51e   :  { %7569 = vmatprep.mubr.bf16.mxu1 %v16949_v10 }
 0x525   :  { %7570 = vmatmul.mubr.bf16.gmra.mrb[164].mxu1 %v16927_v11 }
 0x526   :  { %7579 = vmatprep.mubr.bf16.mxu1 %v16971_v61 }
 0x52d   :  { %7580 = vmatmul.mubr.bf16.gmra.mrb[168].mxu1 %v16949_v10 }
 0x52e   :  { %7622 = vmatprep.mubr.bf16.mxu1 %v16800_v6 }
 0x535   :  { %7623 = vmatmul.mubr.bf16.vlgmr.msra.gmra.mrb[116].mxu1 %v16778_v8  ;;  %v14087_v8 = vld [vmem:[%s18739_s3 + $0x434] ss:$8 sps:$4 sm:$0xff]  }
 0x536   :  { %7632 = vmatprep.mubr.bf16.mxu1 %v16822_v56  ;;  %7764 = vmatpush1.bf16.msra.mxu1 %v14076_v39  ;;  %v14139_v39 = vld [vmem:[%s18739_s3 + $0x550] ss:$8 sps:$4 sm:$0xff]  }
 0x537   :  { %7765 = vmatprep.subr.bf16.mxu1 %v14081_v16  ;;  %v14144_v16 = vld [vmem:[%s18739_s3 + $0x564] ss:$8 sps:$4 sm:$0xff]  }
 0x53a   :  { %7766 = vmatpush1.bf16.msra.mxu1 %v14079_v29  ;;  %v14142_v29 = vld [vmem:[%s18739_s3 + $0x560] ss:$8 sps:$4 sm:$0xff]  }
 0x53b   :  { %7767 = vmatprep.subr.bf16.mxu1 %v14084_v50  ;;  %v14147_v50 = vld [vmem:[%s18739_s3 + $0x574] ss:$8 sps:$4 sm:$0xff]  }
 0x53d   :  { %7633 = vmatmul.mubr.bf16.gmra.mrb[120].mxu1 %v16800_v6  ;;  %v14093_v6 = vld [vmem:[%s18739_s3 + $0x454] ss:$8 sps:$4 sm:$0xff]  }
 0x53e   :  { %7642 = vmatprep.mubr.bf16.mxu1 %v16844_v15  ;;  %7768 = vmatpush1.bf16.msra.mxu1 %v14082_v37  ;;  %v14145_v37 = vld [vmem:[%s18739_s3 + $0x570] ss:$8 sps:$4 sm:$0xff]  }
 0x53f   :  { %7769 = vmatprep.subr.bf16.mxu1 %v14087_v8  ;;  %v14150_v8 = vld [vmem:[%s18739_s3 + $0x584] ss:$8 sps:$4 sm:$0xff]  }
 0x542   :  { %7770 = vmatpush1.bf16.msra.mxu1 %v14085_v5  ;;  %v14148_v5 = vld [vmem:[%s18739_s3 + $0x580] ss:$8 sps:$4 sm:$0xff]  }
 0x543   :  { %7771 = vmatprep.subr.bf16.mxu1 %v14090_v59  ;;  %v14153_v59 = vld [vmem:[%s18739_s3 + $0x594] ss:$8 sps:$4 sm:$0xff]  }
 0x545   :  { %7643 = vmatmul.mubr.bf16.gmra.mrb[124].mxu1 %v16822_v56 }
 0x546   :  { %7652 = vmatprep.mubr.bf16.mxu1 %v16854_v22  ;;  %7772 = vmatpush1.bf16.msra.mxu1 %v14088_v58  ;;  %v14151_v58 = vld [vmem:[%s18739_s3 + $0x590] ss:$8 sps:$4 sm:$0xff]  }
 0x547   :  { %7773 = vmatprep.subr.bf16.mxu1 %v14093_v6  ;;  %v14156_v6 = vld [vmem:[%s18739_s3 + $0x5a4] ss:$8 sps:$4 sm:$0xff]  }
 0x54a   :  { %7774 = vmatpush1.bf16.msra.mxu1 %v14091_v34  ;;  %v14154_v34 = vld [vmem:[%s18739_s3 + $0x5a0] ss:$8 sps:$4 sm:$0xff]  }
 0x54b   :  { %7775 = vmatprep.subr.bf16.mxu1 %v14096_v25  ;;  %v14159_v25 = vld [vmem:[%s18739_s3 + $0x5b4] ss:$8 sps:$4 sm:$0xff]  }
 0x54d   :  { %7653 = vmatmul.mubr.bf16.gmra.mrb[128].mxu1 %v16844_v15 }
 0x54e   :  { %7662 = vmatprep.mubr.bf16.mxu1 %v16864_v14  ;;  %7776 = vmatpush1.bf16.msra.mxu1 %v14094_v24  ;;  %v14157_v24 = vld [vmem:[%s18739_s3 + $0x5b0] ss:$8 sps:$4 sm:$0xff]  }
 0x54f   :  { %7777 = vmatprep.subr.bf16.mxu1 %v14099_v30  ;;  %v14162_v30 = vld [vmem:[%s18739_s3 + $0x5c4] ss:$8 sps:$4 sm:$0xff]  }
 0x552   :  { %7778 = vmatpush1.bf16.msra.mxu1 %v14097_v20  ;;  %v14160_v20 = vld [vmem:[%s18739_s3 + $0x5c0] ss:$8 sps:$4 sm:$0xff]  }
 0x553   :  { %7779 = vmatprep.subr.bf16.mxu1 %v14102_v51  ;;  %v14165_v51 = vld [vmem:[%s18739_s3 + $0x5d4] ss:$8 sps:$4 sm:$0xff]  }
 0x555   :  { %7663 = vmatmul.mubr.bf16.gmra.mrb[132].mxu1 %v16854_v22 }
 0x556   :  { %7672 = vmatprep.mubr.bf16.mxu1 %v16874_v3  ;;  %7780 = vmatpush1.bf16.msra.mxu1 %v14100_v4  ;;  %v14163_v4 = vld [vmem:[%s18739_s3 + $0x5d0] ss:$8 sps:$4 sm:$0xff]  }
 0x557   :  { %7781 = vmatprep.subr.bf16.mxu1 %v14105_v7  ;;  %v14168_v7 = vld [vmem:[%s18739_s3 + $0x5e4] ss:$8 sps:$4 sm:$0xff]  }
 0x55a   :  { %7782 = vmatpush1.bf16.msra.mxu1 %v14103_v31  ;;  %v14166_v31 = vld [vmem:[%s18739_s3 + $0x5e0] ss:$8 sps:$4 sm:$0xff]  }
 0x55b   :  { %7783 = vmatprep.subr.bf16.mxu1 %v14108_v43  ;;  %v14171_v43 = vld [vmem:[%s18739_s3 + $0x5f4] ss:$8 sps:$4 sm:$0xff]  }
 0x55d   :  { %7673 = vmatmul.mubr.bf16.gmra.mrb[136].mxu1 %v16864_v14 }
 0x55e   :  { %7682 = vmatprep.mubr.bf16.mxu1 %v16884_v60  ;;  %7784 = vmatpush1.bf16.msra.mxu1 %v14106_v2  ;;  %v14169_v2 = vld [vmem:[%s18739_s3 + $0x5f0] ss:$8 sps:$4 sm:$0xff]  }
 0x55f   :  { %7785 = vmatprep.subr.bf16.mxu1 %v14111_v49  ;;  %v14174_v49 = vld [vmem:[%s18739_s3 + $0x604] ss:$8 sps:$4 sm:$0xff]  }
 0x562   :  { %7786 = vmatpush1.bf16.msra.mxu1 %v14109_v45  ;;  %v14172_v45 = vld [vmem:[%s18739_s3 + $0x600] ss:$8 sps:$4 sm:$0xff]  }
 0x563   :  { %7787 = vmatprep.subr.bf16.mxu1 %v14114_v12  ;;  %v14177_v12 = vld [vmem:[%s18739_s3 + $0x614] ss:$8 sps:$4 sm:$0xff]  }
 0x565   :  { %7683 = vmatmul.mubr.bf16.gmra.mrb[140].mxu1 %v16874_v3 }
 0x566   :  { %7692 = vmatprep.mubr.bf16.mxu1 %v16894_v62  ;;  %7788 = vmatpush1.bf16.msra.mxu1 %v14112_v27  ;;  %v14175_v27 = vld [vmem:[%s18739_s3 + $0x610] ss:$8 sps:$4 sm:$0xff]  }
 0x567   :  { %7789 = vmatprep.subr.bf16.mxu1 %v14117_v42  ;;  %v14180_v42 = vld [vmem:[%s18739_s3 + $0x624] ss:$8 sps:$4 sm:$0xff]  }
 0x56a   :  { %7790 = vmatpush1.bf16.msra.mxu1 %v14115_v40  ;;  %v14178_v40 = vld [vmem:[%s18739_s3 + $0x620] ss:$8 sps:$4 sm:$0xff]  }
 0x56b   :  { %7791 = vmatprep.subr.bf16.mxu1 %v14120_v36  ;;  %v14181_v36 = vld [vmem:[%s18739_s3 + $0x630] ss:$8 sps:$4 sm:$0xff]  }
 0x56d   :  { %7693 = vmatmul.mubr.bf16.gmra.mrb[144].mxu1 %v16884_v60 }
 0x56e   :  { %7702 = vmatprep.mubr.bf16.mxu1 %v16905_v52  ;;  %7792 = vmatpush1.bf16.msra.mxu1 %v14118_v17  ;;  %v14186_v17 = vld [vmem:[%s18739_s3 + $0x644] ss:$8 sps:$4 sm:$0xff]  }
 0x56f   :  { %7793 = vmatprep.subr.bf16.mxu1 %v14123_v23  ;;  %v14184_v23 = vld [vmem:[%s18739_s3 + $0x640] ss:$8 sps:$4 sm:$0xff]  }
 0x572   :  { %7794 = vmatpush1.bf16.msra.mxu1 %v14121_v57  ;;  %v14187_v57 = vld [vmem:[%s18739_s3 + $0x650] ss:$8 sps:$4 sm:$0xff]  }
 0x573   :  { %7936 = vmatprep.subr.bf16.mxu1 %v14126_v53  ;;  %v14192_v53 = vld [vmem:[%s18739_s3 + $0x664] ss:$8 sps:$4 sm:$0xff]  }
 0x575   :  { %7703 = vmatmul.mubr.bf16.gmra.mrb[148].mxu1 %v16894_v62 }
 0x576   :  { %7712 = vmatprep.mubr.bf16.mxu1 %v16927_v11 }
 0x57d   :  { %7713 = vmatmul.mubr.bf16.gmra.mrb[152].mxu1 %v16905_v52 }
 0x57e   :  { %7722 = vmatprep.mubr.bf16.mxu1 %v16949_v10 }
 0x585   :  { %7723 = vmatmul.mubr.bf16.gmra.mrb[156].mxu1 %v16927_v11 }
 0x586   :  { %7732 = vmatprep.mubr.bf16.mxu1 %v16971_v61 }
 0x58d   :  { %7733 = vmatmul.mubr.bf16.gmra.mrb[160].mxu1 %v16949_v10 }
 0x58e   :  { %7742 = vmatprep.mubr.bf16.mxu1 %v16993_v1 }
 0x595   :  { %7743 = vmatmul.mubr.bf16.gmra.mrb[164].mxu1 %v16971_v61 }
 0x596   :  { %7752 = vmatprep.mubr.bf16.mxu1 %v17015_v21 }
 0x59d   :  { %7753 = vmatmul.mubr.bf16.gmra.mrb[168].mxu1 %v16993_v1 }
 0x59e   :  { %7795 = vmatprep.mubr.bf16.mxu1 %v16844_v15 }
 0x5a5   :  { %7796 = vmatmul.mubr.bf16.vlgmr.msra.gmra.mrb[116].mxu1 %v16822_v56  ;;  %v14135_v56 = vld [vmem:[%s18739_s3 + $0x534] ss:$8 sps:$4 sm:$0xff]  }
 0x5a6   :  { %7805 = vmatprep.mubr.bf16.mxu1 %v16854_v22  ;;  %7937 = vmatpush1.bf16.msra.mxu1 %v14124_v44  ;;  %v14190_v44 = vld [vmem:[%s18739_s3 + $0x660] ss:$8 sps:$4 sm:$0xff]  }
 0x5a7   :  { %7938 = vmatprep.subr.bf16.mxu1 %v14129_v33  ;;  %v14195_v33 = vld [vmem:[%s18739_s3 + $0x674] ss:$8 sps:$4 sm:$0xff]  }
 0x5aa   :  { %7939 = vmatpush1.bf16.msra.mxu1 %v14127_v54  ;;  %v14193_v54 = vld [vmem:[%s18739_s3 + $0x670] ss:$8 sps:$4 sm:$0xff]  }
 0x5ab   :  { %7940 = vmatprep.subr.bf16.mxu1 %v14132_v41  ;;  %v14198_v41 = vld [vmem:[%s18739_s3 + $0x684] ss:$8 sps:$4 sm:$0xff]  }
 0x5ad   :  { %7806 = vmatmul.mubr.bf16.gmra.mrb[120].mxu1 %v16844_v15  ;;  %v14141_v15 = vld [vmem:[%s18739_s3 + $0x554] ss:$8 sps:$4 sm:$0xff]  }
 0x5ae   :  { %7815 = vmatprep.mubr.bf16.mxu1 %v16864_v14  ;;  %7941 = vmatpush1.bf16.msra.mxu1 %v14130_v46  ;;  %v14196_v46 = vld [vmem:[%s18739_s3 + $0x680] ss:$8 sps:$4 sm:$0xff]  }
 0x5af   :  { %7942 = vmatprep.subr.bf16.mxu1 %v14135_v56  ;;  %v14201_v56 = vld [vmem:[%s18739_s3 + $0x694] ss:$8 sps:$4 sm:$0xff]  }
 0x5b2   :  { %7943 = vmatpush1.bf16.msra.mxu1 %v14133_v32  ;;  %v14199_v32 = vld [vmem:[%s18739_s3 + $0x690] ss:$8 sps:$4 sm:$0xff]  }
 0x5b3   :  { %7944 = vmatprep.subr.bf16.mxu1 %v14138_v19  ;;  %v14204_v19 = vld [vmem:[%s18739_s3 + $0x6a4] ss:$8 sps:$4 sm:$0xff]  }
 0x5b5   :  { %7816 = vmatmul.mubr.bf16.gmra.mrb[124].mxu1 %v16854_v22 }
 0x5b6   :  { %7825 = vmatprep.mubr.bf16.mxu1 %v16874_v3  ;;  %7945 = vmatpush1.bf16.msra.mxu1 %v14136_v55  ;;  %v14202_v55 = vld [vmem:[%s18739_s3 + $0x6a0] ss:$8 sps:$4 sm:$0xff]  }
 0x5b7   :  { %7946 = vmatprep.subr.bf16.mxu1 %v14141_v15  ;;  %v14207_v15 = vld [vmem:[%s18739_s3 + $0x6b4] ss:$8 sps:$4 sm:$0xff]  }
 0x5ba   :  { %7947 = vmatpush1.bf16.msra.mxu1 %v14139_v39  ;;  %v14205_v39 = vld [vmem:[%s18739_s3 + $0x6b0] ss:$8 sps:$4 sm:$0xff]  }
 0x5bb   :  { %7948 = vmatprep.subr.bf16.mxu1 %v14144_v16  ;;  %v14210_v16 = vld [vmem:[%s18739_s3 + $0x6c4] ss:$8 sps:$4 sm:$0xff]  }
 0x5bd   :  { %7826 = vmatmul.mubr.bf16.gmra.mrb[128].mxu1 %v16864_v14 }
 0x5be   :  { %7835 = vmatprep.mubr.bf16.mxu1 %v16884_v60  ;;  %7949 = vmatpush1.bf16.msra.mxu1 %v14142_v29  ;;  %v14208_v29 = vld [vmem:[%s18739_s3 + $0x6c0] ss:$8 sps:$4 sm:$0xff]  }
 0x5bf   :  { %7950 = vmatprep.subr.bf16.mxu1 %v14147_v50  ;;  %v14213_v50 = vld [vmem:[%s18739_s3 + $0x6d4] ss:$8 sps:$4 sm:$0xff]  }
 0x5c2   :  { %7951 = vmatpush1.bf16.msra.mxu1 %v14145_v37  ;;  %v14211_v37 = vld [vmem:[%s18739_s3 + $0x6d0] ss:$8 sps:$4 sm:$0xff]  }
 0x5c3   :  { %7952 = vmatprep.subr.bf16.mxu1 %v14150_v8  ;;  %v14216_v8 = vld [vmem:[%s18739_s3 + $0x6e4] ss:$8 sps:$4 sm:$0xff]  }
 0x5c5   :  { %7836 = vmatmul.mubr.bf16.gmra.mrb[132].mxu1 %v16874_v3 }
 0x5c6   :  { %7845 = vmatprep.mubr.bf16.mxu1 %v16894_v62  ;;  %7953 = vmatpush1.bf16.msra.mxu1 %v14148_v5  ;;  %v14214_v5 = vld [vmem:[%s18739_s3 + $0x6e0] ss:$8 sps:$4 sm:$0xff]  }
 0x5c7   :  { %7954 = vmatprep.subr.bf16.mxu1 %v14153_v59  ;;  %v14219_v59 = vld [vmem:[%s18739_s3 + $0x6f4] ss:$8 sps:$4 sm:$0xff]  }
 0x5ca   :  { %7955 = vmatpush1.bf16.msra.mxu1 %v14151_v58  ;;  %v14217_v58 = vld [vmem:[%s18739_s3 + $0x6f0] ss:$8 sps:$4 sm:$0xff]  }
 0x5cb   :  { %7956 = vmatprep.subr.bf16.mxu1 %v14156_v6  ;;  %v14222_v6 = vld [vmem:[%s18739_s3 + $0x704] ss:$8 sps:$4 sm:$0xff]  }
 0x5cd   :  { %7846 = vmatmul.mubr.bf16.gmra.mrb[136].mxu1 %v16884_v60 }
 0x5ce   :  { %7855 = vmatprep.mubr.bf16.mxu1 %v16905_v52  ;;  %7957 = vmatpush1.bf16.msra.mxu1 %v14154_v34  ;;  %v14268_v34 = vld [vmem:[%s18740_s5 + $0x80] ss:$8 sps:$4 sm:$0xff]  }
 0x5cf   :  { %7958 = vmatprep.subr.bf16.mxu1 %v14159_v25  ;;  %v14270_v25 = vld [vmem:[%s18740_s5 + $0x84] ss:$8 sps:$4 sm:$0xff]  }
 0x5d0   :  { %8804 = vmatprep.subr.bf16.mxu0 %v14270_v25 }
 0x5d1   :  { %8805 = vmatpush1.bf16.msra.mxu0 %v14268_v34  ;;  %v14289_v34 = vld [vmem:[%s18740_s5 + $0xf0] ss:$8 sps:$4 sm:$0xff]  }
 0x5d2   :  { %7959 = vmatpush1.bf16.msra.mxu1 %v14157_v24  ;;  %v14220_v24 = vld [vmem:[%s18739_s3 + $0x700] ss:$8 sps:$4 sm:$0xff]  }
 0x5d3   :  { %7960 = vmatprep.subr.bf16.mxu1 %v14162_v30  ;;  %v14225_v30 = vld [vmem:[%s18739_s3 + $0x714] ss:$8 sps:$4 sm:$0xff]  }
 0x5d5   :  { %7856 = vmatmul.mubr.bf16.gmra.mrb[140].mxu1 %v16894_v62 }
 0x5d6   :  { %7865 = vmatprep.mubr.bf16.mxu1 %v16927_v11  ;;  %7961 = vmatpush1.bf16.msra.mxu1 %v14160_v20  ;;  %v14223_v20 = vld [vmem:[%s18739_s3 + $0x710] ss:$8 sps:$4 sm:$0xff]  }
 0x5d7   :  { %7962 = vmatprep.subr.bf16.mxu1 %v14165_v51  ;;  %v14228_v51 = vld [vmem:[%s18739_s3 + $0x724] ss:$8 sps:$4 sm:$0xff]  }
 0x5da   :  { %7963 = vmatpush1.bf16.msra.mxu1 %v14163_v4  ;;  %v14226_v4 = vld [vmem:[%s18739_s3 + $0x720] ss:$8 sps:$4 sm:$0xff]  }
 0x5db   :  { %7964 = vmatprep.subr.bf16.mxu1 %v14168_v7  ;;  %v14229_v7 = vld [vmem:[%s18739_s3 + $0x730] ss:$8 sps:$4 sm:$0xff]  }
 0x5dd   :  { %7866 = vmatmul.mubr.bf16.gmra.mrb[144].mxu1 %v16905_v52 }
 0x5de   :  { %7875 = vmatprep.mubr.bf16.mxu1 %v16949_v10  ;;  %7965 = vmatpush1.bf16.msra.mxu1 %v14166_v31  ;;  %v14271_v31 = vld [vmem:[%s18740_s5 + $0x90] ss:$8 sps:$4 sm:$0xff]  }
 0x5df   :  { %7966 = vmatprep.subr.bf16.mxu1 %v14171_v43  ;;  %v14273_v43 = vld [vmem:[%s18740_s5 + $0x94] ss:$8 sps:$4 sm:$0xff]  }
 0x5e0   :  { %8806 = vmatprep.subr.bf16.mxu0 %v14273_v43 }
 0x5e1   :  { %8807 = vmatpush1.bf16.msra.mxu0 %v14271_v31 }
 0x5e2   :  { %7967 = vmatpush1.bf16.msra.mxu1 %v14169_v2  ;;  %v14232_v2 = vld [vmem:[%s18739_s3 + $0x740] ss:$8 sps:$4 sm:$0xff]  }
 0x5e3   :  { %8109 = vmatprep.subr.bf16.mxu1 %v14174_v49  ;;  %v14237_v49 = vld [vmem:[%s18739_s3 + $0x754] ss:$8 sps:$4 sm:$0xff]  }
 0x5e5   :  { %7876 = vmatmul.mubr.bf16.gmra.mrb[148].mxu1 %v16927_v11 }
 0x5e6   :  { %7885 = vmatprep.mubr.bf16.mxu1 %v16971_v61 }
 0x5ed   :  { %7886 = vmatmul.mubr.bf16.gmra.mrb[152].mxu1 %v16949_v10 }
 0x5ee   :  { %7895 = vmatprep.mubr.bf16.mxu1 %v16993_v1 }
 0x5f5   :  { %7896 = vmatmul.mubr.bf16.gmra.mrb[156].mxu1 %v16971_v61 }
 0x5f6   :  { %7905 = vmatprep.mubr.bf16.mxu1 %v17015_v21 }
 0x5fd   :  { %7906 = vmatmul.mubr.bf16.gmra.mrb[160].mxu1 %v16993_v1 }
 0x5fe   :  { %7915 = vmatprep.mubr.bf16.mxu1 %v17037_v35 }
 0x605   :  { %7916 = vmatmul.mubr.bf16.gmra.mrb[164].mxu1 %v17015_v21 }
 0x606   :  { %7925 = vmatprep.mubr.bf16.mxu1 %v17059_v13 }
 0x60d   :  { %7926 = vmatmul.mubr.bf16.gmra.mrb[168].mxu1 %v17037_v35 }
 0x60e   :  { %7968 = vmatprep.mubr.bf16.mxu1 %v16864_v14 }
 0x615   :  { %7969 = vmatmul.mubr.bf16.vlgmr.msra.gmra.mrb[116].mxu1 %v16854_v22  ;;  %v14183_v22 = vld [vmem:[%s18739_s3 + $0x634] ss:$8 sps:$4 sm:$0xff]  }
 0x616   :  { %7978 = vmatprep.mubr.bf16.mxu1 %v16874_v3  ;;  %8110 = vmatpush1.bf16.msra.mxu1 %v14172_v45  ;;  %v14235_v45 = vld [vmem:[%s18739_s3 + $0x750] ss:$8 sps:$4 sm:$0xff]  }
 0x617   :  { %8111 = vmatprep.subr.bf16.mxu1 %v14177_v12  ;;  %v14240_v12 = vld [vmem:[%s18739_s3 + $0x764] ss:$8 sps:$4 sm:$0xff]  }
 0x61a   :  { %8112 = vmatpush1.bf16.msra.mxu1 %v14175_v27  ;;  %v14238_v27 = vld [vmem:[%s18739_s3 + $0x760] ss:$8 sps:$4 sm:$0xff]  }
 0x61b   :  { %8113 = vmatprep.subr.bf16.mxu1 %v14180_v42  ;;  %v14243_v42 = vld [vmem:[%s18739_s3 + $0x774] ss:$8 sps:$4 sm:$0xff]  }
 0x61d   :  { %7979 = vmatmul.mubr.bf16.gmra.mrb[120].mxu1 %v16864_v14  ;;  %v14189_v14 = vld [vmem:[%s18739_s3 + $0x654] ss:$8 sps:$4 sm:$0xff]  }
 0x61e   :  { %7988 = vmatprep.mubr.bf16.mxu1 %v16884_v60  ;;  %8114 = vmatpush1.bf16.msra.mxu1 %v14178_v40  ;;  %v14241_v40 = vld [vmem:[%s18739_s3 + $0x770] ss:$8 sps:$4 sm:$0xff]  }
 0x61f   :  { %8115 = vmatprep.subr.bf16.mxu1 %v14183_v22  ;;  %v14246_v22 = vld [vmem:[%s18739_s3 + $0x784] ss:$8 sps:$4 sm:$0xff]  }
 0x622   :  { %8116 = vmatpush1.bf16.msra.mxu1 %v14181_v36  ;;  %v14244_v36 = vld [vmem:[%s18739_s3 + $0x780] ss:$8 sps:$4 sm:$0xff]  }
 0x623   :  { %8117 = vmatprep.subr.bf16.mxu1 %v14186_v17  ;;  %v14249_v17 = vld [vmem:[%s18739_s3 + $0x794] ss:$8 sps:$4 sm:$0xff]  }
 0x625   :  { %7989 = vmatmul.mubr.bf16.gmra.mrb[124].mxu1 %v16874_v3 }
 0x626   :  { %7998 = vmatprep.mubr.bf16.mxu1 %v16894_v62  ;;  %8118 = vmatpush1.bf16.msra.mxu1 %v14184_v23  ;;  %v14247_v23 = vld [vmem:[%s18739_s3 + $0x790] ss:$8 sps:$4 sm:$0xff]  }
 0x627   :  { %8119 = vmatprep.subr.bf16.mxu1 %v14189_v14  ;;  %v14252_v14 = vld [vmem:[%s18739_s3 + $0x7a4] ss:$8 sps:$4 sm:$0xff]  }
 0x62a   :  { %8120 = vmatpush1.bf16.msra.mxu1 %v14187_v57  ;;  %v14250_v57 = vld [vmem:[%s18739_s3 + $0x7a0] ss:$8 sps:$4 sm:$0xff]  }
 0x62b   :  { %8121 = vmatprep.subr.bf16.mxu1 %v14192_v53  ;;  %v14255_v53 = vld [vmem:[%s18739_s3 + $0x7b4] ss:$8 sps:$4 sm:$0xff]  }
 0x62d   :  { %7999 = vmatmul.mubr.bf16.gmra.mrb[128].mxu1 %v16884_v60 }
 0x62e   :  { %8008 = vmatprep.mubr.bf16.mxu1 %v16905_v52  ;;  %8122 = vmatpush1.bf16.msra.mxu1 %v14190_v44  ;;  %v14253_v44 = vld [vmem:[%s18739_s3 + $0x7b0] ss:$8 sps:$4 sm:$0xff]  }
 0x62f   :  { %8123 = vmatprep.subr.bf16.mxu1 %v14195_v33  ;;  %v14274_v33 = vld [vmem:[%s18740_s5 + $0xa0] ss:$8 sps:$4 sm:$0xff]  }
 0x632   :  { %8124 = vmatpush1.bf16.msra.mxu1 %v14193_v54  ;;  %v14276_v54 = vld [vmem:[%s18740_s5 + $0xa4] ss:$8 sps:$4 sm:$0xff]  }
 0x633   :  { %8125 = vmatprep.subr.bf16.mxu1 %v14198_v41  ;;  %v14258_v41 = vld [vmem:[%s18739_s3 + $0x7c4] ss:$8 sps:$4 sm:$0xff]   ;;  %8808 = vmatprep.subr.bf16.mxu0 %v14276_v54 }
 0x634   :  { %8809 = vmatpush1.bf16.msra.mxu0 %v14274_v33 }
 0x635   :  { %8009 = vmatmul.mubr.bf16.gmra.mrb[132].mxu1 %v16894_v62 }
 0x636   :  { %8018 = vmatprep.mubr.bf16.mxu1 %v16927_v11  ;;  %8126 = vmatpush1.bf16.msra.mxu1 %v14196_v46  ;;  %v14256_v46 = vld [vmem:[%s18739_s3 + $0x7c0] ss:$8 sps:$4 sm:$0xff]  }
 0x637   :  { %8127 = vmatprep.subr.bf16.mxu1 %v14201_v56  ;;  %v14261_v56 = vld [vmem:[%s18739_s3 + $0x7d4] ss:$8 sps:$4 sm:$0xff]  }
 0x63a   :  { %8128 = vmatpush1.bf16.msra.mxu1 %v14199_v32  ;;  %v14259_v32 = vld [vmem:[%s18739_s3 + $0x7d0] ss:$8 sps:$4 sm:$0xff]  }
 0x63b   :  { %8129 = vmatprep.subr.bf16.mxu1 %v14204_v19  ;;  %v14264_v19 = vld [vmem:[%s18739_s3 + $0x7e4] ss:$8 sps:$4 sm:$0xff]  }
 0x63d   :  { %8019 = vmatmul.mubr.bf16.gmra.mrb[136].mxu1 %v16905_v52 }
 0x63e   :  { %8028 = vmatprep.mubr.bf16.mxu1 %v16949_v10  ;;  %8130 = vmatpush1.bf16.msra.mxu1 %v14202_v55  ;;  %v14262_v55 = vld [vmem:[%s18739_s3 + $0x7e0] ss:$8 sps:$4 sm:$0xff]  }
 0x63f   :  { %8131 = vmatprep.subr.bf16.mxu1 %v14207_v15  ;;  %v14267_v15 = vld [vmem:[%s18739_s3 + $0x7f4] ss:$8 sps:$4 sm:$0xff]  }
 0x642   :  { %8132 = vmatpush1.bf16.msra.mxu1 %v14205_v39  ;;  %v14265_v39 = vld [vmem:[%s18739_s3 + $0x7f0] ss:$8 sps:$4 sm:$0xff]  }
 0x643   :  { %8133 = vmatprep.subr.bf16.mxu1 %v14210_v16  ;;  %v14277_v16 = vld [vmem:[%s18740_s5 + $0xb0] ss:$8 sps:$4 sm:$0xff]  }
 0x645   :  { %8029 = vmatmul.mubr.bf16.gmra.mrb[140].mxu1 %v16927_v11 }
 0x646   :  { %8038 = vmatprep.mubr.bf16.mxu1 %v16971_v61  ;;  %8134 = vmatpush1.bf16.msra.mxu1 %v14208_v29  ;;  %v14279_v29 = vld [vmem:[%s18740_s5 + $0xb4] ss:$8 sps:$4 sm:$0xff]  }
 0x647   :  { %8135 = vmatprep.subr.bf16.mxu1 %v14213_v50  ;;  %8810 = vmatprep.subr.bf16.mxu0 %v14279_v29  ;;  %v14280_v50 = vld [vmem:[%s18740_s5 + $0xc0] ss:$8 sps:$4 sm:$0xff]  }
 0x648   :  { %8811 = vmatpush1.bf16.msra.mxu0 %v14277_v16  ;;  %v14297_v16 = vld [vmem:[%s18740_s5 + $0x14] ss:$8 sps:$4 sm:$0xff]  }
 0x64a   :  { %8136 = vmatpush1.bf16.msra.mxu1 %v14211_v37  ;;  %v14282_v37 = vld [vmem:[%s18740_s5 + $0xc4] ss:$8 sps:$4 sm:$0xff]  }
 0x64b   :  { %8137 = vmatprep.subr.bf16.mxu1 %v14216_v8  ;;  %v14285_v8 = vld [vmem:[%s18740_s5 + $0xd4] ss:$8 sps:$4 sm:$0xff]   ;;  %8812 = vmatprep.subr.bf16.mxu0 %v14282_v37 }
 0x64c   :  { %8813 = vmatpush1.bf16.msra.mxu0 %v14280_v50 }
 0x64d   :  { %8039 = vmatmul.mubr.bf16.gmra.mrb[144].mxu1 %v16949_v10  ;;  %8814 = vmatprep.subr.bf16.mxu0 %v14285_v8 }
 0x64e   :  { %8048 = vmatprep.mubr.bf16.mxu1 %v16993_v1  ;;  %8138 = vmatpush1.bf16.msra.mxu1 %v14214_v5  ;;  %v14283_v5 = vld [vmem:[%s18740_s5 + $0xd0] ss:$8 sps:$4 sm:$0xff]  }
 0x64f   :  { %8139 = vmatprep.subr.bf16.mxu1 %v14219_v59  ;;  %v14288_v59 = vld [vmem:[%s18740_s5 + $0xe4] ss:$8 sps:$4 sm:$0xff]  }
 0x650   :  { %8815 = vmatpush1.bf16.msra.mxu0 %v14283_v5 }
 0x651   :  { %8816 = vmatprep.subr.bf16.mxu0 %v14288_v59 }
 0x652   :  { %8140 = vmatpush1.bf16.msra.mxu1 %v14217_v58  ;;  %v14286_v58 = vld [vmem:[%s18740_s5 + $0xe0] ss:$8 sps:$4 sm:$0xff]  }
 0x653   :  { %8282 = vmatprep.subr.bf16.mxu1 %v14222_v6  ;;  %v14291_v6 = vld [vmem:[%s18740_s5 + $0xf4] ss:$8 sps:$4 sm:$0xff]  }
 0x654   :  { %8817 = vmatpush1.bf16.msra.mxu0 %v14286_v58  ;;  %v14295_v58 = vld [vmem:[%s18740_s5 + $0x10] ss:$8 sps:$4 sm:$0xff]  }
 0x655   :  { %8049 = vmatmul.mubr.bf16.gmra.mrb[148].mxu1 %v16971_v61  ;;  %8818 = vmatprep.subr.bf16.mxu0 %v14291_v6 }
 0x656   :  { %8058 = vmatprep.mubr.bf16.mxu1 %v17015_v21 }
 0x658   :  { %8819 = vmatpush1.bf16.msra.mxu0 %v14289_v34 }
 0x65d   :  { %8059 = vmatmul.mubr.bf16.gmra.mrb[152].mxu1 %v16993_v1 }
 0x65e   :  { %8068 = vmatprep.mubr.bf16.mxu1 %v17037_v35 }
 0x665   :  { %8069 = vmatmul.mubr.bf16.gmra.mrb[156].mxu1 %v17015_v21 }
 0x666   :  { %8078 = vmatprep.mubr.bf16.mxu1 %v17059_v13 }
 0x66d   :  { %8079 = vmatmul.mubr.bf16.gmra.mrb[160].mxu1 %v17037_v35 }
 0x66e   :  { %8088 = vmatprep.mubr.bf16.mxu1 %v17081_v48 }
 0x675   :  { %8089 = vmatmul.mubr.bf16.gmra.mrb[164].mxu1 %v17059_v13 }
 0x676   :  { %8098 = vmatprep.mubr.bf16.mxu1 %v17091_v18 }
 0x67d   :  { %8099 = vmatmul.mubr.bf16.gmra.mrb[168].mxu1 %v17081_v48 }
 0x67e   :  { %8141 = vmatprep.mubr.bf16.mxu1 %v16884_v60 }
 0x685   :  { %8142 = vmatmul.mubr.bf16.vlgmr.msra.gmra.mrb[116].mxu1 %v16874_v3  ;;  %v14231_v3 = vld [vmem:[%s18739_s3 + $0x734] ss:$8 sps:$4 sm:$0xff]  }
 0x686   :  { %8151 = vmatprep.mubr.bf16.mxu1 %v16894_v62  ;;  %8283 = vmatpush1.bf16.msra.mxu1 %v14220_v24 }
 0x687   :  { %8284 = vmatprep.subr.bf16.mxu1 %v14225_v30 }
 0x68a   :  { %8285 = vmatpush1.bf16.msra.mxu1 %v14223_v20 }
 0x68b   :  { %8286 = vmatprep.subr.bf16.mxu1 %v14228_v51 }
 0x68d   :  { %8152 = vmatmul.mubr.bf16.gmra.mrb[120].mxu1 %v16884_v60  ;;  %v14234_v60 = vld [vmem:[%s18739_s3 + $0x744] ss:$8 sps:$4 sm:$0xff]  }
 0x68e   :  { %8161 = vmatprep.mubr.bf16.mxu1 %v16905_v52  ;;  %8287 = vmatpush1.bf16.msra.mxu1 %v14226_v4 }
 0x68f   :  { %8288 = vmatprep.subr.bf16.mxu1 %v14231_v3 }
 0x692   :  { %8289 = vmatpush1.bf16.msra.mxu1 %v14229_v7 }
 0x693   :  { %8290 = vmatprep.subr.bf16.mxu1 %v14234_v60 }
 0x695   :  { %8162 = vmatmul.mubr.bf16.gmra.mrb[124].mxu1 %v16894_v62 }
 0x696   :  { %8171 = vmatprep.mubr.bf16.mxu1 %v16927_v11  ;;  %8291 = vmatpush1.bf16.msra.mxu1 %v14232_v2 }
 0x697   :  { %8292 = vmatprep.subr.bf16.mxu1 %v14237_v49 }
 0x69a   :  { %8293 = vmatpush1.bf16.msra.mxu1 %v14235_v45 }
 0x69b   :  { %8294 = vmatprep.subr.bf16.mxu1 %v14240_v12 }
 0x69d   :  { %8172 = vmatmul.mubr.bf16.gmra.mrb[128].mxu1 %v16905_v52 }
 0x69e   :  { %8181 = vmatprep.mubr.bf16.mxu1 %v16949_v10  ;;  %8295 = vmatpush1.bf16.msra.mxu1 %v14238_v27 }
 0x69f   :  { %8296 = vmatprep.subr.bf16.mxu1 %v14243_v42 }
 0x6a2   :  { %8297 = vmatpush1.bf16.msra.mxu1 %v14241_v40 }
 0x6a3   :  { %8298 = vmatprep.subr.bf16.mxu1 %v14246_v22 }
 0x6a5   :  { %8182 = vmatmul.mubr.bf16.gmra.mrb[132].mxu1 %v16927_v11 }
 0x6a6   :  { %8191 = vmatprep.mubr.bf16.mxu1 %v16971_v61  ;;  %8299 = vmatpush1.bf16.msra.mxu1 %v14244_v36 }
 0x6a7   :  { %8300 = vmatprep.subr.bf16.mxu1 %v14249_v17 }
 0x6aa   :  { %8301 = vmatpush1.bf16.msra.mxu1 %v14247_v23 }
 0x6ab   :  { %8302 = vmatprep.subr.bf16.mxu1 %v14252_v14 }
 0x6ad   :  { %8192 = vmatmul.mubr.bf16.gmra.mrb[136].mxu1 %v16949_v10 }
 0x6ae   :  { %8201 = vmatprep.mubr.bf16.mxu1 %v16993_v1  ;;  %8303 = vmatpush1.bf16.msra.mxu1 %v14250_v57 }
 0x6af   :  { %8304 = vmatprep.subr.bf16.mxu1 %v14255_v53 }
 0x6b2   :  { %8305 = vmatpush1.bf16.msra.mxu1 %v14253_v44 }
 0x6b3   :  { %8306 = vmatprep.subr.bf16.mxu1 %v14258_v41 }
 0x6b5   :  { %8202 = vmatmul.mubr.bf16.gmra.mrb[140].mxu1 %v16971_v61 }
 0x6b6   :  { %8211 = vmatprep.mubr.bf16.mxu1 %v17015_v21  ;;  %8307 = vmatpush1.bf16.msra.mxu1 %v14256_v46 }
 0x6b7   :  { %8308 = vmatprep.subr.bf16.mxu1 %v14261_v56 }
 0x6ba   :  { %8309 = vmatpush1.bf16.msra.mxu1 %v14259_v32  ;;  %v14292_v32 = vld [vmem:[%s18740_s5] ss:$8 sps:$4 sm:$0xff]  }
 0x6bb   :  { %8310 = vmatprep.subr.bf16.mxu1 %v14264_v19 }
 0x6bd   :  { %8212 = vmatmul.mubr.bf16.gmra.mrb[144].mxu1 %v16993_v1 }
 0x6be   :  { %8221 = vmatprep.mubr.bf16.mxu1 %v17037_v35  ;;  %8311 = vmatpush1.bf16.msra.mxu1 %v14262_v55 }
 0x6bf   :  { %8312 = vmatprep.subr.bf16.mxu1 %v14267_v15 }
 0x6c2   :  { %8313 = vmatpush1.bf16.msra.mxu1 %v14265_v39 }
 0x6c5   :  { %8222 = vmatmul.mubr.bf16.gmra.mrb[148].mxu1 %v17015_v21 }
 0x6c6   :  { %8231 = vmatprep.mubr.bf16.mxu1 %v17059_v13 }
 0x6cd   :  { %8232 = vmatmul.mubr.bf16.gmra.mrb[152].mxu1 %v17037_v35 }
 0x6ce   :  { %8241 = vmatprep.mubr.bf16.mxu1 %v17081_v48 }
 0x6d5   :  { %8242 = vmatmul.mubr.bf16.gmra.mrb[156].mxu1 %v17059_v13 }
 0x6d6   :  { %8251 = vmatprep.mubr.bf16.mxu1 %v17091_v18 }
 0x6dd   :  { %8252 = vmatmul.mubr.bf16.gmra.mrb[160].mxu1 %v17081_v48 }
 0x6de   :  { %8261 = vmatprep.mubr.bf16.mxu1 %v17102_v0 }
 0x6e5   :  { %8262 = vmatmul.mubr.bf16.gmra.mrb[164].mxu1 %v17091_v18 }
 0x6e6   :  { %8271 = vmatprep.mubr.bf16.mxu1 %v17112_v26 }
 0x6ed   :  { %8272 = vmatmul.mubr.bf16.gmra.mrb[168].mxu1 %v17102_v0 }
 0x6ee   :  { %8314 = vmatprep.mubr.bf16.mxu1 %v16905_v52 }
 0x6f5   :  { %8315 = vmatmul.mubr.bf16.vlgmr.msra.gmra.mrb[116].mxu1 %v16894_v62  ;;  %v14294_v62 = vld [vmem:[%s18740_s5 + $0x4] ss:$8 sps:$4 sm:$0xff]  }
 0x6f6   :  { %8324 = vmatprep.mubr.bf16.mxu1 %v16927_v11  ;;  %9037 = vmatprep.subr.bf16.mxu0 %v14294_v62  ;;  %v14300_v62 = vld [vmem:[%s18740_s5 + $0x24] ss:$8 sps:$4 sm:$0xff]  }
 0x6fd   :  { %8325 = vmatmul.mubr.bf16.gmra.mrb[120].mxu1 %v16905_v52  ;;  %v5779_v52 = vld [vmem:[%s18741_s4] sm:$0x3] }
 0x6fe   :  { %8334 = vmatprep.mubr.bf16.mxu1 %v16949_v10 }
 0x705   :  { %8335 = vmatmul.mubr.bf16.gmra.mrb[124].mxu1 %v16927_v11  ;;  %v18849_v11 = vld [vmem:[#allocation6_spill] sm:$0xff] }
 0x706   :  { %8344 = vmatprep.mubr.bf16.mxu1 %v16971_v61 }
 0x70d   :  { %8345 = vmatmul.mubr.bf16.gmra.mrb[128].mxu1 %v16949_v10  ;;  %v17837_v10 = vrot.slane %v5779_v52, %v18849_v11 }
 0x70e   :  { %8354 = vmatprep.mubr.bf16.mxu1 %v16993_v1 }
 0x715   :  { %8355 = vmatmul.mubr.bf16.gmra.mrb[132].mxu1 %v16971_v61  ;;  %v18850_v61 = vld [vmem:[#allocation7_spill] sm:$0xff] }
 0x716   :  { %8364 = vmatprep.mubr.bf16.mxu1 %v17015_v21 }
 0x71d   :  { %8365 = vmatmul.mubr.bf16.gmra.mrb[136].mxu1 %v16993_v1  ;;  %v17840_v1 = vrot.slane %v5779_v52, %v18850_v61 }
 0x71e   :  { %8374 = vmatprep.mubr.bf16.mxu1 %v17037_v35 }
 0x725   :  { %8375 = vmatmul.mubr.bf16.gmra.mrb[140].mxu1 %v17015_v21 }
 0x726   :  { %8384 = vmatprep.mubr.bf16.mxu1 %v17059_v13 }
 0x72d   :  { %8385 = vmatmul.mubr.bf16.gmra.mrb[144].mxu1 %v17037_v35 }
 0x72e   :  { %8394 = vmatprep.mubr.bf16.mxu1 %v17081_v48 }
 0x735   :  { %8395 = vmatmul.mubr.bf16.gmra.mrb[148].mxu1 %v17059_v13 }
 0x736   :  { %8404 = vmatprep.mubr.bf16.mxu1 %v17091_v18 }
 0x73d   :  { %8405 = vmatmul.mubr.bf16.gmra.mrb[152].mxu1 %v17081_v48 }
 0x73e   :  { %8414 = vmatprep.mubr.bf16.mxu1 %v17102_v0 }
 0x745   :  { %8415 = vmatmul.mubr.bf16.gmra.mrb[156].mxu1 %v17091_v18 }
 0x746   :  { %8424 = vmatprep.mubr.bf16.mxu1 %v17112_v26 }
 0x74d   :  { %8425 = vmatmul.mubr.bf16.gmra.mrb[160].mxu1 %v17102_v0 }
 0x74e   :  { %8434 = vmatprep.mubr.bf16.mxu1 %v17122_v9 }
 0x755   :  { %8435 = vmatmul.mubr.bf16.gmra.mrb[164].mxu1 %v17112_v26 }
 0x756   :  { %8444 = vmatprep.mubr.bf16.mxu1 %v4821_v38 }
 0x75d   :  { %8445 = vmatmul.mubr.bf16.gmra.mrb[168].mxu1 %v17122_v9 }
 0x7c8   :  { %v8316_v21 = vpop.f32.mrb[116].mxu1 }
 0x7c9   :  { %v12657_v35 = vadd.f32 %v8316_v21, %v17837_v10  ;;  %v8318_v13 = vpop.f32.mrb[117].mxu1 }
 0x7ca   :  { %v12658_v48 = vadd.f32 %v8318_v13, %v17840_v1  ;;  %v8320_v18 = vpop.f32.mrb[118].mxu1 }
 0x7cb   :  { %vm8455_vm12 = vcmp.ge.f32.partialorder %v12657_v35, 0.0  ;;  %v8511_v0 = vmul.f32 0.01, %v12657_v35  ;;  %v12659_v26 = vadd.f32 %v8320_v18, %v17837_v10  ;;  %v8322_v9 = vpop.f32.mrb[119].mxu1 }
 0x7cc   :  { %vm8456_vm13 = vcmp.ge.f32.partialorder %v12658_v48, 0.0  ;;  %v8512_v47 = vmul.f32 0.01, %v12658_v48  ;;  %v12660_v28 = vadd.f32 %v8322_v9, %v17840_v1 }
 0x7cd   :  { %v8567_v38 = vsel %vm8455_vm12, %v12657_v35, %v8511_v0  ;;  %vm8457_vm14 = vcmp.ge.f32.partialorder %v12659_v26, 0.0  ;;  %v8513_v25 = vmul.f32 0.01, %v12659_v26 }
 0x7ce   :  { %v8568_v24 = vsel %vm8456_vm13, %v12658_v48, %v8512_v47  ;;  %vm8458_vm15 = vcmp.ge.f32.partialorder %v12660_v28, 0.0  ;;  %v8514_v30 = vmul.f32 0.01, %v12660_v28 }
 0x7cf   :  { %v17846_v20 = vadd.f32 %v8568_v24, %v8567_v38  ;;  %v8569_v51 = vsel %vm8457_vm14, %v12659_v26, %v8513_v25  ;;  %v14298_v26 = vld [vmem:[%s18740_s5 + $0x20] ss:$8 sps:$4 sm:$0xff]   ;;  %v14303_v25 = vld [vmem:[%s18740_s5 + $0x34] ss:$8 sps:$4 sm:$0xff]  }
 0x7d0   :  { %v8570_v4 = vsel %vm8458_vm15, %v12660_v28, %v8514_v30  ;;  %v8326_v3 = vpop.f32.mrb[120].mxu1 }
 0x7d1   :  { %v17848_v7 = vadd.f32 %v8570_v4, %v8569_v51  ;;  %v12661_v31 = vadd.f32 %v8326_v3, %v17837_v10  ;;  %v8328_v43 = vpop.f32.mrb[121].mxu1 }
 0x7d2   :  { %v12662_v60 = vadd.f32 %v8328_v43, %v17840_v1  ;;  %v8330_v2 = vpop.f32.mrb[122].mxu1  ;;  %v14301_v43 = vld [vmem:[%s18740_s5 + $0x30] ss:$8 sps:$4 sm:$0xff]  }
 0x7d3   :  { %v8651_v49 = vpack.c.bf16 %v17848_v7, %v17846_v20  ;;  %vm8459_vm0 = vcmp.ge.f32.partialorder %v12661_v31, 0.0  ;;  %v8515_v45 = vmul.f32 0.01, %v12661_v31  ;;  %v12663_v12 = vadd.f32 %v8330_v2, %v17837_v10  ;;  %v8332_v27 = vpop.f32.mrb[123].mxu1  ;;  %v14327_v20 = vld [vmem:[%s18740_s5 + $0x134] ss:$8 sps:$4 sm:$0xff]  }
 0x7d4   :  { %vm8460_vm1 = vcmp.ge.f32.partialorder %v12662_v60, 0.0  ;;  %v8516_v42 = vmul.f32 0.01, %v12662_v60  ;;  %v12664_v40 = vadd.f32 %v8332_v27, %v17840_v1  ;;  %v14325_v7 = vld [vmem:[%s18740_s5 + $0x130] ss:$8 sps:$4 sm:$0xff]  }
 0x7d5   :  { %v8571_v22 = vsel %vm8459_vm0, %v12661_v31, %v8515_v45  ;;  %vm8461_vm2 = vcmp.ge.f32.partialorder %v12663_v12, 0.0  ;;  %v8517_v36 = vmul.f32 0.01, %v12663_v12  ;;  %v14306_v45 = vld [vmem:[%s18740_s5 + $0x44] ss:$8 sps:$4 sm:$0xff]  }
 0x7d6   :  { %v8572_v17 = vsel %vm8460_vm1, %v12662_v60, %v8516_v42  ;;  %vm8462_vm3 = vcmp.ge.f32.partialorder %v12664_v40, 0.0  ;;  %v8518_v23 = vmul.f32 0.01, %v12664_v40 }
 0x7d7   :  { %v8625_v14 = vadd.f32 %v8572_v17, %v8571_v22  ;;  %v8573_v57 = vsel %vm8461_vm2, %v12663_v12, %v8517_v36 }
 0x7d8   :  { %v8574_v53 = vsel %vm8462_vm3, %v12664_v40, %v8518_v23  ;;  %v8336_v44 = vpop.f32.mrb[124].mxu1  ;;  %v14304_v23 = vld [vmem:[%s18740_s5 + $0x40] ss:$8 sps:$4 sm:$0xff]  }
 0x7d9   :  { %v8626_v33 = vadd.f32 %v8574_v53, %v8573_v57  ;;  %v12665_v54 = vadd.f32 %v8336_v44, %v17837_v10  ;;  %v8338_v41 = vpop.f32.mrb[125].mxu1 }
 0x7da   :  { %v12666_v46 = vadd.f32 %v8338_v41, %v17840_v1  ;;  %v8340_v56 = vpop.f32.mrb[126].mxu1 }
 0x7db   :  { %v17861_v19 = vpack.c.bf16 %v8626_v33, %v8625_v14  ;;  %vm8463_vm4 = vcmp.ge.f32.partialorder %v12665_v54, 0.0  ;;  %v8519_v55 = vmul.f32 0.01, %v12665_v54  ;;  %v12667_v15 = vadd.f32 %v8340_v56, %v17837_v10  ;;  %v8342_v39 = vpop.f32.mrb[127].mxu1  ;;  %v14309_v33 = vld [vmem:[%s18740_s5 + $0x54] ss:$8 sps:$4 sm:$0xff]  }
 0x7dc   :  { %vm8464_vm5 = vcmp.ge.f32.partialorder %v12666_v46, 0.0  ;;  %v8520_v29 = vmul.f32 0.01, %v12666_v46  ;;  %v12668_v50 = vadd.f32 %v8342_v39, %v17840_v1 }
 0x7dd   :  { %v8575_v37 = vsel %vm8463_vm4, %v12665_v54, %v8519_v55  ;;  %vm8465_vm6 = vcmp.ge.f32.partialorder %v12667_v15, 0.0  ;;  %v8521_v8 = vmul.f32 0.01, %v12667_v15  ;;  %8837 = vmatmul.mubr.bf16.vlgmr.msra.gmra.mrb[232].mxu0 %v17861_v19 }
 0x7de   :  { %v8576_v5 = vsel %vm8464_vm5, %v12666_v46, %v8520_v29  ;;  %vm8466_vm7 = vcmp.ge.f32.partialorder %v12668_v50, 0.0  ;;  %v8522_v59 = vmul.f32 0.01, %v12668_v50  ;;  %9038 = vmatpush1.bf16.msra.mxu0 %v14292_v32  ;;  %8846 = vmatprep.mubr.bf16.mxu0 %v18803_v63  ;;  %v14312_v29 = vld [vmem:[%s18740_s5 + $0x64] ss:$8 sps:$4 sm:$0xff]  }
 0x7df   :  { %v8577_v6 = vsel %vm8465_vm6, %v12667_v15, %v8521_v8  ;;  %v8627_v34 = vadd.f32 %v8576_v5, %v8575_v37  ;;  %9039 = vmatprep.subr.bf16.mxu0 %v14297_v16  ;;  %v14307_v15 = vld [vmem:[%s18740_s5 + $0x50] ss:$8 sps:$4 sm:$0xff]  }
 0x7e0   :  { %v8578_v52 = vsel %vm8466_vm7, %v12668_v50, %v8522_v59  ;;  %v8346_v21 = vpop.f32.mrb[128].mxu1 }
 0x7e1   :  { %v12669_v35 = vadd.f32 %v8346_v21, %v17837_v10  ;;  %v8348_v13 = vpop.f32.mrb[129].mxu1  ;;  %v8628_v48 = vadd.f32 %v8578_v52, %v8577_v6 }
 0x7e2   :  { %v12670_v18 = vadd.f32 %v8348_v13, %v17840_v1  ;;  %v8350_v0 = vpop.f32.mrb[130].mxu1  ;;  %9040 = vmatpush1.bf16.msra.mxu0 %v14295_v58  ;;  %v14315_v13 = vld [vmem:[%s18740_s5 + $0x74] ss:$8 sps:$4 sm:$0xff]  }
 0x7e3   :  { %vm8467_vm8 = vcmp.ge.f32.partialorder %v12669_v35, 0.0  ;;  %v8523_v9 = vmul.f32 0.01, %v12669_v35  ;;  %v12671_v47 = vadd.f32 %v8350_v0, %v17837_v10  ;;  %v8352_v28 = vpop.f32.mrb[131].mxu1  ;;  %v17882_v38 = vpack.c.bf16 %v8628_v48, %v8627_v34  ;;  %9041 = vmatprep.subr.bf16.mxu0 %v14300_v62  ;;  %v14310_v34 = vld [vmem:[%s18740_s5 + $0x60] ss:$8 sps:$4 sm:$0xff]  }
 0x7e4   :  { %vm8468_vm9 = vcmp.ge.f32.partialorder %v12670_v18, 0.0  ;;  %v8524_v24 = vmul.f32 0.01, %v12670_v18  ;;  %v12672_v30 = vadd.f32 %v8352_v28, %v17840_v1  ;;  %v14313_v28 = vld [vmem:[%s18740_s5 + $0x70] ss:$8 sps:$4 sm:$0xff]  }
 0x7e5   :  { %v8579_v51 = vsel %vm8467_vm8, %v12669_v35, %v8523_v9  ;;  %vm8469_vm10 = vcmp.ge.f32.partialorder %v12671_v47, 0.0  ;;  %v8525_v4 = vmul.f32 0.01, %v12671_v47  ;;  %8847 = vmatmul.mubr.bf16.gmra.mrb[236].mxu0 %v17882_v38 }
 0x7e6   :  { %v8580_v3 = vsel %vm8468_vm9, %v12670_v18, %v8524_v24  ;;  %vm8470_vm11 = vcmp.ge.f32.partialorder %v12672_v30, 0.0  ;;  %v8526_v31 = vmul.f32 0.01, %v12672_v30  ;;  %8856 = vmatprep.mubr.bf16.mxu0 %v18803_v63  ;;  %9042 = vmatpush1.bf16.msra.mxu0 %v14298_v26 }
 0x7e7   :  { %v8581_v60 = vsel %vm8469_vm10, %v12671_v47, %v8525_v4  ;;  %v8629_v2 = vadd.f32 %v8580_v3, %v8579_v51  ;;  %9043 = vmatprep.subr.bf16.mxu0 %v14303_v25 }
 0x7e8   :  { %v8582_v12 = vsel %vm8470_vm11, %v12672_v30, %v8526_v31  ;;  %v8356_v27 = vpop.f32.mrb[132].mxu1  ;;  %v14318_v30 = vld [vmem:[%s18740_s5 + $0x104] ss:$8 sps:$4 sm:$0xff]  }
 0x7e9   :  { %v12673_v42 = vadd.f32 %v8356_v27, %v17837_v10  ;;  %v8358_v40 = vpop.f32.mrb[133].mxu1  ;;  %v8630_v22 = vadd.f32 %v8582_v12, %v8581_v60 }
 0x7ea   :  { %v12674_v36 = vadd.f32 %v8358_v40, %v17840_v1  ;;  %v8360_v17 = vpop.f32.mrb[134].mxu1  ;;  %9044 = vmatpush1.bf16.msra.mxu0 %v14301_v43 }
 0x7eb   :  { %vm8471_vm12 = vcmp.ge.f32.partialorder %v12673_v42, 0.0  ;;  %v8527_v14 = vmul.f32 0.01, %v12673_v42  ;;  %v12675_v57 = vadd.f32 %v8360_v17, %v17837_v10  ;;  %v8362_v53 = vpop.f32.mrb[135].mxu1  ;;  %v17902_v44 = vpack.c.bf16 %v8630_v22, %v8629_v2  ;;  %9045 = vmatprep.subr.bf16.mxu0 %v14306_v45 }
 0x7ec   :  { %vm8472_vm13 = vcmp.ge.f32.partialorder %v12674_v36, 0.0  ;;  %v8528_v54 = vmul.f32 0.01, %v12674_v36  ;;  %v12676_v41 = vadd.f32 %v8362_v53, %v17840_v1 }
 0x7ed   :  { %v8583_v46 = vsel %vm8471_vm12, %v12673_v42, %v8527_v14  ;;  %vm8473_vm14 = vcmp.ge.f32.partialorder %v12675_v57, 0.0  ;;  %v8529_v56 = vmul.f32 0.01, %v12675_v57  ;;  %8857 = vmatmul.mubr.bf16.gmra.mrb[240].mxu0 %v17902_v44 }
 0x7ee   :  { %v8584_v32 = vsel %vm8472_vm13, %v12674_v36, %v8528_v54  ;;  %vm8474_vm15 = vcmp.ge.f32.partialorder %v12676_v41, 0.0  ;;  %v8530_v55 = vmul.f32 0.01, %v12676_v41  ;;  %8866 = vmatprep.mubr.bf16.mxu0 %v18803_v63  ;;  %9046 = vmatpush1.bf16.msra.mxu0 %v14304_v23 }
 0x7ef   :  { %v8585_v39 = vsel %vm8473_vm14, %v12675_v57, %v8529_v56  ;;  %v8631_v16 = vadd.f32 %v8584_v32, %v8583_v46  ;;  %9047 = vmatprep.subr.bf16.mxu0 %v14309_v33 }
 0x7f0   :  { %v8586_v50 = vsel %vm8474_vm15, %v12676_v41, %v8530_v55  ;;  %v8366_v37 = vpop.f32.mrb[136].mxu1 }
 0x7f1   :  { %v12677_v8 = vadd.f32 %v8366_v37, %v17837_v10  ;;  %v8368_v5 = vpop.f32.mrb[137].mxu1  ;;  %v8632_v59 = vadd.f32 %v8586_v50, %v8585_v39 }
 0x7f2   :  { %v12678_v58 = vadd.f32 %v8368_v5, %v17840_v1  ;;  %v8370_v6 = vpop.f32.mrb[138].mxu1  ;;  %9048 = vmatpush1.bf16.msra.mxu0 %v14307_v15 }
 0x7f3   :  { %vm8475_vm0 = vcmp.ge.f32.partialorder %v12677_v8, 0.0  ;;  %v8531_v62 = vmul.f32 0.01, %v12677_v8  ;;  %v12679_v52 = vadd.f32 %v8370_v6, %v17837_v10  ;;  %v8372_v21 = vpop.f32.mrb[139].mxu1  ;;  %v17922_v35 = vpack.c.bf16 %v8632_v59, %v8631_v16  ;;  %9049 = vmatprep.subr.bf16.mxu0 %v14312_v29 }
 0x7f4   :  { %vm8476_vm1 = vcmp.ge.f32.partialorder %v12678_v58, 0.0  ;;  %v8532_v48 = vmul.f32 0.01, %v12678_v58  ;;  %v12680_v18 = vadd.f32 %v8372_v21, %v17840_v1 }
 0x7f5   :  { %v8587_v0 = vsel %vm8475_vm0, %v12677_v8, %v8531_v62  ;;  %vm8477_vm2 = vcmp.ge.f32.partialorder %v12679_v52, 0.0  ;;  %v8533_v26 = vmul.f32 0.01, %v12679_v52  ;;  %8867 = vmatmul.mubr.bf16.gmra.mrb[244].mxu0 %v17922_v35 }
 0x7f6   :  { %v8588_v9 = vsel %vm8476_vm1, %v12678_v58, %v8532_v48  ;;  %vm8478_vm3 = vcmp.ge.f32.partialorder %v12680_v18, 0.0  ;;  %v8534_v47 = vmul.f32 0.01, %v12680_v18  ;;  %8876 = vmatprep.mubr.bf16.mxu0 %v18803_v63  ;;  %9050 = vmatpush1.bf16.msra.mxu0 %v14310_v34 }
 0x7f7   :  { %v8589_v25 = vsel %vm8477_vm2, %v12679_v52, %v8533_v26  ;;  %v8633_v24 = vadd.f32 %v8588_v9, %v8587_v0  ;;  %9051 = vmatprep.subr.bf16.mxu0 %v14315_v13 }
 0x7f8   :  { %v8590_v51 = vsel %vm8478_vm3, %v12680_v18, %v8534_v47  ;;  %v8376_v4 = vpop.f32.mrb[140].mxu1 }
 0x7f9   :  { %v12681_v3 = vadd.f32 %v8376_v4, %v17837_v10  ;;  %v8378_v31 = vpop.f32.mrb[141].mxu1  ;;  %v8634_v43 = vadd.f32 %v8590_v51, %v8589_v25 }
 0x7fa   :  { %v12682_v60 = vadd.f32 %v8378_v31, %v17840_v1  ;;  %v8380_v2 = vpop.f32.mrb[142].mxu1  ;;  %9052 = vmatpush1.bf16.msra.mxu0 %v14313_v28 }
 0x7fb   :  { %vm8479_vm4 = vcmp.ge.f32.partialorder %v12681_v3, 0.0  ;;  %v8535_v45 = vmul.f32 0.01, %v12681_v3  ;;  %v12683_v12 = vadd.f32 %v8380_v2, %v17837_v10  ;;  %v8382_v27 = vpop.f32.mrb[143].mxu1  ;;  %v17939_v42 = vpack.c.bf16 %v8634_v43, %v8633_v24  ;;  %9298 = vmatprep.subr.bf16.mxu0 %v14318_v30 }
 0x7fc   :  { %vm8480_vm5 = vcmp.ge.f32.partialorder %v12682_v60, 0.0  ;;  %v8536_v40 = vmul.f32 0.01, %v12682_v60  ;;  %v12684_v22 = vadd.f32 %v8382_v27, %v17840_v1 }
 0x7fd   :  { %v8591_v36 = vsel %vm8479_vm4, %v12681_v3, %v8535_v45  ;;  %vm8481_vm6 = vcmp.ge.f32.partialorder %v12683_v12, 0.0  ;;  %v8537_v17 = vmul.f32 0.01, %v12683_v12  ;;  %8877 = vmatmul.mubr.bf16.gmra.mrb[248].mxu0 %v17939_v42 }
 0x7fe   :  { %v8592_v23 = vsel %vm8480_vm5, %v12682_v60, %v8536_v40  ;;  %vm8482_vm7 = vcmp.ge.f32.partialorder %v12684_v22, 0.0  ;;  %v8538_v14 = vmul.f32 0.01, %v12684_v22  ;;  %8886 = vmatprep.mubr.bf16.mxu0 %v18803_v63 }
 0x7ff   :  { %v8593_v57 = vsel %vm8481_vm6, %v12683_v12, %v8537_v17  ;;  %v8635_v53 = vadd.f32 %v8592_v23, %v8591_v36 }
 0x800   :  { %v8594_v33 = vsel %vm8482_vm7, %v12684_v22, %v8538_v14  ;;  %v8386_v54 = vpop.f32.mrb[144].mxu1 }
 0x801   :  { %v12685_v41 = vadd.f32 %v8386_v54, %v17837_v10  ;;  %v8388_v46 = vpop.f32.mrb[145].mxu1  ;;  %v8636_v56 = vadd.f32 %v8594_v33, %v8593_v57 }
 0x802   :  { %v12686_v32 = vadd.f32 %v8388_v46, %v17840_v1  ;;  %v8390_v55 = vpop.f32.mrb[146].mxu1 }
 0x803   :  { %vm8483_vm8 = vcmp.ge.f32.partialorder %v12685_v41, 0.0  ;;  %v8539_v15 = vmul.f32 0.01, %v12685_v41  ;;  %v12687_v39 = vadd.f32 %v8390_v55, %v17837_v10  ;;  %v8392_v16 = vpop.f32.mrb[147].mxu1  ;;  %v17947_v29 = vpack.c.bf16 %v8636_v56, %v8635_v53 }
 0x804   :  { %vm8484_vm9 = vcmp.ge.f32.partialorder %v12686_v32, 0.0  ;;  %v8540_v50 = vmul.f32 0.01, %v12686_v32  ;;  %v12688_v37 = vadd.f32 %v8392_v16, %v17840_v1 }
 0x805   :  { %v8595_v8 = vsel %vm8483_vm8, %v12685_v41, %v8539_v15  ;;  %vm8485_vm10 = vcmp.ge.f32.partialorder %v12687_v39, 0.0  ;;  %v8541_v5 = vmul.f32 0.01, %v12687_v39  ;;  %8887 = vmatmul.mubr.bf16.gmra.mrb[252].mxu0 %v17947_v29 }
 0x806   :  { %v8596_v59 = vsel %vm8484_vm9, %v12686_v32, %v8540_v50  ;;  %vm8486_vm11 = vcmp.ge.f32.partialorder %v12688_v37, 0.0  ;;  %v8542_v58 = vmul.f32 0.01, %v12688_v37  ;;  %8896 = vmatprep.mubr.bf16.mxu0 %v18803_v63 }
 0x807   :  { %v8637_v6 = vadd.f32 %v8596_v59, %v8595_v8  ;;  %v8597_v34 = vsel %vm8485_vm10, %v12687_v39, %v8541_v5 }
 0x808   :  { %v8598_v62 = vsel %vm8486_vm11, %v12688_v37, %v8542_v58  ;;  %v8396_v52 = vpop.f32.mrb[148].mxu1 }
 0x809   :  { %v8638_v21 = vadd.f32 %v8598_v62, %v8597_v34  ;;  %v12689_v13 = vadd.f32 %v8396_v52, %v17837_v10  ;;  %v8398_v48 = vpop.f32.mrb[149].mxu1 }
 0x80a   :  { %v12690_v18 = vadd.f32 %v8398_v48, %v17840_v1  ;;  %v8400_v0 = vpop.f32.mrb[150].mxu1 }
 0x80b   :  { %v17954_v26 = vpack.c.bf16 %v8638_v21, %v8637_v6  ;;  %vm8487_vm12 = vcmp.ge.f32.partialorder %v12689_v13, 0.0  ;;  %v8543_v9 = vmul.f32 0.01, %v12689_v13  ;;  %v12691_v47 = vadd.f32 %v8400_v0, %v17837_v10  ;;  %v8402_v28 = vpop.f32.mrb[151].mxu1 }
 0x80c   :  { %vm8488_vm13 = vcmp.ge.f32.partialorder %v12690_v18, 0.0  ;;  %v8544_v25 = vmul.f32 0.01, %v12690_v18  ;;  %v12692_v24 = vadd.f32 %v8402_v28, %v17840_v1 }
 0x80d   :  { %v8599_v30 = vsel %vm8487_vm12, %v12689_v13, %v8543_v9  ;;  %vm8489_vm14 = vcmp.ge.f32.partialorder %v12691_v47, 0.0  ;;  %v8545_v51 = vmul.f32 0.01, %v12691_v47  ;;  %8897 = vmatmul.mubr.bf16.gmra.mrb[0].mxu0 %v17954_v26 }
 0x80e   :  { %v8600_v4 = vsel %vm8488_vm13, %v12690_v18, %v8544_v25  ;;  %vm8490_vm15 = vcmp.ge.f32.partialorder %v12692_v24, 0.0  ;;  %v8546_v3 = vmul.f32 0.01, %v12692_v24  ;;  %8906 = vmatprep.mubr.bf16.mxu0 %v18803_v63 }
 0x80f   :  { %v8639_v31 = vadd.f32 %v8600_v4, %v8599_v30  ;;  %v8601_v43 = vsel %vm8489_vm14, %v12691_v47, %v8545_v51 }
 0x810   :  { %v8602_v60 = vsel %vm8490_vm15, %v12692_v24, %v8546_v3  ;;  %v8406_v2 = vpop.f32.mrb[152].mxu1 }
 0x811   :  { %v8640_v45 = vadd.f32 %v8602_v60, %v8601_v43  ;;  %v12693_v12 = vadd.f32 %v8406_v2, %v17837_v10  ;;  %v8408_v27 = vpop.f32.mrb[153].mxu1 }
 0x812   :  { %v12694_v40 = vadd.f32 %v8408_v27, %v17840_v1  ;;  %v8410_v22 = vpop.f32.mrb[154].mxu1 }
 0x813   :  { %v17962_v36 = vpack.c.bf16 %v8640_v45, %v8639_v31  ;;  %vm8491_vm0 = vcmp.ge.f32.partialorder %v12693_v12, 0.0  ;;  %v8547_v17 = vmul.f32 0.01, %v12693_v12  ;;  %v12695_v23 = vadd.f32 %v8410_v22, %v17837_v10  ;;  %v8412_v14 = vpop.f32.mrb[155].mxu1 }
 0x814   :  { %vm8492_vm1 = vcmp.ge.f32.partialorder %v12694_v40, 0.0  ;;  %v8548_v57 = vmul.f32 0.01, %v12694_v40  ;;  %v12696_v53 = vadd.f32 %v8412_v14, %v17840_v1 }
 0x815   :  { %v8603_v33 = vsel %vm8491_vm0, %v12693_v12, %v8547_v17  ;;  %vm8493_vm2 = vcmp.ge.f32.partialorder %v12695_v23, 0.0  ;;  %v8549_v54 = vmul.f32 0.01, %v12695_v23  ;;  %8907 = vmatmul.mubr.bf16.gmra.mrb[4].mxu0 %v17962_v36 }
 0x816   :  { %v8604_v41 = vsel %vm8492_vm1, %v12694_v40, %v8548_v57  ;;  %vm8494_vm3 = vcmp.ge.f32.partialorder %v12696_v53, 0.0  ;;  %v8550_v46 = vmul.f32 0.01, %v12696_v53  ;;  %8916 = vmatprep.mubr.bf16.mxu0 %v18803_v63 }
 0x817   :  { %v8641_v56 = vadd.f32 %v8604_v41, %v8603_v33  ;;  %v8605_v32 = vsel %vm8493_vm2, %v12695_v23, %v8549_v54 }
 0x818   :  { %v8606_v55 = vsel %vm8494_vm3, %v12696_v53, %v8550_v46  ;;  %v8416_v15 = vpop.f32.mrb[156].mxu1 }
 0x819   :  { %v8642_v39 = vadd.f32 %v8606_v55, %v8605_v32  ;;  %v12697_v16 = vadd.f32 %v8416_v15, %v17837_v10  ;;  %v8418_v50 = vpop.f32.mrb[157].mxu1 }
 0x81a   :  { %v12698_v37 = vadd.f32 %v8418_v50, %v17840_v1  ;;  %v8420_v8 = vpop.f32.mrb[158].mxu1 }
 0x81b   :  { %v17970_v5 = vpack.c.bf16 %v8642_v39, %v8641_v56  ;;  %vm8495_vm4 = vcmp.ge.f32.partialorder %v12697_v16, 0.0  ;;  %v8551_v59 = vmul.f32 0.01, %v12697_v16  ;;  %v12699_v58 = vadd.f32 %v8420_v8, %v17837_v10  ;;  %v8422_v6 = vpop.f32.mrb[159].mxu1 }
 0x81c   :  { %vm8496_vm5 = vcmp.ge.f32.partialorder %v12698_v37, 0.0  ;;  %v8552_v34 = vmul.f32 0.01, %v12698_v37  ;;  %v12700_v62 = vadd.f32 %v8422_v6, %v17840_v1 }
 0x81d   :  { %v8607_v52 = vsel %vm8495_vm4, %v12697_v16, %v8551_v59  ;;  %vm8497_vm6 = vcmp.ge.f32.partialorder %v12699_v58, 0.0  ;;  %v8553_v21 = vmul.f32 0.01, %v12699_v58  ;;  %8917 = vmatmul.mubr.bf16.gmra.mrb[8].mxu0 %v17970_v5  ;;  %vm14538_vm4 = vmmov 0  }
 0x81e   :  { %v8608_v13 = vsel %vm8496_vm5, %v12698_v37, %v8552_v34  ;;  %vm8498_vm7 = vcmp.ge.f32.partialorder %v12700_v62, 0.0  ;;  %v8554_v48 = vmul.f32 0.01, %v12700_v62  ;;  %8926 = vmatprep.mubr.bf16.mxu0 %v18803_v63 }
 0x81f   :  { %v8643_v18 = vadd.f32 %v8608_v13, %v8607_v52  ;;  %v8609_v0 = vsel %vm8497_vm6, %v12699_v58, %v8553_v21 }
 0x820   :  { %v8610_v9 = vsel %vm8498_vm7, %v12700_v62, %v8554_v48  ;;  %v8426_v47 = vpop.f32.mrb[160].mxu1 }
 0x821   :  { %v8644_v28 = vadd.f32 %v8610_v9, %v8609_v0  ;;  %v12701_v25 = vadd.f32 %v8426_v47, %v17837_v10  ;;  %v8428_v24 = vpop.f32.mrb[161].mxu1 }
 0x822   :  { %v12702_v30 = vadd.f32 %v8428_v24, %v17840_v1  ;;  %v8430_v51 = vpop.f32.mrb[162].mxu1 }
 0x823   :  { %v17978_v4 = vpack.c.bf16 %v8644_v28, %v8643_v18  ;;  %vm8499_vm8 = vcmp.ge.f32.partialorder %v12701_v25, 0.0  ;;  %v8555_v3 = vmul.f32 0.01, %v12701_v25  ;;  %v12703_v31 = vadd.f32 %v8430_v51, %v17837_v10  ;;  %v8432_v43 = vpop.f32.mrb[163].mxu1 }
 0x824   :  { %vm8500_vm9 = vcmp.ge.f32.partialorder %v12702_v30, 0.0  ;;  %v8556_v60 = vmul.f32 0.01, %v12702_v30  ;;  %v12704_v2 = vadd.f32 %v8432_v43, %v17840_v1 }
 0x825   :  { %v8611_v45 = vsel %vm8499_vm8, %v12701_v25, %v8555_v3  ;;  %vm8501_vm10 = vcmp.ge.f32.partialorder %v12703_v31, 0.0  ;;  %v8557_v12 = vmul.f32 0.01, %v12703_v31  ;;  %8927 = vmatmul.mubr.bf16.gmra.mrb[12].mxu0 %v17978_v4 }
 0x826   :  { %v8612_v27 = vsel %vm8500_vm9, %v12702_v30, %v8556_v60  ;;  %vm8502_vm11 = vcmp.ge.f32.partialorder %v12704_v2, 0.0  ;;  %v8558_v40 = vmul.f32 0.01, %v12704_v2  ;;  %8936 = vmatprep.mubr.bf16.mxu0 %v18803_v63 }
 0x827   :  { %v8645_v22 = vadd.f32 %v8612_v27, %v8611_v45  ;;  %v8613_v17 = vsel %vm8501_vm10, %v12703_v31, %v8557_v12  ;;  %v14321_v45 = vld [vmem:[%s18740_s5 + $0x114] ss:$8 sps:$4 sm:$0xff]   ;;  %v14319_v12 = vld [vmem:[%s18740_s5 + $0x110] ss:$8 sps:$4 sm:$0xff]   ;;  %v14324_v27 = vld [vmem:[%s18740_s5 + $0x124] ss:$8 sps:$4 sm:$0xff]  }
 0x828   :  { %v8614_v23 = vsel %vm8502_vm11, %v12704_v2, %v8558_v40  ;;  %v8436_v14 = vpop.f32.mrb[164].mxu1  ;;  %v14322_v40 = vld [vmem:[%s18740_s5 + $0x120] ss:$8 sps:$4 sm:$0xff]  }
 0x829   :  { %v8646_v57 = vadd.f32 %v8614_v23, %v8613_v17  ;;  %v12705_v53 = vadd.f32 %v8436_v14, %v17837_v10  ;;  %v8438_v33 = vpop.f32.mrb[165].mxu1  ;;  %v14331_v17 = vld [vmem:[%s18740_s5 + $0x150] ss:$8 sps:$4 sm:$0xff]   ;;  %v14336_v23 = vld [vmem:[%s18740_s5 + $0x164] ss:$8 sps:$4 sm:$0xff]  }
 0x82a   :  { %v12706_v54 = vadd.f32 %v8438_v33, %v17840_v1  ;;  %v8440_v41 = vpop.f32.mrb[166].mxu1  ;;  %v14334_v14 = vld [vmem:[%s18740_s5 + $0x160] ss:$8 sps:$4 sm:$0xff]   ;;  %v14537_v33 = vmov 0.0  }
 0x82b   :  { %v17986_v46 = vpack.c.bf16 %v8646_v57, %v8645_v22  ;;  %vm8503_vm12 = vcmp.ge.f32.partialorder %v12705_v53, 0.0  ;;  %v8559_v56 = vmul.f32 0.01, %v12705_v53  ;;  %v12707_v32 = vadd.f32 %v8440_v41, %v17837_v10  ;;  %v8442_v55 = vpop.f32.mrb[167].mxu1  ;;  %v14328_v22 = vld [vmem:[%s18740_s5 + $0x140] ss:$8 sps:$4 sm:$0xff]   ;;  %12137 = vmatprep.subr.bf16.mxu1 %v14537_v33  ;;  %12153 = vmatprep.mubr.msk.bf16.mxu1 %vm14538_vm4, %v14537_v33 }
 0x82c   :  { %vm8504_vm13 = vcmp.ge.f32.partialorder %v12706_v54, 0.0  ;;  %v8560_v15 = vmul.f32 0.01, %v12706_v54  ;;  %v12708_v39 = vadd.f32 %v8442_v55, %v17840_v1  ;;  %v14339_v57 = vld [vmem:[%s18740_s5 + $0x174] ss:$8 sps:$4 sm:$0xff]   ;;  %v14341_v41 = vld [vmem:[%s18742_s7 + $0x48] sm:$0xff]  }
 0x82d   :  { %v8615_v16 = vsel %vm8503_vm12, %v12705_v53, %v8559_v56  ;;  %vm8505_vm14 = vcmp.ge.f32.partialorder %v12707_v32, 0.0  ;;  %v8561_v50 = vmul.f32 0.01, %v12707_v32  ;;  %8937 = vmatmul.mubr.bf16.gmra.mrb[16].mxu0 %v17986_v46  ;;  %v14337_v53 = vld [vmem:[%s18740_s5 + $0x170] ss:$8 sps:$4 sm:$0xff]   ;;  %v14345_v55 = vld [vmem:[%s18742_s7 + $0x68] sm:$0xff]  }
 0x82e   :  { %v8616_v37 = vsel %vm8504_vm13, %v12706_v54, %v8560_v15  ;;  %vm8506_vm15 = vcmp.ge.f32.partialorder %v12708_v39, 0.0  ;;  %v8562_v8 = vmul.f32 0.01, %v12708_v39  ;;  %8946 = vmatprep.mubr.bf16.mxu0 %v18803_v63  ;;  %v14340_v54 = vld [vmem:[%s18742_s7 + $0x40] sm:$0xff]   ;;  %v14342_v56 = vld [vmem:[%s18742_s7 + $0x50] sm:$0xff]  }
 0x82f   :  { %v8647_v59 = vadd.f32 %v8616_v37, %v8615_v16  ;;  %v8617_v58 = vsel %vm8505_vm14, %v12707_v32, %v8561_v50  ;;  %v14343_v32 = vld [vmem:[%s18742_s7 + $0x58] sm:$0xff]   ;;  %v9499_v15 = vld [vmem:[%s18743_s6] sm:$0x3] }
 0x830   :  { %v8618_v6 = vsel %vm8506_vm15, %v12708_v39, %v8562_v8  ;;  %v8446_v34 = vpop.f32.mrb[168].mxu1  ;;  %v18176_v39 = vrot.slane %v9499_v15, %v18849_v11  ;;  %v18179_v16 = vrot.slane %v9499_v15, %v18850_v61 }
 0x831   :  { %v8648_v62 = vadd.f32 %v8618_v6, %v8617_v58  ;;  %v12709_v52 = vadd.f32 %v8446_v34, %v17837_v10  ;;  %v8448_v21 = vpop.f32.mrb[169].mxu1 }
 0x832   :  { %v12710_v13 = vadd.f32 %v8448_v21, %v17840_v1  ;;  %v8450_v48 = vpop.f32.mrb[170].mxu1 }
 0x833   :  { %v17994_v18 = vpack.c.bf16 %v8648_v62, %v8647_v59  ;;  %vm8507_vm0 = vcmp.ge.f32.partialorder %v12709_v52, 0.0  ;;  %v8563_v0 = vmul.f32 0.01, %v12709_v52  ;;  %v12711_v9 = vadd.f32 %v8450_v48, %v17837_v10  ;;  %v8452_v47 = vpop.f32.mrb[171].mxu1 }
 0x834   :  { %vm8508_vm1 = vcmp.ge.f32.partialorder %v12710_v13, 0.0  ;;  %v8564_v28 = vmul.f32 0.01, %v12710_v13  ;;  %v12712_v25 = vadd.f32 %v8452_v47, %v17840_v1  ;;  %v14316_v1 = vld [vmem:[%s18740_s5 + $0x100] ss:$8 sps:$4 sm:$0xff]  }
 0x835   :  { %v8619_v24 = vsel %vm8507_vm0, %v12709_v52, %v8563_v0  ;;  %vm8509_vm2 = vcmp.ge.f32.partialorder %v12711_v9, 0.0  ;;  %v8565_v30 = vmul.f32 0.01, %v12711_v9  ;;  %8947 = vmatmul.mubr.bf16.gmra.mrb[20].mxu0 %v17994_v18 }
 0x836   :  { %v8620_v51 = vsel %vm8508_vm1, %v12710_v13, %v8564_v28  ;;  %vm8510_vm3 = vcmp.ge.f32.partialorder %v12712_v25, 0.0  ;;  %v8566_v3 = vmul.f32 0.01, %v12712_v25  ;;  %9069 = vmatprep.mubr.bf16.mxu0 %v18803_v63 }
 0x837   :  { %v18000_v31 = vadd.f32 %v8620_v51, %v8619_v24  ;;  %v8621_v43 = vsel %vm8509_vm2, %v12711_v9, %v8565_v30 }
 0x838   :  { %v8622_v60 = vsel %vm8510_vm3, %v12712_v25, %v8566_v3 }
 0x839   :  { %v18002_v10 = vadd.f32 %v8622_v60, %v8621_v43 }
 0x83b   :  { %v8664_v2 = vpack.c.bf16 %v18002_v10, %v18000_v31 }
 0x83d   :  { %9070 = vmatmul.mubr.bf16.vlgmr.msra.gmra.mrb[232].mxu0 %v8651_v49  ;;  %v14330_v49 = vld [vmem:[%s18740_s5 + $0x144] ss:$8 sps:$4 sm:$0xff]  }
 0x83e   :  { %9299 = vmatpush1.bf16.msra.mxu0 %v14316_v1  ;;  %9079 = vmatprep.mubr.bf16.mxu0 %v18803_v63 }
 0x83f   :  { %9300 = vmatprep.subr.bf16.mxu0 %v14321_v45 }
 0x842   :  { %9301 = vmatpush1.bf16.msra.mxu0 %v14319_v12 }
 0x843   :  { %9302 = vmatprep.subr.bf16.mxu0 %v14324_v27 }
 0x845   :  { %9080 = vmatmul.mubr.bf16.gmra.mrb[236].mxu0 %v17861_v19  ;;  %v14333_v19 = vld [vmem:[%s18740_s5 + $0x154] ss:$8 sps:$4 sm:$0xff]  }
 0x846   :  { %9089 = vmatprep.mubr.bf16.mxu0 %v18803_v63  ;;  %9303 = vmatpush1.bf16.msra.mxu0 %v14322_v40 }
 0x847   :  { %9304 = vmatprep.subr.bf16.mxu0 %v14327_v20 }
 0x84a   :  { %9305 = vmatpush1.bf16.msra.mxu0 %v14325_v7 }
 0x84b   :  { %9306 = vmatprep.subr.bf16.mxu0 %v14330_v49 }
 0x84d   :  { %9090 = vmatmul.mubr.bf16.gmra.mrb[240].mxu0 %v17882_v38 }
 0x84e   :  { %9099 = vmatprep.mubr.bf16.mxu0 %v18803_v63  ;;  %9307 = vmatpush1.bf16.msra.mxu0 %v14328_v22 }
 0x84f   :  { %9308 = vmatprep.subr.bf16.mxu0 %v14333_v19 }
 0x852   :  { %9309 = vmatpush1.bf16.msra.mxu0 %v14331_v17 }
 0x853   :  { %9310 = vmatprep.subr.bf16.mxu0 %v14336_v23 }
 0x855   :  { %9100 = vmatmul.mubr.bf16.gmra.mrb[244].mxu0 %v17902_v44 }
 0x856   :  { %9109 = vmatprep.mubr.bf16.mxu0 %v18803_v63  ;;  %9311 = vmatpush1.bf16.msra.mxu0 %v14334_v14 }
 0x857   :  { %9312 = vmatprep.subr.bf16.mxu0 %v14339_v57  ;;  %v14348_v57 = vld [vmem:[%s18742_s7] sm:$0xff]  }
 0x85a   :  { %9313 = vmatpush1.bf16.msra.mxu0 %v14337_v53 }
 0x85b   :  { %12037 = vmatprep.subr.bf16.mxu0 %v14537_v33 }
 0x85d   :  { %9110 = vmatmul.mubr.bf16.gmra.mrb[248].mxu0 %v17922_v35 }
 0x85e   :  { %9119 = vmatprep.mubr.bf16.mxu0 %v18803_v63 }
 0x865   :  { %9120 = vmatmul.mubr.bf16.gmra.mrb[252].mxu0 %v17939_v42 }
 0x866   :  { %9129 = vmatprep.mubr.bf16.mxu0 %v18803_v63 }
 0x86d   :  { %9130 = vmatmul.mubr.bf16.gmra.mrb[0].mxu0 %v17947_v29 }
 0x86e   :  { %9139 = vmatprep.mubr.bf16.mxu0 %v18803_v63 }
 0x875   :  { %9140 = vmatmul.mubr.bf16.gmra.mrb[4].mxu0 %v17954_v26 }
 0x876   :  { %9149 = vmatprep.mubr.bf16.mxu0 %v18803_v63 }
 0x87d   :  { %9150 = vmatmul.mubr.bf16.gmra.mrb[8].mxu0 %v17962_v36 }
 0x87e   :  { %9159 = vmatprep.mubr.bf16.mxu0 %v18803_v63 }
 0x885   :  { %9160 = vmatmul.mubr.bf16.gmra.mrb[12].mxu0 %v17970_v5 }
 0x886   :  { %9169 = vmatprep.mubr.bf16.mxu0 %v18803_v63 }
 0x88d   :  { %9170 = vmatmul.mubr.bf16.gmra.mrb[16].mxu0 %v17978_v4 }
 0x88e   :  { %9179 = vmatprep.mubr.bf16.mxu0 %v18803_v63 }
 0x895   :  { %9180 = vmatmul.mubr.bf16.gmra.mrb[20].mxu0 %v17986_v46 }
 0x896   :  { %9330 = vmatprep.mubr.bf16.mxu0 %v18803_v63 }
 0x89d   :  { %9331 = vmatmul.mubr.bf16.vlgmr.msra.gmra.mrb[232].mxu0 %v17882_v38  ;;  %v14344_v38 = vld [vmem:[%s18742_s7 + $0x60] sm:$0xff]  }
 0x89e   :  { %9340 = vmatprep.mubr.bf16.mxu0 %v18803_v63  ;;  %12038 = vmatpush3.bf16.msra.mxu0 %v14340_v54 }
 0x89f   :  { %12039 = vmatprep.subr.bf16.mxu0 %v14537_v33 }
 0x8a2   :  { %12040 = vmatpush3.bf16.msra.mxu0 %v14341_v41 }
 0x8a3   :  { %12041 = vmatprep.subr.bf16.mxu0 %v14537_v33 }
 0x8a5   :  { %9341 = vmatmul.mubr.bf16.gmra.mrb[236].mxu0 %v17902_v44  ;;  %v14346_v44 = vld [vmem:[%s18742_s7 + $0x70] sm:$0xff]  }
 0x8a6   :  { %9350 = vmatprep.mubr.bf16.mxu0 %v18803_v63  ;;  %12042 = vmatpush3.bf16.msra.mxu0 %v14342_v56 }
 0x8a7   :  { %12043 = vmatprep.subr.bf16.mxu0 %v14537_v33 }
 0x8aa   :  { %12044 = vmatpush3.bf16.msra.mxu0 %v14343_v32 }
 0x8ab   :  { %12045 = vmatprep.subr.bf16.mxu0 %v14537_v33 }
 0x8ad   :  { %9351 = vmatmul.mubr.bf16.gmra.mrb[240].mxu0 %v17922_v35  ;;  %v14347_v35 = vld [vmem:[%s18742_s7 + $0x78] sm:$0xff]  }
 0x8ae   :  { %9360 = vmatprep.mubr.bf16.mxu0 %v18803_v63  ;;  %12046 = vmatpush3.bf16.msra.mxu0 %v14344_v38 }
 0x8af   :  { %12047 = vmatprep.subr.bf16.mxu0 %v14537_v33 }
 0x8b2   :  { %12048 = vmatpush3.bf16.msra.mxu0 %v14345_v55 }
 0x8b3   :  { %12049 = vmatprep.subr.bf16.mxu0 %v14537_v33 }
 0x8b5   :  { %9361 = vmatmul.mubr.bf16.gmra.mrb[244].mxu0 %v17939_v42  ;;  %v14349_v42 = vld [vmem:[%s18742_s7 + $0x140] sm:$0xff]  }
 0x8b6   :  { %9370 = vmatprep.mubr.bf16.mxu0 %v18803_v63  ;;  %12050 = vmatpush3.bf16.msra.mxu0 %v14346_v44 }
 0x8b7   :  { %12051 = vmatprep.subr.bf16.mxu0 %v14537_v33  ;;  %12138 = vmatpush3.bf16.msra.mxu1 %v14349_v42 }
 0x8b8   :  { %12139 = vmatprep.subr.bf16.mxu1 %v14537_v33 }
 0x8ba   :  { %12052 = vmatpush3.bf16.msra.mxu0 %v14347_v35 }
 0x8bb   :  { %12057 = vmatprep.subr.bf16.mxu0 %v14537_v33 }
 0x8bd   :  { %9371 = vmatmul.mubr.bf16.gmra.mrb[248].mxu0 %v17947_v29  ;;  %v14353_v29 = vld [vmem:[%s18742_s7 + $0x150] sm:$0xff]  }
 0x8be   :  { %9380 = vmatprep.mubr.bf16.mxu0 %v18803_v63 }
 0x8c5   :  { %9381 = vmatmul.mubr.bf16.gmra.mrb[252].mxu0 %v17954_v26  ;;  %v14355_v26 = vld [vmem:[%s18742_s7 + $0x158] sm:$0xff]  }
 0x8c6   :  { %9390 = vmatprep.mubr.bf16.mxu0 %v18803_v63 }
 0x8cd   :  { %9391 = vmatmul.mubr.bf16.gmra.mrb[0].mxu0 %v17962_v36  ;;  %v14357_v36 = vld [vmem:[%s18742_s7 + $0x160] sm:$0xff]  }
 0x8ce   :  { %9400 = vmatprep.mubr.bf16.mxu0 %v18803_v63 }
 0x8d5   :  { %9401 = vmatmul.mubr.bf16.gmra.mrb[4].mxu0 %v17970_v5  ;;  %v14359_v5 = vld [vmem:[%s18742_s7 + $0x168] sm:$0xff]  }
 0x8d6   :  { %9410 = vmatprep.mubr.bf16.mxu0 %v18803_v63 }
 0x8dd   :  { %9411 = vmatmul.mubr.bf16.gmra.mrb[8].mxu0 %v17978_v4  ;;  %v14361_v4 = vld [vmem:[%s18742_s7 + $0x170] sm:$0xff]  }
 0x8de   :  { %9420 = vmatprep.mubr.bf16.mxu0 %v18803_v63 }
 0x8e5   :  { %9421 = vmatmul.mubr.bf16.gmra.mrb[12].mxu0 %v17986_v46  ;;  %v14363_v46 = vld [vmem:[%s18742_s7 + $0x178] sm:$0xff]  }
 0x8e6   :  { %9430 = vmatprep.mubr.bf16.mxu0 %v18803_v63 }
 0x8ed   :  { %9431 = vmatmul.mubr.bf16.gmra.mrb[16].mxu0 %v17994_v18 }
 0x8ee   :  { %9440 = vmatprep.mubr.bf16.mxu0 %v18803_v63  ;;  %v14351_v63 = vld [vmem:[%s18742_s7 + $0x148] sm:$0xff]  }
 0x8ef   :  { %12140 = vmatpush3.bf16.msra.mxu1 %v14351_v63  ;;  %v14350_v63 = vld [vmem:[%s18742_s7 + $0x8] sm:$0xff]  }
 0x8f0   :  { %12141 = vmatprep.subr.bf16.mxu1 %v14537_v33 }
 0x8f3   :  { %12142 = vmatpush3.bf16.msra.mxu1 %v14353_v29 }
 0x8f4   :  { %12143 = vmatprep.subr.bf16.mxu1 %v14537_v33 }
 0x8f5   :  { %9441 = vmatmul.mubr.bf16.gmra.mrb[20].mxu0 %v8664_v2 }
 0x8f6   :  { %12053 = vmatprep.mubr.msk.bf16.mxu0 %vm14538_vm4, %v14537_v33 }
 0x8f7   :  { %12144 = vmatpush3.bf16.msra.mxu1 %v14355_v26 }
 0x8f8   :  { %12145 = vmatprep.subr.bf16.mxu1 %v14537_v33 }
 0x8fb   :  { %12146 = vmatpush3.bf16.msra.mxu1 %v14357_v36 }
 0x8fc   :  { %12147 = vmatprep.subr.bf16.mxu1 %v14537_v33 }
 0x8ff   :  { %12148 = vmatpush3.bf16.msra.mxu1 %v14359_v5 }
 0x900   :  { %12149 = vmatprep.subr.bf16.mxu1 %v14537_v33 }
 0x903   :  { %12150 = vmatpush3.bf16.msra.mxu1 %v14361_v4 }
 0x904   :  { %12151 = vmatprep.subr.bf16.mxu1 %v14537_v33 }
 0x907   :  { %12152 = vmatpush3.bf16.msra.mxu1 %v14363_v46 }
 0x908   :  { %12177 = vmatprep.subr.bf16.mxu1 %v14537_v33 }
 0x970   :  { %v9332_v50 = vpop.f32.mrb[232].mxu0 }
 0x971   :  { %v9511_v37 = vadd.f32 %v18176_v39, %v9332_v50  ;;  %v9334_v8 = vpop.f32.mrb[233].mxu0 }
 0x972   :  { %v9512_v59 = vadd.f32 %v18179_v16, %v9334_v8  ;;  %v9336_v58 = vpop.f32.mrb[234].mxu0  ;;  %v14352_v8 = vld [vmem:[%s18742_s7 + $0x10] sm:$0xff]  }
 0x973   :  { %vm9559_vm5 = vcmp.ge.f32.partialorder %v9511_v37, 0.0  ;;  %v9607_v6 = vmul.f32 0.01, %v9511_v37  ;;  %v9513_v34 = vadd.f32 %v18176_v39, %v9336_v58  ;;  %v9338_v62 = vpop.f32.mrb[235].mxu0 }
 0x974   :  { %vm9560_vm6 = vcmp.ge.f32.partialorder %v9512_v59, 0.0  ;;  %v9608_v52 = vmul.f32 0.01, %v9512_v59  ;;  %v9514_v11 = vadd.f32 %v18179_v16, %v9338_v62 }
 0x975   :  { %v9655_v21 = vsel %vm9559_vm5, %v9511_v37, %v9607_v6  ;;  %vm9561_vm7 = vcmp.ge.f32.partialorder %v9513_v34, 0.0  ;;  %v9609_v61 = vmul.f32 0.01, %v9513_v34 }
 0x976   :  { %v9656_v13 = vsel %vm9560_vm6, %v9512_v59, %v9608_v52  ;;  %vm9562_vm8 = vcmp.ge.f32.partialorder %v9514_v11, 0.0  ;;  %v9610_v48 = vmul.f32 0.01, %v9514_v11 }
 0x977   :  { %v18185_v18 = vadd.f32 %v9656_v13, %v9655_v21  ;;  %v9657_v0 = vsel %vm9561_vm7, %v9513_v34, %v9609_v61 }
 0x978   :  { %v9658_v9 = vsel %vm9562_vm8, %v9514_v11, %v9610_v48  ;;  %v9342_v47 = vpop.f32.mrb[236].mxu0  ;;  %v14354_v48 = vld [vmem:[%s18742_s7 + $0x18] sm:$0xff]  }
 0x979   :  { %v18187_v28 = vadd.f32 %v9658_v9, %v9657_v0  ;;  %v9515_v25 = vadd.f32 %v18176_v39, %v9342_v47  ;;  %v9344_v24 = vpop.f32.mrb[237].mxu0 }
 0x97a   :  { %v9516_v30 = vadd.f32 %v18179_v16, %v9344_v24  ;;  %v9346_v51 = vpop.f32.mrb[238].mxu0 }
 0x97b   :  { %v9727_v3 = vpack.c.bf16 %v18187_v28, %v18185_v18  ;;  %vm9563_vm9 = vcmp.ge.f32.partialorder %v9515_v25, 0.0  ;;  %v9611_v31 = vmul.f32 0.01, %v9515_v25  ;;  %v9517_v43 = vadd.f32 %v18176_v39, %v9346_v51  ;;  %v9348_v60 = vpop.f32.mrb[239].mxu0 }
 0x97c   :  { %vm9564_vm10 = vcmp.ge.f32.partialorder %v9516_v30, 0.0  ;;  %v9612_v10 = vmul.f32 0.01, %v9516_v30  ;;  %v9518_v1 = vadd.f32 %v18179_v16, %v9348_v60  ;;  %v14356_v60 = vld [vmem:[%s18742_s7 + $0x20] sm:$0xff]  }
 0x97d   :  { %v9659_v2 = vsel %vm9563_vm9, %v9515_v25, %v9611_v31  ;;  %vm9565_vm11 = vcmp.ge.f32.partialorder %v9517_v43, 0.0  ;;  %v9613_v45 = vmul.f32 0.01, %v9517_v43 }
 0x97e   :  { %v9660_v12 = vsel %vm9564_vm10, %v9516_v30, %v9612_v10  ;;  %vm9566_vm12 = vcmp.ge.f32.partialorder %v9518_v1, 0.0  ;;  %v9614_v27 = vmul.f32 0.01, %v9518_v1 }
 0x97f   :  { %v9705_v40 = vadd.f32 %v9660_v12, %v9659_v2  ;;  %v9661_v20 = vsel %vm9565_vm11, %v9517_v43, %v9613_v45 }
 0x980   :  { %v9662_v7 = vsel %vm9566_vm12, %v9518_v1, %v9614_v27  ;;  %v9352_v49 = vpop.f32.mrb[240].mxu0 }
 0x981   :  { %v9706_v22 = vadd.f32 %v9662_v7, %v9661_v20  ;;  %v9519_v19 = vadd.f32 %v18176_v39, %v9352_v49  ;;  %v9354_v17 = vpop.f32.mrb[241].mxu0 }
 0x982   :  { %v9520_v23 = vadd.f32 %v18179_v16, %v9354_v17  ;;  %v9356_v14 = vpop.f32.mrb[242].mxu0 }
 0x983   :  { %v9728_v53 = vpack.c.bf16 %v9706_v22, %v9705_v40  ;;  %vm9567_vm13 = vcmp.ge.f32.partialorder %v9519_v19, 0.0  ;;  %v9615_v54 = vmul.f32 0.01, %v9519_v19  ;;  %v9521_v41 = vadd.f32 %v18176_v39, %v9356_v14  ;;  %v9358_v56 = vpop.f32.mrb[243].mxu0  ;;  %v14358_v22 = vld [vmem:[%s18742_s7 + $0x28] sm:$0xff]  }
 0x984   :  { %vm9568_vm14 = vcmp.ge.f32.partialorder %v9520_v23, 0.0  ;;  %v9616_v32 = vmul.f32 0.01, %v9520_v23  ;;  %v9522_v38 = vadd.f32 %v18179_v16, %v9358_v56 }
 0x985   :  { %v9663_v55 = vsel %vm9567_vm13, %v9519_v19, %v9615_v54  ;;  %vm9569_vm15 = vcmp.ge.f32.partialorder %v9521_v41, 0.0  ;;  %v9617_v44 = vmul.f32 0.01, %v9521_v41  ;;  %12054 = vmatmul.mubr.bf16.vlgmr.msra.gmra.mrb[24].mxu0 %v9728_v53 }
 0x986   :  { %v9664_v35 = vsel %vm9568_vm14, %v9520_v23, %v9616_v32  ;;  %vm9570_vm0 = vcmp.ge.f32.partialorder %v9522_v38, 0.0  ;;  %v9618_v42 = vmul.f32 0.01, %v9522_v38  ;;  %12058 = vmatpush3.bf16.msra.mxu0 %v14348_v57  ;;  %12073 = vmatprep.mubr.msk.bf16.mxu0 %vm14538_vm4, %v14537_v33  ;;  %v14360_v32 = vld [vmem:[%s18742_s7 + $0x30] sm:$0xff]  }
 0x987   :  { %v18207_v29 = vadd.f32 %v9664_v35, %v9663_v55  ;;  %v9665_v26 = vsel %vm9569_vm15, %v9521_v41, %v9617_v44  ;;  %12059 = vmatprep.subr.bf16.mxu0 %v14537_v33 }
 0x988   :  { %v9666_v36 = vsel %vm9570_vm0, %v9522_v38, %v9618_v42  ;;  %v9362_v5 = vpop.f32.mrb[244].mxu0 }
 0x989   :  { %v18210_v4 = vadd.f32 %v9666_v36, %v9665_v26  ;;  %v9523_v46 = vadd.f32 %v18176_v39, %v9362_v5  ;;  %v9364_v15 = vpop.f32.mrb[245].mxu0 }
 0x98a   :  { %v9524_v50 = vadd.f32 %v18179_v16, %v9364_v15  ;;  %12060 = vmatpush3.bf16.msra.mxu0 %v14350_v63  ;;  %v9366_v37 = vpop.f32.mrb[246].mxu0  ;;  %v14362_v15 = vld [vmem:[%s18742_s7 + $0x38] sm:$0xff]  }
 0x98b   :  { %v9729_v59 = vpack.c.bf16 %v18210_v4, %v18207_v29  ;;  %vm9571_vm1 = vcmp.ge.f32.partialorder %v9523_v46, 0.0  ;;  %v9619_v58 = vmul.f32 0.01, %v9523_v46  ;;  %v9525_v6 = vadd.f32 %v18176_v39, %v9366_v37  ;;  %v9368_v34 = vpop.f32.mrb[247].mxu0  ;;  %12061 = vmatprep.subr.bf16.mxu0 %v14537_v33 }
 0x98c   :  { %vm9572_vm2 = vcmp.ge.f32.partialorder %v9524_v50, 0.0  ;;  %v9620_v62 = vmul.f32 0.01, %v9524_v50  ;;  %v9526_v52 = vadd.f32 %v18179_v16, %v9368_v34 }
 0x98d   :  { %v9667_v11 = vsel %vm9571_vm1, %v9523_v46, %v9619_v58  ;;  %vm9573_vm3 = vcmp.ge.f32.partialorder %v9525_v6, 0.0  ;;  %v9621_v21 = vmul.f32 0.01, %v9525_v6 }
 0x98e   :  { %v9668_v61 = vsel %vm9572_vm2, %v9524_v50, %v9620_v62  ;;  %vm9574_vm5 = vcmp.ge.f32.partialorder %v9526_v52, 0.0  ;;  %v9622_v13 = vmul.f32 0.01, %v9526_v52  ;;  %12062 = vmatpush3.bf16.msra.mxu0 %v14352_v8 }
 0x98f   :  { %v18225_v0 = vadd.f32 %v9668_v61, %v9667_v11  ;;  %v9669_v9 = vsel %vm9573_vm3, %v9525_v6, %v9621_v21  ;;  %12063 = vmatprep.subr.bf16.mxu0 %v14537_v33  ;;  %v14364_v21 = vld [vmem:[%s18742_s7 + $0x80] sm:$0xff]  }
 0x990   :  { %v9670_v47 = vsel %vm9574_vm5, %v9526_v52, %v9622_v13  ;;  %v9372_v25 = vpop.f32.mrb[248].mxu0  ;;  %v14365_v61 = vld [vmem:[%s18742_s7 + $0x1c0] sm:$0xff]  }
 0x991   :  { %v18228_v24 = vadd.f32 %v9670_v47, %v9669_v9  ;;  %v9527_v30 = vadd.f32 %v18176_v39, %v9372_v25  ;;  %v9374_v51 = vpop.f32.mrb[249].mxu0 }
 0x992   :  { %v9528_v31 = vadd.f32 %v18179_v16, %v9374_v51  ;;  %12064 = vmatpush3.bf16.msra.mxu0 %v14354_v48  ;;  %v9376_v43 = vpop.f32.mrb[250].mxu0 }
 0x993   :  { %v9730_v10 = vpack.c.bf16 %v18228_v24, %v18225_v0  ;;  %vm9575_vm6 = vcmp.ge.f32.partialorder %v9527_v30, 0.0  ;;  %v9623_v1 = vmul.f32 0.01, %v9527_v30  ;;  %v9529_v2 = vadd.f32 %v18176_v39, %v9376_v43  ;;  %v9378_v45 = vpop.f32.mrb[251].mxu0  ;;  %12065 = vmatprep.subr.bf16.mxu0 %v14537_v33  ;;  %v14400_v0 = vld [vmem:[%s18742_s7 + $0x110] sm:$0xff]  }
 0x994   :  { %vm9576_vm7 = vcmp.ge.f32.partialorder %v9528_v31, 0.0  ;;  %v9624_v12 = vmul.f32 0.01, %v9528_v31  ;;  %v9530_v27 = vadd.f32 %v18179_v16, %v9378_v45  ;;  %v14401_v24 = vld [vmem:[%s18742_s7 + $0x2d0] sm:$0xff]  }
 0x995   :  { %v9671_v40 = vsel %vm9575_vm6, %v9527_v30, %v9623_v1  ;;  %vm9577_vm8 = vcmp.ge.f32.partialorder %v9529_v2, 0.0  ;;  %v9625_v20 = vmul.f32 0.01, %v9529_v2  ;;  %v14366_v1 = vld [vmem:[%s18742_s7 + $0x88] sm:$0xff]  }
 0x996   :  { %v9672_v7 = vsel %vm9576_vm7, %v9528_v31, %v9624_v12  ;;  %vm9578_vm9 = vcmp.ge.f32.partialorder %v9530_v27, 0.0  ;;  %v9626_v49 = vmul.f32 0.01, %v9530_v27  ;;  %12066 = vmatpush3.bf16.msra.mxu0 %v14356_v60 }
 0x997   :  { %v18243_v19 = vadd.f32 %v9672_v7, %v9671_v40  ;;  %v9673_v17 = vsel %vm9577_vm8, %v9529_v2, %v9625_v20  ;;  %12067 = vmatprep.subr.bf16.mxu0 %v14537_v33  ;;  %v14367_v2 = vld [vmem:[%s18742_s7 + $0x1c8] sm:$0xff]  }
 0x998   :  { %v9674_v23 = vsel %vm9578_vm9, %v9530_v27, %v9626_v49  ;;  %v9382_v14 = vpop.f32.mrb[252].mxu0  ;;  %v14368_v49 = vld [vmem:[%s18742_s7 + $0x90] sm:$0xff]  }
 0x999   :  { %v18246_v57 = vadd.f32 %v9674_v23, %v9673_v17  ;;  %v9531_v53 = vadd.f32 %v18176_v39, %v9382_v14  ;;  %v9384_v54 = vpop.f32.mrb[253].mxu0 }
 0x99a   :  { %v9532_v41 = vadd.f32 %v18179_v16, %v9384_v54  ;;  %12068 = vmatpush3.bf16.msra.mxu0 %v14358_v22  ;;  %v9386_v56 = vpop.f32.mrb[254].mxu0  ;;  %v14369_v22 = vld [vmem:[%s18742_s7 + $0x1d0] sm:$0xff]  }
 0x99b   :  { %v9731_v38 = vpack.c.bf16 %v18246_v57, %v18243_v19  ;;  %vm9579_vm10 = vcmp.ge.f32.partialorder %v9531_v53, 0.0  ;;  %v9627_v55 = vmul.f32 0.01, %v9531_v53  ;;  %v9533_v44 = vadd.f32 %v18176_v39, %v9386_v56  ;;  %v9388_v35 = vpop.f32.mrb[255].mxu0  ;;  %12069 = vmatprep.subr.bf16.mxu0 %v14537_v33  ;;  %v14414_v19 = vld [vmem:[%s18742_s7 + $0x190] sm:$0xff]   ;;  %v14415_v57 = vld [vmem:[%s18742_s7 + $0x198] sm:$0xff]  }
 0x99c   :  { %vm9580_vm11 = vcmp.ge.f32.partialorder %v9532_v41, 0.0  ;;  %v9628_v42 = vmul.f32 0.01, %v9532_v41  ;;  %v9534_v63 = vadd.f32 %v18179_v16, %v9388_v35  ;;  %v14370_v35 = vld [vmem:[%s18742_s7 + $0x98] sm:$0xff]  }
 0x99d   :  { %v9675_v26 = vsel %vm9579_vm10, %v9531_v53, %v9627_v55  ;;  %vm9581_vm12 = vcmp.ge.f32.partialorder %v9533_v44, 0.0  ;;  %v9629_v36 = vmul.f32 0.01, %v9533_v44 }
 0x99e   :  { %v9676_v5 = vsel %vm9580_vm11, %v9532_v41, %v9628_v42  ;;  %vm9582_vm13 = vcmp.ge.f32.partialorder %v9534_v63, 0.0  ;;  %v9630_v46 = vmul.f32 0.01, %v9534_v63  ;;  %12070 = vmatpush3.bf16.msra.mxu0 %v14360_v32  ;;  %v14371_v42 = vld [vmem:[%s18742_s7 + $0x1d8] sm:$0xff]  }
 0x99f   :  { %v9713_v50 = vadd.f32 %v9676_v5, %v9675_v26  ;;  %v9677_v37 = vsel %vm9581_vm12, %v9533_v44, %v9629_v36  ;;  %12071 = vmatprep.subr.bf16.mxu0 %v14537_v33 }
 0x9a0   :  { %v9678_v8 = vsel %vm9582_vm13, %v9534_v63, %v9630_v46  ;;  %v9392_v58 = vpop.f32.mrb[0].mxu0 }
 0x9a1   :  { %v9714_v6 = vadd.f32 %v9678_v8, %v9677_v37  ;;  %v9535_v34 = vadd.f32 %v18176_v39, %v9392_v58  ;;  %v9394_v62 = vpop.f32.mrb[1].mxu0  ;;  %v14372_v58 = vld [vmem:[%s18742_s7 + $0xa0] sm:$0xff]  }
 0x9a2   :  { %v9536_v52 = vadd.f32 %v18179_v16, %v9394_v62  ;;  %12072 = vmatpush3.bf16.msra.mxu0 %v14362_v15  ;;  %v9396_v11 = vpop.f32.mrb[2].mxu0 }
 0x9a3   :  { %v9732_v13 = vpack.c.bf16 %v9714_v6, %v9713_v50  ;;  %vm9583_vm14 = vcmp.ge.f32.partialorder %v9535_v34, 0.0  ;;  %v9631_v48 = vmul.f32 0.01, %v9535_v34  ;;  %v9537_v9 = vadd.f32 %v18176_v39, %v9396_v11  ;;  %v9398_v47 = vpop.f32.mrb[3].mxu0  ;;  %12077 = vmatprep.subr.bf16.mxu0 %v14537_v33  ;;  %v14373_v6 = vld [vmem:[%s18742_s7 + $0x1e0] sm:$0xff]  }
 0x9a4   :  { %vm9584_vm15 = vcmp.ge.f32.partialorder %v9536_v52, 0.0  ;;  %v9632_v25 = vmul.f32 0.01, %v9536_v52  ;;  %v9538_v30 = vadd.f32 %v18179_v16, %v9398_v47 }
 0x9a5   :  { %v9679_v51 = vsel %vm9583_vm14, %v9535_v34, %v9631_v48  ;;  %vm9585_vm0 = vcmp.ge.f32.partialorder %v9537_v9, 0.0  ;;  %v9633_v31 = vmul.f32 0.01, %v9537_v9  ;;  %12074 = vmatmul.mubr.bf16.vlgmr.msra.gmra.mrb[28].mxu0 %v9727_v3  ;;  %12154 = vmatmul.mubr.bf16.vlgmr.msra.gmra.mrb[172].mxu1 %v9732_v13 }
 0x9a6   :  { %v9680_v43 = vsel %vm9584_vm15, %v9536_v52, %v9632_v25  ;;  %vm9586_vm1 = vcmp.ge.f32.partialorder %v9538_v30, 0.0  ;;  %v9634_v60 = vmul.f32 0.01, %v9538_v30  ;;  %12078 = vmatpush3.bf16.msra.mxu0 %v14364_v21  ;;  %12178 = vmatpush3.bf16.msra.mxu1 %v14365_v61  ;;  %v14374_v25 = vld [vmem:[%s18742_s7 + $0xa8] sm:$0xff]  }
 0x9a7   :  { %v18282_v45 = vadd.f32 %v9680_v43, %v9679_v51  ;;  %v9681_v12 = vsel %vm9585_vm0, %v9537_v9, %v9633_v31  ;;  %12079 = vmatprep.subr.bf16.mxu0 %v14537_v33  ;;  %12179 = vmatprep.subr.bf16.mxu1 %v14537_v33 }
 0x9a8   :  { %v9682_v18 = vsel %vm9586_vm1, %v9538_v30, %v9634_v60  ;;  %v9402_v28 = vpop.f32.mrb[4].mxu0  ;;  %12093 = vmatprep.mubr.msk.bf16.mxu0 %vm14538_vm4, %v14537_v33  ;;  %12193 = vmatprep.mubr.msk.bf16.mxu1 %vm14538_vm4, %v14537_v33  ;;  %v14375_v30 = vld [vmem:[%s18742_s7 + $0x1e8] sm:$0xff]  }
 0x9a9   :  { %v18290_v3 = vadd.f32 %v9682_v18, %v9681_v12  ;;  %v9539_v27 = vadd.f32 %v18176_v39, %v9402_v28  ;;  %v9404_v40 = vpop.f32.mrb[5].mxu0 }
 0x9aa   :  { %v9540_v20 = vadd.f32 %v18179_v16, %v9404_v40  ;;  %12080 = vmatpush3.bf16.msra.mxu0 %v14366_v1  ;;  %12180 = vmatpush3.bf16.msra.mxu1 %v14367_v2  ;;  %v9406_v7 = vpop.f32.mrb[6].mxu0  ;;  %v14377_v40 = vld [vmem:[%s18742_s7 + $0x1f0] sm:$0xff]  }
 0x9ab   :  { %v9733_v17 = vpack.c.bf16 %v18290_v3, %v18282_v45  ;;  %vm9587_vm2 = vcmp.ge.f32.partialorder %v9539_v27, 0.0  ;;  %v9635_v23 = vmul.f32 0.01, %v9539_v27  ;;  %v9541_v14 = vadd.f32 %v18176_v39, %v9406_v7  ;;  %v9408_v53 = vpop.f32.mrb[7].mxu0  ;;  %12081 = vmatprep.subr.bf16.mxu0 %v14537_v33  ;;  %12181 = vmatprep.subr.bf16.mxu1 %v14537_v33  ;;  %v14423_v45 = vld [vmem:[%s18742_s7 + $0x218] sm:$0xff]   ;;  %v14424_v3 = vld [vmem:[%s18742_s7 + $0x220] sm:$0xff]  }
 0x9ac   :  { %vm9588_vm3 = vcmp.ge.f32.partialorder %v9540_v20, 0.0  ;;  %v9636_v54 = vmul.f32 0.01, %v9540_v20  ;;  %v9542_v41 = vadd.f32 %v18179_v16, %v9408_v53 }
 0x9ad   :  { %v9683_v56 = vsel %vm9587_vm2, %v9539_v27, %v9635_v23  ;;  %vm9589_vm5 = vcmp.ge.f32.partialorder %v9541_v14, 0.0  ;;  %v9637_v32 = vmul.f32 0.01, %v9541_v14  ;;  %v14376_v27 = vld [vmem:[%s18742_s7 + $0xb0] sm:$0xff]  }
 0x9ae   :  { %v9684_v55 = vsel %vm9588_vm3, %v9540_v20, %v9636_v54  ;;  %vm9590_vm6 = vcmp.ge.f32.partialorder %v9542_v41, 0.0  ;;  %v9638_v44 = vmul.f32 0.01, %v9542_v41  ;;  %12082 = vmatpush3.bf16.msra.mxu0 %v14368_v49  ;;  %12182 = vmatpush3.bf16.msra.mxu1 %v14369_v22 }
 0x9af   :  { %v18312_v63 = vadd.f32 %v9684_v55, %v9683_v56  ;;  %v9685_v26 = vsel %vm9589_vm5, %v9541_v14, %v9637_v32  ;;  %12083 = vmatprep.subr.bf16.mxu0 %v14537_v33  ;;  %12183 = vmatprep.subr.bf16.mxu1 %v14537_v33  ;;  %v14378_v32 = vld [vmem:[%s18742_s7 + $0xb8] sm:$0xff]  }
 0x9b0   :  { %v9686_v36 = vsel %vm9590_vm6, %v9542_v41, %v9638_v44  ;;  %v9412_v5 = vpop.f32.mrb[8].mxu0  ;;  %v14379_v55 = vld [vmem:[%s18742_s7 + $0x1f8] sm:$0xff]  }
 0x9b1   :  { %v18316_v46 = vadd.f32 %v9686_v36, %v9685_v26  ;;  %v9543_v15 = vadd.f32 %v18176_v39, %v9412_v5  ;;  %v9414_v50 = vpop.f32.mrb[9].mxu0 }
 0x9b2   :  { %v9544_v37 = vadd.f32 %v18179_v16, %v9414_v50  ;;  %12084 = vmatpush3.bf16.msra.mxu0 %v14370_v35  ;;  %12184 = vmatpush3.bf16.msra.mxu1 %v14371_v42  ;;  %v9416_v8 = vpop.f32.mrb[10].mxu0 }
 0x9b3   :  { %vm9591_vm7 = vcmp.ge.f32.partialorder %v9543_v15, 0.0  ;;  %v9639_v34 = vmul.f32 0.01, %v9543_v15  ;;  %v9545_v62 = vadd.f32 %v18176_v39, %v9416_v8  ;;  %v9418_v52 = vpop.f32.mrb[11].mxu0  ;;  %12085 = vmatprep.subr.bf16.mxu0 %v14537_v33  ;;  %12185 = vmatprep.subr.bf16.mxu1 %v14537_v33  ;;  %v9734_v11 = vpack.c.bf16 %v18316_v46, %v18312_v63  ;;  %v14380_v8 = vld [vmem:[%s18742_s7 + $0xc0] sm:$0xff]  }
 0x9b4   :  { %vm9592_vm8 = vcmp.ge.f32.partialorder %v9544_v37, 0.0  ;;  %v9640_v21 = vmul.f32 0.01, %v9544_v37  ;;  %v9546_v61 = vadd.f32 %v18179_v16, %v9418_v52 }
 0x9b5   :  { %v9687_v13 = vsel %vm9591_vm7, %v9543_v15, %v9639_v34  ;;  %vm9593_vm9 = vcmp.ge.f32.partialorder %v9545_v62, 0.0  ;;  %v9641_v48 = vmul.f32 0.01, %v9545_v62 }
 0x9b6   :  { %v9688_v9 = vsel %vm9592_vm8, %v9544_v37, %v9640_v21  ;;  %vm9594_vm10 = vcmp.ge.f32.partialorder %v9546_v61, 0.0  ;;  %v9642_v47 = vmul.f32 0.01, %v9546_v61  ;;  %12086 = vmatpush3.bf16.msra.mxu0 %v14372_v58  ;;  %12186 = vmatpush3.bf16.msra.mxu1 %v14373_v6  ;;  %v14381_v58 = vld [vmem:[%s18742_s7 + $0x240] sm:$0xff]  }
 0x9b7   :  { %v18338_v51 = vadd.f32 %v9688_v9, %v9687_v13  ;;  %v9689_v31 = vsel %vm9593_vm9, %v9545_v62, %v9641_v48  ;;  %12087 = vmatprep.subr.bf16.mxu0 %v14537_v33  ;;  %12187 = vmatprep.subr.bf16.mxu1 %v14537_v33 }
 0x9b8   :  { %v9690_v43 = vsel %vm9594_vm10, %v9546_v61, %v9642_v47  ;;  %v9422_v60 = vpop.f32.mrb[12].mxu0 }
 0x9b9   :  { %v18342_v1 = vadd.f32 %v9690_v43, %v9689_v31  ;;  %v9547_v2 = vadd.f32 %v18176_v39, %v9422_v60  ;;  %v9424_v12 = vpop.f32.mrb[13].mxu0 }
 0x9ba   :  { %v9548_v18 = vadd.f32 %v18179_v16, %v9424_v12  ;;  %12088 = vmatpush3.bf16.msra.mxu0 %v14374_v25  ;;  %12188 = vmatpush3.bf16.msra.mxu1 %v14375_v30  ;;  %v9426_v28 = vpop.f32.mrb[14].mxu0  ;;  %v14382_v25 = vld [vmem:[%s18742_s7 + $0xc8] sm:$0xff]   ;;  %v14385_v12 = vld [vmem:[%s18742_s7 + $0x250] sm:$0xff]  }
 0x9bb   :  { %v9735_v20 = vpack.c.bf16 %v18342_v1, %v18338_v51  ;;  %vm9595_vm11 = vcmp.ge.f32.partialorder %v9547_v2, 0.0  ;;  %v9643_v7 = vmul.f32 0.01, %v9547_v2  ;;  %v9549_v49 = vadd.f32 %v18176_v39, %v9426_v28  ;;  %v9428_v22 = vpop.f32.mrb[15].mxu0  ;;  %12089 = vmatprep.subr.bf16.mxu0 %v14537_v33  ;;  %12189 = vmatprep.subr.bf16.mxu1 %v14537_v33  ;;  %v14383_v30 = vld [vmem:[%s18742_s7 + $0x248] sm:$0xff]   ;;  %v14431_v51 = vld [vmem:[%s18742_s7 + $0x298] sm:$0xff]  }
 0x9bc   :  { %vm9596_vm12 = vcmp.ge.f32.partialorder %v9548_v18, 0.0  ;;  %v9644_v23 = vmul.f32 0.01, %v9548_v18  ;;  %v9550_v14 = vadd.f32 %v18179_v16, %v9428_v22  ;;  %v14432_v1 = vld [vmem:[%s18742_s7 + $0x2a0] sm:$0xff]  }
 0x9bd   :  { %v9691_v53 = vsel %vm9595_vm11, %v9547_v2, %v9643_v7  ;;  %vm9597_vm13 = vcmp.ge.f32.partialorder %v9549_v49, 0.0  ;;  %v9645_v54 = vmul.f32 0.01, %v9549_v49  ;;  %v14384_v2 = vld [vmem:[%s18742_s7 + $0xd0] sm:$0xff]   ;;  %vm11217_vm11 = vcmask 523264  }
 0x9be   :  { %v9692_v41 = vsel %vm9596_vm12, %v9548_v18, %v9644_v23  ;;  %vm9598_vm14 = vcmp.ge.f32.partialorder %v9550_v14, 0.0  ;;  %v9646_v56 = vmul.f32 0.01, %v9550_v14  ;;  %12090 = vmatpush3.bf16.msra.mxu0 %v14376_v27  ;;  %12190 = vmatpush3.bf16.msra.mxu1 %v14377_v40 }
 0x9bf   :  { %v18364_v44 = vadd.f32 %v9692_v41, %v9691_v53  ;;  %v9693_v35 = vsel %vm9597_vm13, %v9549_v49, %v9645_v54  ;;  %12091 = vmatprep.subr.bf16.mxu0 %v14537_v33  ;;  %12191 = vmatprep.subr.bf16.mxu1 %v14537_v33  ;;  %v14387_v54 = vld [vmem:[%s18742_s7 + $0x258] sm:$0xff]  }
 0x9c0   :  { %v9694_v42 = vsel %vm9598_vm14, %v9550_v14, %v9646_v56  ;;  %v9432_v26 = vpop.f32.mrb[16].mxu0 }
 0x9c1   :  { %v18368_v36 = vadd.f32 %v9694_v42, %v9693_v35  ;;  %v9551_v5 = vadd.f32 %v18176_v39, %v9432_v26  ;;  %v9434_v15 = vpop.f32.mrb[17].mxu0  ;;  %v14389_v35 = vld [vmem:[%s18742_s7 + $0x260] sm:$0xff]   ;;  %v14390_v26 = vld [vmem:[%s18742_s7 + $0xe8] sm:$0xff]  }
 0x9c2   :  { %v9552_v50 = vadd.f32 %v18179_v16, %v9434_v15  ;;  %12092 = vmatpush3.bf16.msra.mxu0 %v14378_v32  ;;  %12192 = vmatpush3.bf16.msra.mxu1 %v14379_v55  ;;  %v9436_v37 = vpop.f32.mrb[18].mxu0  ;;  %v14388_v55 = vld [vmem:[%s18742_s7 + $0xe0] sm:$0xff]   ;;  %v14392_v15 = vld [vmem:[%s18742_s7 + $0xf0] sm:$0xff]  }
 0x9c3   :  { %vm9599_vm15 = vcmp.ge.f32.partialorder %v9551_v5, 0.0  ;;  %v9647_v6 = vmul.f32 0.01, %v9551_v5  ;;  %v9553_v34 = vadd.f32 %v18176_v39, %v9436_v37  ;;  %v9438_v62 = vpop.f32.mrb[19].mxu0  ;;  %12097 = vmatprep.subr.bf16.mxu0 %v14537_v33  ;;  %12217 = vmatprep.subr.bf16.mxu1 %v14537_v33  ;;  %v9736_v52 = vpack.c.bf16 %v18368_v36, %v18364_v44  ;;  %v14394_v37 = vld [vmem:[%s18742_s7 + $0xf8] sm:$0xff]   ;;  %v14404_v36 = vld [vmem:[%s18742_s7 + $0x120] sm:$0xff]  }
 0x9c4   :  { %vm9600_vm0 = vcmp.ge.f32.partialorder %v9552_v50, 0.0  ;;  %v9648_v21 = vmul.f32 0.01, %v9552_v50  ;;  %v9554_v61 = vadd.f32 %v18179_v16, %v9438_v62  ;;  %v14399_v62 = vld [vmem:[%s18742_s7 + $0x2c8] sm:$0xff]   ;;  %v14403_v44 = vld [vmem:[%s18742_s7 + $0x2d8] sm:$0xff]  }
 0x9c5   :  { %v9695_v13 = vsel %vm9599_vm15, %v9551_v5, %v9647_v6  ;;  %vm9601_vm1 = vcmp.ge.f32.partialorder %v9553_v34, 0.0  ;;  %v9649_v48 = vmul.f32 0.01, %v9553_v34  ;;  %12094 = vmatmul.mubr.bf16.vlgmr.msra.gmra.mrb[32].mxu0 %v9729_v59  ;;  %12194 = vmatmul.mubr.bf16.vlgmr.msra.gmra.mrb[176].mxu1 %v9734_v11  ;;  %v14391_v5 = vld [vmem:[%s18742_s7 + $0x268] sm:$0xff]   ;;  %v14397_v6 = vld [vmem:[%s18742_s7 + $0x2c0] sm:$0xff]  }
 0x9c6   :  { %v9696_v9 = vsel %vm9600_vm0, %v9552_v50, %v9648_v21  ;;  %vm9602_vm2 = vcmp.ge.f32.partialorder %v9554_v61, 0.0  ;;  %v9650_v47 = vmul.f32 0.01, %v9554_v61  ;;  %12098 = vmatpush3.bf16.msra.mxu0 %v14380_v8  ;;  %12218 = vmatpush3.bf16.msra.mxu1 %v14381_v58  ;;  %v14393_v50 = vld [vmem:[%s18742_s7 + $0x270] sm:$0xff]   ;;  %v14395_v8 = vld [vmem:[%s18742_s7 + $0x278] sm:$0xff]   ;;  %v14396_v58 = vld [vmem:[%s18742_s7 + $0x100] sm:$0xff]  }
 0x9c7   :  { %v18396_v31 = vadd.f32 %v9696_v9, %v9695_v13  ;;  %v9697_v29 = vsel %vm9601_vm1, %v9553_v34, %v9649_v48  ;;  %12099 = vmatprep.subr.bf16.mxu0 %v14537_v33  ;;  %12219 = vmatprep.subr.bf16.mxu1 %v14537_v33  ;;  %v14398_v34 = vld [vmem:[%s18742_s7 + $0x108] sm:$0xff]   ;;  %v14408_v13 = vld [vmem:[%s18742_s7 + $0x130] sm:$0xff]   ;;  %v14410_v9 = vld [vmem:[%s18742_s7 + $0x138] sm:$0xff]  }
 0x9c8   :  { %v9698_v4 = vsel %vm9602_vm2, %v9554_v61, %v9650_v47  ;;  %v9442_v59 = vpop.f32.mrb[20].mxu0  ;;  %12113 = vmatprep.mubr.msk.bf16.mxu0 %vm14538_vm4, %v14537_v33  ;;  %12233 = vmatprep.mubr.msk.bf16.mxu1 %vm14538_vm4, %v14537_v33  ;;  %v14406_v21 = vld [vmem:[%s18742_s7 + $0x128] sm:$0xff]   ;;  %v14409_v48 = vld [vmem:[%s18742_s7 + $0x2f0] sm:$0xff]   ;;  %v14411_v47 = vld [vmem:[%s18742_s7 + $0x2f8] sm:$0xff]  }
 0x9c9   :  { %v18404_v63 = vadd.f32 %v9698_v4, %v9697_v29  ;;  %v9555_v46 = vadd.f32 %v18176_v39, %v9442_v59  ;;  %v9444_v11 = vpop.f32.mrb[21].mxu0  ;;  %v14407_v61 = vld [vmem:[%s18742_s7 + $0x2e8] sm:$0xff]   ;;  %v14418_v4 = vld [vmem:[%s18742_s7 + $0x1b0] sm:$0xff]   ;;  %v14419_v59 = vld [vmem:[%s18742_s7 + $0x1b8] sm:$0xff]  }
 0x9ca   :  { %v9556_v43 = vadd.f32 %v18179_v16, %v9444_v11  ;;  %12100 = vmatpush3.bf16.msra.mxu0 %v14382_v25  ;;  %12220 = vmatpush3.bf16.msra.mxu1 %v14383_v30  ;;  %v9446_v60 = vpop.f32.mrb[22].mxu0  ;;  %v14412_v25 = vld [vmem:[%s18742_s7 + $0x180] sm:$0xff]   ;;  %v14413_v30 = vld [vmem:[%s18742_s7 + $0x188] sm:$0xff]  }
 0x9cb   :  { %v9737_v18 = vpack.c.bf16 %v18404_v63, %v18396_v31  ;;  %vm9603_vm3 = vcmp.ge.f32.partialorder %v9555_v46, 0.0  ;;  %v9651_v28 = vmul.f32 0.01, %v9555_v46  ;;  %v9557_v27 = vadd.f32 %v18176_v39, %v9446_v60  ;;  %v9448_v40 = vpop.f32.mrb[23].mxu0  ;;  %12101 = vmatprep.subr.bf16.mxu0 %v14537_v33  ;;  %12221 = vmatprep.subr.bf16.mxu1 %v14537_v33  ;;  %v14386_v39 = vld [vmem:[%s18742_s7 + $0xd8] sm:$0xff]   ;;  %v14417_v29 = vld [vmem:[%s18742_s7 + $0x1a8] sm:$0xff]  }
 0x9cc   :  { %vm9604_vm5 = vcmp.ge.f32.partialorder %v9556_v43, 0.0  ;;  %v9652_v7 = vmul.f32 0.01, %v9556_v43  ;;  %v9558_v49 = vadd.f32 %v18179_v16, %v9448_v40  ;;  %v14421_v11 = vld [vmem:[%s18742_s7 + $0x208] sm:$0xff]   ;;  %v14426_v60 = vld [vmem:[%s18742_s7 + $0x230] sm:$0xff]  }
 0x9cd   :  { %v9699_v22 = vsel %vm9603_vm3, %v9555_v46, %v9651_v28  ;;  %vm9605_vm6 = vcmp.ge.f32.partialorder %v9557_v27, 0.0  ;;  %v9653_v23 = vmul.f32 0.01, %v9557_v27  ;;  %v14420_v46 = vld [vmem:[%s18742_s7 + $0x200] sm:$0xff]   ;;  %v14429_v28 = vld [vmem:[%s18742_s7 + $0x288] sm:$0xff]  }
 0x9ce   :  { %v9700_v14 = vsel %vm9604_vm5, %v9556_v43, %v9652_v7  ;;  %vm9606_vm7 = vcmp.ge.f32.partialorder %v9558_v49, 0.0  ;;  %v9654_v53 = vmul.f32 0.01, %v9558_v49  ;;  %12102 = vmatpush3.bf16.msra.mxu0 %v14384_v2  ;;  %12222 = vmatpush3.bf16.msra.mxu1 %v14385_v12  ;;  %v14422_v43 = vld [vmem:[%s18742_s7 + $0x210] sm:$0xff]   ;;  %v14427_v2 = vld [vmem:[%s18742_s7 + $0x238] sm:$0xff]   ;;  %v14428_v12 = vld [vmem:[%s18742_s7 + $0x280] sm:$0xff]  }
 0x9cf   :  { %v18426_v41 = vadd.f32 %v9700_v14, %v9699_v22  ;;  %v9701_v56 = vsel %vm9605_vm6, %v9557_v27, %v9653_v23  ;;  %12103 = vmatprep.subr.bf16.mxu0 %v14537_v33  ;;  %12223 = vmatprep.subr.bf16.mxu1 %v14537_v33  ;;  %v14430_v27 = vld [vmem:[%s18742_s7 + $0x290] sm:$0xff]   ;;  %v14435_v14 = vld [vmem:[%s18742_s7 + $0x2b8] sm:$0xff]  }
 0x9d0   :  { %v9702_v16 = vsel %vm9606_vm7, %v9558_v49, %v9654_v53  ;;  %v14434_v22 = vld [vmem:[%s18742_s7 + $0x2b0] sm:$0xff]  }
 0x9d1   :  { %v18430_v32 = vadd.f32 %v9702_v16, %v9701_v56 }
 0x9d2   :  { %12104 = vmatpush3.bf16.msra.mxu0 %v14386_v39  ;;  %12224 = vmatpush3.bf16.msra.mxu1 %v14387_v54 }
 0x9d3   :  { %12105 = vmatprep.subr.bf16.mxu0 %v14537_v33  ;;  %12225 = vmatprep.subr.bf16.mxu1 %v14537_v33  ;;  %v9738_v42 = vpack.c.bf16 %v18430_v32, %v18426_v41 }
 0x9d6   :  { %12106 = vmatpush3.bf16.msra.mxu0 %v14388_v55  ;;  %12226 = vmatpush3.bf16.msra.mxu1 %v14389_v35 }
 0x9d7   :  { %12107 = vmatprep.subr.bf16.mxu0 %v14537_v33  ;;  %12227 = vmatprep.subr.bf16.mxu1 %v14537_v33 }
 0x9da   :  { %12108 = vmatpush3.bf16.msra.mxu0 %v14390_v26  ;;  %12228 = vmatpush3.bf16.msra.mxu1 %v14391_v5 }
 0x9db   :  { %12109 = vmatprep.subr.bf16.mxu0 %v14537_v33  ;;  %12229 = vmatprep.subr.bf16.mxu1 %v14537_v33 }
 0x9de   :  { %12110 = vmatpush3.bf16.msra.mxu0 %v14392_v15  ;;  %12230 = vmatpush3.bf16.msra.mxu1 %v14393_v50 }
 0x9df   :  { %12111 = vmatprep.subr.bf16.mxu0 %v14537_v33  ;;  %12231 = vmatprep.subr.bf16.mxu1 %v14537_v33 }
 0x9e2   :  { %12112 = vmatpush3.bf16.msra.mxu0 %v14394_v37  ;;  %12232 = vmatpush3.bf16.msra.mxu1 %v14395_v8 }
 0x9e3   :  { %12117 = vmatprep.subr.bf16.mxu0 %v14537_v33  ;;  %12257 = vmatprep.subr.bf16.mxu1 %v14537_v33 }
 0x9e5   :  { %12114 = vmatmul.mubr.bf16.vlgmr.msra.gmra.mrb[36].mxu0 %v9730_v10  ;;  %12234 = vmatmul.mubr.bf16.vlgmr.msra.gmra.mrb[180].mxu1 %v9736_v52  ;;  %v14402_v10 = vld [vmem:[%s18742_s7 + $0x118] sm:$0xff]   ;;  %v14405_v52 = vld [vmem:[%s18742_s7 + $0x2e0] sm:$0xff]  }
 0x9e6   :  { %12118 = vmatpush3.bf16.msra.mxu0 %v14396_v58  ;;  %12258 = vmatpush3.bf16.msra.mxu1 %v14397_v6  ;;  %v14436_v6 = vld [vmem:[%s18744_s9] sm:$0xff]  }
 0x9e7   :  { %12119 = vmatprep.subr.bf16.mxu0 %v14537_v33  ;;  %12259 = vmatprep.subr.bf16.mxu1 %v14537_v33 }
 0x9e8   :  { %12133 = vmatprep.mubr.msk.bf16.mxu0 %vm14538_vm4, %v14537_v33  ;;  %12273 = vmatprep.mubr.msk.bf16.mxu1 %vm14538_vm4, %v14537_v33 }
 0x9ea   :  { %12120 = vmatpush3.bf16.msra.mxu0 %v14398_v34  ;;  %12260 = vmatpush3.bf16.msra.mxu1 %v14399_v62  ;;  %v14437_v34 = vld [vmem:[%s18744_s9 + $0x8] sm:$0xff]   ;;  %v14438_v62 = vld [vmem:[%s18744_s9 + $0x10] sm:$0xff]  }
 0x9eb   :  { %12121 = vmatprep.subr.bf16.mxu0 %v14537_v33  ;;  %12261 = vmatprep.subr.bf16.mxu1 %v14537_v33 }
 0x9ee   :  { %12122 = vmatpush3.bf16.msra.mxu0 %v14400_v0  ;;  %12262 = vmatpush3.bf16.msra.mxu1 %v14401_v24  ;;  %v14439_v0 = vld [vmem:[%s18744_s9 + $0x18] sm:$0xff]   ;;  %v14440_v24 = vld [vmem:[%s18744_s9 + $0x20] sm:$0xff]  }
 0x9ef   :  { %12123 = vmatprep.subr.bf16.mxu0 %v14537_v33  ;;  %12263 = vmatprep.subr.bf16.mxu1 %v14537_v33 }
 0x9f2   :  { %12124 = vmatpush3.bf16.msra.mxu0 %v14402_v10  ;;  %12264 = vmatpush3.bf16.msra.mxu1 %v14403_v44 }
 0x9f3   :  { %12125 = vmatprep.subr.bf16.mxu0 %v14537_v33  ;;  %12265 = vmatprep.subr.bf16.mxu1 %v14537_v33 }
 0x9f6   :  { %12126 = vmatpush3.bf16.msra.mxu0 %v14404_v36  ;;  %12266 = vmatpush3.bf16.msra.mxu1 %v14405_v52 }
 0x9f7   :  { %12127 = vmatprep.subr.bf16.mxu0 %v14537_v33  ;;  %12267 = vmatprep.subr.bf16.mxu1 %v14537_v33 }
 0x9fa   :  { %12128 = vmatpush3.bf16.msra.mxu0 %v14406_v21  ;;  %12268 = vmatpush3.bf16.msra.mxu1 %v14407_v61 }
 0x9fb   :  { %12129 = vmatprep.subr.bf16.mxu0 %v14537_v33  ;;  %12269 = vmatprep.subr.bf16.mxu1 %v14537_v33 }
 0x9fe   :  { %12130 = vmatpush3.bf16.msra.mxu0 %v14408_v13  ;;  %12270 = vmatpush3.bf16.msra.mxu1 %v14409_v48 }
 0x9ff   :  { %12131 = vmatprep.subr.bf16.mxu0 %v14537_v33  ;;  %12271 = vmatprep.subr.bf16.mxu1 %v14537_v33 }
 0xa02   :  { %12132 = vmatpush3.bf16.msra.mxu0 %v14410_v9  ;;  %12272 = vmatpush3.bf16.msra.mxu1 %v14411_v47 }
 0xa03   :  { %12157 = vmatprep.subr.bf16.mxu0 %v14537_v33  ;;  %12297 = vmatprep.subr.bf16.mxu1 %v14537_v33 }
 0xa05   :  { %12134 = vmatmul.mubr.bf16.vlgmr.msra.gmra.mrb[40].mxu0 %v9731_v38  ;;  %12274 = vmatmul.mubr.bf16.vlgmr.msra.gmra.mrb[184].mxu1 %v9738_v42  ;;  %v14416_v38 = vld [vmem:[%s18742_s7 + $0x1a0] sm:$0xff]  }
 0xa06   :  { %12158 = vmatpush3.bf16.msra.mxu0 %v14412_v25  ;;  %12173 = vmatprep.mubr.msk.bf16.mxu0 %vm14538_vm4, %v14537_v33  ;;  %v14441_v25 = vld [vmem:[%s18744_s9 + $0x28] sm:$0xff]  }
 0xa07   :  { %12159 = vmatprep.subr.bf16.mxu0 %v14537_v33  ;;  %12305 = vmatprep.mubr.msk.bf16.mxu1 %vm14538_vm4, %v14537_v33 }
 0xa0a   :  { %12160 = vmatpush3.bf16.msra.mxu0 %v14413_v30  ;;  %v14442_v30 = vld [vmem:[%s18744_s9 + $0x30] sm:$0xff]  }
 0xa0b   :  { %12161 = vmatprep.subr.bf16.mxu0 %v14537_v33 }
 0xa0e   :  { %12162 = vmatpush3.bf16.msra.mxu0 %v14414_v19  ;;  %v14444_v19 = vld [vmem:[%s18745_s11] sm:$0xff]  }
 0xa0f   :  { %12163 = vmatprep.subr.bf16.mxu0 %v14537_v33  ;;  %12298 = vmatpush3.bf16.msra.mxu1 %v14444_v19 }
 0xa10   :  { %12299 = vmatprep.subr.bf16.mxu1 %v14537_v33 }
 0xa12   :  { %12164 = vmatpush3.bf16.msra.mxu0 %v14415_v57  ;;  %v14445_v57 = vld [vmem:[%s18745_s11 + $0x8] sm:$0xff]  }
 0xa13   :  { %12165 = vmatprep.subr.bf16.mxu0 %v14537_v33  ;;  %12300 = vmatpush3.bf16.msra.mxu1 %v14445_v57 }
 0xa14   :  { %12301 = vmatprep.subr.bf16.mxu1 %v14537_v33 }
 0xa16   :  { %12166 = vmatpush3.bf16.msra.mxu0 %v14416_v38  ;;  %v14443_v38 = vld [vmem:[%s18744_s9 + $0x38] sm:$0xff]  }
 0xa17   :  { %12167 = vmatprep.subr.bf16.mxu0 %v14537_v33 }
 0xa1a   :  { %12168 = vmatpush3.bf16.msra.mxu0 %v14417_v29 }
 0xa1b   :  { %12169 = vmatprep.subr.bf16.mxu0 %v14537_v33 }
 0xa1e   :  { %12170 = vmatpush3.bf16.msra.mxu0 %v14418_v4 }
 0xa1f   :  { %12171 = vmatprep.subr.bf16.mxu0 %v14537_v33 }
 0xa22   :  { %12172 = vmatpush3.bf16.msra.mxu0 %v14419_v59 }
 0xa23   :  { %12197 = vmatprep.subr.bf16.mxu0 %v14537_v33 }
 0xa25   :  { %12174 = vmatmul.mubr.bf16.vlgmr.msra.gmra.mrb[44].mxu0 %v9733_v17  ;;  %v14425_v17 = vld [vmem:[%s18742_s7 + $0x228] sm:$0xff]  }
 0xa26   :  { %12198 = vmatpush3.bf16.msra.mxu0 %v14420_v46  ;;  %12213 = vmatprep.mubr.msk.bf16.mxu0 %vm14538_vm4, %v14537_v33 }
 0xa27   :  { %12199 = vmatprep.subr.bf16.mxu0 %v14537_v33 }
 0xa2a   :  { %12200 = vmatpush3.bf16.msra.mxu0 %v14421_v11 }
 0xa2b   :  { %12201 = vmatprep.subr.bf16.mxu0 %v14537_v33 }
 0xa2e   :  { %12202 = vmatpush3.bf16.msra.mxu0 %v14422_v43 }
 0xa2f   :  { %12203 = vmatprep.subr.bf16.mxu0 %v14537_v33 }
 0xa32   :  { %12204 = vmatpush3.bf16.msra.mxu0 %v14423_v45 }
 0xa33   :  { %12205 = vmatprep.subr.bf16.mxu0 %v14537_v33 }
 0xa36   :  { %12206 = vmatpush3.bf16.msra.mxu0 %v14424_v3 }
 0xa37   :  { %12207 = vmatprep.subr.bf16.mxu0 %v14537_v33 }
 0xa3a   :  { %12208 = vmatpush3.bf16.msra.mxu0 %v14425_v17 }
 0xa3b   :  { %12209 = vmatprep.subr.bf16.mxu0 %v14537_v33 }
 0xa3e   :  { %12210 = vmatpush3.bf16.msra.mxu0 %v14426_v60 }
 0xa3f   :  { %12211 = vmatprep.subr.bf16.mxu0 %v14537_v33 }
 0xa42   :  { %12212 = vmatpush3.bf16.msra.mxu0 %v14427_v2 }
 0xa43   :  { %12237 = vmatprep.subr.bf16.mxu0 %v14537_v33 }
 0xa45   :  { %12214 = vmatmul.mubr.bf16.vlgmr.msra.gmra.mrb[48].mxu0 %v9735_v20  ;;  %v14433_v20 = vld [vmem:[%s18742_s7 + $0x2a8] sm:$0xff]  }
 0xa46   :  { %12238 = vmatpush3.bf16.msra.mxu0 %v14428_v12  ;;  %12253 = vmatprep.mubr.msk.bf16.mxu0 %vm14538_vm4, %v14537_v33 }
 0xa47   :  { %12239 = vmatprep.subr.bf16.mxu0 %v14537_v33 }
 0xa4a   :  { %12240 = vmatpush3.bf16.msra.mxu0 %v14429_v28 }
 0xa4b   :  { %12241 = vmatprep.subr.bf16.mxu0 %v14537_v33 }
 0xa4e   :  { %12242 = vmatpush3.bf16.msra.mxu0 %v14430_v27 }
 0xa4f   :  { %12243 = vmatprep.subr.bf16.mxu0 %v14537_v33 }
 0xa52   :  { %12244 = vmatpush3.bf16.msra.mxu0 %v14431_v51 }
 0xa53   :  { %12245 = vmatprep.subr.bf16.mxu0 %v14537_v33 }
 0xa56   :  { %12246 = vmatpush3.bf16.msra.mxu0 %v14432_v1 }
 0xa57   :  { %12247 = vmatprep.subr.bf16.mxu0 %v14537_v33 }
 0xa58   :  { %v9867_v40 = vpop.f32.mrb[24].mxu0 }
 0xa59   :  { %v12055_v7 = vpop.f32.mrb[25].mxu0 }
 0xa5a   :  { %12248 = vmatpush3.bf16.msra.mxu0 %v14433_v20  ;;  %v9870_v49 = vpop.f32.mrb[26].mxu0 }
 0xa5b   :  { %v12056_v23 = vpop.f32.mrb[27].mxu0  ;;  %12249 = vmatprep.subr.bf16.mxu0 %v14537_v33 }
 0xa5e   :  { %12250 = vmatpush3.bf16.msra.mxu0 %v14434_v22 }
 0xa5f   :  { %12251 = vmatprep.subr.bf16.mxu0 %v14537_v33 }
 0xa62   :  { %12252 = vmatpush3.bf16.msra.mxu0 %v14435_v14 }
 0xa63   :  { %12277 = vmatprep.subr.bf16.mxu0 %v14537_v33 }
 0xa65   :  { %12254 = vmatmul.mubr.bf16.vlgmr.msra.gmra.mrb[52].mxu0 %v9737_v18 }
 0xa66   :  { %12293 = vmatprep.mubr.msk.bf16.mxu0 %vm14538_vm4, %v14537_v33  ;;  %12278 = vmatpush3.bf16.msra.mxu0 %v14436_v6 }
 0xa67   :  { %12279 = vmatprep.subr.bf16.mxu0 %v14537_v33 }
 0xa6a   :  { %12280 = vmatpush3.bf16.msra.mxu0 %v14437_v34  ;;  %v14446_v34 = vld [vmem:[%s18745_s11 + $0x10] sm:$0xff]  }
 0xa6b   :  { %12281 = vmatprep.subr.bf16.mxu0 %v14537_v33  ;;  %12302 = vmatpush3.bf16.msra.mxu1 %v14446_v34 }
 0xa6c   :  { %12303 = vmatprep.subr.bf16.mxu1 %v14537_v33 }
 0xa6e   :  { %12282 = vmatpush3.bf16.msra.mxu0 %v14438_v62  ;;  %v14447_v62 = vld [vmem:[%s18745_s11 + $0x18] sm:$0xff]  }
 0xa6f   :  { %12283 = vmatprep.subr.bf16.mxu0 %v14537_v33  ;;  %12304 = vmatpush3.bf16.msra.mxu1 %v14447_v62 }
 0xa72   :  { %12284 = vmatpush3.bf16.msra.mxu0 %v14439_v0  ;;  %v11900_v0 = vld [vmem:[%s18747_s10] ss:$0 sm:$0xff] }
 0xa73   :  { %12285 = vmatprep.subr.bf16.mxu0 %v14537_v33 }
 0xa76   :  { %12286 = vmatpush3.bf16.msra.mxu0 %v14440_v24 }
 0xa77   :  { %12287 = vmatprep.subr.bf16.mxu0 %v14537_v33 }
 0xa78   :  { %v9956_v53 = vpop.f32.mrb[28].mxu0  ;;  %v18663_v39 = vpop.f32.mrb[172].mxu1 }
 0xa79   :  { %v9957_v54 = vadd.f32 %v9956_v53, %v9867_v40  ;;  %v12075_v41 = vpop.f32.mrb[29].mxu0  ;;  %v12155_v56 = vpop.f32.mrb[173].mxu1 }
 0xa7a   :  { %v9959_v16 = vpop.f32.mrb[30].mxu0  ;;  %v18665_v32 = vpop.f32.mrb[174].mxu1  ;;  %12288 = vmatpush3.bf16.msra.mxu0 %v14441_v25 }
 0xa7b   :  { %v9960_v55 = vadd.f32 %v9959_v16, %v9870_v49  ;;  %v12076_v35 = vpop.f32.mrb[31].mxu0  ;;  %v12156_v42 = vpop.f32.mrb[175].mxu1  ;;  %12289 = vmatprep.subr.bf16.mxu0 %v14537_v33 }
 0xa7c   :  { %v11899_v35 = vld [vmem:[%s18746_s8] ss:$0 sm:$0xff] }
 0xa7e   :  { %12290 = vmatpush3.bf16.msra.mxu0 %v14442_v30 }
 0xa7f   :  { %12291 = vmatprep.subr.bf16.mxu0 %v14537_v33  ;;  %v11909_v33 = vld [vmem:[%s18748_s12] ss:$0 sm:$0xff] }
 0xa82   :  { %12292 = vmatpush3.bf16.msra.mxu0 %v14443_v38 }
 0xa98   :  { %v10062_v26 = vpop.f32.mrb[32].mxu0  ;;  %v18667_v5 = vpop.f32.mrb[176].mxu1 }
 0xa99   :  { %v10069_v31 = vadd.f32 %v10062_v26, %v9957_v54  ;;  %v12095_v63 = vpop.f32.mrb[33].mxu0  ;;  %v12195_v18 = vpop.f32.mrb[177].mxu1 }
 0xa9a   :  { %v10065_v15 = vpop.f32.mrb[34].mxu0  ;;  %v18669_v50 = vpop.f32.mrb[178].mxu1 }
 0xa9b   :  { %v10070_v37 = vadd.f32 %v10065_v15, %v9960_v55  ;;  %v12096_v8 = vpop.f32.mrb[35].mxu0  ;;  %v12196_v58 = vpop.f32.mrb[179].mxu1 }
 0xab8   :  { %v10170_v10 = vpop.f32.mrb[36].mxu0  ;;  %v10818_v44 = vpop.f32.mrb[180].mxu1 }
 0xab9   :  { %v10177_v36 = vadd.f32 %v10170_v10, %v10069_v31  ;;  %v12115_v52 = vpop.f32.mrb[37].mxu0  ;;  %v12235_v21 = vpop.f32.mrb[181].mxu1 }
 0xaba   :  { %v10173_v61 = vpop.f32.mrb[38].mxu0  ;;  %v10821_v13 = vpop.f32.mrb[182].mxu1 }
 0xabb   :  { %v10178_v48 = vadd.f32 %v10173_v61, %v10070_v37  ;;  %v12116_v9 = vpop.f32.mrb[39].mxu0  ;;  %v12236_v47 = vpop.f32.mrb[183].mxu1 }
 0xad8   :  { %v10278_v29 = vpop.f32.mrb[40].mxu0  ;;  %v11034_v4 = vpop.f32.mrb[184].mxu1 }
 0xad9   :  { %v10285_v59 = vadd.f32 %v10278_v29, %v10177_v36  ;;  %v12135_v46 = vpop.f32.mrb[41].mxu0  ;;  %v12275_v11 = vpop.f32.mrb[185].mxu1 }
 0xada   :  { %v10281_v43 = vpop.f32.mrb[42].mxu0  ;;  %v11037_v45 = vpop.f32.mrb[186].mxu1 }
 0xadb   :  { %v10286_v3 = vadd.f32 %v10281_v43, %v10178_v48  ;;  %v12136_v17 = vpop.f32.mrb[43].mxu0  ;;  %v12276_v60 = vpop.f32.mrb[187].mxu1  ;;  %v10393_v2 = vadd.f32 %v18663_v39, %v10285_v59 }
 0xadd   :  { %v10394_v12 = vadd.f32 %v18665_v32, %v10286_v3 }
 0xaf8   :  { %v10494_v28 = vpop.f32.mrb[44].mxu0 }
 0xaf9   :  { %v10501_v27 = vadd.f32 %v10494_v28, %v10393_v2  ;;  %v12175_v51 = vpop.f32.mrb[45].mxu0 }
 0xafa   :  { %v10497_v1 = vpop.f32.mrb[46].mxu0 }
 0xafb   :  { %v10502_v20 = vadd.f32 %v10497_v1, %v10394_v12  ;;  %v12176_v40 = vpop.f32.mrb[47].mxu0  ;;  %v10609_v7 = vadd.f32 %v18667_v5, %v10501_v27 }
 0xafd   :  { %v10610_v49 = vadd.f32 %v18669_v50, %v10502_v20 }
 0xb18   :  { %v10710_v22 = vpop.f32.mrb[48].mxu0 }
 0xb19   :  { %v10717_v23 = vadd.f32 %v10710_v22, %v10609_v7  ;;  %v12215_v14 = vpop.f32.mrb[49].mxu0 }
 0xb1a   :  { %v10713_v53 = vpop.f32.mrb[50].mxu0 }
 0xb1b   :  { %v10718_v54 = vadd.f32 %v10713_v53, %v10610_v49  ;;  %v12216_v41 = vpop.f32.mrb[51].mxu0  ;;  %v10825_v56 = vadd.f32 %v10818_v44, %v10717_v23 }
 0xb1d   :  { %v10826_v39 = vadd.f32 %v10821_v13, %v10718_v54 }
 0xb38   :  { %v10926_v16 = vpop.f32.mrb[52].mxu0 }
 0xb39   :  { %v10933_v32 = vadd.f32 %v10926_v16, %v10825_v56  ;;  %v12255_v55 = vpop.f32.mrb[53].mxu0 }
 0xb3a   :  { %v10929_v42 = vpop.f32.mrb[54].mxu0 }
 0xb3b   :  { %v11041_v26 = vadd.f32 %v11034_v4, %v10933_v32  ;;  %v10934_v5 = vadd.f32 %v10929_v42, %v10826_v39  ;;  %v12256_v31 = vpop.f32.mrb[55].mxu0 }
 0xb3d   :  { %v11050_v63 = vadd.f32 %v11899_v35, %v11041_v26  ;;  %v11042_v18 = vadd.f32 %v11037_v45, %v10934_v5 }
 0xb3f   :  { %v11054_v15 = vmul.f32 0.01, %v11050_v63  ;;  %v11051_v50 = vadd.f32 %v11899_v35, %v11042_v18  ;;  %vm11052_vm4 = vcmp.ge.f32.partialorder %v11050_v63, 0.0 }
 0xb41   :  { %vm11053_vm8 = vcmp.ge.f32.partialorder %v11051_v50, 0.0  ;;  %v11055_v37 = vmul.f32 0.01, %v11051_v50  ;;  %v11056_v8 = vsel %vm11052_vm4, %v11050_v63, %v11054_v15 }
 0xb43   :  { %v11057_v58 = vsel %vm11053_vm8, %v11051_v50, %v11055_v37 }
 0xb44   :  { %v11058_v6 = vpack.c.bf16 %v11057_v58, %v11056_v8 }
 0xb46   :  { %12294 = vmatmul.mubr.bf16.vlgmr.msra.gmra.mrb[56].mxu0 %v11058_v6 }
 0xc19   :  { %v11164_v24 = vpop.f32.mrb[56].mxu0 }
 0xc1a   :  { %v11165_v10 = vadd.f32 %v11900_v0, %v11164_v24  ;;  %v12295_v44 = vpop.f32.mrb[57].mxu0 }
 0xc1b   :  { %v11167_v36 = vpop.f32.mrb[58].mxu0 }
 0xc1c   :  { %v11173_v52 = vmul.f32 0.01, %v11165_v10  ;;  %v11168_v21 = vadd.f32 %v11900_v0, %v11167_v36  ;;  %v12296_v61 = vpop.f32.mrb[59].mxu0  ;;  %vm11171_vm9 = vcmp.ge.f32.partialorder %v11165_v10, 0.0 }
 0xc1e   :  { %vm11172_vm10 = vcmp.ge.f32.partialorder %v11168_v21, 0.0  ;;  %v11174_v13 = vmul.f32 0.01, %v11168_v21  ;;  %v11175_v48 = vsel %vm11171_vm9, %v11165_v10, %v11173_v52 }
 0xc20   :  { %v11176_v9 = vsel %vm11172_vm10, %v11168_v21, %v11174_v13 }
 0xc21   :  { %v11177_v47 = vpack.c.bf16 %v11176_v9, %v11175_v48 }
 0xc23   :  { %12306 = vmatmul.mubr.msk.bf16.vlgmr.msra.gmra.mrb[188].mxu1 %vm11217_vm11, %v11177_v47 }
 0xcf6   :  { %v11255_v25 = vpop.f32.mrb[188].mxu1 }
 0xcf7   :  { %v11256_v30 = vadd.f32 %v11909_v33, %v11255_v25  ;;  %v12307_v19 = vpop.f32.mrb[189].mxu1 }
 0xcf8   :  { %v11258_v57 = vpop.f32.mrb[190].mxu1 }
 0xcf9   :  { %11262 = vst [vmem:[%s18749_s13] sm:$0xff] %v11256_v30  ;;  %v11259_v38 = vadd.f32 %v11909_v33, %v11258_v57  ;;  %v12308_v29 = vpop.f32.mrb[191].mxu1 }
 0xcfb   :  { %11263 = vst [vmem:[%s18749_s13 + $0x8] sm:$0xff] %v11259_v38 }

</bundles_post_ra>
